<compile_context>
chip_gen: v6e
topology: v6e:2x2x1
jax: 0.10.0
libtpu: 0.0.40
codegen_flags: <defaults>
</compile_context>

<pallas_src>
import functools
import numpy as np

import jax
import jax.numpy as jnp
from jax import lax
from jax.experimental import pallas as pl
from jax.experimental.pallas import tpu as pltpu


# =============================================================================
# Fused transformer-block kernel.  One grid step == `wb` windows (wb*N rows):
# LN1 -> fused qkv -> windowed MHSA (rel-pos bias, optional shift mask) ->
# output projection -> +residual -> LN2 -> MLP (exact GELU) -> +residual.
# =============================================================================
def transformer_block_kernel(*refs, heads, head_dim, scale, wb, n_tok,
                             use_mask, mm_dtype):
    if use_mask:
        (x_ref, mask_ref, bias_ref,
         ln1_w_ref, ln1_b_ref, wqkv_ref, bqkv_ref, wp_ref, bp_ref,
         ln2_w_ref, ln2_b_ref, w1_ref, b1_ref, w2_ref, b2_ref,
         out_ref) = refs
    else:
        (x_ref, bias_ref,
         ln1_w_ref, ln1_b_ref, wqkv_ref, bqkv_ref, wp_ref, bp_ref,
         ln2_w_ref, ln2_b_ref, w1_ref, b1_ref, w2_ref, b2_ref,
         out_ref) = refs
        mask_ref = None

    C = heads * head_dim
    rows = wb * n_tok

    def mm(a, w_ref, b_ref):
        # Weights are pre-cast to mm_dtype on the host; accumulate in f32.
        return jnp.dot(a.astype(mm_dtype), w_ref[...],
                       preferred_element_type=jnp.float32) + b_ref[...]

    def layernorm(v, w_ref, b_ref):
        mu = jnp.mean(v, axis=-1, keepdims=True)
        var = jnp.mean(jnp.square(v - mu), axis=-1, keepdims=True)
        return (v - mu) * lax.rsqrt(var + 1e-5) * w_ref[...] + b_ref[...]

    # Block may be (1, wb*win, win, C) (folded windows) or (rows, C) (flat);
    # both reshape contiguously to (rows, C) with window-partition row order.
    x = x_ref[...].reshape(rows, C).astype(jnp.float32)

    # ---------------- attention branch (norm1 + WindowAttention) ------------
    xn = layernorm(x, ln1_w_ref, ln1_b_ref)
    qkv = mm(xn, wqkv_ref, bqkv_ref)                          # (rows, 3C)

    def to_heads(t):  # (rows, C) -> (heads*wb, N, hd); axis-0 concat is cheap
        return jnp.concatenate(
            [t[:, h * head_dim:(h + 1) * head_dim].reshape(wb, n_tok, head_dim)
             for h in range(heads)], axis=0)

    qh = to_heads(qkv[:, :C] * scale)
    kh = to_heads(qkv[:, C:2 * C])
    vh = to_heads(qkv[:, 2 * C:])

    # Scores / probs as single batched contractions (batch dim = head*window).
    s = jnp.einsum('bqd,bkd->bqk', qh.astype(mm_dtype), kh.astype(mm_dtype),
                   preferred_element_type=jnp.float32)        # (heads*wb, N, N)
    s = s.reshape(heads, wb, n_tok, n_tok) + bias_ref[...][:, None]
    if use_mask:
        s = s + mask_ref[...].reshape(wb, n_tok, n_tok)[None]
    s = s - jnp.max(s, axis=-1, keepdims=True)
    p = jnp.exp(s)
    p = p * pl.reciprocal(jnp.sum(p, axis=-1, keepdims=True), approx=True)
    p = p.reshape(heads * wb, n_tok, n_tok)

    o = jnp.einsum('bqk,bkd->bqd', p.astype(mm_dtype), vh.astype(mm_dtype),
                   preferred_element_type=jnp.float32)        # (heads*wb, N, hd)
    # Reassemble (rows, C) as a *value* (no VMEM scratch, no masked stores).
    o = o.reshape(heads, rows, head_dim)
    ocat = jnp.concatenate([o[h] for h in range(heads)], axis=-1)

    a = x + mm(ocat, wp_ref, bp_ref)                          # attention residual

    # ---------------- MLP branch (norm2 + Mlp) -------------------------------
    an = layernorm(a, ln2_w_ref, ln2_b_ref)
    h1 = mm(an, w1_ref, b1_ref)
    h1 = 0.5 * h1 * (1.0 + lax.erf(h1 * 0.7071067811865476))  # exact GELU
    y = a + mm(h1, w2_ref, b2_ref)
    out_ref[...] = y.reshape(out_ref.shape).astype(out_ref.dtype)


# =============================================================================
# pallas_call wrapper
# =============================================================================
def _const_spec(shape):
    n = len(shape)
    return pl.BlockSpec(shape, lambda *_ignored, _n=n: (0,) * _n)


def transformer_block(x, mask_arr, rel_bias, kp, *, heads, head_dim, win, wb,
                      fold_windows, use_mask, mm_dtype, vmem_limit_bytes):
    C = heads * head_dim
    n_tok = win * win
    rows = wb * n_tok
    hidden = kp["w1"].shape[1]
    scale = head_dim ** (-0.5)

    kernel = functools.partial(
        transformer_block_kernel, heads=heads, head_dim=head_dim, scale=scale,
        wb=wb, n_tok=n_tok, use_mask=use_mask, mm_dtype=mm_dtype)

    if fold_windows:
        B, H, W, _ = x.shape
        assert H % (wb * win) == 0 and W % win == 0
        grid = (B, H // (wb * win), W // win)
        # One block = wb vertically stacked windows, gathered by the DMA.
        x_spec = pl.BlockSpec((1, wb * win, win, C), lambda b, i, j: (b, i, j, 0))
        mask_spec = pl.BlockSpec((wb, 1, n_tok, n_tok),
                                 lambda b, i, j: (i, j, 0, 0))
    else:
        total_rows = x.shape[0]
        assert total_rows % rows == 0
        grid = (total_rows // rows,)
        x_spec = pl.BlockSpec((rows, C), lambda g: (g, 0))
        mask_spec = None
        if use_mask:
            assert mask_arr.shape[0] % wb == 0
            n_mask_blocks = mask_arr.shape[0] // wb
            mask_spec = pl.BlockSpec((wb, n_tok, n_tok),
                                     lambda g, _n=n_mask_blocks: (g % _n, 0, 0))

    in_specs = [x_spec]
    args = [x]
    if use_mask:
        in_specs.append(mask_spec)
        args.append(mask_arr)

    const_shapes = [
        (heads, n_tok, n_tok),                  # relative position bias
        (1, C), (1, C),                         # ln1 w / b
        (C, 3 * C), (1, 3 * C),                 # fused qkv
        (C, C), (1, C),                         # output projection
        (1, C), (1, C),                         # ln2 w / b
        (C, hidden), (1, hidden),               # fc1
        (hidden, C), (1, C),                    # fc2
    ]
    in_specs += [_const_spec(s) for s in const_shapes]
    args += [rel_bias, kp["ln1_w"], kp["ln1_b"], kp["wqkv"], kp["bqkv"],
             kp["wp"], kp["bp"], kp["ln2_w"], kp["ln2_b"],
             kp["w1"], kp["b1"], kp["w2"], kp["b2"]]

    return pl.pallas_call(
        kernel,
        out_shape=jax.ShapeDtypeStruct(x.shape, x.dtype),
        grid=grid,
        in_specs=in_specs,
        out_specs=x_spec,
        input_output_aliases={0: 0},
        compiler_params=pltpu.CompilerParams(
            dimension_semantics=("parallel",) * len(grid),
            vmem_limit_bytes=vmem_limit_bytes),
    )(*args)


# =============================================================================
# Host-side helpers: window partition (fallback path), shift mask, rel-pos
# index, tiling planner, parameter init.
# =============================================================================
def window_partition(x, ws):
    B, H, W, C = x.shape
    x = x.reshape(B, H // ws, ws, W // ws, ws, C)
    return jnp.transpose(x, (0, 1, 3, 2, 4, 5)).reshape(-1, ws, ws, C)


def window_reverse(windows, ws, H, W):
    B = windows.shape[0] // (H * W // ws // ws)
    x = windows.reshape(B, H // ws, W // ws, ws, ws, -1)
    return jnp.transpose(x, (0, 1, 3, 2, 4, 5)).reshape(B, H, W, -1)


def relative_position_index(win):
    coords = np.stack(np.meshgrid(np.arange(win), np.arange(win), indexing="ij"))
    coords_flat = coords.reshape(2, -1)
    rel = coords_flat[:, :, None] - coords_flat[:, None, :]
    rel = rel.transpose(1, 2, 0).astype(np.int64)
    rel[:, :, 0] += win - 1
    rel[:, :, 1] += win - 1
    rel[:, :, 0] *= 2 * win - 1
    return rel.sum(-1)                                        # (N, N)


def _np_window_partition(x, ws):
    B, H, W, C = x.shape
    x = x.reshape(B, H // ws, ws, W // ws, ws, C)
    return x.transpose(0, 1, 3, 2, 4, 5).reshape(-1, ws, ws, C)


def compute_shift_mask(H, W, win, shift):
    """Swin shift attention mask, (nW, N, N) additive (-100 / 0), pure numpy."""
    m = np.zeros((1, H, W, 1), np.float32)
    cnt = 0
    for hs in (slice(0, -win), slice(-win, -shift), slice(-shift, None)):
        for ws_ in (slice(0, -win), slice(-win, -shift), slice(-shift, None)):
            m[:, hs, ws_, :] = cnt
            cnt += 1
    mw = _np_window_partition(m, win).reshape(-1, win * win)
    diff = mw[:, None, :] - mw[:, :, None]
    return np.where(diff != 0, -100.0, 0.0).astype(np.float32)


def build_shift_mask_folded(H, W, win, shift):
    N = win * win
    m = compute_shift_mask(H, W, win, shift)                  # (nW, N, N)
    return jnp.asarray(m.reshape(H // win, W // win, N, N))


def build_shift_mask_flat(H, W, win, shift, wb):
    n_w = (H // win) * (W // win)
    m = compute_shift_mask(H, W, win, shift)
    if wb > n_w:
        m = np.tile(m, (wb // n_w, 1, 1))
    return jnp.asarray(m)


def estimate_block_vmem(rows, C, hidden, heads, wb, n_tok, use_mask,
                        w_bytes, x_bytes):
    """Per-step VMEM footprint: double-buffered blocks + weights + f32 temps."""
    io = rows * C * x_bytes * 2 * 2                  # x-in + out, 2 buffers each
    mask = wb * n_tok * n_tok * 4 * 2 if use_mask else 0
    consts = (heads * n_tok * n_tok * 4
              + (4 * C * C + 2 * C * hidden) * w_bytes
              + (10 * C + hidden) * 4) * 2
    scores = heads * wb * n_tok * n_tok * 4 * 2      # scores + probabilities
    inter = rows * (8 * C + hidden) * 4              # f32 activation temporaries
    return io + mask + consts + scores + inter


def _pick_wb(cands, row_target, min_grid):
    """cands: list of (wb, rows, grid_steps) already filtered by VMEM budget."""
    if not cands:
        return 1
    ok = [c for c in cands if c[2] >= min_grid] or cands
    under = [c for c in ok if c[1] <= row_target] or [min(ok, key=lambda c: c[1])]
    aligned = [c for c in under if c[1] % 128 == 0]
    return max(aligned or under, key=lambda c: c[1])[0]


def plan_tiling(B, H, W, C, hidden, heads, win, mm_dtype, x_dtype,
                row_target=512, min_grid=4, vmem_budget=24 << 20):
    """Pick fold mode, windows-per-step and an explicit VMEM limit.

    min_grid=4 keeps >=2 grid steps per TensorCore on v7x (2 TCs) so the
    input/output DMA can double-buffer; the 24 MiB activation/weight budget and
    the 48 MiB cap on vmem_limit_bytes are safe on v7x's 64 MiB/TC while still
    raising v5e's 16 MiB default scoped limit.
    """
    N = win * win
    fold = (H % win == 0) and (W % win == 0) and (win % 8 == 0 or win == W)
    w_bytes = jnp.dtype(mm_dtype).itemsize
    x_bytes = jnp.dtype(x_dtype).itemsize
    nh, nw = H // win, W // win

    def fits(d):
        return estimate_block_vmem(d * N, C, hidden, heads, d, N, True,
                                   w_bytes, x_bytes) <= vmem_budget

    if fold:
        cands = [(d, d * N, B * nw * (nh // d))
                 for d in range(1, nh + 1) if nh % d == 0 and fits(d)]
    else:
        n_w = nh * nw
        total = B * n_w
        ds = {d for d in range(1, n_w + 1) if n_w % d == 0}
        ds |= {r * n_w for r in range(1, B + 1) if B % r == 0}
        cands = [(d, d * N, total // d) for d in sorted(ds) if fits(d)]
    wb = _pick_wb(cands, row_target, min_grid)

    est = estimate_block_vmem(wb * N, C, hidden, heads, wb, N, True,
                              w_bytes, x_bytes)
    vmem_limit = int(min(max(32 << 20, 1.5 * est + (4 << 20)), 48 << 20))
    return fold, wb, vmem_limit


def init_block_params(key, dim, heads, hidden, win):
    ks = jax.random.split(key, 6)

    def lin(k, fan_in, shape):
        return jax.random.normal(k, shape, jnp.float32) / np.sqrt(fan_in)

    return dict(
        ln1_w=jnp.ones((1, dim), jnp.float32),
        ln1_b=jnp.zeros((1, dim), jnp.float32),
        wq=lin(ks[0], dim, (dim, dim)),
        bq=jnp.zeros((1, dim), jnp.float32),
        wkv=lin(ks[1], dim, (dim, 2 * dim)),
        bkv=jnp.zeros((1, 2 * dim), jnp.float32),
        wp=lin(ks[2], dim, (dim, dim)),
        bp=jnp.zeros((1, dim), jnp.float32),
        rel_table=0.02 * jax.random.normal(ks[3], ((2 * win - 1) ** 2, heads),
                                           jnp.float32),
        ln2_w=jnp.ones((1, dim), jnp.float32),
        ln2_b=jnp.zeros((1, dim), jnp.float32),
        w1=lin(ks[4], dim, (dim, hidden)),
        b1=jnp.zeros((1, hidden), jnp.float32),
        w2=lin(ks[5], hidden, (hidden, dim)),
        b2=jnp.zeros((1, dim), jnp.float32),
    )


# =============================================================================
# Full TransformerBlocks forward (jittable)
# =============================================================================
def transformer_blocks_forward(x, params_list, rel_idx, shift_mask, *,
                               win, heads, wb, fold_windows,
                               mm_dtype=jnp.bfloat16, vmem_limit_bytes=32 << 20):
    B, H, W, C = x.shape
    head_dim = C // heads
    N = win * win

    for i, p in enumerate(params_list):
        shift = 0 if i % 2 == 0 else win // 2
        use_mask = shift > 0

        # Per-layer constants, hoisted out of the kernel: fused qkv weight,
        # host-side bf16 weight casts, gathered relative-position bias.
        kp = dict(
            ln1_w=p["ln1_w"], ln1_b=p["ln1_b"],
            wqkv=jnp.concatenate([p["wq"], p["wkv"]], axis=1).astype(mm_dtype),
            bqkv=jnp.concatenate([p["bq"], p["bkv"]], axis=1),
            wp=p["wp"].astype(mm_dtype), bp=p["bp"],
            ln2_w=p["ln2_w"], ln2_b=p["ln2_b"],
            w1=p["w1"].astype(mm_dtype), b1=p["b1"],
            w2=p["w2"].astype(mm_dtype), b2=p["b2"],
        )
        rel_bias = jnp.take(p["rel_table"], rel_idx.reshape(-1), axis=0)
        rel_bias = rel_bias.reshape(N, N, heads).transpose(2, 0, 1)  # (heads,N,N)

        xs = x if shift == 0 else jnp.roll(x, shift=(-shift, -shift), axis=(1, 2))

        blk = functools.partial(
            transformer_block, rel_bias=rel_bias, kp=kp, heads=heads,
            head_dim=head_dim, win=win, wb=wb, fold_windows=fold_windows,
            use_mask=use_mask, mm_dtype=mm_dtype,
            vmem_limit_bytes=vmem_limit_bytes)

        if fold_windows:
            # Window partition/reverse are done by the BlockSpec DMA.
            y = blk(xs, shift_mask if use_mask else None)
        else:
            xw = window_partition(xs, win).reshape(-1, C)
            yw = blk(xw, shift_mask if use_mask else None)
            y = window_reverse(yw.reshape(-1, win, win, C), win, H, W)

        x = y if shift == 0 else jnp.roll(y, shift=(shift, shift), axis=(1, 2))
    return x


# =============================================================================
if __name__ == "__main__":
    B, H, W, C = 2, 16, 16, 32
    heads, win, depth, mlp_ratio = 4, 8, 2, 4
    hidden = int(C * mlp_ratio)
    mm_dtype = jnp.bfloat16       # MXU inputs; LN / softmax / GELU stay f32

    fold, wb, vmem_limit = plan_tiling(B, H, W, C, hidden, heads, win,
                                       mm_dtype, jnp.float32)

    key = jax.random.PRNGKey(0)
    kx, kparams = jax.random.split(key)
    x = jax.random.normal(kx, (B, H, W, C), jnp.float32)
    params = [init_block_params(k, C, heads, hidden, win)
              for k in jax.random.split(kparams, depth)]

    rel_idx = jnp.asarray(relative_position_index(win), jnp.int32)
    if fold:
        shift_mask = build_shift_mask_folded(H, W, win, win // 2)
    else:
        shift_mask = build_shift_mask_flat(H, W, win, win // 2, wb)

    fwd = jax.jit(functools.partial(
        transformer_blocks_forward, win=win, heads=heads, wb=wb,
        fold_windows=fold, mm_dtype=mm_dtype, vmem_limit_bytes=vmem_limit))

    out = jax.block_until_ready(fwd(x, params, rel_idx, shift_mask))
    assert out.shape == (B, H, W, C)
    assert bool(jnp.all(jnp.isfinite(out)))
    print("KERNEL_OK")
</pallas_src>

<mosaic_0001>
module attributes {stable_mosaic.version = 11 : i64} {
  func.func @transformer_block_kernel(%arg0: i32, %arg1: i32, %arg2: i32, %arg3: memref<1x16x8x32xf32, #tpu.memory_space<vmem>>, %arg4: memref<4x64x64xf32, #tpu.memory_space<vmem>>, %arg5: memref<1x32xf32, #tpu.memory_space<vmem>>, %arg6: memref<1x32xf32, #tpu.memory_space<vmem>>, %arg7: memref<32x96xbf16, #tpu.memory_space<vmem>>, %arg8: memref<1x96xf32, #tpu.memory_space<vmem>>, %arg9: memref<32x32xbf16, #tpu.memory_space<vmem>>, %arg10: memref<1x32xf32, #tpu.memory_space<vmem>>, %arg11: memref<1x32xf32, #tpu.memory_space<vmem>>, %arg12: memref<1x32xf32, #tpu.memory_space<vmem>>, %arg13: memref<32x128xbf16, #tpu.memory_space<vmem>>, %arg14: memref<1x128xf32, #tpu.memory_space<vmem>>, %arg15: memref<128x32xbf16, #tpu.memory_space<vmem>>, %arg16: memref<1x32xf32, #tpu.memory_space<vmem>>, %arg17: memref<1x16x8x32xf32, #tpu.memory_space<vmem>>) attributes {dimension_semantics = [#tpu.dimension_semantics<parallel>, #tpu.dimension_semantics<parallel>, #tpu.dimension_semantics<parallel>], iteration_bounds = array<i64: 2, 1, 2>, scalar_prefetch = 0 : i64, scratch_operands = 0 : i64, tpu.core_type = #tpu.core_type<tc>, window_params = [{transform_indices = @transform_0, window_bounds = array<i64: 1, 16, 8, 32>}, {pipeline_mode = #tpu.pipeline_mode<synchronous>, transform_indices = @transform_1, window_bounds = array<i64: 4, 64, 64>}, {pipeline_mode = #tpu.pipeline_mode<synchronous>, transform_indices = @transform_2, window_bounds = array<i64: 1, 32>}, {pipeline_mode = #tpu.pipeline_mode<synchronous>, transform_indices = @transform_3, window_bounds = array<i64: 1, 32>}, {pipeline_mode = #tpu.pipeline_mode<synchronous>, transform_indices = @transform_4, window_bounds = array<i64: 32, 96>}, {pipeline_mode = #tpu.pipeline_mode<synchronous>, transform_indices = @transform_5, window_bounds = array<i64: 1, 96>}, {pipeline_mode = #tpu.pipeline_mode<synchronous>, transform_indices = @transform_6, window_bounds = array<i64: 32, 32>}, {pipeline_mode = #tpu.pipeline_mode<synchronous>, transform_indices = @transform_7, window_bounds = array<i64: 1, 32>}, {pipeline_mode = #tpu.pipeline_mode<synchronous>, transform_indices = @transform_8, window_bounds = array<i64: 1, 32>}, {pipeline_mode = #tpu.pipeline_mode<synchronous>, transform_indices = @transform_9, window_bounds = array<i64: 1, 32>}, {pipeline_mode = #tpu.pipeline_mode<synchronous>, transform_indices = @transform_10, window_bounds = array<i64: 32, 128>}, {pipeline_mode = #tpu.pipeline_mode<synchronous>, transform_indices = @transform_11, window_bounds = array<i64: 1, 128>}, {pipeline_mode = #tpu.pipeline_mode<synchronous>, transform_indices = @transform_12, window_bounds = array<i64: 128, 32>}, {pipeline_mode = #tpu.pipeline_mode<synchronous>, transform_indices = @transform_13, window_bounds = array<i64: 1, 32>}, {transform_indices = @transform_14, window_bounds = array<i64: 1, 16, 8, 32>}]} {
    %c0 = arith.constant 0 : index
    %c0_0 = arith.constant 0 : index
    %c0_1 = arith.constant 0 : index
    %c0_2 = arith.constant 0 : index
    %0 = vector.load %arg3[%c0, %c0_0, %c0_1, %c0_2] : memref<1x16x8x32xf32, #tpu.memory_space<vmem>>, vector<1x16x8x32xf32>
    %1 = vector.shape_cast %0 : vector<1x16x8x32xf32> to vector<128x32xf32>
    %cst = arith.constant dense<0.000000e+00> : vector<128xf32>
    %2 = vector.multi_reduction <add>, %1, %cst [1] : vector<128x32xf32> to vector<128xf32>
    %3 = vector.shape_cast %2 : vector<128xf32> to vector<128x1xf32>
    %cst_3 = arith.constant 3.200000e+01 : f32
    %4 = vector.broadcast %cst_3 : f32 to vector<128x1xf32>
    %5 = arith.divf %3, %4 : vector<128x1xf32>
    %6 = vector.broadcast %5 : vector<128x1xf32> to vector<128x32xf32>
    %7 = arith.subf %1, %6 : vector<128x32xf32>
    %8 = arith.mulf %7, %7 : vector<128x32xf32>
    %cst_4 = arith.constant dense<0.000000e+00> : vector<128xf32>
    %9 = vector.multi_reduction <add>, %8, %cst_4 [1] : vector<128x32xf32> to vector<128xf32>
    %10 = vector.shape_cast %9 : vector<128xf32> to vector<128x1xf32>
    %cst_5 = arith.constant 3.200000e+01 : f32
    %11 = vector.broadcast %cst_5 : f32 to vector<128x1xf32>
    %12 = arith.divf %10, %11 : vector<128x1xf32>
    %13 = vector.broadcast %5 : vector<128x1xf32> to vector<128x32xf32>
    %14 = arith.subf %1, %13 : vector<128x32xf32>
    %cst_6 = arith.constant 9.99999974E-6 : f32
    %15 = vector.broadcast %cst_6 : f32 to vector<128x1xf32>
    %16 = arith.addf %12, %15 : vector<128x1xf32>
    %17 = math.rsqrt %16 : vector<128x1xf32>
    %18 = vector.broadcast %17 : vector<128x1xf32> to vector<128x32xf32>
    %19 = arith.mulf %14, %18 : vector<128x32xf32>
    %c0_7 = arith.constant 0 : index
    %c0_8 = arith.constant 0 : index
    %20 = vector.load %arg5[%c0_7, %c0_8] : memref<1x32xf32, #tpu.memory_space<vmem>>, vector<1x32xf32>
    %21 = vector.broadcast %20 : vector<1x32xf32> to vector<128x32xf32>
    %22 = arith.mulf %19, %21 : vector<128x32xf32>
    %c0_9 = arith.constant 0 : index
    %c0_10 = arith.constant 0 : index
    %23 = vector.load %arg6[%c0_9, %c0_10] : memref<1x32xf32, #tpu.memory_space<vmem>>, vector<1x32xf32>
    %24 = vector.broadcast %23 : vector<1x32xf32> to vector<128x32xf32>
    %25 = arith.addf %22, %24 : vector<128x32xf32>
    %26 = arith.truncf %25 : vector<128x32xf32> to vector<128x32xbf16>
    %c0_11 = arith.constant 0 : index
    %c0_12 = arith.constant 0 : index
    %27 = vector.load %arg7[%c0_11, %c0_12] : memref<32x96xbf16, #tpu.memory_space<vmem>>, vector<32x96xbf16>
    %cst_13 = arith.constant dense<0.000000e+00> : vector<128x96xf32>
    %28 = tpu.matmul %26, %27, %cst_13 {dimension_numbers = #tpu.dot_dimension_numbers<[1], [0], [0], [1], [0, 0, 1, 1], [], []>} : vector<128x32xbf16>, vector<32x96xbf16>, vector<128x96xf32> -> vector<128x96xf32>
    %c0_14 = arith.constant 0 : index
    %c0_15 = arith.constant 0 : index
    %29 = vector.load %arg8[%c0_14, %c0_15] : memref<1x96xf32, #tpu.memory_space<vmem>>, vector<1x96xf32>
    %30 = vector.broadcast %29 : vector<1x96xf32> to vector<128x96xf32>
    %31 = arith.addf %28, %30 : vector<128x96xf32>
    %32 = vector.extract_strided_slice %31 {offsets = [0, 0], sizes = [128, 32], strides = [1, 1]} : vector<128x96xf32> to vector<128x32xf32>
    %cst_16 = arith.constant 0.353553385 : f32
    %33 = vector.broadcast %cst_16 : f32 to vector<128x32xf32>
    %34 = arith.mulf %32, %33 : vector<128x32xf32>
    %35 = vector.extract_strided_slice %34 {offsets = [0, 0], sizes = [128, 8], strides = [1, 1]} : vector<128x32xf32> to vector<128x8xf32>
    %36 = vector.shape_cast %35 : vector<128x8xf32> to vector<2x64x8xf32>
    %37 = vector.extract_strided_slice %34 {offsets = [0, 8], sizes = [128, 8], strides = [1, 1]} : vector<128x32xf32> to vector<128x8xf32>
    %38 = vector.shape_cast %37 : vector<128x8xf32> to vector<2x64x8xf32>
    %39 = vector.extract_strided_slice %34 {offsets = [0, 16], sizes = [128, 8], strides = [1, 1]} : vector<128x32xf32> to vector<128x8xf32>
    %40 = vector.shape_cast %39 : vector<128x8xf32> to vector<2x64x8xf32>
    %41 = vector.extract_strided_slice %34 {offsets = [0, 24], sizes = [128, 8], strides = [1, 1]} : vector<128x32xf32> to vector<128x8xf32>
    %42 = vector.shape_cast %41 : vector<128x8xf32> to vector<2x64x8xf32>
    %43 = tpu.concatenate %36, %38, %40, %42 in 0 : vector<2x64x8xf32>, vector<2x64x8xf32>, vector<2x64x8xf32>, vector<2x64x8xf32> -> vector<8x64x8xf32>
    %44 = vector.extract_strided_slice %31 {offsets = [0, 32], sizes = [128, 32], strides = [1, 1]} : vector<128x96xf32> to vector<128x32xf32>
    %45 = vector.extract_strided_slice %44 {offsets = [0, 0], sizes = [128, 8], strides = [1, 1]} : vector<128x32xf32> to vector<128x8xf32>
    %46 = vector.shape_cast %45 : vector<128x8xf32> to vector<2x64x8xf32>
    %47 = vector.extract_strided_slice %44 {offsets = [0, 8], sizes = [128, 8], strides = [1, 1]} : vector<128x32xf32> to vector<128x8xf32>
    %48 = vector.shape_cast %47 : vector<128x8xf32> to vector<2x64x8xf32>
    %49 = vector.extract_strided_slice %44 {offsets = [0, 16], sizes = [128, 8], strides = [1, 1]} : vector<128x32xf32> to vector<128x8xf32>
    %50 = vector.shape_cast %49 : vector<128x8xf32> to vector<2x64x8xf32>
    %51 = vector.extract_strided_slice %44 {offsets = [0, 24], sizes = [128, 8], strides = [1, 1]} : vector<128x32xf32> to vector<128x8xf32>
    %52 = vector.shape_cast %51 : vector<128x8xf32> to vector<2x64x8xf32>
    %53 = tpu.concatenate %46, %48, %50, %52 in 0 : vector<2x64x8xf32>, vector<2x64x8xf32>, vector<2x64x8xf32>, vector<2x64x8xf32> -> vector<8x64x8xf32>
    %54 = vector.extract_strided_slice %31 {offsets = [0, 64], sizes = [128, 32], strides = [1, 1]} : vector<128x96xf32> to vector<128x32xf32>
    %55 = vector.extract_strided_slice %54 {offsets = [0, 0], sizes = [128, 8], strides = [1, 1]} : vector<128x32xf32> to vector<128x8xf32>
    %56 = vector.shape_cast %55 : vector<128x8xf32> to vector<2x64x8xf32>
    %57 = vector.extract_strided_slice %54 {offsets = [0, 8], sizes = [128, 8], strides = [1, 1]} : vector<128x32xf32> to vector<128x8xf32>
    %58 = vector.shape_cast %57 : vector<128x8xf32> to vector<2x64x8xf32>
    %59 = vector.extract_strided_slice %54 {offsets = [0, 16], sizes = [128, 8], strides = [1, 1]} : vector<128x32xf32> to vector<128x8xf32>
    %60 = vector.shape_cast %59 : vector<128x8xf32> to vector<2x64x8xf32>
    %61 = vector.extract_strided_slice %54 {offsets = [0, 24], sizes = [128, 8], strides = [1, 1]} : vector<128x32xf32> to vector<128x8xf32>
    %62 = vector.shape_cast %61 : vector<128x8xf32> to vector<2x64x8xf32>
    %63 = tpu.concatenate %56, %58, %60, %62 in 0 : vector<2x64x8xf32>, vector<2x64x8xf32>, vector<2x64x8xf32>, vector<2x64x8xf32> -> vector<8x64x8xf32>
    %64 = arith.truncf %43 : vector<8x64x8xf32> to vector<8x64x8xbf16>
    %65 = arith.truncf %53 : vector<8x64x8xf32> to vector<8x64x8xbf16>
    "tpu.trace_start"() <{level = 10 : i32, message = "bqd,bkd->bqk"}> : () -> ()
    %cst_17 = arith.constant dense<0.000000e+00> : vector<8x64x64xf32>
    %66 = tpu.matmul %64, %65, %cst_17 {dimension_numbers = #tpu.dot_dimension_numbers<[2], [2], [1], [1], [0, 0, 0, 1, 1, 1], [0], [0]>} : vector<8x64x8xbf16>, vector<8x64x8xbf16>, vector<8x64x64xf32> -> vector<8x64x64xf32>
    "tpu.trace_stop"() : () -> ()
    %67 = vector.shape_cast %66 : vector<8x64x64xf32> to vector<4x2x64x64xf32>
    %c0_18 = arith.constant 0 : index
    %c0_19 = arith.constant 0 : index
    %c0_20 = arith.constant 0 : index
    %68 = vector.load %arg4[%c0_18, %c0_19, %c0_20] : memref<4x64x64xf32, #tpu.memory_space<vmem>>, vector<4x64x64xf32>
    %69 = vector.shape_cast %68 : vector<4x64x64xf32> to vector<4x1x64x64xf32>
    %70 = vector.broadcast %69 : vector<4x1x64x64xf32> to vector<4x2x64x64xf32>
    %71 = arith.addf %67, %70 : vector<4x2x64x64xf32>
    %cst_21 = arith.constant dense<0xFF800000> : vector<4x2x64xf32>
    %72 = vector.multi_reduction <maximumf>, %71, %cst_21 [3] : vector<4x2x64x64xf32> to vector<4x2x64xf32>
    %73 = vector.shape_cast %72 : vector<4x2x64xf32> to vector<4x2x64x1xf32>
    %74 = vector.broadcast %73 : vector<4x2x64x1xf32> to vector<4x2x64x64xf32>
    %75 = arith.subf %71, %74 : vector<4x2x64x64xf32>
    %76 = math.exp %75 : vector<4x2x64x64xf32>
    %cst_22 = arith.constant dense<0.000000e+00> : vector<4x2x64xf32>
    %77 = vector.multi_reduction <add>, %76, %cst_22 [3] : vector<4x2x64x64xf32> to vector<4x2x64xf32>
    %78 = vector.shape_cast %77 : vector<4x2x64xf32> to vector<4x2x64x1xf32>
    %79 = tpu.reciprocal %78 {approx = true} : vector<4x2x64x1xf32> -> vector<4x2x64x1xf32>
    %80 = vector.broadcast %79 : vector<4x2x64x1xf32> to vector<4x2x64x64xf32>
    %81 = arith.mulf %76, %80 : vector<4x2x64x64xf32>
    %82 = vector.shape_cast %81 : vector<4x2x64x64xf32> to vector<8x64x64xf32>
    %83 = arith.truncf %82 : vector<8x64x64xf32> to vector<8x64x64xbf16>
    %84 = arith.truncf %63 : vector<8x64x8xf32> to vector<8x64x8xbf16>
    "tpu.trace_start"() <{level = 10 : i32, message = "bqk,bkd->bqd"}> : () -> ()
    %cst_23 = arith.constant dense<0.000000e+00> : vector<8x64x8xf32>
    %85 = tpu.matmul %83, %84, %cst_23 {dimension_numbers = #tpu.dot_dimension_numbers<[2], [1], [1], [2], [0, 0, 0, 1, 1, 2], [0], [0]>} : vector<8x64x64xbf16>, vector<8x64x8xbf16>, vector<8x64x8xf32> -> vector<8x64x8xf32>
    "tpu.trace_stop"() : () -> ()
    %86 = vector.shape_cast %85 : vector<8x64x8xf32> to vector<4x128x8xf32>
    %87 = vector.extract_strided_slice %86 {offsets = [0, 0, 0], sizes = [1, 128, 8], strides = [1, 1, 1]} : vector<4x128x8xf32> to vector<1x128x8xf32>
    %88 = vector.shape_cast %87 : vector<1x128x8xf32> to vector<128x8xf32>
    %89 = vector.extract_strided_slice %86 {offsets = [1, 0, 0], sizes = [1, 128, 8], strides = [1, 1, 1]} : vector<4x128x8xf32> to vector<1x128x8xf32>
    %90 = vector.shape_cast %89 : vector<1x128x8xf32> to vector<128x8xf32>
    %91 = vector.extract_strided_slice %86 {offsets = [2, 0, 0], sizes = [1, 128, 8], strides = [1, 1, 1]} : vector<4x128x8xf32> to vector<1x128x8xf32>
    %92 = vector.shape_cast %91 : vector<1x128x8xf32> to vector<128x8xf32>
    %93 = vector.extract_strided_slice %86 {offsets = [3, 0, 0], sizes = [1, 128, 8], strides = [1, 1, 1]} : vector<4x128x8xf32> to vector<1x128x8xf32>
    %94 = vector.shape_cast %93 : vector<1x128x8xf32> to vector<128x8xf32>
    %95 = tpu.concatenate %88, %90, %92, %94 in 1 : vector<128x8xf32>, vector<128x8xf32>, vector<128x8xf32>, vector<128x8xf32> -> vector<128x32xf32>
    %96 = arith.truncf %95 : vector<128x32xf32> to vector<128x32xbf16>
    %c0_24 = arith.constant 0 : index
    %c0_25 = arith.constant 0 : index
    %97 = vector.load %arg9[%c0_24, %c0_25] : memref<32x32xbf16, #tpu.memory_space<vmem>>, vector<32x32xbf16>
    %cst_26 = arith.constant dense<0.000000e+00> : vector<128x32xf32>
    %98 = tpu.matmul %96, %97, %cst_26 {dimension_numbers = #tpu.dot_dimension_numbers<[1], [0], [0], [1], [0, 0, 1, 1], [], []>} : vector<128x32xbf16>, vector<32x32xbf16>, vector<128x32xf32> -> vector<128x32xf32>
    %c0_27 = arith.constant 0 : index
    %c0_28 = arith.constant 0 : index
    %99 = vector.load %arg10[%c0_27, %c0_28] : memref<1x32xf32, #tpu.memory_space<vmem>>, vector<1x32xf32>
    %100 = vector.broadcast %99 : vector<1x32xf32> to vector<128x32xf32>
    %101 = arith.addf %98, %100 : vector<128x32xf32>
    %102 = arith.addf %1, %101 : vector<128x32xf32>
    %cst_29 = arith.constant dense<0.000000e+00> : vector<128xf32>
    %103 = vector.multi_reduction <add>, %102, %cst_29 [1] : vector<128x32xf32> to vector<128xf32>
    %104 = vector.shape_cast %103 : vector<128xf32> to vector<128x1xf32>
    %cst_30 = arith.constant 3.200000e+01 : f32
    %105 = vector.broadcast %cst_30 : f32 to vector<128x1xf32>
    %106 = arith.divf %104, %105 : vector<128x1xf32>
    %107 = vector.broadcast %106 : vector<128x1xf32> to vector<128x32xf32>
    %108 = arith.subf %102, %107 : vector<128x32xf32>
    %109 = arith.mulf %108, %108 : vector<128x32xf32>
    %cst_31 = arith.constant dense<0.000000e+00> : vector<128xf32>
    %110 = vector.multi_reduction <add>, %109, %cst_31 [1] : vector<128x32xf32> to vector<128xf32>
    %111 = vector.shape_cast %110 : vector<128xf32> to vector<128x1xf32>
    %cst_32 = arith.constant 3.200000e+01 : f32
    %112 = vector.broadcast %cst_32 : f32 to vector<128x1xf32>
    %113 = arith.divf %111, %112 : vector<128x1xf32>
    %114 = vector.broadcast %106 : vector<128x1xf32> to vector<128x32xf32>
    %115 = arith.subf %102, %114 : vector<128x32xf32>
    %cst_33 = arith.constant 9.99999974E-6 : f32
    %116 = vector.broadcast %cst_33 : f32 to vector<128x1xf32>
    %117 = arith.addf %113, %116 : vector<128x1xf32>
    %118 = math.rsqrt %117 : vector<128x1xf32>
    %119 = vector.broadcast %118 : vector<128x1xf32> to vector<128x32xf32>
    %120 = arith.mulf %115, %119 : vector<128x32xf32>
    %c0_34 = arith.constant 0 : index
    %c0_35 = arith.constant 0 : index
    %121 = vector.load %arg11[%c0_34, %c0_35] : memref<1x32xf32, #tpu.memory_space<vmem>>, vector<1x32xf32>
    %122 = vector.broadcast %121 : vector<1x32xf32> to vector<128x32xf32>
    %123 = arith.mulf %120, %122 : vector<128x32xf32>
    %c0_36 = arith.constant 0 : index
    %c0_37 = arith.constant 0 : index
    %124 = vector.load %arg12[%c0_36, %c0_37] : memref<1x32xf32, #tpu.memory_space<vmem>>, vector<1x32xf32>
    %125 = vector.broadcast %124 : vector<1x32xf32> to vector<128x32xf32>
    %126 = arith.addf %123, %125 : vector<128x32xf32>
    %127 = arith.truncf %126 : vector<128x32xf32> to vector<128x32xbf16>
    %c0_38 = arith.constant 0 : index
    %c0_39 = arith.constant 0 : index
    %128 = vector.load %arg13[%c0_38, %c0_39] : memref<32x128xbf16, #tpu.memory_space<vmem>>, vector<32x128xbf16>
    %cst_40 = arith.constant dense<0.000000e+00> : vector<128x128xf32>
    %129 = tpu.matmul %127, %128, %cst_40 {dimension_numbers = #tpu.dot_dimension_numbers<[1], [0], [0], [1], [0, 0, 1, 1], [], []>} : vector<128x32xbf16>, vector<32x128xbf16>, vector<128x128xf32> -> vector<128x128xf32>
    %c0_41 = arith.constant 0 : index
    %c0_42 = arith.constant 0 : index
    %130 = vector.load %arg14[%c0_41, %c0_42] : memref<1x128xf32, #tpu.memory_space<vmem>>, vector<1x128xf32>
    %131 = vector.broadcast %130 : vector<1x128xf32> to vector<128x128xf32>
    %132 = arith.addf %129, %131 : vector<128x128xf32>
    %cst_43 = arith.constant 5.000000e-01 : f32
    %133 = vector.broadcast %cst_43 : f32 to vector<128x128xf32>
    %134 = arith.mulf %133, %132 : vector<128x128xf32>
    %cst_44 = arith.constant 0.707106769 : f32
    %135 = vector.broadcast %cst_44 : f32 to vector<128x128xf32>
    %136 = arith.mulf %132, %135 : vector<128x128xf32>
    %137 = math.erf %136 : vector<128x128xf32>
    %cst_45 = arith.constant 1.000000e+00 : f32
    %138 = vector.broadcast %cst_45 : f32 to vector<128x128xf32>
    %139 = arith.addf %138, %137 : vector<128x128xf32>
    %140 = arith.mulf %134, %139 : vector<128x128xf32>
    %141 = arith.truncf %140 : vector<128x128xf32> to vector<128x128xbf16>
    %c0_46 = arith.constant 0 : index
    %c0_47 = arith.constant 0 : index
    %142 = vector.load %arg15[%c0_46, %c0_47] : memref<128x32xbf16, #tpu.memory_space<vmem>>, vector<128x32xbf16>
    %cst_48 = arith.constant dense<0.000000e+00> : vector<128x32xf32>
    %143 = tpu.matmul %141, %142, %cst_48 {dimension_numbers = #tpu.dot_dimension_numbers<[1], [0], [0], [1], [0, 0, 1, 1], [], []>} : vector<128x128xbf16>, vector<128x32xbf16>, vector<128x32xf32> -> vector<128x32xf32>
    %c0_49 = arith.constant 0 : index
    %c0_50 = arith.constant 0 : index
    %144 = vector.load %arg16[%c0_49, %c0_50] : memref<1x32xf32, #tpu.memory_space<vmem>>, vector<1x32xf32>
    %145 = vector.broadcast %144 : vector<1x32xf32> to vector<128x32xf32>
    %146 = arith.addf %143, %145 : vector<128x32xf32>
    %147 = arith.addf %102, %146 : vector<128x32xf32>
    %148 = vector.shape_cast %147 : vector<128x32xf32> to vector<1x16x8x32xf32>
    %c0_51 = arith.constant 0 : index
    %c0_52 = arith.constant 0 : index
    %c0_53 = arith.constant 0 : index
    %c0_54 = arith.constant 0 : index
    %149 = vector.load %arg17[%c0_51, %c0_52, %c0_53, %c0_54] : memref<1x16x8x32xf32, #tpu.memory_space<vmem>>, vector<1x16x8x32xf32>
    tpu.vector_store %arg17[%c0_51, %c0_52, %c0_53, %c0_54], %148 {strides = array<i32>} : memref<1x16x8x32xf32, #tpu.memory_space<vmem>>, vector<1x16x8x32xf32>,
    return
  }
  func.func @transform_0(%arg0: i32, %arg1: i32, %arg2: i32) -> (i32, i32, i32, i32) {
    %c0_i32 = arith.constant 0 : i32
    %c0_i32_0 = arith.constant 0 : i32
    return %arg0, %arg1, %arg2, %c0_i32 : i32, i32, i32, i32
  }
  func.func @transform_1(%arg0: i32, %arg1: i32, %arg2: i32) -> (i32, i32, i32) {
    %c0_i32 = arith.constant 0 : i32
    %c0_i32_0 = arith.constant 0 : i32
    %c0_i32_1 = arith.constant 0 : i32
    %c0_i32_2 = arith.constant 0 : i32
    return %c0_i32, %c0_i32_0, %c0_i32_1 : i32, i32, i32
  }
  func.func @transform_2(%arg0: i32, %arg1: i32, %arg2: i32) -> (i32, i32) {
    %c0_i32 = arith.constant 0 : i32
    %c0_i32_0 = arith.constant 0 : i32
    %c0_i32_1 = arith.constant 0 : i32
    return %c0_i32, %c0_i32_0 : i32, i32
  }
  func.func @transform_3(%arg0: i32, %arg1: i32, %arg2: i32) -> (i32, i32) {
    %c0_i32 = arith.constant 0 : i32
    %c0_i32_0 = arith.constant 0 : i32
    %c0_i32_1 = arith.constant 0 : i32
    return %c0_i32, %c0_i32_0 : i32, i32
  }
  func.func @transform_4(%arg0: i32, %arg1: i32, %arg2: i32) -> (i32, i32) {
    %c0_i32 = arith.constant 0 : i32
    %c0_i32_0 = arith.constant 0 : i32
    %c0_i32_1 = arith.constant 0 : i32
    return %c0_i32, %c0_i32_0 : i32, i32
  }
  func.func @transform_5(%arg0: i32, %arg1: i32, %arg2: i32) -> (i32, i32) {
    %c0_i32 = arith.constant 0 : i32
    %c0_i32_0 = arith.constant 0 : i32
    %c0_i32_1 = arith.constant 0 : i32
    return %c0_i32, %c0_i32_0 : i32, i32
  }
  func.func @transform_6(%arg0: i32, %arg1: i32, %arg2: i32) -> (i32, i32) {
    %c0_i32 = arith.constant 0 : i32
    %c0_i32_0 = arith.constant 0 : i32
    %c0_i32_1 = arith.constant 0 : i32
    return %c0_i32, %c0_i32_0 : i32, i32
  }
  func.func @transform_7(%arg0: i32, %arg1: i32, %arg2: i32) -> (i32, i32) {
    %c0_i32 = arith.constant 0 : i32
    %c0_i32_0 = arith.constant 0 : i32
    %c0_i32_1 = arith.constant 0 : i32
    return %c0_i32, %c0_i32_0 : i32, i32
  }
  func.func @transform_8(%arg0: i32, %arg1: i32, %arg2: i32) -> (i32, i32) {
    %c0_i32 = arith.constant 0 : i32
    %c0_i32_0 = arith.constant 0 : i32
    %c0_i32_1 = arith.constant 0 : i32
    return %c0_i32, %c0_i32_0 : i32, i32
  }
  func.func @transform_9(%arg0: i32, %arg1: i32, %arg2: i32) -> (i32, i32) {
    %c0_i32 = arith.constant 0 : i32
    %c0_i32_0 = arith.constant 0 : i32
    %c0_i32_1 = arith.constant 0 : i32
    return %c0_i32, %c0_i32_0 : i32, i32
  }
  func.func @transform_10(%arg0: i32, %arg1: i32, %arg2: i32) -> (i32, i32) {
    %c0_i32 = arith.constant 0 : i32
    %c0_i32_0 = arith.constant 0 : i32
    %c0_i32_1 = arith.constant 0 : i32
    return %c0_i32, %c0_i32_0 : i32, i32
  }
  func.func @transform_11(%arg0: i32, %arg1: i32, %arg2: i32) -> (i32, i32) {
    %c0_i32 = arith.constant 0 : i32
    %c0_i32_0 = arith.constant 0 : i32
    %c0_i32_1 = arith.constant 0 : i32
    return %c0_i32, %c0_i32_0 : i32, i32
  }
  func.func @transform_12(%arg0: i32, %arg1: i32, %arg2: i32) -> (i32, i32) {
    %c0_i32 = arith.constant 0 : i32
    %c0_i32_0 = arith.constant 0 : i32
    %c0_i32_1 = arith.constant 0 : i32
    return %c0_i32, %c0_i32_0 : i32, i32
  }
  func.func @transform_13(%arg0: i32, %arg1: i32, %arg2: i32) -> (i32, i32) {
    %c0_i32 = arith.constant 0 : i32
    %c0_i32_0 = arith.constant 0 : i32
    %c0_i32_1 = arith.constant 0 : i32
    return %c0_i32, %c0_i32_0 : i32, i32
  }
  func.func @transform_14(%arg0: i32, %arg1: i32, %arg2: i32) -> (i32, i32, i32, i32) {
    %c0_i32 = arith.constant 0 : i32
    %c0_i32_0 = arith.constant 0 : i32
    return %arg0, %arg1, %arg2, %c0_i32 : i32, i32, i32, i32
  }
}

module attributes {stable_mosaic.version = 11 : i64} {
  func.func @transformer_block_kernel(%arg0: i32, %arg1: i32, %arg2: i32, %arg3: memref<1x16x8x32xf32, #tpu.memory_space<vmem>>, %arg4: memref<2x1x64x64xf32, #tpu.memory_space<vmem>>, %arg5: memref<4x64x64xf32, #tpu.memory_space<vmem>>, %arg6: memref<1x32xf32, #tpu.memory_space<vmem>>, %arg7: memref<1x32xf32, #tpu.memory_space<vmem>>, %arg8: memref<32x96xbf16, #tpu.memory_space<vmem>>, %arg9: memref<1x96xf32, #tpu.memory_space<vmem>>, %arg10: memref<32x32xbf16, #tpu.memory_space<vmem>>, %arg11: memref<1x32xf32, #tpu.memory_space<vmem>>, %arg12: memref<1x32xf32, #tpu.memory_space<vmem>>, %arg13: memref<1x32xf32, #tpu.memory_space<vmem>>, %arg14: memref<32x128xbf16, #tpu.memory_space<vmem>>, %arg15: memref<1x128xf32, #tpu.memory_space<vmem>>, %arg16: memref<128x32xbf16, #tpu.memory_space<vmem>>, %arg17: memref<1x32xf32, #tpu.memory_space<vmem>>, %arg18: memref<1x16x8x32xf32, #tpu.memory_space<vmem>>) attributes {dimension_semantics = [#tpu.dimension_semantics<parallel>, #tpu.dimension_semantics<parallel>, #tpu.dimension_semantics<parallel>], iteration_bounds = array<i64: 2, 1, 2>, scalar_prefetch = 0 : i64, scratch_operands = 0 : i64, tpu.core_type = #tpu.core_type<tc>, window_params = [{transform_indices = @transform_0, window_bounds = array<i64: 1, 16, 8, 32>}, {transform_indices = @transform_1, window_bounds = array<i64: 2, 1, 64, 64>}, {pipeline_mode = #tpu.pipeline_mode<synchronous>, transform_indices = @transform_2, window_bounds = array<i64: 4, 64, 64>}, {pipeline_mode = #tpu.pipeline_mode<synchronous>, transform_indices = @transform_3, window_bounds = array<i64: 1, 32>}, {pipeline_mode = #tpu.pipeline_mode<synchronous>, transform_indices = @transform_4, window_bounds = array<i64: 1, 32>}, {pipeline_mode = #tpu.pipeline_mode<synchronous>, transform_indices = @transform_5, window_bounds = array<i64: 32, 96>}, {pipeline_mode = #tpu.pipeline_mode<synchronous>, transform_indices = @transform_6, window_bounds = array<i64: 1, 96>}, {pipeline_mode = #tpu.pipeline_mode<synchronous>, transform_indices = @transform_7, window_bounds = array<i64: 32, 32>}, {pipeline_mode = #tpu.pipeline_mode<synchronous>, transform_indices = @transform_8, window_bounds = array<i64: 1, 32>}, {pipeline_mode = #tpu.pipeline_mode<synchronous>, transform_indices = @transform_9, window_bounds = array<i64: 1, 32>}, {pipeline_mode = #tpu.pipeline_mode<synchronous>, transform_indices = @transform_10, window_bounds = array<i64: 1, 32>}, {pipeline_mode = #tpu.pipeline_mode<synchronous>, transform_indices = @transform_11, window_bounds = array<i64: 32, 128>}, {pipeline_mode = #tpu.pipeline_mode<synchronous>, transform_indices = @transform_12, window_bounds = array<i64: 1, 128>}, {pipeline_mode = #tpu.pipeline_mode<synchronous>, transform_indices = @transform_13, window_bounds = array<i64: 128, 32>}, {pipeline_mode = #tpu.pipeline_mode<synchronous>, transform_indices = @transform_14, window_bounds = array<i64: 1, 32>}, {transform_indices = @transform_15, window_bounds = array<i64: 1, 16, 8, 32>}]} {
    %c0 = arith.constant 0 : index
    %c0_0 = arith.constant 0 : index
    %c0_1 = arith.constant 0 : index
    %c0_2 = arith.constant 0 : index
    %0 = vector.load %arg3[%c0, %c0_0, %c0_1, %c0_2] : memref<1x16x8x32xf32, #tpu.memory_space<vmem>>, vector<1x16x8x32xf32>
    %1 = vector.shape_cast %0 : vector<1x16x8x32xf32> to vector<128x32xf32>
    %cst = arith.constant dense<0.000000e+00> : vector<128xf32>
    %2 = vector.multi_reduction <add>, %1, %cst [1] : vector<128x32xf32> to vector<128xf32>
    %3 = vector.shape_cast %2 : vector<128xf32> to vector<128x1xf32>
    %cst_3 = arith.constant 3.200000e+01 : f32
    %4 = vector.broadcast %cst_3 : f32 to vector<128x1xf32>
    %5 = arith.divf %3, %4 : vector<128x1xf32>
    %6 = vector.broadcast %5 : vector<128x1xf32> to vector<128x32xf32>
    %7 = arith.subf %1, %6 : vector<128x32xf32>
    %8 = arith.mulf %7, %7 : vector<128x32xf32>
    %cst_4 = arith.constant dense<0.000000e+00> : vector<128xf32>
    %9 = vector.multi_reduction <add>, %8, %cst_4 [1] : vector<128x32xf32> to vector<128xf32>
    %10 = vector.shape_cast %9 : vector<128xf32> to vector<128x1xf32>
    %cst_5 = arith.constant 3.200000e+01 : f32
    %11 = vector.broadcast %cst_5 : f32 to vector<128x1xf32>
    %12 = arith.divf %10, %11 : vector<128x1xf32>
    %13 = vector.broadcast %5 : vector<128x1xf32> to vector<128x32xf32>
    %14 = arith.subf %1, %13 : vector<128x32xf32>
    %cst_6 = arith.constant 9.99999974E-6 : f32
    %15 = vector.broadcast %cst_6 : f32 to vector<128x1xf32>
    %16 = arith.addf %12, %15 : vector<128x1xf32>
    %17 = math.rsqrt %16 : vector<128x1xf32>
    %18 = vector.broadcast %17 : vector<128x1xf32> to vector<128x32xf32>
    %19 = arith.mulf %14, %18 : vector<128x32xf32>
    %c0_7 = arith.constant 0 : index
    %c0_8 = arith.constant 0 : index
    %20 = vector.load %arg6[%c0_7, %c0_8] : memref<1x32xf32, #tpu.memory_space<vmem>>, vector<1x32xf32>
    %21 = vector.broadcast %20 : vector<1x32xf32> to vector<128x32xf32>
    %22 = arith.mulf %19, %21 : vector<128x32xf32>
    %c0_9 = arith.constant 0 : index
    %c0_10 = arith.constant 0 : index
    %23 = vector.load %arg7[%c0_9, %c0_10] : memref<1x32xf32, #tpu.memory_space<vmem>>, vector<1x32xf32>
    %24 = vector.broadcast %23 : vector<1x32xf32> to vector<128x32xf32>
    %25 = arith.addf %22, %24 : vector<128x32xf32>
    %26 = arith.truncf %25 : vector<128x32xf32> to vector<128x32xbf16>
    %c0_11 = arith.constant 0 : index
    %c0_12 = arith.constant 0 : index
    %27 = vector.load %arg8[%c0_11, %c0_12] : memref<32x96xbf16, #tpu.memory_space<vmem>>, vector<32x96xbf16>
    %cst_13 = arith.constant dense<0.000000e+00> : vector<128x96xf32>
    %28 = tpu.matmul %26, %27, %cst_13 {dimension_numbers = #tpu.dot_dimension_numbers<[1], [0], [0], [1], [0, 0, 1, 1], [], []>} : vector<128x32xbf16>, vector<32x96xbf16>, vector<128x96xf32> -> vector<128x96xf32>
    %c0_14 = arith.constant 0 : index
    %c0_15 = arith.constant 0 : index
    %29 = vector.load %arg9[%c0_14, %c0_15] : memref<1x96xf32, #tpu.memory_space<vmem>>, vector<1x96xf32>
    %30 = vector.broadcast %29 : vector<1x96xf32> to vector<128x96xf32>
    %31 = arith.addf %28, %30 : vector<128x96xf32>
    %32 = vector.extract_strided_slice %31 {offsets = [0, 0], sizes = [128, 32], strides = [1, 1]} : vector<128x96xf32> to vector<128x32xf32>
    %cst_16 = arith.constant 0.353553385 : f32
    %33 = vector.broadcast %cst_16 : f32 to vector<128x32xf32>
    %34 = arith.mulf %32, %33 : vector<128x32xf32>
    %35 = vector.extract_strided_slice %34 {offsets = [0, 0], sizes = [128, 8], strides = [1, 1]} : vector<128x32xf32> to vector<128x8xf32>
    %36 = vector.shape_cast %35 : vector<128x8xf32> to vector<2x64x8xf32>
    %37 = vector.extract_strided_slice %34 {offsets = [0, 8], sizes = [128, 8], strides = [1, 1]} : vector<128x32xf32> to vector<128x8xf32>
    %38 = vector.shape_cast %37 : vector<128x8xf32> to vector<2x64x8xf32>
    %39 = vector.extract_strided_slice %34 {offsets = [0, 16], sizes = [128, 8], strides = [1, 1]} : vector<128x32xf32> to vector<128x8xf32>
    %40 = vector.shape_cast %39 : vector<128x8xf32> to vector<2x64x8xf32>
    %41 = vector.extract_strided_slice %34 {offsets = [0, 24], sizes = [128, 8], strides = [1, 1]} : vector<128x32xf32> to vector<128x8xf32>
    %42 = vector.shape_cast %41 : vector<128x8xf32> to vector<2x64x8xf32>
    %43 = tpu.concatenate %36, %38, %40, %42 in 0 : vector<2x64x8xf32>, vector<2x64x8xf32>, vector<2x64x8xf32>, vector<2x64x8xf32> -> vector<8x64x8xf32>
    %44 = vector.extract_strided_slice %31 {offsets = [0, 32], sizes = [128, 32], strides = [1, 1]} : vector<128x96xf32> to vector<128x32xf32>
    %45 = vector.extract_strided_slice %44 {offsets = [0, 0], sizes = [128, 8], strides = [1, 1]} : vector<128x32xf32> to vector<128x8xf32>
    %46 = vector.shape_cast %45 : vector<128x8xf32> to vector<2x64x8xf32>
    %47 = vector.extract_strided_slice %44 {offsets = [0, 8], sizes = [128, 8], strides = [1, 1]} : vector<128x32xf32> to vector<128x8xf32>
    %48 = vector.shape_cast %47 : vector<128x8xf32> to vector<2x64x8xf32>
    %49 = vector.extract_strided_slice %44 {offsets = [0, 16], sizes = [128, 8], strides = [1, 1]} : vector<128x32xf32> to vector<128x8xf32>
    %50 = vector.shape_cast %49 : vector<128x8xf32> to vector<2x64x8xf32>
    %51 = vector.extract_strided_slice %44 {offsets = [0, 24], sizes = [128, 8], strides = [1, 1]} : vector<128x32xf32> to vector<128x8xf32>
    %52 = vector.shape_cast %51 : vector<128x8xf32> to vector<2x64x8xf32>
    %53 = tpu.concatenate %46, %48, %50, %52 in 0 : vector<2x64x8xf32>, vector<2x64x8xf32>, vector<2x64x8xf32>, vector<2x64x8xf32> -> vector<8x64x8xf32>
    %54 = vector.extract_strided_slice %31 {offsets = [0, 64], sizes = [128, 32], strides = [1, 1]} : vector<128x96xf32> to vector<128x32xf32>
    %55 = vector.extract_strided_slice %54 {offsets = [0, 0], sizes = [128, 8], strides = [1, 1]} : vector<128x32xf32> to vector<128x8xf32>
    %56 = vector.shape_cast %55 : vector<128x8xf32> to vector<2x64x8xf32>
    %57 = vector.extract_strided_slice %54 {offsets = [0, 8], sizes = [128, 8], strides = [1, 1]} : vector<128x32xf32> to vector<128x8xf32>
    %58 = vector.shape_cast %57 : vector<128x8xf32> to vector<2x64x8xf32>
    %59 = vector.extract_strided_slice %54 {offsets = [0, 16], sizes = [128, 8], strides = [1, 1]} : vector<128x32xf32> to vector<128x8xf32>
    %60 = vector.shape_cast %59 : vector<128x8xf32> to vector<2x64x8xf32>
    %61 = vector.extract_strided_slice %54 {offsets = [0, 24], sizes = [128, 8], strides = [1, 1]} : vector<128x32xf32> to vector<128x8xf32>
    %62 = vector.shape_cast %61 : vector<128x8xf32> to vector<2x64x8xf32>
    %63 = tpu.concatenate %56, %58, %60, %62 in 0 : vector<2x64x8xf32>, vector<2x64x8xf32>, vector<2x64x8xf32>, vector<2x64x8xf32> -> vector<8x64x8xf32>
    %64 = arith.truncf %43 : vector<8x64x8xf32> to vector<8x64x8xbf16>
    %65 = arith.truncf %53 : vector<8x64x8xf32> to vector<8x64x8xbf16>
    "tpu.trace_start"() <{level = 10 : i32, message = "bqd,bkd->bqk"}> : () -> ()
    %cst_17 = arith.constant dense<0.000000e+00> : vector<8x64x64xf32>
    %66 = tpu.matmul %64, %65, %cst_17 {dimension_numbers = #tpu.dot_dimension_numbers<[2], [2], [1], [1], [0, 0, 0, 1, 1, 1], [0], [0]>} : vector<8x64x8xbf16>, vector<8x64x8xbf16>, vector<8x64x64xf32> -> vector<8x64x64xf32>
    "tpu.trace_stop"() : () -> ()
    %67 = vector.shape_cast %66 : vector<8x64x64xf32> to vector<4x2x64x64xf32>
    %c0_18 = arith.constant 0 : index
    %c0_19 = arith.constant 0 : index
    %c0_20 = arith.constant 0 : index
    %68 = vector.load %arg5[%c0_18, %c0_19, %c0_20] : memref<4x64x64xf32, #tpu.memory_space<vmem>>, vector<4x64x64xf32>
    %69 = vector.shape_cast %68 : vector<4x64x64xf32> to vector<4x1x64x64xf32>
    %70 = vector.broadcast %69 : vector<4x1x64x64xf32> to vector<4x2x64x64xf32>
    %71 = arith.addf %67, %70 : vector<4x2x64x64xf32>
    %c0_21 = arith.constant 0 : index
    %c0_22 = arith.constant 0 : index
    %c0_23 = arith.constant 0 : index
    %c0_24 = arith.constant 0 : index
    %72 = vector.load %arg4[%c0_21, %c0_22, %c0_23, %c0_24] : memref<2x1x64x64xf32, #tpu.memory_space<vmem>>, vector<2x1x64x64xf32>
    %73 = vector.shape_cast %72 : vector<2x1x64x64xf32> to vector<2x64x64xf32>
    %74 = vector.shape_cast %73 : vector<2x64x64xf32> to vector<1x2x64x64xf32>
    %75 = vector.broadcast %74 : vector<1x2x64x64xf32> to vector<4x2x64x64xf32>
    %76 = arith.addf %71, %75 : vector<4x2x64x64xf32>
    %cst_25 = arith.constant dense<0xFF800000> : vector<4x2x64xf32>
    %77 = vector.multi_reduction <maximumf>, %76, %cst_25 [3] : vector<4x2x64x64xf32> to vector<4x2x64xf32>
    %78 = vector.shape_cast %77 : vector<4x2x64xf32> to vector<4x2x64x1xf32>
    %79 = vector.broadcast %78 : vector<4x2x64x1xf32> to vector<4x2x64x64xf32>
    %80 = arith.subf %76, %79 : vector<4x2x64x64xf32>
    %81 = math.exp %80 : vector<4x2x64x64xf32>
    %cst_26 = arith.constant dense<0.000000e+00> : vector<4x2x64xf32>
    %82 = vector.multi_reduction <add>, %81, %cst_26 [3] : vector<4x2x64x64xf32> to vector<4x2x64xf32>
    %83 = vector.shape_cast %82 : vector<4x2x64xf32> to vector<4x2x64x1xf32>
    %84 = tpu.reciprocal %83 {approx = true} : vector<4x2x64x1xf32> -> vector<4x2x64x1xf32>
    %85 = vector.broadcast %84 : vector<4x2x64x1xf32> to vector<4x2x64x64xf32>
    %86 = arith.mulf %81, %85 : vector<4x2x64x64xf32>
    %87 = vector.shape_cast %86 : vector<4x2x64x64xf32> to vector<8x64x64xf32>
    %88 = arith.truncf %87 : vector<8x64x64xf32> to vector<8x64x64xbf16>
    %89 = arith.truncf %63 : vector<8x64x8xf32> to vector<8x64x8xbf16>
    "tpu.trace_start"() <{level = 10 : i32, message = "bqk,bkd->bqd"}> : () -> ()
    %cst_27 = arith.constant dense<0.000000e+00> : vector<8x64x8xf32>
    %90 = tpu.matmul %88, %89, %cst_27 {dimension_numbers = #tpu.dot_dimension_numbers<[2], [1], [1], [2], [0, 0, 0, 1, 1, 2], [0], [0]>} : vector<8x64x64xbf16>, vector<8x64x8xbf16>, vector<8x64x8xf32> -> vector<8x64x8xf32>
    "tpu.trace_stop"() : () -> ()
    %91 = vector.shape_cast %90 : vector<8x64x8xf32> to vector<4x128x8xf32>
    %92 = vector.extract_strided_slice %91 {offsets = [0, 0, 0], sizes = [1, 128, 8], strides = [1, 1, 1]} : vector<4x128x8xf32> to vector<1x128x8xf32>
    %93 = vector.shape_cast %92 : vector<1x128x8xf32> to vector<128x8xf32>
    %94 = vector.extract_strided_slice %91 {offsets = [1, 0, 0], sizes = [1, 128, 8], strides = [1, 1, 1]} : vector<4x128x8xf32> to vector<1x128x8xf32>
    %95 = vector.shape_cast %94 : vector<1x128x8xf32> to vector<128x8xf32>
    %96 = vector.extract_strided_slice %91 {offsets = [2, 0, 0], sizes = [1, 128, 8], strides = [1, 1, 1]} : vector<4x128x8xf32> to vector<1x128x8xf32>
    %97 = vector.shape_cast %96 : vector<1x128x8xf32> to vector<128x8xf32>
    %98 = vector.extract_strided_slice %91 {offsets = [3, 0, 0], sizes = [1, 128, 8], strides = [1, 1, 1]} : vector<4x128x8xf32> to vector<1x128x8xf32>
    %99 = vector.shape_cast %98 : vector<1x128x8xf32> to vector<128x8xf32>
    %100 = tpu.concatenate %93, %95, %97, %99 in 1 : vector<128x8xf32>, vector<128x8xf32>, vector<128x8xf32>, vector<128x8xf32> -> vector<128x32xf32>
    %101 = arith.truncf %100 : vector<128x32xf32> to vector<128x32xbf16>
    %c0_28 = arith.constant 0 : index
    %c0_29 = arith.constant 0 : index
    %102 = vector.load %arg10[%c0_28, %c0_29] : memref<32x32xbf16, #tpu.memory_space<vmem>>, vector<32x32xbf16>
    %cst_30 = arith.constant dense<0.000000e+00> : vector<128x32xf32>
    %103 = tpu.matmul %101, %102, %cst_30 {dimension_numbers = #tpu.dot_dimension_numbers<[1], [0], [0], [1], [0, 0, 1, 1], [], []>} : vector<128x32xbf16>, vector<32x32xbf16>, vector<128x32xf32> -> vector<128x32xf32>
    %c0_31 = arith.constant 0 : index
    %c0_32 = arith.constant 0 : index
    %104 = vector.load %arg11[%c0_31, %c0_32] : memref<1x32xf32, #tpu.memory_space<vmem>>, vector<1x32xf32>
    %105 = vector.broadcast %104 : vector<1x32xf32> to vector<128x32xf32>
    %106 = arith.addf %103, %105 : vector<128x32xf32>
    %107 = arith.addf %1, %106 : vector<128x32xf32>
    %cst_33 = arith.constant dense<0.000000e+00> : vector<128xf32>
    %108 = vector.multi_reduction <add>, %107, %cst_33 [1] : vector<128x32xf32> to vector<128xf32>
    %109 = vector.shape_cast %108 : vector<128xf32> to vector<128x1xf32>
    %cst_34 = arith.constant 3.200000e+01 : f32
    %110 = vector.broadcast %cst_34 : f32 to vector<128x1xf32>
    %111 = arith.divf %109, %110 : vector<128x1xf32>
    %112 = vector.broadcast %111 : vector<128x1xf32> to vector<128x32xf32>
    %113 = arith.subf %107, %112 : vector<128x32xf32>
    %114 = arith.mulf %113, %113 : vector<128x32xf32>
    %cst_35 = arith.constant dense<0.000000e+00> : vector<128xf32>
    %115 = vector.multi_reduction <add>, %114, %cst_35 [1] : vector<128x32xf32> to vector<128xf32>
    %116 = vector.shape_cast %115 : vector<128xf32> to vector<128x1xf32>
    %cst_36 = arith.constant 3.200000e+01 : f32
    %117 = vector.broadcast %cst_36 : f32 to vector<128x1xf32>
    %118 = arith.divf %116, %117 : vector<128x1xf32>
    %119 = vector.broadcast %111 : vector<128x1xf32> to vector<128x32xf32>
    %120 = arith.subf %107, %119 : vector<128x32xf32>
    %cst_37 = arith.constant 9.99999974E-6 : f32
    %121 = vector.broadcast %cst_37 : f32 to vector<128x1xf32>
    %122 = arith.addf %118, %121 : vector<128x1xf32>
    %123 = math.rsqrt %122 : vector<128x1xf32>
    %124 = vector.broadcast %123 : vector<128x1xf32> to vector<128x32xf32>
    %125 = arith.mulf %120, %124 : vector<128x32xf32>
    %c0_38 = arith.constant 0 : index
    %c0_39 = arith.constant 0 : index
    %126 = vector.load %arg12[%c0_38, %c0_39] : memref<1x32xf32, #tpu.memory_space<vmem>>, vector<1x32xf32>
    %127 = vector.broadcast %126 : vector<1x32xf32> to vector<128x32xf32>
    %128 = arith.mulf %125, %127 : vector<128x32xf32>
    %c0_40 = arith.constant 0 : index
    %c0_41 = arith.constant 0 : index
    %129 = vector.load %arg13[%c0_40, %c0_41] : memref<1x32xf32, #tpu.memory_space<vmem>>, vector<1x32xf32>
    %130 = vector.broadcast %129 : vector<1x32xf32> to vector<128x32xf32>
    %131 = arith.addf %128, %130 : vector<128x32xf32>
    %132 = arith.truncf %131 : vector<128x32xf32> to vector<128x32xbf16>
    %c0_42 = arith.constant 0 : index
    %c0_43 = arith.constant 0 : index
    %133 = vector.load %arg14[%c0_42, %c0_43] : memref<32x128xbf16, #tpu.memory_space<vmem>>, vector<32x128xbf16>
    %cst_44 = arith.constant dense<0.000000e+00> : vector<128x128xf32>
    %134 = tpu.matmul %132, %133, %cst_44 {dimension_numbers = #tpu.dot_dimension_numbers<[1], [0], [0], [1], [0, 0, 1, 1], [], []>} : vector<128x32xbf16>, vector<32x128xbf16>, vector<128x128xf32> -> vector<128x128xf32>
    %c0_45 = arith.constant 0 : index
    %c0_46 = arith.constant 0 : index
    %135 = vector.load %arg15[%c0_45, %c0_46] : memref<1x128xf32, #tpu.memory_space<vmem>>, vector<1x128xf32>
    %136 = vector.broadcast %135 : vector<1x128xf32> to vector<128x128xf32>
    %137 = arith.addf %134, %136 : vector<128x128xf32>
    %cst_47 = arith.constant 5.000000e-01 : f32
    %138 = vector.broadcast %cst_47 : f32 to vector<128x128xf32>
    %139 = arith.mulf %138, %137 : vector<128x128xf32>
    %cst_48 = arith.constant 0.707106769 : f32
    %140 = vector.broadcast %cst_48 : f32 to vector<128x128xf32>
    %141 = arith.mulf %137, %140 : vector<128x128xf32>
    %142 = math.erf %141 : vector<128x128xf32>
    %cst_49 = arith.constant 1.000000e+00 : f32
    %143 = vector.broadcast %cst_49 : f32 to vector<128x128xf32>
    %144 = arith.addf %143, %142 : vector<128x128xf32>
    %145 = arith.mulf %139, %144 : vector<128x128xf32>
    %146 = arith.truncf %145 : vector<128x128xf32> to vector<128x128xbf16>
    %c0_50 = arith.constant 0 : index
    %c0_51 = arith.constant 0 : index
    %147 = vector.load %arg16[%c0_50, %c0_51] : memref<128x32xbf16, #tpu.memory_space<vmem>>, vector<128x32xbf16>
    %cst_52 = arith.constant dense<0.000000e+00> : vector<128x32xf32>
    %148 = tpu.matmul %146, %147, %cst_52 {dimension_numbers = #tpu.dot_dimension_numbers<[1], [0], [0], [1], [0, 0, 1, 1], [], []>} : vector<128x128xbf16>, vector<128x32xbf16>, vector<128x32xf32> -> vector<128x32xf32>
    %c0_53 = arith.constant 0 : index
    %c0_54 = arith.constant 0 : index
    %149 = vector.load %arg17[%c0_53, %c0_54] : memref<1x32xf32, #tpu.memory_space<vmem>>, vector<1x32xf32>
    %150 = vector.broadcast %149 : vector<1x32xf32> to vector<128x32xf32>
    %151 = arith.addf %148, %150 : vector<128x32xf32>
    %152 = arith.addf %107, %151 : vector<128x32xf32>
    %153 = vector.shape_cast %152 : vector<128x32xf32> to vector<1x16x8x32xf32>
    %c0_55 = arith.constant 0 : index
    %c0_56 = arith.constant 0 : index
    %c0_57 = arith.constant 0 : index
    %c0_58 = arith.constant 0 : index
    %154 = vector.load %arg18[%c0_55, %c0_56, %c0_57, %c0_58] : memref<1x16x8x32xf32, #tpu.memory_space<vmem>>, vector<1x16x8x32xf32>
    tpu.vector_store %arg18[%c0_55, %c0_56, %c0_57, %c0_58], %153 {strides = array<i32>} : memref<1x16x8x32xf32, #tpu.memory_space<vmem>>, vector<1x16x8x32xf32>,
    return
  }
  func.func @transform_0(%arg0: i32, %arg1: i32, %arg2: i32) -> (i32, i32, i32, i32) {
    %c0_i32 = arith.constant 0 : i32
    %c0_i32_0 = arith.constant 0 : i32
    return %arg0, %arg1, %arg2, %c0_i32 : i32, i32, i32, i32
  }
  func.func @transform_1(%arg0: i32, %arg1: i32, %arg2: i32) -> (i32, i32, i32, i32) {
    %c0_i32 = arith.constant 0 : i32
    %c0_i32_0 = arith.constant 0 : i32
    %c0_i32_1 = arith.constant 0 : i32
    return %arg1, %arg2, %c0_i32, %c0_i32_0 : i32, i32, i32, i32
  }
  func.func @transform_2(%arg0: i32, %arg1: i32, %arg2: i32) -> (i32, i32, i32) {
    %c0_i32 = arith.constant 0 : i32
    %c0_i32_0 = arith.constant 0 : i32
    %c0_i32_1 = arith.constant 0 : i32
    %c0_i32_2 = arith.constant 0 : i32
    return %c0_i32, %c0_i32_0, %c0_i32_1 : i32, i32, i32
  }
  func.func @transform_3(%arg0: i32, %arg1: i32, %arg2: i32) -> (i32, i32) {
    %c0_i32 = arith.constant 0 : i32
    %c0_i32_0 = arith.constant 0 : i32
    %c0_i32_1 = arith.constant 0 : i32
    return %c0_i32, %c0_i32_0 : i32, i32
  }
  func.func @transform_4(%arg0: i32, %arg1: i32, %arg2: i32) -> (i32, i32) {
    %c0_i32 = arith.constant 0 : i32
    %c0_i32_0 = arith.constant 0 : i32
    %c0_i32_1 = arith.constant 0 : i32
    return %c0_i32, %c0_i32_0 : i32, i32
  }
  func.func @transform_5(%arg0: i32, %arg1: i32, %arg2: i32) -> (i32, i32) {
    %c0_i32 = arith.constant 0 : i32
    %c0_i32_0 = arith.constant 0 : i32
    %c0_i32_1 = arith.constant 0 : i32
    return %c0_i32, %c0_i32_0 : i32, i32
  }
  func.func @transform_6(%arg0: i32, %arg1: i32, %arg2: i32) -> (i32, i32) {
    %c0_i32 = arith.constant 0 : i32
    %c0_i32_0 = arith.constant 0 : i32
    %c0_i32_1 = arith.constant 0 : i32
    return %c0_i32, %c0_i32_0 : i32, i32
  }
  func.func @transform_7(%arg0: i32, %arg1: i32, %arg2: i32) -> (i32, i32) {
    %c0_i32 = arith.constant 0 : i32
    %c0_i32_0 = arith.constant 0 : i32
    %c0_i32_1 = arith.constant 0 : i32
    return %c0_i32, %c0_i32_0 : i32, i32
  }
  func.func @transform_8(%arg0: i32, %arg1: i32, %arg2: i32) -> (i32, i32) {
    %c0_i32 = arith.constant 0 : i32
    %c0_i32_0 = arith.constant 0 : i32
    %c0_i32_1 = arith.constant 0 : i32
    return %c0_i32, %c0_i32_0 : i32, i32
  }
  func.func @transform_9(%arg0: i32, %arg1: i32, %arg2: i32) -> (i32, i32) {
    %c0_i32 = arith.constant 0 : i32
    %c0_i32_0 = arith.constant 0 : i32
    %c0_i32_1 = arith.constant 0 : i32
    return %c0_i32, %c0_i32_0 : i32, i32
  }
  func.func @transform_10(%arg0: i32, %arg1: i32, %arg2: i32) -> (i32, i32) {
    %c0_i32 = arith.constant 0 : i32
    %c0_i32_0 = arith.constant 0 : i32
    %c0_i32_1 = arith.constant 0 : i32
    return %c0_i32, %c0_i32_0 : i32, i32
  }
  func.func @transform_11(%arg0: i32, %arg1: i32, %arg2: i32) -> (i32, i32) {
    %c0_i32 = arith.constant 0 : i32
    %c0_i32_0 = arith.constant 0 : i32
    %c0_i32_1 = arith.constant 0 : i32
    return %c0_i32, %c0_i32_0 : i32, i32
  }
  func.func @transform_12(%arg0: i32, %arg1: i32, %arg2: i32) -> (i32, i32) {
    %c0_i32 = arith.constant 0 : i32
    %c0_i32_0 = arith.constant 0 : i32
    %c0_i32_1 = arith.constant 0 : i32
    return %c0_i32, %c0_i32_0 : i32, i32
  }
  func.func @transform_13(%arg0: i32, %arg1: i32, %arg2: i32) -> (i32, i32) {
    %c0_i32 = arith.constant 0 : i32
    %c0_i32_0 = arith.constant 0 : i32
    %c0_i32_1 = arith.constant 0 : i32
    return %c0_i32, %c0_i32_0 : i32, i32
  }
  func.func @transform_14(%arg0: i32, %arg1: i32, %arg2: i32) -> (i32, i32) {
    %c0_i32 = arith.constant 0 : i32
    %c0_i32_0 = arith.constant 0 : i32
    %c0_i32_1 = arith.constant 0 : i32
    return %c0_i32, %c0_i32_0 : i32, i32
  }
  func.func @transform_15(%arg0: i32, %arg1: i32, %arg2: i32) -> (i32, i32, i32, i32) {
    %c0_i32 = arith.constant 0 : i32
    %c0_i32_0 = arith.constant 0 : i32
    return %arg0, %arg1, %arg2, %c0_i32 : i32, i32, i32, i32
  }
}

</mosaic_0001>

<bundles_post_ra>
// kernel: transformer_blocks_forward.2
= control target key start
LH: loop header
LB: loop body
LE: loop exit
PB: predicated region body
PF: predicated region fallthrough
CT: control target
= control target key end

     0   :  { %s9122_s0 = inlined_call_operand.vmem [shape: f32[2,16,16,32], index: 0, kind: input, shape index: {}, may-alias: {0,14}]   ;;  %s9123_s1 = inlined_call_operand.vmem [shape: f32[4,64,64], index: 1, kind: input, shape index: {}]   ;;  %s9124_s2 = inlined_call_operand.vmem [shape: f32[1,32], index: 2, kind: input, shape index: {}]   ;;  %s9125_s3 = inlined_call_operand.vmem [shape: f32[1,32], index: 3, kind: input, shape index: {}]   ;;  %s9126_s4 = inlined_call_operand.vmem [shape: bf16[32,96], index: 4, kind: input, shape index: {}]   ;;  %s9127_s5 = inlined_call_operand.vmem [shape: f32[1,96], index: 5, kind: input, shape index: {}]   ;;  %s9128_s6 = inlined_call_operand.vmem [shape: bf16[32,32], index: 6, kind: input, shape index: {}]   ;;  %s9129_s7 = inlined_call_operand.vmem [shape: f32[1,32], index: 7, kind: input, shape index: {}]   ;;  %s9130_s8 = inlined_call_operand.vmem [shape: f32[1,32], index: 8, kind: input, shape index: {}]   ;;  %s9131_s9 = inlined_call_operand.vmem [shape: f32[1,32], index: 9, kind: input, shape index: {}]   ;;  %s9132_s10 = inlined_call_operand.vmem [shape: bf16[32,128], index: 10, kind: input, shape index: {}]   ;;  %s9133_s11 = inlined_call_operand.vmem [shape: f32[1,128], index: 11, kind: input, shape index: {}]   ;;  %s9134_s12 = inlined_call_operand.vmem [shape: bf16[128,32], index: 12, kind: input, shape index: {}]   ;;  %s9135_s13 = inlined_call_operand.vmem [shape: f32[1,32], index: 13, kind: input, shape index: {}]   ;;  %s9136_s14 = inlined_call_operand.vmem [shape: f32[2,16,16,32], index: 14, kind: output, shape index: {}, may-alias: {0,14}]  }
   0x1   :  { %9185 = sst [smem:[#allocation47_spill]] %s9135_s13 }
   0x2   :  { %9186 = sst [smem:[#allocation48_spill]] %s9136_s14 }
   0x3   :  { %s6684_s29 = smov 0   ;;  %s6686_s30 = smov 0  }
   0x4   :  { %s6688_s15 = smov 0   ;;  %s6690_s16 = smov 0  }
   0x5   :  { %s6692_s17 = smov 0   ;;  %s6694_s18 = smov 0  }
   0x6   :  { %s6696_s19 = smov 0  }
   0x7 LB: > { %9187 = sst [smem:[#allocation4_spill]] %s6583_s15  ;;  %s36_s20 = sadd.s32 1, %s6591_s17  ;;  %s6599_s19 = sphi %s6696_s19, %s24_s19   ;;  %s6595_s18 = sphi %s6694_s18, %s9295_s18   ;;  %s6591_s17 = sphi %s6692_s17, %s9294_s17   ;;  %s6587_s16 = sphi %s6690_s16, %s9293_s16   ;;  %s6583_s15 = sphi %s6688_s15, %s9292_s15   ;;  %s6579_s30 = sphi %s6686_s30, %s9291_s30   ;;  %s6575_s29 = sphi %s6684_s29, %s9290_s29  }
   0x8   : > { %9188 = sst [smem:[#allocation5_spill]] %s6587_s16  ;;  %p37_p0 = scmp.ge.s32.totalorder %s36_s20, 2 }
   0x9   : > { %s43_s21 = sadd.s32 1, %s6595_s18  ;;  %s5060_s22 = sadd.s32 4294967295, %s6599_s19  }
   0xa   : > { %p61_p1 = scmp.ne.s32.totalorder %s6579_s30, %s6575_s29  ;;  %s9297_s20 = smov (%p37_p0, %s36_s20), 0 }
   0xb   : > { %9189 = sst [smem:[#allocation6_spill]] %s9297_s20  ;;  %s9299_s21 = smov (!%p37_p0, %s43_s21), %s6595_s18 }
   0xc   : > { %p62_p2 = scmp.eq.s32.totalorder %s6599_s19, 0  ;;  %p45_p3 = scmp.ge.s32.totalorder %s9299_s21, 2 }
   0xd   : > { %p368_p4 = scmp.eq.s32.totalorder %s5060_s22, 3  ;;  %s50_s23 = ssub.s32 %s6591_s17, %s9297_s20 }
   0xe   : > { %p63_p5 = por %p62_p2, %p61_p1  ;;  %s9301_s21 = smov (%p45_p3, %s9299_s21), 0 }
   0xf   : > { %p6732_p6 = por %p368_p4, %p61_p1  ;;  %s47_s25 = ssub.s32 %s6595_s18, %s9301_s21 }
  0x10   : > { %s51_s26 = sor.u32 %s50_s23, %s47_s25  ;;  %s54_s27 = sadd.s32 1, %s6579_s30 }
  0x11   : > { %s9190_s24 = scalar_select %p6732_p6, 1, 0 }
  0x12   : > { %p52_p7 = scmp.eq.s32.totalorder %s51_s26, 0  ;;  %p5063_p8 = scmp.ge.s32.totalorder %s6599_s19, 4 }
  0x13   : > { %9191 = sst [smem:[#allocation7_spill]] %s9190_s24 }
  0x14   : > { %s6740_s28 = scalar_select %p52_p7, %s6579_s30, %s54_s27  }
  0x15   : > { %429 = sbr.rel (%p5063_p8) target bundleno = 40 (0x28), region = 68 }
  0x1a   : > { %432 = sbr.rel (!%p63_p5) target bundleno = 40 (0x28), region = 72  ;;  %s434_s22 = sand.u32 (%p63_p5), 1, %s6579_s30  }
  0x1b   : > { %s5065_s20 = sshll.u32 (%p63_p5), %s6595_s18, 5  ;;  %s5064_s14 = sshll.u32 (%p63_p5), %s434_s22, 7 }
  0x1c   : > { %s441_s15 = sadd.s32 (%p63_p5), %s6591_s17, %s5065_s20  ;;  %s436_s25 = scalar_lea.vmem (%p63_p5), [#allocation2], %s5064_s14 }
  0x1d   : > { %s5066_s16 = sshll.u32 (%p63_p5), %s441_s15, 3 }
  0x1e   : > { %s6749_s23 = scalar_lea.vmem (%p63_p5), %s9122_s0, %s5066_s16 }
  0x1f   : > { %v502_v0 = vld [vmem:[%s6749_s23] sm:$0xff]  ;;  %v504_v1 = vld [vmem:[%s6749_s23 + $0x10] sm:$0xff] }
  0x20   : > { %v506_v2 = vld [vmem:[%s6749_s23 + $0x20] sm:$0xff]  ;;  %503 = vst [vmem:[%s436_s25] sm:$0xff] %v502_v0  ;;  %505 = vst [vmem:[%s436_s25 + $0x8] sm:$0xff] %v504_v1  ;;  %v508_v3 = vld [vmem:[%s6749_s23 + $0x30] sm:$0xff] }
  0x21   : > { %507 = vst [vmem:[%s436_s25 + $0x10] sm:$0xff] %v506_v2  ;;  %v510_v4 = vld [vmem:[%s6749_s23 + $0x40] sm:$0xff]  ;;  %v512_v5 = vld [vmem:[%s6749_s23 + $0x50] sm:$0xff]  ;;  %509 = vst [vmem:[%s436_s25 + $0x18] sm:$0xff] %v508_v3 }
  0x22   : > { %511 = vst [vmem:[%s436_s25 + $0x20] sm:$0xff] %v510_v4  ;;  %513 = vst [vmem:[%s436_s25 + $0x28] sm:$0xff] %v512_v5  ;;  %v514_v6 = vld [vmem:[%s6749_s23 + $0x60] sm:$0xff]  ;;  %v516_v7 = vld [vmem:[%s6749_s23 + $0x70] sm:$0xff] }
  0x23   : > { %v518_v8 = vld [vmem:[%s6749_s23 + $0x80] sm:$0xff]  ;;  %515 = vst [vmem:[%s436_s25 + $0x30] sm:$0xff] %v514_v6  ;;  %517 = vst [vmem:[%s436_s25 + $0x38] sm:$0xff] %v516_v7  ;;  %v520_v9 = vld [vmem:[%s6749_s23 + $0x90] sm:$0xff] }
  0x24   : > { %519 = vst [vmem:[%s436_s25 + $0x40] sm:$0xff] %v518_v8  ;;  %v522_v10 = vld [vmem:[%s6749_s23 + $0xa0] sm:$0xff]  ;;  %v524_v11 = vld [vmem:[%s6749_s23 + $0xb0] sm:$0xff]  ;;  %521 = vst [vmem:[%s436_s25 + $0x48] sm:$0xff] %v520_v9 }
  0x25   : > { %523 = vst [vmem:[%s436_s25 + $0x50] sm:$0xff] %v522_v10  ;;  %525 = vst [vmem:[%s436_s25 + $0x58] sm:$0xff] %v524_v11  ;;  %v526_v12 = vld [vmem:[%s6749_s23 + $0xc0] sm:$0xff]  ;;  %v528_v13 = vld [vmem:[%s6749_s23 + $0xd0] sm:$0xff] }
  0x26   : > { %v530_v14 = vld [vmem:[%s6749_s23 + $0xe0] sm:$0xff]  ;;  %527 = vst [vmem:[%s436_s25 + $0x60] sm:$0xff] %v526_v12  ;;  %529 = vst [vmem:[%s436_s25 + $0x68] sm:$0xff] %v528_v13  ;;  %v532_v15 = vld [vmem:[%s6749_s23 + $0xf0] sm:$0xff] }
  0x27   : > { %531 = vst [vmem:[%s436_s25 + $0x70] sm:$0xff] %v530_v14  ;;  %533 = vst [vmem:[%s436_s25 + $0x78] sm:$0xff] %v532_v15 }
  0x28 PF: > { %p5067_p9 = scmp.ge.s32.totalorder %s6599_s19, 1  ;;  %p538_p10 = scmp.lt.s32.totalorder %s6599_s19, 5 }
  0x2a   : > { %p539_p11 = pnand %p5067_p9, %p538_p10 }
  0x2c   : > { %542 = sbr.rel (%p539_p11) target bundleno = 2808 (0xaf8), region = 110 }
  0x31   : > { %s545_s13 = sand.u32 1, %s6575_s29   ;;  %vm608_vm0 = vcmask 261120   ;;  %s6601_s29 = smov 120   ;;  %vm1428_vm1 = vcmask 64512   ;;  %vm2321_vm2 = vcmask 523264   ;;  %vm3978_vm3 = vcmask 130048  }
  0x32   : > { %s6770_s14 = sshll.u32 %s545_s13, 7  ;;  %s6602_s16 = smov 112   ;;  %vm3995_vm4 = vcmask 195584  }
  0x33   : > { %s6773_s15 = scalar_lea.vmem [#allocation2], %s6770_s14  ;;  %s6603_s20 = smov 96  }
  0x34   : > { %v592_v16 = vld [vmem:[%s6773_s15] sm:$0xff]  ;;  %v594_v17 = vld [vmem:[%s6773_s15 + $0x10] sm:$0xff]  ;;  %v593_v18 = vld [vmem:[%s6773_s15 + $0x8] sm:$0xff]  ;;  %s6604_s24 = smov 104   ;;  %s6605_s26 = smov 64  }
  0x35   : > { %v609_v19 = vsel %vm608_vm0, %v592_v16, 0.0  ;;  %v615_v20 = vsel %vm608_vm0, %v594_v17, 0.0  ;;  %v595_v21 = vld [vmem:[%s6773_s15 + $0x18] sm:$0xff]  ;;  %v6782_v22 = vld [vmem:[%s6773_s15 + $0x20] sm:$0xff]  ;;  %v6785_v23 = vld [vmem:[%s6773_s15 + $0x28] sm:$0xff]  ;;  %v612_v24 = vsel %vm608_vm0, %v593_v18, 0.0 }
  0x36   : > { %610 = vadd.xlane.f32.xlu0 %v609_v19  ;;  %616 = vadd.xlane.f32.xlu1 %v615_v20  ;;  %v618_v25 = vsel %vm608_vm0, %v595_v21, 0.0  ;;  %v6790_v26 = vld [vmem:[%s6773_s15 + $0x30] sm:$0xff]  ;;  %v6793_v27 = vld [vmem:[%s6773_s15 + $0x38] sm:$0xff]  ;;  %v621_v28 = vsel %vm608_vm0, %v6782_v22, 0.0  ;;  %v624_v29 = vsel %vm608_vm0, %v6785_v23, 0.0  ;;  %v6804_v32 = vld [vmem:[%s6773_s15 + $0x40] sm:$0xff] }
  0x37   : > { %v627_v30 = vsel %vm608_vm0, %v6790_v26, 0.0  ;;  %v630_v31 = vsel %vm608_vm0, %v6793_v27, 0.0  ;;  %v6807_v33 = vld [vmem:[%s6773_s15 + $0x48] sm:$0xff]  ;;  %v633_v34 = vsel %vm608_vm0, %v6804_v32, 0.0  ;;  %v6814_v36 = vld [vmem:[%s6773_s15 + $0x50] sm:$0xff]  ;;  %v6817_v37 = vld [vmem:[%s6773_s15 + $0x58] sm:$0xff] }
  0x38   : > { %v636_v35 = vsel %vm608_vm0, %v6807_v33, 0.0  ;;  %v639_v38 = vsel %vm608_vm0, %v6814_v36, 0.0  ;;  %v642_v39 = vsel %vm608_vm0, %v6817_v37, 0.0  ;;  %v6824_v40 = vld [vmem:[%s6773_s15 + $0x60] sm:$0xff]  ;;  %v6827_v41 = vld [vmem:[%s6773_s15 + $0x68] sm:$0xff]  ;;  %v6834_v44 = vld [vmem:[%s6773_s15 + $0x70] sm:$0xff] }
  0x39   : > { %v645_v42 = vsel %vm608_vm0, %v6824_v40, 0.0  ;;  %v648_v43 = vsel %vm608_vm0, %v6827_v41, 0.0  ;;  %v6837_v45 = vld [vmem:[%s6773_s15 + $0x78] sm:$0xff]  ;;  %v651_v46 = vsel %vm608_vm0, %v6834_v44, 0.0  ;;  %s6607_s22 = smov 16   ;;  %s9284_s13 = sld [smem:[#allocation47_spill]] }
  0x3a   : > { %613 = vadd.xlane.f32.xlu0 %v612_v24  ;;  %619 = vadd.xlane.f32.xlu1 %v618_v25  ;;  %v654_v47 = vsel %vm608_vm0, %v6837_v45, 0.0  ;;  %s9288_s23 = sld [smem:[#allocation48_spill]] (%p6732_p6) }
  0x3e   : > { %622 = vadd.xlane.f32.xlu0 %v621_v28  ;;  %625 = vadd.xlane.f32.xlu1 %v624_v29 }
  0x42   : > { %628 = vadd.xlane.f32.xlu0 %v627_v30  ;;  %631 = vadd.xlane.f32.xlu1 %v630_v31 }
  0x46   : > { %634 = vadd.xlane.f32.xlu0 %v633_v34  ;;  %637 = vadd.xlane.f32.xlu1 %v636_v35 }
  0x4a   : > { %640 = vadd.xlane.f32.xlu0 %v639_v38  ;;  %643 = vadd.xlane.f32.xlu1 %v642_v39 }
  0x4e   : > { %646 = vadd.xlane.f32.xlu0 %v645_v42  ;;  %649 = vadd.xlane.f32.xlu1 %v648_v43 }
  0x52   : > { %652 = vadd.xlane.f32.xlu0 %v651_v46  ;;  %655 = vadd.xlane.f32.xlu1 %v654_v47 }
  0xbf   : > { %v611_v48 = vpop.xlane.xlu0 %610  ;;  %v617_v49 = vpop.xlane.xlu1 %616 }
  0xc0   : > { %v658_v50 = vmul.f32 0.03125, %v611_v48  ;;  %v660_v51 = vmul.f32 0.03125, %v617_v49 }
  0xc2   : > { %v6843_v52 = vsub.f32 %v592_v16, %v658_v50  ;;  %v6845_v53 = vsub.f32 %v594_v17, %v660_v51 }
  0xc3   : > { %v614_v54 = vpop.xlane.xlu0 %613  ;;  %v620_v55 = vpop.xlane.xlu1 %619 }
  0xc4   : > { %v659_v56 = vmul.f32 0.03125, %v614_v54  ;;  %v661_v57 = vmul.f32 0.03125, %v620_v55  ;;  %v690_v58 = vmul.f32 %v6843_v52, %v6843_v52  ;;  %v692_v59 = vmul.f32 %v6845_v53, %v6845_v53 }
  0xc6   : > { %v6851_v60 = vsub.f32 %v593_v18, %v659_v56  ;;  %v6853_v61 = vsub.f32 %v595_v21, %v661_v57  ;;  %v706_v62 = vsel %vm608_vm0, %v690_v58, 0.0  ;;  %v712_v1 = vsel %vm608_vm0, %v692_v59, 0.0 }
  0xc7   : > { %707 = vadd.xlane.f32.xlu0 %v706_v62  ;;  %v623_v63 = vpop.xlane.xlu0 %622  ;;  %v626_v0 = vpop.xlane.xlu1 %625 }
  0xc8   : > { %v662_v2 = vmul.f32 0.03125, %v623_v63  ;;  %v663_v3 = vmul.f32 0.03125, %v626_v0  ;;  %v691_v4 = vmul.f32 %v6851_v60, %v6851_v60  ;;  %v693_v5 = vmul.f32 %v6853_v61, %v6853_v61 }
  0xca   : > { %v6862_v6 = vsub.f32 %v6782_v22, %v662_v2  ;;  %v6865_v7 = vsub.f32 %v6785_v23, %v663_v3  ;;  %v709_v8 = vsel %vm608_vm0, %v691_v4, 0.0  ;;  %v715_v11 = vsel %vm608_vm0, %v693_v5, 0.0  ;;  %v6164_v5 = vld [vmem:[%s9126_s4] sm:$0xff]  }
  0xcb   : > { %713 = vadd.xlane.f32.xlu0 %v712_v1  ;;  %710 = vadd.xlane.f32.xlu1 %v709_v8  ;;  %v629_v9 = vpop.xlane.xlu0 %628  ;;  %v632_v10 = vpop.xlane.xlu1 %631 }
  0xcc   : > { %v664_v12 = vmul.f32 0.03125, %v629_v9  ;;  %v665_v13 = vmul.f32 0.03125, %v632_v10  ;;  %v694_v14 = vmul.f32 %v6862_v6, %v6862_v6  ;;  %v695_v15 = vmul.f32 %v6865_v7, %v6865_v7 }
  0xce   : > { %v6874_v16 = vsub.f32 %v6790_v26, %v664_v12  ;;  %v6877_v17 = vsub.f32 %v6793_v27, %v665_v13  ;;  %v718_v18 = vsel %vm608_vm0, %v694_v14, 0.0  ;;  %v721_v21 = vsel %vm608_vm0, %v695_v15, 0.0 }
  0xcf   : > { %716 = vadd.xlane.f32.xlu1 %v715_v11  ;;  %719 = vadd.xlane.f32.xlu0 %v718_v18  ;;  %v635_v19 = vpop.xlane.xlu0 %634  ;;  %v638_v20 = vpop.xlane.xlu1 %637 }
  0xd0   : > { %v666_v22 = vmul.f32 0.03125, %v635_v19  ;;  %v667_v23 = vmul.f32 0.03125, %v638_v20  ;;  %v696_v24 = vmul.f32 %v6874_v16, %v6874_v16  ;;  %v697_v25 = vmul.f32 %v6877_v17, %v6877_v17 }
  0xd2   : > { %v6886_v26 = vsub.f32 %v6804_v32, %v666_v22  ;;  %v6889_v27 = vsub.f32 %v6807_v33, %v667_v23  ;;  %v724_v28 = vsel %vm608_vm0, %v696_v24, 0.0  ;;  %v727_v31 = vsel %vm608_vm0, %v697_v25, 0.0 }
  0xd3   : > { %722 = vadd.xlane.f32.xlu1 %v721_v21  ;;  %725 = vadd.xlane.f32.xlu0 %v724_v28  ;;  %v641_v29 = vpop.xlane.xlu0 %640  ;;  %v644_v30 = vpop.xlane.xlu1 %643 }
  0xd4   : > { %v668_v34 = vmul.f32 0.03125, %v641_v29  ;;  %v669_v35 = vmul.f32 0.03125, %v644_v30  ;;  %v698_v38 = vmul.f32 %v6886_v26, %v6886_v26  ;;  %v699_v32 = vmul.f32 %v6889_v27, %v6889_v27 }
  0xd6   : > { %v6898_v39 = vsub.f32 %v6814_v36, %v668_v34  ;;  %v6901_v33 = vsub.f32 %v6817_v37, %v669_v35  ;;  %v730_v42 = vsel %vm608_vm0, %v698_v38, 0.0  ;;  %v733_v47 = vsel %vm608_vm0, %v699_v32, 0.0 }
  0xd7   : > { %728 = vadd.xlane.f32.xlu1 %v727_v31  ;;  %731 = vadd.xlane.f32.xlu0 %v730_v42  ;;  %v647_v43 = vpop.xlane.xlu0 %646  ;;  %v650_v46 = vpop.xlane.xlu1 %649 }
  0xd8   : > { %v670_v48 = vmul.f32 0.03125, %v647_v43  ;;  %v671_v49 = vmul.f32 0.03125, %v650_v46  ;;  %v700_v50 = vmul.f32 %v6898_v39, %v6898_v39  ;;  %v701_v36 = vmul.f32 %v6901_v33, %v6901_v33 }
  0xda   : > { %v6910_v51 = vsub.f32 %v6824_v40, %v670_v48  ;;  %v6913_v37 = vsub.f32 %v6827_v41, %v671_v49  ;;  %v736_v54 = vsel %vm608_vm0, %v700_v50, 0.0  ;;  %v739_v57 = vsel %vm608_vm0, %v701_v36, 0.0  ;;  %v6945_v49 = vld [vmem:[%s9124_s2] ss:$0 sm:$0xff] }
  0xdb   : > { %734 = vadd.xlane.f32.xlu1 %v733_v47  ;;  %737 = vadd.xlane.f32.xlu0 %v736_v54  ;;  %v653_v55 = vpop.xlane.xlu0 %652  ;;  %v656_v56 = vpop.xlane.xlu1 %655 }
  0xdc   : > { %v672_v58 = vmul.f32 0.03125, %v653_v55  ;;  %v673_v59 = vmul.f32 0.03125, %v656_v56  ;;  %v702_v62 = vmul.f32 %v6910_v51, %v6910_v51  ;;  %v703_v40 = vmul.f32 %v6913_v37, %v6913_v37 }
  0xde   : > { %v6922_v63 = vsub.f32 %v6834_v44, %v672_v58  ;;  %v6925_v41 = vsub.f32 %v6837_v45, %v673_v59  ;;  %v742_v0 = vsel %vm608_vm0, %v702_v62, 0.0  ;;  %v745_v1 = vsel %vm608_vm0, %v703_v40, 0.0  ;;  %v6163_v45 = vld [vmem:[%s9126_s4 + $0x8] sm:$0xff]  }
  0xdf   : > { %740 = vadd.xlane.f32.xlu1 %v739_v57  ;;  %743 = vadd.xlane.f32.xlu0 %v742_v0 }
  0xe0   : > { %v704_v2 = vmul.f32 %v6922_v63, %v6922_v63  ;;  %v705_v3 = vmul.f32 %v6925_v41, %v6925_v41  ;;  %5359 = vmatprep.subr.bf16.mxu0 %v6163_v45 }
  0xe1   : > { %5360 = vmatpush3.bf16.msra.mxu0 %v6163_v45 }
  0xe2   : > { %v748_v4 = vsel %vm608_vm0, %v704_v2, 0.0  ;;  %v751_v44 = vsel %vm608_vm0, %v705_v3, 0.0  ;;  %5361 = vmatprep.subr.bf16.mxu0 %v6164_v5 }
  0xe3   : > { %746 = vadd.xlane.f32.xlu1 %v745_v1  ;;  %749 = vadd.xlane.f32.xlu0 %v748_v4 }
  0xe5   : > { %5362 = vmatpush3.bf16.msra.mxu0 %v6164_v5 }
  0xe7   : > { %752 = vadd.xlane.f32.xlu1 %v751_v44 }
 0x150   : > { %v708_v8 = vpop.xlane.xlu0 %707 }
 0x151   : > { %v754_v9 = vmul.f32 0.03125, %v708_v8 }
 0x153   : > { %v770_v10 = vadd.f32 1e-05, %v754_v9 }
 0x154   : > { %v711_v11 = vpop.xlane.xlu1 %710  ;;  %v714_v12 = vpop.xlane.xlu0 %713 }
 0x155   : > { %6177 = vrsqrt.f32 %v770_v10  ;;  %v755_v13 = vmul.f32 0.03125, %v711_v11  ;;  %v756_v14 = vmul.f32 0.03125, %v714_v12 }
 0x157   : > { %v771_v15 = vadd.f32 1e-05, %v755_v13  ;;  %v772_v18 = vadd.f32 1e-05, %v756_v14 }
 0x158   : > { %v717_v19 = vpop.xlane.xlu1 %716  ;;  %v720_v20 = vpop.xlane.xlu0 %719 }
 0x159   : > { %6179 = vrsqrt.f32 %v771_v15  ;;  %v757_v21 = vmul.f32 0.03125, %v717_v19  ;;  %v758_v22 = vmul.f32 0.03125, %v720_v20 }
 0x15a   : > { %6181 = vrsqrt.f32 %v772_v18 }
 0x15b   : > { %v773_v23 = vadd.f32 1e-05, %v757_v21  ;;  %v774_v24 = vadd.f32 1e-05, %v758_v22 }
 0x15c   : > { %v723_v25 = vpop.xlane.xlu1 %722  ;;  %v726_v28 = vpop.xlane.xlu0 %725 }
 0x15d   : > { %6183 = vrsqrt.f32 %v773_v23  ;;  %v759_v29 = vmul.f32 0.03125, %v723_v25  ;;  %v760_v30 = vmul.f32 0.03125, %v726_v28 }
 0x15e   : > { %6185 = vrsqrt.f32 %v774_v24 }
 0x15f   : > { %v775_v31 = vadd.f32 1e-05, %v759_v29  ;;  %v776_v34 = vadd.f32 1e-05, %v760_v30 }
 0x160   : > { %v729_v35 = vpop.xlane.xlu1 %728  ;;  %v732_v38 = vpop.xlane.xlu0 %731 }
 0x161   : > { %6187 = vrsqrt.f32 %v775_v31  ;;  %v761_v32 = vmul.f32 0.03125, %v729_v35  ;;  %v762_v42 = vmul.f32 0.03125, %v732_v38 }
 0x162   : > { %v6178_v43 = vpop.eup %6177  ;;  %6189 = vrsqrt.f32 %v776_v34 }
 0x163   : > { %v777_v46 = vadd.f32 1e-05, %v761_v32  ;;  %v778_v47 = vadd.f32 1e-05, %v762_v42  ;;  %v802_v48 = vmul.f32 %v6178_v43, %v6843_v52  ;;  %v6952_v52 = vld [vmem:[%s9125_s3] ss:$0 sm:$0xff] }
 0x164   : > { %v735_v50 = vpop.xlane.xlu1 %734  ;;  %v738_v36 = vpop.xlane.xlu0 %737 }
 0x165   : > { %6191 = vrsqrt.f32 %v777_v46  ;;  %v763_v54 = vmul.f32 0.03125, %v735_v50  ;;  %v764_v55 = vmul.f32 0.03125, %v738_v36  ;;  %v825_v57 = vmul.f32 %v6945_v49, %v802_v48 }
 0x166   : > { %v6180_v56 = vpop.eup %6179  ;;  %6193 = vrsqrt.f32 %v778_v47 }
 0x167   : > { %v6182_v58 = vpop.eup %6181  ;;  %v779_v59 = vadd.f32 1e-05, %v763_v54  ;;  %v780_v62 = vadd.f32 1e-05, %v764_v55  ;;  %v803_v40 = vmul.f32 %v6180_v56, %v6851_v60  ;;  %v848_v5 = vadd.f32 %v6952_v52, %v825_v57 }
 0x168   : > { %v741_v0 = vpop.xlane.xlu1 %740  ;;  %v744_v1 = vpop.xlane.xlu0 %743  ;;  %v804_v2 = vmul.f32 %v6182_v58, %v6845_v53 }
 0x169   : > { %6195 = vrsqrt.f32 %v779_v59  ;;  %v765_v3 = vmul.f32 0.03125, %v741_v0  ;;  %v766_v4 = vmul.f32 0.03125, %v744_v1  ;;  %v826_v44 = vmul.f32 %v6945_v49, %v803_v40 }
 0x16a   : > { %v6184_v45 = vpop.eup %6183  ;;  %6197 = vrsqrt.f32 %v780_v62  ;;  %v827_v53 = vmul.f32 %v6945_v49, %v804_v2 }
 0x16b   : > { %v6186_v8 = vpop.eup %6185  ;;  %v781_v60 = vadd.f32 1e-05, %v765_v3  ;;  %v782_v9 = vadd.f32 1e-05, %v766_v4  ;;  %v849_v10 = vadd.f32 %v6952_v52, %v826_v44  ;;  %v805_v11 = vmul.f32 %v6184_v45, %v6853_v61 }
 0x16c   : > { %v747_v12 = vpop.xlane.xlu1 %746  ;;  %v750_v13 = vpop.xlane.xlu0 %749  ;;  %v806_v14 = vmul.f32 %v6186_v8, %v6862_v6  ;;  %v850_v6 = vadd.f32 %v6952_v52, %v827_v53 }
 0x16d   : > { %6199 = vrsqrt.f32 %v781_v60  ;;  %v767_v15 = vmul.f32 0.03125, %v747_v12  ;;  %v768_v18 = vmul.f32 0.03125, %v750_v13  ;;  %v864_v19 = vpack.c.bf16 %v849_v10, %v848_v5 }
 0x16e   : > { %v6188_v20 = vpop.eup %6187  ;;  %6201 = vrsqrt.f32 %v782_v9  ;;  %v828_v21 = vmul.f32 %v6945_v49, %v805_v11  ;;  %v829_v22 = vmul.f32 %v6945_v49, %v806_v14 }
 0x16f   : > { %v6190_v23 = vpop.eup %6189  ;;  %v783_v24 = vadd.f32 1e-05, %v767_v15  ;;  %v784_v25 = vadd.f32 1e-05, %v768_v18  ;;  %5363 = vmatprep.mubr.msk.bf16.mxu0 %vm608_vm0, %v864_v19  ;;  %v807_v61 = vmul.f32 %v6188_v20, %v6865_v7 }
 0x170   : > { %v753_v28 = vpop.xlane.xlu1 %752  ;;  %v851_v29 = vadd.f32 %v6952_v52, %v828_v21  ;;  %v808_v30 = vmul.f32 %v6190_v23, %v6874_v16  ;;  %v852_v32 = vadd.f32 %v6952_v52, %v829_v22 }
 0x171   : > { %6203 = vrsqrt.f32 %v783_v24  ;;  %v769_v31 = vmul.f32 0.03125, %v753_v28  ;;  %v830_v34 = vmul.f32 %v6945_v49, %v807_v61 }
 0x172   : > { %v6192_v35 = vpop.eup %6191  ;;  %6205 = vrsqrt.f32 %v784_v25  ;;  %v865_v38 = vpack.c.bf16 %v851_v29, %v850_v6  ;;  %v831_v47 = vmul.f32 %v6945_v49, %v808_v30 }
 0x173   : > { %v6194_v42 = vpop.eup %6193  ;;  %v785_v43 = vadd.f32 1e-05, %v769_v31  ;;  %v853_v7 = vadd.f32 %v6952_v52, %v830_v34  ;;  %v809_v46 = vmul.f32 %v6192_v35, %v6877_v17 }
 0x174   : > { %5364 = vmatmul.mubr.msk.bf16.vlgmr.msra.gmra.mxu0 %vm608_vm0, %v865_v38  ;;  %v810_v16 = vmul.f32 %v6194_v42, %v6886_v26  ;;  %v854_v55 = vadd.f32 %v6952_v52, %v831_v47 }
 0x175   : > { %6207 = vrsqrt.f32 %v785_v43  ;;  %v866_v48 = vpack.c.bf16 %v853_v7, %v852_v32  ;;  %v832_v50 = vmul.f32 %v6945_v49, %v809_v46 }
 0x176   : > { %v6196_v36 = vpop.eup %6195  ;;  %v833_v57 = vmul.f32 %v6945_v49, %v810_v16 }
 0x177   : > { %v6198_v54 = vpop.eup %6197  ;;  %5367 = vmatprep.mubr.msk.bf16.mxu0 %vm608_vm0, %v866_v48  ;;  %v855_v56 = vadd.f32 %v6952_v52, %v832_v50  ;;  %v811_v17 = vmul.f32 %v6196_v36, %v6889_v27 }
 0x178   : > { %v812_v58 = vmul.f32 %v6198_v54, %v6898_v39  ;;  %v856_v0 = vadd.f32 %v6952_v52, %v833_v57 }
 0x179   : > { %v867_v59 = vpack.c.bf16 %v855_v56, %v854_v55  ;;  %v834_v26 = vmul.f32 %v6945_v49, %v811_v17 }
 0x17a   : > { %v6200_v62 = vpop.eup %6199  ;;  %v835_v3 = vmul.f32 %v6945_v49, %v812_v58 }
 0x17b   : > { %v6202_v40 = vpop.eup %6201  ;;  %v857_v1 = vadd.f32 %v6952_v52, %v834_v26  ;;  %v813_v2 = vmul.f32 %v6200_v62, %v6901_v33 }
 0x17c   : > { %5368 = vmatmul.mubr.msk.bf16.gmra.mxu0 %vm608_vm0, %v867_v59  ;;  %v814_v27 = vmul.f32 %v6202_v40, %v6910_v51  ;;  %v858_v5 = vadd.f32 %v6952_v52, %v835_v3 }
 0x17d   : > { %v868_v4 = vpack.c.bf16 %v857_v1, %v856_v0  ;;  %v836_v39 = vmul.f32 %v6945_v49, %v813_v2 }
 0x17e   : > { %v6204_v44 = vpop.eup %6203  ;;  %v837_v33 = vmul.f32 %v6945_v49, %v814_v27 }
 0x17f   : > { %v6206_v45 = vpop.eup %6205  ;;  %5371 = vmatprep.mubr.msk.bf16.mxu0 %vm608_vm0, %v868_v4  ;;  %v859_v8 = vadd.f32 %v6952_v52, %v836_v39  ;;  %v815_v60 = vmul.f32 %v6204_v44, %v6913_v37 }
 0x180   : > { %v816_v9 = vmul.f32 %v6206_v45, %v6922_v63  ;;  %v860_v12 = vadd.f32 %v6952_v52, %v837_v33 }
 0x181   : > { %v869_v10 = vpack.c.bf16 %v859_v8, %v858_v5  ;;  %v838_v51 = vmul.f32 %v6945_v49, %v815_v60 }
 0x182   : > { %v6208_v11 = vpop.eup %6207  ;;  %v839_v14 = vmul.f32 %v6945_v49, %v816_v9 }
 0x183   : > { %v861_v13 = vadd.f32 %v6952_v52, %v838_v51  ;;  %v817_v53 = vmul.f32 %v6208_v11, %v6925_v41  ;;  %v7010_v41 = vld [vmem:[%s9127_s5] ss:$0 sm:$0xff] }
 0x184   : > { %5372 = vmatmul.mubr.msk.bf16.gmra.mxu0 %vm608_vm0, %v869_v10  ;;  %v862_v63 = vadd.f32 %v6952_v52, %v839_v14 }
 0x185   : > { %v870_v15 = vpack.c.bf16 %v861_v13, %v860_v12  ;;  %v840_v37 = vmul.f32 %v6945_v49, %v817_v53 }
 0x187   : > { %5375 = vmatprep.mubr.msk.bf16.mxu0 %vm608_vm0, %v870_v15  ;;  %v863_v18 = vadd.f32 %v6952_v52, %v840_v37 }
 0x189   : > { %v871_v19 = vpack.c.bf16 %v863_v18, %v862_v63 }
 0x18c   : > { %5376 = vmatmul.mubr.msk.bf16.gmra.mxu0 %vm608_vm0, %v871_v19 }
 0x234   : > { %v5365_v20 = vpop.f32.mrf.mxu0 }
 0x235   : > { %v7013_v22 = vadd.f32 %v5365_v20, %v7010_v41 }
 0x236   : > { %v953_v21 = vpop.f32.mrf.mxu0 }
 0x237   : > { %v7016_v23 = vadd.f32 %v7010_v41, %v953_v21  ;;  %v7029_v6 = vmul.f32 0.35355338, %v7013_v22 }
 0x238   : > { %v5366_v49 = vpop.f32.mrf.mxu0 }
 0x239   : > { %v7019_v24 = vadd.f32 %v5366_v49, %v7010_v41  ;;  %v1016_v30 = vmul.f32 0.35355338, %v7016_v23 }
 0x23a   : > { %v956_v52 = vpop.f32.mrf.mxu0 }
 0x23b   : > { %v7022_v25 = vadd.f32 %v7010_v41, %v956_v52  ;;  %v7026_v61 = vpack.i.bf16 %v7019_v24, %v7013_v22  ;;  %v7032_v29 = vmul.f32 0.35355338, %v7019_v24  ;;  %v7126_v21 = vpack.c.bf16 %v7019_v24, %v7013_v22 }
 0x23c   : > { %v5369_v28 = vpop.f32.mrf.mxu0 }
 0x23d   : > { %5809 = vrot.lane.b32.xlu1 %v7026_v61, %s6601_s29  ;;  %v1017_v31 = vmul.f32 0.35355338, %v7022_v25  ;;  %v7040_v35 = vpack.i.bf16 %v7032_v29, %v7029_v6  ;;  %v7044_v38 = vpack.i.bf16 %v7022_v25, %v7016_v23  ;;  %v978_v32 = vadd.f32 %v5369_v28, %v7010_v41 }
 0x23e   : > { %v969_v34 = vpop.f32.mrf.mxu0  ;;  %v1353_v46 = vpack.c.bf16 %v7032_v29, %v7029_v6 }
 0x23f   : > { %v1352_v42 = vpack.c.bf16 %v1017_v31, %v1016_v30  ;;  %v7047_v43 = vpack.i.bf16 %v1017_v31, %v1016_v30  ;;  %v970_v16 = vadd.f32 %v7010_v41, %v969_v34  ;;  %v7055_v55 = vmul.f32 0.35355338, %v978_v32 }
 0x240   : > { %v5370_v7 = vpop.f32.mrf.mxu0 }
 0x241   : > { %v981_v47 = vadd.f32 %v5370_v7, %v7010_v41  ;;  %5387 = vmatprep.mubr.msk.bf16.mxu1 %vm1428_vm1, %v1352_v42  ;;  %v7064_v59 = vmul.f32 0.35355338, %v970_v16 }
 0x242   : > { %v972_v48 = vpop.f32.mrf.mxu0 }
 0x243   : > { %v973_v50 = vadd.f32 %v7010_v41, %v972_v48  ;;  %v5803_v36 = vpack.i.bf16 %v981_v47, %v978_v32  ;;  %v7057_v56 = vmul.f32 0.35355338, %v981_v47  ;;  %v7088_v44 = vpack.c.bf16 %v981_v47, %v978_v32 }
 0x244   : > { %v5373_v54 = vpop.f32.mrf.mxu0  ;;  %v7159_v32 = vpack.c.bf16 %v7022_v25, %v7016_v23 }
 0x245   : > { %5804 = vrot.lane.b32.xlu0 %v5803_v36, %s6601_s29  ;;  %v5818_v17 = vpack.i.bf16 %v973_v50, %v970_v16  ;;  %v7062_v58 = vpack.i.bf16 %v7057_v56, %v7055_v55  ;;  %v7066_v26 = vmul.f32 0.35355338, %v973_v50  ;;  %v1355_v62 = vpack.c.bf16 %v7057_v56, %v7055_v55 }
 0x246   : > { %v985_v57 = vpop.f32.mrf.mxu0  ;;  %v7071_v40 = vadd.f32 %v5373_v54, %v7010_v41  ;;  %v7101_v10 = vpack.c.bf16 %v973_v50, %v970_v16 }
 0x247   : > { %5819 = vrot.lane.b32.xlu1 %v5818_v17, %s6601_s29  ;;  %v7076_v1 = vpack.i.bf16 %v7066_v26, %v7064_v59  ;;  %v1354_v2 = vpack.c.bf16 %v7066_v26, %v7064_v59  ;;  %v7081_v3 = vadd.f32 %v7010_v41, %v985_v57 }
 0x248   : > { %v5374_v0 = vpop.f32.mrf.mxu0  ;;  %v7094_v8 = vmul.f32 0.35355338, %v7071_v40 }
 0x249   : > { %v997_v27 = vadd.f32 %v5374_v0, %v7010_v41  ;;  %5814 = vrot.lane.b32.xlu0 %v7044_v38, %s6601_s29  ;;  %v1024_v33 = vmul.f32 0.35355338, %v7081_v3 }
 0x24a   : > { %v988_v4 = vpop.f32.mrf.mxu0 }
 0x24b   : > { %v989_v39 = vadd.f32 %v7010_v41, %v988_v4  ;;  %5829 = vrot.lane.b32.xlu1 %v5818_v17, %s6602_s16  ;;  %v7091_v5 = vpack.i.bf16 %v997_v27, %v7071_v40  ;;  %v7096_v60 = vmul.f32 0.35355338, %v997_v27  ;;  %v7171_v7 = vpack.c.bf16 %v997_v27, %v7071_v40 }
 0x24c   : > { %v5377_v45 = vpop.f32.mrf.mxu0 }
 0x24d   : > { %v1025_v9 = vmul.f32 0.35355338, %v989_v39  ;;  %1426 = vrot.lane.b32.xlu0 %v7088_v44, %s6603_s20  ;;  %v7104_v11 = vpack.i.bf16 %v989_v39, %v7081_v3  ;;  %v7108_v12 = vpack.i.bf16 %v7096_v60, %v7094_v8  ;;  %v1010_v13 = vadd.f32 %v5377_v45, %v7010_v41 }
 0x24e   : > { %v1001_v51 = vpop.f32.mrf.mxu0  ;;  %v1357_v37 = vpack.c.bf16 %v7096_v60, %v7094_v8  ;;  %v7183_v25 = vpack.c.bf16 %v989_v39, %v7081_v3 }
 0x24f   : > { %1424 = vrot.lane.b32.xlu1 %v7101_v10, %s6603_s20  ;;  %v1356_v53 = vpack.c.bf16 %v1025_v9, %v1024_v33  ;;  %v7113_v14 = vpack.i.bf16 %v1025_v9, %v1024_v33  ;;  %v1002_v63 = vadd.f32 %v7010_v41, %v1001_v51  ;;  %v7128_v49 = vmul.f32 0.35355338, %v1010_v13 }
 0x250   : > { %v5378_v15 = vpop.f32.mrf.mxu0 }
 0x251   : > { %v1013_v18 = vadd.f32 %v5378_v15, %v7010_v41  ;;  %5824 = vrot.lane.b32.xlu0 %v5803_v36, %s6602_s16  ;;  %5403 = vmatprep.mubr.msk.bf16.mxu0 %vm1428_vm1, %v1356_v53  ;;  %v7134_v28 = vmul.f32 0.35355338, %v1002_v63 }
 0x252   : > { %v1004_v19 = vpop.f32.mrf.mxu0 }
 0x253   : > { %v1005_v20 = vadd.f32 %v7010_v41, %v1004_v19  ;;  %5834 = vrot.lane.b32.xlu1 %v7091_v5, %s6601_s29  ;;  %v7130_v52 = vmul.f32 0.35355338, %v1013_v18  ;;  %v5878_v34 = vpack.i.bf16 %v1013_v18, %v1010_v13  ;;  %v7175_v23 = vpack.c.bf16 %v1013_v18, %v1010_v13 }
 0x255   : > { %1422 = vrot.lane.b32.xlu0 %v7126_v21, %s6603_s20  ;;  %v7136_v30 = vmul.f32 0.35355338, %v1005_v20  ;;  %v7140_v41 = vpack.i.bf16 %v7130_v52, %v7128_v49  ;;  %v1359_v31 = vpack.c.bf16 %v7130_v52, %v7128_v49  ;;  %v5893_v42 = vpack.i.bf16 %v1005_v20, %v1002_v63 }
 0x256   : > { %v7187_v47 = vpack.c.bf16 %v1005_v20, %v1002_v63 }
 0x257   : > { %5859 = vrot.lane.b32.xlu1 %v5803_v36, %s6604_s24  ;;  %v7147_v22 = vpack.i.bf16 %v7136_v30, %v7134_v28  ;;  %v1358_v24 = vpack.c.bf16 %v7136_v30, %v7134_v28 }
 0x259   : > { %5839 = vrot.lane.b32.xlu0 %v7104_v11, %s6601_s29 }
 0x25b   : > { %5864 = vrot.lane.b32.xlu1 %v5818_v17, %s6604_s24 }
 0x25d   : > { %5844 = vrot.lane.b32.xlu0 %v7026_v61, %s6602_s16 }
 0x25f   : > { %5879 = vrot.lane.b32.xlu1 %v5878_v34, %s6601_s29 }
 0x261   : > { %1420 = vrot.lane.b32.xlu0 %v7159_v32, %s6603_s20 }
 0x263   : > { %5884 = vrot.lane.b32.xlu1 %v5878_v34, %s6602_s16 }
 0x265   : > { %5849 = vrot.lane.b32.xlu0 %v7044_v38, %s6602_s16 }
 0x267   : > { %5889 = vrot.lane.b32.xlu1 %v5878_v34, %s6604_s24 }
 0x269   : > { %5854 = vrot.lane.b32.xlu0 %v7091_v5, %s6602_s16 }
 0x26b   : > { %5894 = vrot.lane.b32.xlu1 %v5893_v42, %s6601_s29 }
 0x26d   : > { %1524 = vrot.lane.b32.xlu0 %v7171_v7, %s6603_s20 }
 0x26f   : > { %1528 = vrot.lane.b32.xlu1 %v7175_v23, %s6603_s20 }
 0x271   : > { %5869 = vrot.lane.b32.xlu0 %v7104_v11, %s6602_s16 }
 0x273   : > { %5899 = vrot.lane.b32.xlu1 %v5893_v42, %s6602_s16 }
 0x275   : > { %1522 = vrot.lane.b32.xlu0 %v7183_v25, %s6603_s20 }
 0x277   : > { %1526 = vrot.lane.b32.xlu1 %v7187_v47, %s6603_s20 }
 0x279   : > { %5874 = vrot.lane.b32.xlu0 %v7026_v61, %s6604_s24 }
 0x27b   : > { %5909 = vrot.lane.b32.xlu1 %v5893_v42, %s6604_s24 }
 0x27f   : > { %5919 = vrot.lane.b32.xlu1 %v7040_v35, %s6601_s29 }
 0x2af   : > { %v5810_v16 = vpop.permute.xlu1 %5809 }
 0x2b0   : > { %v5812_v48 = vunpack.i.h.bf16 %v5810_v16  ;;  %v5811_v50 = vunpack.i.l.bf16 %v5810_v16 }
 0x2b2   : > { %v7196_v36 = vpack.c.bf16 %v5812_v48, %v5811_v50 }
 0x2b4   : > { %1625 = vrot.lane.b32.xlu0 %v7196_v36, %s6603_s20 }
 0x2b7   : > { %v5805_v54 = vpop.permute.xlu0 %5804 }
 0x2b8   : > { %v5807_v17 = vunpack.i.h.bf16 %v5805_v54  ;;  %v5806_v57 = vunpack.i.l.bf16 %v5805_v54  ;;  %5904 = vrot.lane.b32.xlu0 %v7044_v38, %s6604_s24 }
 0x2b9   : > { %v5820_v61 = vpop.permute.xlu1 %5819 }
 0x2ba   : > { %v7202_v40 = vpack.c.bf16 %v5807_v17, %v5806_v57  ;;  %v5822_v53 = vunpack.i.h.bf16 %v5820_v61  ;;  %v5821_v63 = vunpack.i.l.bf16 %v5820_v61 }
 0x2bb   : > { %v5815_v0 = vpop.permute.xlu0 %5814 }
 0x2bc   : > { %v5817_v3 = vunpack.i.h.bf16 %v5815_v0  ;;  %v5816_v27 = vunpack.i.l.bf16 %v5815_v0  ;;  %1629 = vrot.lane.b32.xlu1 %v7202_v40, %s6603_s20  ;;  %v7227_v50 = vpack.c.bf16 %v5822_v53, %v5821_v63 }
 0x2bd   : > { %v5830_v4 = vpop.permute.xlu1 %5829 }
 0x2be   : > { %v7206_v39 = vpack.c.bf16 %v5817_v3, %v5816_v27  ;;  %v5832_v17 = vunpack.i.h.bf16 %v5830_v4  ;;  %v5831_v57 = vunpack.i.l.bf16 %v5830_v4 }
 0x2bf   : > { %v1427_v45 = vpop.permute.xlu0 %1426 }
 0x2c0   : > { %5707 = vmatprep.subr.msk.bf16.mxu1 %vm1428_vm1, %v1427_v45  ;;  %1623 = vrot.lane.b32.xlu0 %v7206_v39, %s6603_s20  ;;  %v1451_v38 = vsel %vm1428_vm1, %v1427_v45, 0  ;;  %v7238_v27 = vpack.c.bf16 %v5832_v17, %v5831_v57 }
 0x2c1   : > { %v1425_v33 = vpop.permute.xlu1 %1424  ;;  %5380 = vmatpush3.bf16.xpose.msra.mxu1 %v1451_v38 }
 0x2c2   : > { %5708 = vmatprep.subr.msk.bf16.mxu1 %vm1428_vm1, %v1425_v33  ;;  %v1448_v42 = vsel %vm1428_vm1, %v1425_v33, 0 }
 0x2c3   : > { %v5825_v9 = vpop.permute.xlu0 %5824 }
 0x2c4   : > { %v5827_v51 = vunpack.i.h.bf16 %v5825_v9  ;;  %v5826_v13 = vunpack.i.l.bf16 %v5825_v9  ;;  %5914 = vrot.lane.b32.xlu0 %v7047_v43, %s6601_s29 }
 0x2c5   : > { %v5835_v15 = vpop.permute.xlu1 %5834 }
 0x2c6   : > { %v5837_v18 = vunpack.i.h.bf16 %v5835_v15  ;;  %v5836_v19 = vunpack.i.l.bf16 %v5835_v15  ;;  %v7215_v20 = vpack.c.bf16 %v5827_v51, %v5826_v13 }
 0x2c7   : > { %v1423_v34 = vpop.permute.xlu0 %1422 }
 0x2c8   : > { %1831 = vrot.lane.b32.xlu1 %v7215_v20, %s6603_s20  ;;  %v7220_v16 = vpack.c.bf16 %v5837_v18, %v5836_v19  ;;  %v1445_v3 = vsel %vm1428_vm1, %v1423_v34, 0 }
 0x2c9   : > { %v7222_v48 = vpop.permute.xlu1 %5859  ;;  %5382 = vmatpush3.bf16.xpose.msra.mxu1 %v1448_v42 }
 0x2ca   : > { %5709 = vmatprep.subr.msk.bf16.mxu1 %vm1428_vm1, %v1423_v34  ;;  %1726 = vrot.lane.b32.xlu0 %v7220_v16, %s6603_s20 }
 0x2cb   : > { %v5840_v54 = vpop.permute.xlu0 %5839 }
 0x2cc   : > { %1627 = vrot.lane.b32.xlu1 %v7227_v50, %s6603_s20  ;;  %v5842_v53 = vunpack.i.h.bf16 %v5840_v54  ;;  %v5841_v15 = vunpack.i.l.bf16 %v5840_v54 }
 0x2cd   : > { %v7231_v61 = vpop.permute.xlu1 %5864 }
 0x2ce   : > { %5924 = vrot.lane.b32.xlu0 %v7091_v5, %s6604_s24  ;;  %v7260_v57 = vpack.c.bf16 %v5842_v53, %v5841_v15  ;;  %v5862_v53 = vunpack.i.h.bf16 %v7222_v48  ;;  %v5861_v15 = vunpack.i.l.bf16 %v7222_v48 }
 0x2cf   : > { %v5845_v0 = vpop.permute.xlu0 %5844 }
 0x2d0   : > { %5929 = vrot.lane.b32.xlu1 %v7104_v11, %s6604_s24  ;;  %v5847_v38 = vunpack.i.h.bf16 %v5845_v0  ;;  %v5846_v33 = vunpack.i.l.bf16 %v5845_v0  ;;  %v7307_v48 = vpack.c.bf16 %v5862_v53, %v5861_v15 }
 0x2d1   : > { %v5880_v45 = vpop.permute.xlu1 %5879  ;;  %5384 = vmatpush3.bf16.xpose.msra.mxu1 %v1445_v3 }
 0x2d2   : > { %1829 = vrot.lane.b32.xlu0 %v7238_v27, %s6603_s20  ;;  %v7250_v51 = vpack.c.bf16 %v5847_v38, %v5846_v33  ;;  %v5882_v42 = vunpack.i.h.bf16 %v5880_v45  ;;  %v5881_v17 = vunpack.i.l.bf16 %v5880_v45 }
 0x2d3   : > { %v1421_v4 = vpop.permute.xlu0 %1420 }
 0x2d4   : > { %5710 = vmatprep.subr.msk.bf16.mxu1 %vm1428_vm1, %v1421_v4  ;;  %5939 = vrot.lane.b32.xlu1 %v7108_v12, %s6601_s29  ;;  %v1442_v9 = vsel %vm1428_vm1, %v1421_v4, 0  ;;  %v7278_v29 = vpack.c.bf16 %v5882_v42, %v5881_v17  ;;  %v5867_v42 = vunpack.i.h.bf16 %v7231_v61  ;;  %v5866_v17 = vunpack.i.l.bf16 %v7231_v61 }
 0x2d5   : > { %v5885_v5 = vpop.permute.xlu1 %5884 }
 0x2d6   : > { %5934 = vrot.lane.b32.xlu0 %v7113_v14, %s6601_s29  ;;  %v5887_v45 = vunpack.i.h.bf16 %v5885_v5  ;;  %v5886_v4 = vunpack.i.l.bf16 %v5885_v5 }
 0x2d7   : > { %v5850_v11 = vpop.permute.xlu0 %5849 }
 0x2d8   : > { %5949 = vrot.lane.b32.xlu1 %v7062_v58, %s6601_s29  ;;  %v5852_v18 = vunpack.i.h.bf16 %v5850_v11  ;;  %v5851_v19 = vunpack.i.l.bf16 %v5850_v11  ;;  %v7284_v5 = vpack.c.bf16 %v5887_v45, %v5886_v4 }
 0x2d9   : > { %v7252_v13 = vpop.permute.xlu1 %5889  ;;  %5386 = vmatpush3.bf16.xpose.msra.mxu1 %v1442_v9 }
 0x2da   : > { %1827 = vrot.lane.b32.xlu0 %v7250_v51, %s6603_s20  ;;  %v7268_v54 = vpack.c.bf16 %v5852_v18, %v5851_v19 }
 0x2db   : > { %v5855_v63 = vpop.permute.xlu0 %5854 }
 0x2dc   : > { %5959 = vrot.lane.b32.xlu1 %v7040_v35, %s6602_s16  ;;  %v5856_v38 = vunpack.i.l.bf16 %v5855_v63 }
 0x2dd   : > { %v5895_v34 = vpop.permute.xlu1 %5894 }
 0x2de   : > { %5944 = vrot.lane.b32.xlu0 %v7076_v1, %s6601_s29  ;;  %v5896_v33 = vunpack.i.l.bf16 %v5895_v34 }
 0x2df   : > { %v1525_v0 = vpop.permute.xlu0 %1524 }
 0x2e0   : > { %5388 = vmatmul.mubr.msk.bf16.vlgmr.msra.gmra.mxu1 %vm1428_vm1, %v1353_v46  ;;  %1724 = vrot.lane.b32.xlu1 %v7260_v57, %s6603_s20  ;;  %v5857_v46 = vunpack.i.h.bf16 %v5855_v63 }
 0x2e1   : > { %v1529_v3 = vpop.permute.xlu1 %1528  ;;  %5391 = vmatprep.mubr.msk.bf16.mxu1 %vm1428_vm1, %v1354_v2  ;;  %v5897_v2 = vunpack.i.h.bf16 %v5895_v34 }
 0x2e2   : > { %5711 = vmatprep.subr.msk.bf16.mxu0 %vm1428_vm1, %v1529_v3  ;;  %1825 = vrot.lane.b32.xlu0 %v7268_v54, %s6603_s20  ;;  %v1552_v6 = vsel %vm1428_vm1, %v1529_v3, 0  ;;  %v7292_v11 = vpack.c.bf16 %v5857_v46, %v5856_v38  ;;  %v1546_v3 = vsel %vm1428_vm1, %v1525_v0, 0  ;;  %v5891_v46 = vunpack.i.l.bf16 %v7252_v13 }
 0x2e3   : > { %5396 = vmatpush3.bf16.xpose.msra.mxu0 %v1552_v6  ;;  %v5870_v59 = vpop.permute.xlu0 %5869  ;;  %v7300_v55 = vpack.c.bf16 %v5897_v2, %v5896_v33  ;;  %v7323_v6 = vpack.c.bf16 %v5867_v42, %v5866_v17 }
 0x2e4   : > { %1730 = vrot.lane.b32.xlu1 %v7278_v29, %s6603_s20  ;;  %v5871_v18 = vunpack.i.l.bf16 %v5870_v59 }
 0x2e5   : > { %v5900_v26 = vpop.permute.xlu1 %5899 }
 0x2e6   : > { %5954 = vrot.lane.b32.xlu0 %v7047_v43, %s6602_s16  ;;  %v5901_v2 = vunpack.i.l.bf16 %v5900_v26 }
 0x2e7   : > { %v1523_v56 = vpop.permute.xlu0 %1522 }
 0x2e8   : > { %5392 = vmatmul.mubr.msk.bf16.gmra.mxu1 %vm1428_vm1, %v1355_v62  ;;  %1932 = vrot.lane.b32.xlu1 %v7284_v5, %s6603_s20  ;;  %v5872_v62 = vunpack.i.h.bf16 %v5870_v59  ;;  %v1543_v38 = vsel %vm1428_vm1, %v1523_v56, 0 }
 0x2e9   : > { %v1527_v9 = vpop.permute.xlu1 %1526 }
 0x2ea   : > { %5712 = vmatprep.subr.msk.bf16.mxu0 %vm1428_vm1, %v1527_v9  ;;  %1928 = vrot.lane.b32.xlu0 %v7292_v11, %s6603_s20  ;;  %v1549_v63 = vsel %vm1428_vm1, %v1527_v9, 0  ;;  %v7311_v19 = vpack.c.bf16 %v5872_v62, %v5871_v18 }
 0x2eb   : > { %5398 = vmatpush3.bf16.xpose.msra.mxu0 %v1549_v63  ;;  %v5875_v34 = vpop.permute.xlu0 %5874 }
 0x2ec   : > { %5713 = vmatprep.subr.msk.bf16.mxu0 %vm1428_vm1, %v1525_v0  ;;  %1728 = vrot.lane.b32.xlu1 %v7300_v55, %s6603_s20  ;;  %v5877_v45 = vunpack.i.h.bf16 %v5875_v34  ;;  %v5876_v4 = vunpack.i.l.bf16 %v5875_v34  ;;  %v5892_v0 = vunpack.i.h.bf16 %v7252_v13  ;;  %v5902_v13 = vunpack.i.h.bf16 %v5900_v26 }
 0x2ed   : > { %v7366_v8 = vpop.permute.xlu1 %5909 }
 0x2ee   : > { %5964 = vrot.lane.b32.xlu0 %v7147_v22, %s6601_s29  ;;  %v7327_v61 = vpack.c.bf16 %v5877_v45, %v5876_v4  ;;  %v7338_v59 = vpack.c.bf16 %v5892_v0, %v5891_v46  ;;  %v7354_v33 = vpack.c.bf16 %v5902_v13, %v5901_v2 }
 0x2f0   : > { %2033 = vrot.lane.b32.xlu1 %v7307_v48, %s6603_s20 }
 0x2f2   : > { %1926 = vrot.lane.b32.xlu0 %v7311_v19, %s6603_s20 }
 0x2f3   : > { %5400 = vmatpush3.bf16.xpose.msra.mxu0 %v1546_v3 }
 0x2f4   : > { %5714 = vmatprep.subr.msk.bf16.mxu0 %vm1428_vm1, %v1523_v56  ;;  %5969 = vrot.lane.b32.xlu1 %v7140_v41, %s6601_s29  ;;  %s9029_s29 = scalar_lea.vmem [#allocation3], %s6770_s14 }
 0x2f6   : > { %5974 = vrot.lane.b32.xlu0 %v7113_v14, %s6602_s16 }
 0x2f8   : > { %2031 = vrot.lane.b32.xlu1 %v7323_v6, %s6603_s20 }
 0x2fa   : > { %2029 = vrot.lane.b32.xlu0 %v7327_v61, %s6603_s20 }
 0x2fb   : > { %5402 = vmatpush3.bf16.xpose.msra.mxu0 %v1543_v38 }
 0x2fc   : > { %5979 = vrot.lane.b32.xlu1 %v7108_v12, %s6602_s16 }
 0x2fe   : > { %5984 = vrot.lane.b32.xlu0 %v7076_v1, %s6602_s16 }
 0x300   : > { %2134 = vrot.lane.b32.xlu1 %v7338_v59, %s6603_s20 }
 0x302   : > { %5404 = vmatmul.mubr.msk.bf16.vlgmr.msra.gmra.mxu0 %vm1428_vm1, %v1357_v37 }
 0x303   : > { %5407 = vmatprep.mubr.msk.bf16.mxu0 %vm1428_vm1, %v1358_v24 }
 0x304   : > { %5989 = vrot.lane.b32.xlu1 %v7062_v58, %s6602_s16 }
 0x308   : > { %5999 = vrot.lane.b32.xlu1 %v7040_v35, %s6604_s24  ;;  %v7368_v35 = vpop.permute.xlu1 %5919 }
 0x30a   : > { %5408 = vmatmul.mubr.msk.bf16.gmra.mxu0 %vm1428_vm1, %v1359_v31 }
 0x30c   : > { %1930 = vrot.lane.b32.xlu1 %v7354_v33, %s6603_s20 }
 0x310   : > { %6004 = vrot.lane.b32.xlu1 %v7147_v22, %s6602_s16 }
 0x314   : > { %6014 = vrot.lane.b32.xlu1 %v7140_v41, %s6602_s16  ;;  %s6608_s16 = smov 24  }
 0x326   : > { %v1626_v60 = vpop.permute.xlu0 %1625 }
 0x327   : > { %v1647_v13 = vsel %vm1428_vm1, %v1626_v60, 0 }
 0x32a   : > { %v5905_v37 = vpop.permute.xlu0 %5904 }
 0x32b   : > { %v5907_v28 = vunpack.i.h.bf16 %v5905_v37  ;;  %v5906_v30 = vunpack.i.l.bf16 %v5905_v37 }
 0x32d   : > { %v7370_v49 = vpack.c.bf16 %v5907_v28, %v5906_v30 }
 0x32e   : > { %v1630_v52 = vpop.permute.xlu1 %1629 }
 0x32f   : > { %2027 = vrot.lane.b32.xlu0 %v7370_v49, %s6603_s20  ;;  %5715 = vmatprep.subr.msk.bf16.mxu1 %vm1428_vm1, %v1630_v52  ;;  %v1653_v31 = vsel %vm1428_vm1, %v1630_v52, 0 }
 0x330   : > { %5412 = vmatpush3.bf16.xpose.msra.mxu1 %v1653_v31 }
 0x332   : > { %v1624_v24 = vpop.permute.xlu0 %1623 }
 0x333   : > { %5994 = vrot.lane.b32.xlu0 %v7047_v43, %s6604_s24 }
 0x336   : > { %v5915_v26 = vpop.permute.xlu0 %5914 }
 0x337   : > { %v5917_v9 = vunpack.i.h.bf16 %v5915_v26  ;;  %v5916_v53 = vunpack.i.l.bf16 %v5915_v26 }
 0x339   : > { %v1360_v15 = vpack.c.bf16 %v5917_v9, %v5916_v53  ;;  %v5922_v9 = vunpack.i.h.bf16 %v7368_v35 }
 0x33a   : > { %v1832_v63 = vpop.permute.xlu1 %1831 }
 0x33b   : > { %5419 = vmatprep.mubr.msk.bf16.mxu1 %vm1428_vm1, %v1360_v15 }
 0x33c   : > { %v7379_v56 = vpop.permute.xlu0 %1726 }
 0x33e   : > { %v1628_v62 = vpop.permute.xlu1 %1627 }
 0x33f   : > { %5716 = vmatprep.subr.msk.bf16.mxu1 %vm1428_vm1, %v1628_v62  ;;  %v1650_v18 = vsel %vm1428_vm1, %v1628_v62, 0 }
 0x340   : > { %v5925_v34 = vpop.permute.xlu0 %5924  ;;  %5414 = vmatpush3.bf16.xpose.msra.mxu1 %v1650_v18 }
 0x341   : > { %v5927_v42 = vunpack.i.h.bf16 %v5925_v34  ;;  %v5926_v17 = vunpack.i.l.bf16 %v5925_v34  ;;  %5717 = vmatprep.subr.msk.bf16.mxu1 %vm1428_vm1, %v1626_v60 }
 0x342   : > { %v5930_v43 = vpop.permute.xlu1 %5929 }
 0x343   : > { %v7384_v3 = vpack.c.bf16 %v5927_v42, %v5926_v17  ;;  %v5932_v45 = vunpack.i.h.bf16 %v5930_v43  ;;  %v5931_v4 = vunpack.i.l.bf16 %v5930_v43 }
 0x344   : > { %v7386_v0 = vpop.permute.xlu0 %1829 }
 0x345   : > { %9192 = vst [vmem:[#allocation8_spill] sm:$0xff] %v7384_v3  ;;  %v7388_v46 = vpack.c.bf16 %v5932_v45, %v5931_v4  ;;  %2130 = vrot.lane.b32.xlu0 %v7384_v3, %s6603_s20 }
 0x346   : > { %v7392_v38 = vpop.permute.xlu1 %5939 }
 0x347   : > { %9193 = vst [vmem:[#allocation9_spill] sm:$0xff] %v7388_v46  ;;  %2128 = vrot.lane.b32.xlu1 %v7388_v46, %s6603_s20 }
 0x348   : > { %v5935_v2 = vpop.permute.xlu0 %5934  ;;  %5416 = vmatpush3.bf16.xpose.msra.mxu1 %v1647_v13 }
 0x349   : > { %v5937_v37 = vunpack.i.h.bf16 %v5935_v2  ;;  %v5936_v28 = vunpack.i.l.bf16 %v5935_v2  ;;  %6009 = vrot.lane.b32.xlu0 %v7076_v1, %s6604_s24  ;;  %5718 = vmatprep.subr.msk.bf16.mxu1 %vm1428_vm1, %v1624_v24  ;;  %v1644_v1 = vsel %vm1428_vm1, %v1624_v24, 0 }
 0x34a   : > { %v5950_v30 = vpop.permute.xlu1 %5949 }
 0x34b   : > { %v1364_v52 = vpack.c.bf16 %v5937_v37, %v5936_v28  ;;  %6029 = vrot.lane.b32.xlu1 %v7108_v12, %s6604_s24  ;;  %v5921_v12 = vunpack.i.l.bf16 %v7368_v35  ;;  %v5912_v35 = vunpack.i.h.bf16 %v7366_v8  ;;  %v5952_v42 = vunpack.i.h.bf16 %v5950_v30 }
 0x34c   : > { %v7402_v31 = vpop.permute.xlu0 %1827  ;;  %v5951_v17 = vunpack.i.l.bf16 %v5950_v30  ;;  %v1852_v28 = vsel %vm1428_vm1, %v7386_v0, 0  ;;  %v1748_v30 = vsel %vm1428_vm1, %v7379_v56, 0 }
 0x34d   : > { %5435 = vmatprep.mubr.msk.bf16.mxu0 %vm1428_vm1, %v1364_v52  ;;  %6019 = vrot.lane.b32.xlu0 %v7062_v58, %s6604_s24  ;;  %v1361_v24 = vpack.c.bf16 %v5922_v9, %v5921_v12  ;;  %v1849_v52 = vsel %vm1428_vm1, %v7402_v31, 0 }
 0x34e   : > { %v7407_v60 = vpop.permute.xlu1 %5959  ;;  %v1363_v4 = vpack.c.bf16 %v5952_v42, %v5951_v17 }
 0x34f   : > { %6039 = vrot.lane.b32.xlu1 %v7140_v41, %s6604_s24 }
 0x350   : > { %v5945_v26 = vpop.permute.xlu0 %5944  ;;  %5418 = vmatpush3.bf16.xpose.msra.mxu1 %v1644_v1  ;;  %v5941_v1 = vunpack.i.l.bf16 %v7392_v38 }
 0x351   : > { %6024 = vrot.lane.b32.xlu0 %v7113_v14, %s6604_s24  ;;  %5723 = vmatprep.subr.msk.bf16.mxu1 %vm1428_vm1, %v1832_v63  ;;  %v5947_v53 = vunpack.i.h.bf16 %v5945_v26  ;;  %v5946_v58 = vunpack.i.l.bf16 %v5945_v26  ;;  %v5911_v14 = vunpack.i.l.bf16 %v7366_v8  ;;  %v5961_v26 = vunpack.i.l.bf16 %v7407_v60 }
 0x352   : > { %v7417_v15 = vpop.permute.xlu1 %1724 }
 0x353   : > { %3062 = vrot.lane.b32.xlu1 %v7101_v10, %s6605_s26  ;;  %v1362_v62 = vpack.c.bf16 %v5947_v53, %v5946_v58  ;;  %v7434_v8 = vpack.c.bf16 %v5912_v35, %v5911_v14 }
 0x354   : > { %v7421_v41 = vpop.permute.xlu0 %1825 }
 0x355   : > { %6034 = vrot.lane.b32.xlu0 %v7147_v22, %s6604_s24  ;;  %v1855_v22 = vsel %vm1428_vm1, %v1832_v63, 0 }
 0x356   : > { %v1731_v18 = vpop.permute.xlu1 %1730 }
 0x357   : > { %5420 = vmatmul.mubr.msk.bf16.vlgmr.msra.gmra.mxu1 %vm1428_vm1, %v1361_v24  ;;  %5719 = vmatprep.subr.msk.bf16.mxu0 %vm1428_vm1, %v1731_v18  ;;  %v1754_v34 = vsel %vm1428_vm1, %v1731_v18, 0 }
 0x358   : > { %3060 = vrot.lane.b32.xlu1 %v7126_v21, %s6605_s26  ;;  %v5955_v10 = vpop.permute.xlu0 %5954  ;;  %5423 = vmatprep.mubr.msk.bf16.mxu1 %vm1428_vm1, %v1362_v62 }
 0x359   : > { %5428 = vmatpush3.bf16.xpose.msra.mxu0 %v1754_v34  ;;  %5444 = vmatpush3.bf16.xpose.msra.mxu1 %v1855_v22  ;;  %v5957_v43 = vunpack.i.h.bf16 %v5955_v10  ;;  %v5956_v45 = vunpack.i.l.bf16 %v5955_v10 }
 0x35a   : > { %3064 = vrot.lane.b32.xlu0 %v7088_v44, %s6605_s26  ;;  %5724 = vmatprep.subr.msk.bf16.mxu1 %vm1428_vm1, %v7386_v0  ;;  %v7440_v21 = vpop.permute.xlu1 %1932 }
 0x35b   : > { %v1368_v13 = vpack.c.bf16 %v5957_v43, %v5956_v45 }
 0x35c   : > { %2132 = vrot.lane.b32.xlu1 %v7434_v8, %s6603_s20  ;;  %v7444_v63 = vpop.permute.xlu0 %1928  ;;  %s9287_s20 = sld [smem:[#allocation4_spill]] (%p6732_p6) }
 0x35e   : > { %3058 = vrot.lane.b32.xlu0 %v7159_v32, %s6605_s26  ;;  %v1729_v2 = vpop.permute.xlu1 %1728 }
 0x35f   : > { %5424 = vmatmul.mubr.msk.bf16.gmra.mxu1 %vm1428_vm1, %v1363_v4  ;;  %5720 = vmatprep.subr.msk.bf16.mxu0 %vm1428_vm1, %v1729_v2  ;;  %v1751_v44 = vsel %vm1428_vm1, %v1729_v2, 0 }
 0x360   : > { %3153 = vrot.lane.b32.xlu1 %v7175_v23, %s6605_s26  ;;  %v5965_v37 = vpop.permute.xlu0 %5964  ;;  %5451 = vmatprep.mubr.msk.bf16.mxu1 %vm1428_vm1, %v1368_v13 }
 0x361   : > { %5430 = vmatpush3.bf16.xpose.msra.mxu0 %v1751_v44  ;;  %5446 = vmatpush3.bf16.xpose.msra.mxu1 %v1852_v28  ;;  %v5967_v9 = vunpack.i.h.bf16 %v5965_v37  ;;  %v5966_v12 = vunpack.i.l.bf16 %v5965_v37 }
 0x362   : > { %3151 = vrot.lane.b32.xlu0 %v7187_v47, %s6605_s26  ;;  %5721 = vmatprep.subr.msk.bf16.mxu0 %vm1428_vm1, %v7379_v56  ;;  %v2034_v32 = vpop.permute.xlu1 %2033  ;;  %v1846_v56 = vsel %vm1428_vm1, %v7421_v41, 0 }
 0x363   : > { %5725 = vmatprep.subr.msk.bf16.mxu1 %vm1428_vm1, %v7402_v31  ;;  %v2057_v24 = vsel %vm1428_vm1, %v2034_v32, 0 }
 0x364   : > { %3242 = vrot.lane.b32.xlu1 %v7202_v40, %s6605_s26  ;;  %v7464_v23 = vpop.permute.xlu0 %1926 }
 0x366   : > { %3147 = vrot.lane.b32.xlu0 %v7183_v25, %s6605_s26  ;;  %v5970_v0 = vpop.permute.xlu1 %5969 }
 0x367   : > { %v5972_v35 = vunpack.i.h.bf16 %v5970_v0  ;;  %v5971_v14 = vunpack.i.l.bf16 %v5970_v0 }
 0x368   : > { %3240 = vrot.lane.b32.xlu1 %v7227_v50, %s6605_s26  ;;  %v5975_v47 = vpop.permute.xlu0 %5974 }
 0x369   : > { %5432 = vmatpush3.bf16.xpose.msra.mxu0 %v1748_v30  ;;  %5448 = vmatpush3.bf16.xpose.msra.mxu1 %v1849_v52  ;;  %v5977_v34 = vunpack.i.h.bf16 %v5975_v47  ;;  %v5976_v10 = vunpack.i.l.bf16 %v5975_v47 }
 0x36a   : > { %3325 = vrot.lane.b32.xlu0 %v7260_v57, %s6605_s26  ;;  %5722 = vmatprep.subr.msk.bf16.mxu0 %vm1428_vm1, %v7417_v15  ;;  %v2032_v25 = vpop.permute.xlu1 %2031  ;;  %v1745_v57 = vsel %vm1428_vm1, %v7417_v15, 0 }
 0x36b   : > { %5726 = vmatprep.subr.msk.bf16.mxu1 %vm1428_vm1, %v7421_v41  ;;  %v1372_v17 = vpack.c.bf16 %v5977_v34, %v5976_v10 }
 0x36c   : > { %3149 = vrot.lane.b32.xlu1 %v7171_v7, %s6605_s26  ;;  %v7482_v40 = vpop.permute.xlu0 %2029  ;;  %v5942_v7 = vunpack.i.h.bf16 %v7392_v38 }
 0x36d   : > { %v2051_v45 = vsel %vm1428_vm1, %v7482_v40, 0 }
 0x36e   : > { %3503 = vrot.lane.b32.xlu0 %v7311_v19, %s6605_s26  ;;  %v7486_v50 = vpop.permute.xlu1 %5979  ;;  %v5962_v19 = vunpack.i.h.bf16 %v7407_v60  ;;  %v1365_v38 = vpack.c.bf16 %v5942_v7, %v5941_v1  ;;  %v1366_v60 = vpack.c.bf16 %v5967_v9, %v5966_v12  ;;  %v2231_v12 = vld [vmem:[%s9123_s1 + $0x30] sm:$0xff] }
 0x370   : > { %3238 = vrot.lane.b32.xlu1 %v7196_v36, %s6605_s26  ;;  %v5985_v31 = vpop.permute.xlu0 %5984  ;;  %v1369_v15 = vpack.c.bf16 %v5962_v19, %v5961_v26 }
 0x371   : > { %5434 = vmatpush3.bf16.xpose.msra.mxu0 %v1745_v57  ;;  %5450 = vmatpush3.bf16.xpose.msra.mxu1 %v1846_v56  ;;  %v5987_v53 = vunpack.i.h.bf16 %v5985_v31  ;;  %v5986_v58 = vunpack.i.l.bf16 %v5985_v31 }
 0x372   : > { %3329 = vrot.lane.b32.xlu0 %v7300_v55, %s6605_s26  ;;  %5727 = vmatprep.subr.msk.bf16.mxu0 %vm1428_vm1, %v7440_v21  ;;  %v7502_v36 = vpop.permute.xlu1 %2134 }
 0x373   : > { %5731 = vmatprep.subr.msk.bf16.mxu1 %vm1428_vm1, %v2034_v32  ;;  %v1370_v41 = vpack.c.bf16 %v5987_v53, %v5986_v58 }
 0x374   : > { %3236 = vrot.lane.b32.xlu1 %v7206_v39, %s6605_s26  ;;  %v1956_v39 = vsel %vm1428_vm1, %v7440_v21, 0 }
 0x376   : > { %3507 = vrot.lane.b32.xlu0 %v7354_v33, %s6605_s26  ;;  %v5990_v55 = vpop.permute.xlu1 %5989 }
 0x377   : > { %v5992_v33 = vunpack.i.h.bf16 %v5990_v55  ;;  %v5991_v62 = vunpack.i.l.bf16 %v5990_v55 }
 0x378   : > { %5436 = vmatmul.mubr.msk.bf16.vlgmr.msra.gmra.mxu0 %vm1428_vm1, %v1365_v38  ;;  %5452 = vmatmul.mubr.msk.bf16.vlgmr.msra.gmra.mxu1 %vm1428_vm1, %v1369_v15  ;;  %v2229_v15 = vld [vmem:[%s9123_s1 + $0x20] sm:$0xff] }
 0x379   : > { %3331 = vrot.lane.b32.xlu1 %v7278_v29, %s6605_s26  ;;  %5439 = vmatprep.mubr.msk.bf16.mxu0 %vm1428_vm1, %v1366_v60  ;;  %v1367_v29 = vpack.c.bf16 %v5972_v35, %v5971_v14  ;;  %v1371_v22 = vpack.c.bf16 %v5992_v33, %v5991_v62 }
 0x37a   : > { %5455 = vmatprep.mubr.msk.bf16.mxu1 %vm1428_vm1, %v1370_v41  ;;  %5460 = vmatpush3.bf16.xpose.msra.mxu0 %v1956_v39  ;;  %v7518_v18 = vpop.permute.xlu1 %5999 }
 0x37b   : > { %5476 = vmatpush3.bf16.xpose.msra.mxu1 %v2057_v24  ;;  %v6001_v57 = vunpack.i.l.bf16 %v7518_v18 }
 0x37c   : > { %5732 = vmatprep.subr.msk.bf16.mxu1 %vm1428_vm1, %v2032_v25 }
 0x37d   : > { %3420 = vrot.lane.b32.xlu1 %v7215_v20, %s6605_s26  ;;  %v2054_v20 = vsel %vm1428_vm1, %v2032_v25, 0 }
 0x37e   : > { %v1931_v42 = vpop.permute.xlu1 %1930 }
 0x37f   : > { %5728 = vmatprep.subr.msk.bf16.mxu0 %vm1428_vm1, %v1931_v42  ;;  %v1953_v43 = vsel %vm1428_vm1, %v1931_v42, 0 }
 0x380   : > { %5440 = vmatmul.mubr.msk.bf16.gmra.mxu0 %vm1428_vm1, %v1367_v29  ;;  %5456 = vmatmul.mubr.msk.bf16.gmra.mxu1 %vm1428_vm1, %v1371_v22 }
 0x381   : > { %3418 = vrot.lane.b32.xlu1 %v7238_v27, %s6605_s26  ;;  %5467 = vmatprep.mubr.msk.bf16.mxu0 %vm1428_vm1, %v1372_v17  ;;  %v1950_v27 = vsel %vm1428_vm1, %v7444_v63, 0 }
 0x382   : > { %5462 = vmatpush3.bf16.xpose.msra.mxu0 %v1953_v43  ;;  %v6005_v21 = vpop.permute.xlu1 %6004 }
 0x383   : > { %5478 = vmatpush3.bf16.xpose.msra.mxu1 %v2054_v20  ;;  %5729 = vmatprep.subr.msk.bf16.mxu0 %vm1428_vm1, %v7444_v63  ;;  %v5981_v63 = vunpack.i.l.bf16 %v7486_v50  ;;  %v6007_v4 = vunpack.i.h.bf16 %v6005_v21  ;;  %v6006_v13 = vunpack.i.l.bf16 %v6005_v21  ;;  %v2226_v21 = vld [vmem:[%s9123_s1 + $0x8] sm:$0xff] }
 0x384   : > { %5733 = vmatprep.subr.msk.bf16.mxu1 %vm1428_vm1, %v7482_v40 }
 0x385   : > { %3327 = vrot.lane.b32.xlu1 %v7220_v16, %s6605_s26  ;;  %v1947_v16 = vsel %vm1428_vm1, %v7464_v23, 0  ;;  %v1374_v2 = vpack.c.bf16 %v6007_v4, %v6006_v13 }
 0x386   : > { %v6015_v44 = vpop.permute.xlu1 %6014 }
 0x387   : > { %v6017_v37 = vunpack.i.h.bf16 %v6015_v44  ;;  %v6016_v28 = vunpack.i.l.bf16 %v6015_v44 }
 0x389   : > { %3416 = vrot.lane.b32.xlu1 %v7250_v51, %s6605_s26  ;;  %v5982_v51 = vunpack.i.h.bf16 %v7486_v50  ;;  %v1375_v32 = vpack.c.bf16 %v6017_v37, %v6016_v28  ;;  %v6002_v50 = vunpack.i.h.bf16 %v7518_v18 }
 0x38a   : > { %5464 = vmatpush3.bf16.xpose.msra.mxu0 %v1950_v27 }
 0x38b   : > { %5480 = vmatpush3.bf16.xpose.msra.mxu1 %v2051_v45  ;;  %5730 = vmatprep.subr.msk.bf16.mxu0 %vm1428_vm1, %v7464_v23  ;;  %v1377_v53 = vpack.c.bf16 %v6002_v50, %v6001_v57 }
 0x38d   : > { %3414 = vrot.lane.b32.xlu1 %v7268_v54, %s6605_s26  ;;  %v1373_v54 = vpack.c.bf16 %v5982_v51, %v5981_v63 }
 0x391   : > { %3509 = vrot.lane.b32.xlu1 %v7284_v5, %s6605_s26  ;;  %v2158_v5 = vsel %vm1428_vm1, %v7502_v36, 0 }
 0x392   : > { %5466 = vmatpush3.bf16.xpose.msra.mxu0 %v1947_v16 }
 0x393   : > { %5735 = vmatprep.subr.msk.bf16.mxu0 %vm1428_vm1, %v7502_v36 }
 0x395   : > { %3598 = vrot.lane.b32.xlu1 %v7307_v48, %s6605_s26  ;;  %v2227_v48 = vld [vmem:[%s9123_s1 + $0x10] sm:$0xff] }
 0x399   : > { %5468 = vmatmul.mubr.msk.bf16.vlgmr.msra.gmra.mxu0 %vm1428_vm1, %v1373_v54  ;;  %3596 = vrot.lane.b32.xlu1 %v7323_v6, %s6605_s26  ;;  %v7571_v6 = vld [vmem:[%s9123_s1] sm:$0xff] }
 0x39a   : > { %5471 = vmatprep.mubr.msk.bf16.mxu0 %vm1428_vm1, %v1374_v2  ;;  %5492 = vmatpush3.bf16.xpose.msra.mxu0 %v2158_v5  ;;  %v2232_v5 = vld [vmem:[%s9123_s1 + $0x38] sm:$0xff] }
 0x39d   : > { %3505 = vrot.lane.b32.xlu1 %v7292_v11, %s6605_s26 }
 0x3a0   : > { %v5389_v23 = vpop.f32.mrf.mxu1 }
 0x3a1   : > { %5472 = vmatmul.mubr.msk.bf16.gmra.mxu0 %vm1428_vm1, %v1375_v32  ;;  %3594 = vrot.lane.b32.xlu1 %v7327_v61, %s6605_s26  ;;  %v7576_v0 = vadd.f32 %v5389_v23, %v2227_v48  ;;  %v2028_v11 = vpop.permute.xlu0 %2027  ;;  %v7588_v61 = vld [vmem:[%s9123_s1 + $0x18] sm:$0xff] }
 0x3a2   : > { %v1487_v47 = vpop.f32.mrf.mxu1  ;;  %5734 = vmatprep.subr.msk.bf16.mxu1 %vm1428_vm1, %v2028_v11  ;;  %v2048_v30 = vsel %vm1428_vm1, %v2028_v11, 0 }
 0x3a3   : > { %v7581_v52 = vadd.f32 %v7571_v6, %v1487_v47  ;;  %5482 = vmatpush3.bf16.xpose.msra.mxu1 %v2048_v30  ;;  %v2328_v25 = vsel %vm2321_vm2, %v7576_v0, -inf  ;;  %v2230_v30 = vld [vmem:[%s9123_s1 + $0x28] sm:$0xff] }
 0x3a4   : > { %v5390_v40 = vpop.f32.mrf.mxu1  ;;  %2329 = vmax.xlane.f32.xlu0 %v2328_v25 }
 0x3a5   : > { %3592 = vrot.lane.b32.xlu1 %v7370_v49, %s6605_s26  ;;  %v5995_v56 = vpop.permute.xlu0 %5994  ;;  %v7595_v19 = vadd.f32 %v5390_v40, %v7588_v61  ;;  %v2322_v26 = vsel %vm2321_vm2, %v7581_v52, -inf }
 0x3a6   : > { %v5997_v31 = vunpack.i.h.bf16 %v5995_v56  ;;  %v5996_v7 = vunpack.i.l.bf16 %v5995_v56  ;;  %v1490_v1 = vpop.f32.mrf.mxu1 }
 0x3a7   : > { %v2331_v58 = vsel %vm2321_vm2, %v7595_v19, -inf  ;;  %v7639_v54 = vadd.f32 %v2226_v21, %v1490_v1 }
 0x3a8   : > { %v1376_v36 = vpack.c.bf16 %v5997_v31, %v5996_v7  ;;  %v5393_v9 = vpop.f32.mrf.mxu1  ;;  %2323 = vmax.xlane.f32.xlu0 %v2322_v26 }
 0x3a9   : > { %3687 = vrot.lane.b32.xlu1 %v7338_v59, %s6605_s26  ;;  %v7605_v49 = vadd.f32 %v5393_v9, %v2231_v12 }
 0x3aa   : > { %5483 = vmatprep.mubr.msk.bf16.mxu1 %vm1428_vm1, %v1376_v36  ;;  %v1503_v38 = vpop.f32.mrf.mxu1 }
 0x3ab   : > { %5484 = vmatmul.mubr.msk.bf16.vlgmr.msra.gmra.mxu1 %vm1428_vm1, %v1377_v53  ;;  %v7613_v55 = vadd.f32 %v2229_v15, %v1503_v38  ;;  %v2340_v59 = vsel %vm2321_vm2, %v7605_v49, -inf }
 0x3ac   : > { %2332 = vmax.xlane.f32.xlu0 %v2331_v58  ;;  %v5394_v44 = vpop.f32.mrf.mxu1 }
 0x3ad   : > { %v2334_v60 = vsel %vm2321_vm2, %v7613_v55, -inf  ;;  %v7651_v23 = vadd.f32 %v5394_v44, %v2232_v5 }
 0x3ae   : > { %v1506_v47 = vpop.f32.mrf.mxu1 }
 0x3af   : > { %v7664_v56 = vadd.f32 %v2230_v30, %v1506_v47  ;;  %v2343_v31 = vsel %vm2321_vm2, %v7651_v23, -inf }
 0x3b0   : > { %2341 = vmax.xlane.f32.xlu0 %v2340_v59 }
 0x3b1   : > { %v2337_v36 = vsel %vm2321_vm2, %v7664_v56, -inf }
 0x3b4   : > { %2335 = vmax.xlane.f32.xlu0 %v2334_v60 }
 0x3b7   : > { %v2131_v41 = vpop.permute.xlu0 %2130 }
 0x3b9   : > { %v7619_v39 = vpop.permute.xlu1 %2128 }
 0x3bb   : > { %v6010_v24 = vpop.permute.xlu0 %6009 }
 0x3bc   : > { %v6012_v35 = vunpack.i.h.bf16 %v6010_v24  ;;  %v6011_v14 = vunpack.i.l.bf16 %v6010_v24 }
 0x3bd   : > { %v7621_v33 = vpop.permute.xlu1 %6029 }
 0x3be   : > { %v1378_v62 = vpack.c.bf16 %v6012_v35, %v6011_v14  ;;  %v2149_v35 = vsel %vm1428_vm1, %v7619_v39, 0 }
 0x3bf   : > { %v6020_v18 = vpop.permute.xlu0 %6019 }
 0x3c0   : > { %v6022_v34 = vunpack.i.h.bf16 %v6020_v18  ;;  %v6021_v10 = vunpack.i.l.bf16 %v6020_v18  ;;  %5487 = vmatprep.mubr.msk.bf16.mxu1 %vm1428_vm1, %v1378_v62 }
 0x3c1   : > { %v7624_v29 = vpop.permute.xlu1 %6039 }
 0x3c2   : > { %v1379_v22 = vpack.c.bf16 %v6022_v34, %v6021_v10  ;;  %v5405_v42 = vpop.f32.mrf.mxu0  ;;  %v6032_v34 = vunpack.i.h.bf16 %v7621_v33  ;;  %v6031_v10 = vunpack.i.l.bf16 %v7621_v33  ;;  %v6042_v33 = vunpack.i.h.bf16 %v7624_v29 }
 0x3c3   : > { %v7626_v17 = vadd.f32 %v5405_v42, %v2227_v48  ;;  %v6025_v43 = vpop.permute.xlu0 %6024 }
 0x3c4   : > { %v6027_v20 = vunpack.i.h.bf16 %v6025_v43  ;;  %v6026_v27 = vunpack.i.l.bf16 %v6025_v43  ;;  %v1588_v45 = vpop.f32.mrf.mxu0  ;;  %5488 = vmatmul.mubr.msk.bf16.gmra.mxu1 %vm1428_vm1, %v1379_v22 }
 0x3c5   : > { %v7633_v16 = vadd.f32 %v7571_v6, %v1588_v45  ;;  %v7635_v51 = vpop.permute.xlu1 %3062  ;;  %v2352_v63 = vsel %vm2321_vm2, %v7626_v17, -inf  ;;  %v2325_v6 = vsel %vm2321_vm2, %v7639_v54, -inf }
 0x3c6   : > { %v1380_v4 = vpack.c.bf16 %v6027_v20, %v6026_v27  ;;  %v5406_v13 = vpop.f32.mrf.mxu0  ;;  %2353 = vmax.xlane.f32.xlu0 %v2352_v63  ;;  %v1381_v20 = vpack.c.bf16 %v6032_v34, %v6031_v10 }
 0x3c7   : > { %v2346_v37 = vsel %vm2321_vm2, %v7633_v16, -inf  ;;  %v7674_v26 = vadd.f32 %v5406_v13, %v7588_v61  ;;  %v6035_v61 = vpop.permute.xlu0 %6034 }
 0x3c8   : > { %v1591_v2 = vpop.f32.mrf.mxu0  ;;  %5499 = vmatprep.mubr.msk.bf16.mxu0 %vm1428_vm1, %v1380_v4  ;;  %v6037_v22 = vunpack.i.h.bf16 %v6035_v61  ;;  %v6036_v42 = vunpack.i.l.bf16 %v6035_v61  ;;  %v2237_v61 = vld [vmem:[%s9123_s1 + $0x60] sm:$0xff] }
 0x3c9   : > { %v7679_v53 = vadd.f32 %v2226_v21, %v1591_v2  ;;  %v2355_v58 = vsel %vm2321_vm2, %v7674_v26, -inf  ;;  %v6041_v21 = vunpack.i.l.bf16 %v7624_v29 }
 0x3ca   : > { %v7647_v28 = vpop.permute.xlu1 %3060  ;;  %v5409_v48 = vpop.f32.mrf.mxu0  ;;  %2347 = vmax.xlane.f32.xlu0 %v2346_v37  ;;  %v1382_v27 = vpack.c.bf16 %v6037_v22, %v6036_v42  ;;  %v2233_v37 = vld [vmem:[%s9123_s1 + $0x40] sm:$0xff]  ;;  %v2238_v42 = vld [vmem:[%s9123_s1 + $0x68] sm:$0xff] }
 0x3cb   : > { %v7649_v32 = vadd.f32 %v5409_v48, %v2231_v12  ;;  %v2152_v12 = vsel %vm1428_vm1, %v2131_v41, 0  ;;  %v2349_v60 = vsel %vm2321_vm2, %v7679_v53, -inf  ;;  %v1383_v4 = vpack.c.bf16 %v6042_v33, %v6041_v21 }
 0x3cc   : > { %v1604_v11 = vpop.f32.mrf.mxu0  ;;  %v3065_v14 = vpop.permute.xlu0 %3064 }
 0x3cd   : > { %2326 = vmax.xlane.f32.xlu1 %v2325_v6  ;;  %v7658_v25 = vadd.f32 %v2229_v15, %v1604_v11  ;;  %v2364_v40 = vsel %vm2321_vm2, %v7649_v32, -inf  ;;  %v2236_v6 = vld [vmem:[%s9123_s1 + $0x58] sm:$0xff] }
 0x3ce   : > { %v2133_v50 = vpop.permute.xlu1 %2132  ;;  %2365 = vmax.xlane.f32.xlu0 %v2364_v40  ;;  %v5410_v38 = vpop.f32.mrf.mxu0 }
 0x3cf   : > { %5736 = vmatprep.subr.msk.bf16.mxu0 %vm1428_vm1, %v2133_v50  ;;  %v2155_v57 = vsel %vm1428_vm1, %v2133_v50, 0  ;;  %v2358_v7 = vsel %vm2321_vm2, %v7658_v25, -inf  ;;  %v7685_v59 = vadd.f32 %v5410_v38, %v2232_v5 }
 0x3d0   : > { %5494 = vmatpush3.bf16.xpose.msra.mxu0 %v2155_v57  ;;  %v3059_v2 = vpop.permute.xlu0 %3058  ;;  %v2234_v57 = vld [vmem:[%s9123_s1 + $0x48] sm:$0xff] }
 0x3d1   : > { %2344 = vmax.xlane.f32.xlu1 %v2343_v31  ;;  %5737 = vmatprep.subr.msk.bf16.mxu0 %vm1428_vm1, %v2131_v41  ;;  %v1607_v41 = vpop.f32.mrf.mxu0  ;;  %v2367_v18 = vsel %vm2321_vm2, %v7685_v59, -inf }
 0x3d2   : > { %v7671_v1 = vpop.permute.xlu1 %3153  ;;  %2359 = vmax.xlane.f32.xlu0 %v2358_v7  ;;  %v7693_v62 = vadd.f32 %v2230_v30, %v1607_v41 }
 0x3d4   : > { %v7716_v29 = vpop.permute.xlu0 %3151 }
 0x3d5   : > { %2338 = vmax.xlane.f32.xlu1 %v2337_v36  ;;  %v2239_v36 = vld [vmem:[%s9123_s1 + $0x70] sm:$0xff] }
 0x3d6   : > { %v3243_v9 = vpop.permute.xlu1 %3242 }
 0x3d7   : > { %5539 = vmatprep.subr.bf16.mxu1 %v3243_v9 }
 0x3d8   : > { %5496 = vmatpush3.bf16.xpose.msra.mxu0 %v2152_v12  ;;  %5540 = vmatpush3.bf16.msra.mxu1 %v3243_v9  ;;  %v7731_v11 = vpop.permute.xlu0 %3147 }
 0x3d9   : > { %2356 = vmax.xlane.f32.xlu1 %v2355_v58  ;;  %5738 = vmatprep.subr.msk.bf16.mxu0 %vm1428_vm1, %v7619_v39  ;;  %v2361_v39 = vsel %vm2321_vm2, %v7693_v62, -inf  ;;  %9198 = vst [vmem:[#allocation14_spill] sm:$0xff] %v7731_v11 }
 0x3da   : > { %v3241_v15 = vpop.permute.xlu1 %3240 }
 0x3db   : > { %5541 = vmatprep.subr.bf16.mxu1 %v3241_v15 }
 0x3dc   : > { %5542 = vmatpush3.bf16.msra.mxu1 %v3241_v15  ;;  %v7756_v15 = vpop.permute.xlu0 %3325 }
 0x3dd   : > { %2350 = vmax.xlane.f32.xlu1 %v2349_v60  ;;  %9200 = vst [vmem:[#allocation16_spill] sm:$0xff] %v7756_v15 }
 0x3de   : > { %v7689_v24 = vpop.permute.xlu1 %3149 }
 0x3df   : > { %9194 = vst [vmem:[#allocation10_spill] sm:$0xff] %v7689_v24 }
 0x3e0   : > { %5498 = vmatpush3.bf16.xpose.msra.mxu0 %v2149_v35  ;;  %v7782_v33 = vpop.permute.xlu0 %3503 }
 0x3e1   : > { %2368 = vmax.xlane.f32.xlu1 %v2367_v18  ;;  %5507 = vmatprep.subr.bf16.mxu0 %v3065_v14  ;;  %9202 = vst [vmem:[#allocation18_spill] sm:$0xff] %v7782_v33 }
 0x3e2   : > { %v3239_v43 = vpop.permute.xlu1 %3238 }
 0x3e3   : > { %5543 = vmatprep.subr.bf16.mxu1 %v3239_v43 }
 0x3e4   : > { %5544 = vmatpush3.bf16.msra.mxu1 %v3239_v43 }
 0x3e5   : > { %2362 = vmax.xlane.f32.xlu1 %v2361_v39 }
 0x3e6   : > { %v3237_v45 = vpop.permute.xlu1 %3236 }
 0x3e7   : > { %5500 = vmatmul.mubr.msk.bf16.vlgmr.msra.gmra.mxu0 %vm1428_vm1, %v1381_v20  ;;  %5545 = vmatprep.subr.bf16.mxu1 %v3237_v45 }
 0x3e8   : > { %5503 = vmatprep.mubr.msk.bf16.mxu0 %vm1428_vm1, %v1382_v27  ;;  %5508 = vmatpush3.bf16.msra.mxu0 %v3065_v14  ;;  %v2240_v14 = vld [vmem:[%s9123_s1 + $0x78] sm:$0xff] }
 0x3e9   : > { %5546 = vmatpush3.bf16.msra.mxu1 %v3237_v45  ;;  %5509 = vmatprep.subr.bf16.mxu0 %v7635_v51 }
 0x3eb   : > { %v7706_v63 = vpop.permute.xlu1 %3331 }
 0x3ec   : > { %9195 = vst [vmem:[#allocation11_spill] sm:$0xff] %v7706_v63  ;;  %5510 = vmatpush3.bf16.msra.mxu0 %v7635_v51  ;;  %v2235_v51 = vld [vmem:[%s9123_s1 + $0x50] sm:$0xff] }
 0x3ed   : > { %5511 = vmatprep.subr.bf16.mxu0 %v7647_v28 }
 0x3ef   : > { %v7710_v13 = vpop.permute.xlu1 %3420  ;;  %5504 = vmatmul.mubr.msk.bf16.gmra.mxu0 %vm1428_vm1, %v1383_v4 }
 0x3f0   : > { %9196 = vst [vmem:[#allocation12_spill] sm:$0xff] %v7710_v13  ;;  %5571 = vmatprep.subr.bf16.mxu1 %v7710_v13  ;;  %5512 = vmatpush3.bf16.msra.mxu0 %v7647_v28 }
 0x3f1   : > { %5513 = vmatprep.subr.bf16.mxu0 %v3059_v2 }
 0x3f3   : > { %v7718_v44 = vpop.permute.xlu1 %3418 }
 0x3f4   : > { %5514 = vmatpush3.bf16.msra.mxu0 %v3059_v2  ;;  %9197 = vst [vmem:[#allocation13_spill] sm:$0xff] %v7718_v44  ;;  %v7788_v2 = vpop.permute.xlu0 %3329 }
 0x3f5   : > { %5523 = vmatprep.subr.bf16.mxu0 %v7671_v1  ;;  %9204 = vst [vmem:[#allocation20_spill] sm:$0xff] %v7788_v2 }
 0x3f7   : > { %v7737_v40 = vpop.permute.xlu1 %3327 }
 0x3f8   : > { %9199 = vst [vmem:[#allocation15_spill] sm:$0xff] %v7737_v40 }
 0x3fb   : > { %v7760_v41 = vpop.permute.xlu1 %3416 }
 0x3fc   : > { %9201 = vst [vmem:[#allocation17_spill] sm:$0xff] %v7760_v41 }
 0x3ff   : > { %v7784_v21 = vpop.permute.xlu1 %3414 }
 0x400   : > { %9203 = vst [vmem:[#allocation19_spill] sm:$0xff] %v7784_v21 }
 0x417   : > { %v5421_v5 = vpop.f32.mrf.mxu1 }
 0x418   : > { %v7726_v48 = vadd.f32 %v5421_v5, %v2235_v51  ;;  %v7790_v5 = vpop.permute.xlu1 %3509 }
 0x419   : > { %v1689_v28 = vpop.f32.mrf.mxu1  ;;  %9205 = vst [vmem:[#allocation21_spill] sm:$0xff] %v7790_v5 }
 0x41a   : > { %v7733_v47 = vadd.f32 %v2233_v37, %v1689_v28  ;;  %v2376_v30 = vsel %vm2321_vm2, %v7726_v48, -inf  ;;  %v7792_v28 = vpop.permute.xlu0 %3507 }
 0x41b   : > { %2377 = vmax.xlane.f32.xlu0 %v2376_v30  ;;  %v5422_v50 = vpop.f32.mrf.mxu1  ;;  %9206 = vst [vmem:[#allocation22_spill] sm:$0xff] %v7792_v28 }
 0x41c   : > { %v7742_v31 = vadd.f32 %v5422_v50, %v2236_v6  ;;  %v2370_v12 = vsel %vm2321_vm2, %v7733_v47, -inf  ;;  %v7794_v30 = vpop.permute.xlu1 %3598 }
 0x41d   : > { %v1692_v7 = vpop.f32.mrf.mxu1  ;;  %9207 = vst [vmem:[#allocation23_spill] sm:$0xff] %v7794_v30 }
 0x41e   : > { %v7747_v9 = vadd.f32 %v2234_v57, %v1692_v7  ;;  %v2379_v58 = vsel %vm2321_vm2, %v7742_v31, -inf }
 0x41f   : > { %2371 = vmax.xlane.f32.xlu0 %v2370_v12  ;;  %v5425_v38 = vpop.f32.mrf.mxu1  ;;  %2380 = vmax.xlane.f32.xlu1 %v2379_v58 }
 0x420   : > { %v7758_v60 = vadd.f32 %v5425_v38, %v2239_v36  ;;  %v2373_v10 = vsel %vm2321_vm2, %v7747_v9, -inf  ;;  %v7796_v58 = vpop.permute.xlu1 %3596 }
 0x421   : > { %v1705_v35 = vpop.f32.mrf.mxu1  ;;  %9208 = vst [vmem:[#allocation24_spill] sm:$0xff] %v7796_v58 }
 0x422   : > { %v7765_v18 = vadd.f32 %v2237_v61, %v1705_v35  ;;  %v2388_v34 = vsel %vm2321_vm2, %v7758_v60, -inf }
 0x423   : > { %2389 = vmax.xlane.f32.xlu0 %v2388_v34  ;;  %v5426_v22 = vpop.f32.mrf.mxu1  ;;  %2374 = vmax.xlane.f32.xlu1 %v2373_v10 }
 0x424   : > { %v7774_v43 = vadd.f32 %v5426_v22, %v2240_v14  ;;  %v2382_v27 = vsel %vm2321_vm2, %v7765_v18, -inf  ;;  %v7806_v33 = vpop.permute.xlu1 %3505 }
 0x425   : > { %v1708_v39 = vpop.f32.mrf.mxu1  ;;  %9209 = vst [vmem:[#allocation25_spill] sm:$0xff] %v7806_v33 }
 0x426   : > { %v7776_v20 = vadd.f32 %v2238_v42, %v1708_v39  ;;  %v2391_v45 = vsel %vm2321_vm2, %v7774_v43, -inf }
 0x427   : > { %2383 = vmax.xlane.f32.xlu0 %v2382_v27  ;;  %2392 = vmax.xlane.f32.xlu1 %v2391_v45 }
 0x428   : > { %v2385_v4 = vsel %vm2321_vm2, %v7776_v20, -inf }
 0x42b   : > { %2386 = vmax.xlane.f32.xlu1 %v2385_v4 }
 0x42d   : > { %v2330_v50 = vpop.xlane.xlu0 %2329 }
 0x431   : > { %v2324_v27 = vpop.xlane.xlu0 %2323 }
 0x435   : > { %v2333_v58 = vpop.xlane.xlu0 %2332 }
 0x438   : > { %v5437_v7 = vpop.f32.mrf.mxu0  ;;  %v5453_v12 = vpop.f32.mrf.mxu1 }
 0x439   : > { %v7798_v38 = vadd.f32 %v5437_v7, %v2235_v51 }
 0x43a   : > { %v1790_v35 = vpop.f32.mrf.mxu0  ;;  %v1891_v22 = vpop.f32.mrf.mxu1 }
 0x43b   : > { %v7800_v34 = vadd.f32 %v2233_v37, %v1790_v35  ;;  %v2400_v10 = vsel %vm2321_vm2, %v7798_v38, -inf }
 0x43c   : > { %2401 = vmax.xlane.f32.xlu0 %v2400_v10  ;;  %v5438_v39 = vpop.f32.mrf.mxu0  ;;  %v5454_v7 = vpop.f32.mrf.mxu1 }
 0x43d   : > { %v7804_v45 = vadd.f32 %v5438_v39, %v2236_v6  ;;  %v2394_v51 = vsel %vm2321_vm2, %v7800_v34, -inf  ;;  %v2516_v6 = vsub.f32 %v7576_v0, %v2330_v50  ;;  %v2514_v0 = vsub.f32 %v7581_v52, %v2324_v27  ;;  %v7846_v52 = vld [vmem:[%s9123_s1 + $0x80] sm:$0xff] }
 0x43e   : > { %v1793_v4 = vpop.f32.mrf.mxu0 }
 0x43f   : > { %v7808_v30 = vadd.f32 %v2234_v57, %v1793_v4  ;;  %v2403_v37 = vsel %vm2321_vm2, %v7804_v45, -inf }
 0x440   : > { %2395 = vmax.xlane.f32.xlu0 %v2394_v51  ;;  %v5441_v35 = vpop.f32.mrf.mxu0  ;;  %2404 = vmax.xlane.f32.xlu1 %v2403_v37  ;;  %v7826_v51 = vld [vmem:[%s9123_s1 + $0x90] sm:$0xff]  ;;  %v1894_v37 = vpop.f32.mrf.mxu1 }
 0x441   : > { %v7814_v10 = vadd.f32 %v5441_v35, %v2239_v36  ;;  %v2397_v4 = vsel %vm2321_vm2, %v7808_v30, -inf  ;;  %v2582_v35 = vmul.f32 1.442695, %v2516_v6  ;;  %v7835_v21 = vadd.f32 %v5453_v12, %v7826_v51 }
 0x442   : > { %v1806_v39 = vpop.f32.mrf.mxu0  ;;  %v7854_v12 = vadd.f32 %v7846_v52, %v1891_v22  ;;  %v7873_v22 = vld [vmem:[%s9123_s1 + $0xb0] sm:$0xff] }
 0x443   : > { %v7817_v28 = vadd.f32 %v2237_v61, %v1806_v39  ;;  %v2412_v57 = vsel %vm2321_vm2, %v7814_v10, -inf  ;;  %v7831_v61 = vpop.permute.xlu1 %3594  ;;  %v2517_v39 = vsub.f32 %v7595_v19, %v2333_v58  ;;  %v7851_v19 = vld [vmem:[%s9123_s1 + $0x98] sm:$0xff]  ;;  %6209 = vpow2.f32 %v2582_v35  ;;  %v2342_v35 = vpop.xlane.xlu0 %2341 }
 0x444   : > { %2413 = vmax.xlane.f32.xlu0 %v2412_v57  ;;  %v5442_v36 = vpop.f32.mrf.mxu0  ;;  %2398 = vmax.xlane.f32.xlu1 %v2397_v4  ;;  %9210 = vst [vmem:[#allocation26_spill] sm:$0xff] %v7831_v61  ;;  %v7857_v58 = vadd.f32 %v5454_v7, %v7851_v19  ;;  %v2424_v27 = vsel %vm2321_vm2, %v7835_v21, -inf }
 0x445   : > { %v7829_v50 = vadd.f32 %v5442_v36, %v2240_v14  ;;  %v2406_v57 = vsel %vm2321_vm2, %v7817_v28, -inf  ;;  %v5457_v14 = vpop.f32.mrf.mxu1 }
 0x446   : > { %v1809_v33 = vpop.f32.mrf.mxu0 }
 0x447   : > { %v7837_v41 = vadd.f32 %v2238_v42, %v1809_v33  ;;  %v2415_v4 = vsel %vm2321_vm2, %v7829_v50, -inf  ;;  %v2578_v42 = vmul.f32 1.442695, %v2514_v0  ;;  %v2584_v33 = vmul.f32 1.442695, %v2517_v39  ;;  %v7863_v36 = vpop.permute.xlu1 %3592  ;;  %v7868_v0 = vld [vmem:[%s9123_s1 + $0x88] sm:$0xff]  ;;  %v1907_v7 = vpop.f32.mrf.mxu1 }
 0x448   : > { %2407 = vmax.xlane.f32.xlu0 %v2406_v57  ;;  %2416 = vmax.xlane.f32.xlu1 %v2415_v4  ;;  %9211 = vst [vmem:[#allocation27_spill] sm:$0xff] %v7863_v36  ;;  %v7876_v39 = vadd.f32 %v7868_v0, %v1894_v37  ;;  %v7879_v57 = vadd.f32 %v5457_v14, %v7873_v22  ;;  %v2418_v4 = vsel %vm2321_vm2, %v7854_v12, -inf  ;;  %v2427_v36 = vsel %vm2321_vm2, %v7857_v58, -inf  ;;  %v7893_v37 = vld [vmem:[%s9123_s1 + $0xb8] sm:$0xff] }
 0x449   : > { %v2409_v6 = vsel %vm2321_vm2, %v7837_v41, -inf  ;;  %6211 = vpow2.f32 %v2578_v42  ;;  %v5458_v42 = vpop.f32.mrf.mxu1 }
 0x44a   : > { %6213 = vpow2.f32 %v2584_v33  ;;  %v2520_v33 = vsub.f32 %v7605_v49, %v2342_v35  ;;  %v7902_v44 = vadd.f32 %v5458_v42, %v7893_v37  ;;  %v2436_v13 = vsel %vm2321_vm2, %v7879_v57, -inf }
 0x44b   : > { %v7895_v14 = vpop.permute.xlu1 %3687  ;;  %v2421_v3 = vsel %vm2321_vm2, %v7876_v39, -inf  ;;  %v1910_v46 = vpop.f32.mrf.mxu1 }
 0x44c   : > { %2425 = vmax.xlane.f32.xlu0 %v2424_v27  ;;  %2410 = vmax.xlane.f32.xlu1 %v2409_v6  ;;  %v7888_v27 = vld [vmem:[%s9123_s1 + $0xa0] sm:$0xff]  ;;  %9212 = vst [vmem:[#allocation28_spill] sm:$0xff] %v7895_v14  ;;  %v2336_v6 = vpop.xlane.xlu0 %2335  ;;  %v2590_v49 = vmul.f32 1.442695, %v2520_v33  ;;  %v2439_v15 = vsel %vm2321_vm2, %v7902_v44, -inf }
 0x44d   : > { %v7899_v61 = vadd.f32 %v7888_v27, %v1907_v7  ;;  %v2518_v7 = vsub.f32 %v7613_v55, %v2336_v6 }
 0x44e   : > { %6215 = vpow2.f32 %v2590_v49 }
 0x44f   : > { %v2430_v5 = vsel %vm2321_vm2, %v7899_v61, -inf  ;;  %v2586_v6 = vmul.f32 1.442695, %v2518_v7 }
 0x450   : > { %2419 = vmax.xlane.f32.xlu0 %v2418_v4  ;;  %2428 = vmax.xlane.f32.xlu1 %v2427_v36  ;;  %v7911_v36 = vld [vmem:[%s9123_s1 + $0xa8] sm:$0xff]  ;;  %v7914_v4 = vpop.eup %6209 }
 0x451   : > { %v7917_v42 = vadd.f32 %v7911_v36, %v1910_v46  ;;  %v2712_v46 = vsel %vm2321_vm2, %v7914_v4, 0.0 }
 0x454   : > { %2437 = vmax.xlane.f32.xlu0 %v2436_v13  ;;  %2422 = vmax.xlane.f32.xlu1 %v2421_v3 }
 0x456   : > { %v2327_v35 = vpop.xlane.xlu1 %2326  ;;  %v7924_v13 = vpop.eup %6211 }
 0x457   : > { %v2515_v14 = vsub.f32 %v7639_v54, %v2327_v35  ;;  %v7926_v33 = vpop.eup %6213  ;;  %v2433_v54 = vsel %vm2321_vm2, %v7917_v42, -inf  ;;  %v2354_v35 = vpop.xlane.xlu0 %2353  ;;  %v2706_v49 = vsel %vm2321_vm2, %v7924_v13, 0.0 }
 0x458   : > { %2431 = vmax.xlane.f32.xlu0 %v2430_v5  ;;  %2440 = vmax.xlane.f32.xlu1 %v2439_v15  ;;  %v2715_v7 = vsel %vm2321_vm2, %v7926_v33, 0.0 }
 0x459   : > { %v2580_v3 = vmul.f32 1.442695, %v2515_v14  ;;  %v5469_v40 = vpop.f32.mrf.mxu0 }
 0x45a   : > { %v2345_v55 = vpop.xlane.xlu1 %2344  ;;  %v7934_v14 = vadd.f32 %v5469_v40, %v7826_v51 }
 0x45b   : > { %6217 = vpow2.f32 %v2580_v3  ;;  %v2521_v15 = vsub.f32 %v7651_v23, %v2345_v55  ;;  %v1992_v3 = vpop.f32.mrf.mxu0  ;;  %v2524_v55 = vsub.f32 %v7626_v17, %v2354_v35 }
 0x45c   : > { %2713 = vadd.xlane.f32.xlu0 %v2712_v46  ;;  %2434 = vmax.xlane.f32.xlu1 %v2433_v54  ;;  %6219 = vpow2.f32 %v2586_v6  ;;  %v2348_v54 = vpop.xlane.xlu0 %2347  ;;  %v7942_v23 = vadd.f32 %v7846_v52, %v1992_v3  ;;  %v2448_v40 = vsel %vm2321_vm2, %v7934_v14, -inf }
 0x45d   : > { %v2592_v2 = vmul.f32 1.442695, %v2521_v15  ;;  %v5470_v51 = vpop.f32.mrf.mxu0 }
 0x45e   : > { %v2339_v5 = vpop.xlane.xlu1 %2338  ;;  %v7956_v3 = vadd.f32 %v5470_v51, %v7851_v19 }
 0x45f   : > { %v2519_v46 = vsub.f32 %v7664_v56, %v2339_v5  ;;  %6221 = vpow2.f32 %v2592_v2  ;;  %v2442_v56 = vsel %vm2321_vm2, %v7942_v23, -inf  ;;  %v1995_v5 = vpop.f32.mrf.mxu0 }
 0x460   : > { %2707 = vadd.xlane.f32.xlu0 %v2706_v49  ;;  %2716 = vadd.xlane.f32.xlu1 %v2715_v7  ;;  %v7949_v49 = vpop.eup %6215  ;;  %v2366_v52 = vpop.xlane.xlu0 %2365  ;;  %v2598_v7 = vmul.f32 1.442695, %v2524_v55  ;;  %v2522_v55 = vsub.f32 %v7633_v16, %v2348_v54  ;;  %v7967_v19 = vadd.f32 %v7868_v0, %v1995_v5  ;;  %v2451_v51 = vsel %vm2321_vm2, %v7956_v3, -inf  ;;  %v7989_v5 = vld [vmem:[%s9123_s1 + $0xd0] sm:$0xff] }
 0x461   : > { %v2588_v6 = vmul.f32 1.442695, %v2519_v46  ;;  %v2528_v2 = vsub.f32 %v7649_v32, %v2366_v52  ;;  %v2724_v35 = vsel %vm2321_vm2, %v7949_v49, 0.0 }
 0x462   : > { %v2357_v63 = vpop.xlane.xlu1 %2356  ;;  %v2445_v16 = vsel %vm2321_vm2, %v7967_v19, -inf }
 0x463   : > { %6223 = vpow2.f32 %v2588_v6  ;;  %v2606_v6 = vmul.f32 1.442695, %v2528_v2 }
 0x464   : > { %2449 = vmax.xlane.f32.xlu0 %v2448_v40  ;;  %v5473_v40 = vpop.f32.mrf.mxu0  ;;  %6225 = vpow2.f32 %v2598_v7  ;;  %v2594_v7 = vmul.f32 1.442695, %v2522_v55 }
 0x465   : > { %v7972_v32 = vadd.f32 %v5473_v40, %v7873_v22  ;;  %6227 = vpow2.f32 %v2606_v6 }
 0x466   : > { %v7947_v11 = vpop.xlane.xlu1 %2350  ;;  %6229 = vpow2.f32 %v2594_v7 }
 0x468   : > { %v7953_v15 = vpop.eup %6217  ;;  %2443 = vmax.xlane.f32.xlu0 %v2442_v56 }
 0x469   : > { %v2709_v17 = vsel %vm2321_vm2, %v7953_v15, 0.0  ;;  %v7963_v46 = vpop.eup %6219 }
 0x46a   : > { %2710 = vadd.xlane.f32.xlu1 %v2709_v17  ;;  %v2369_v24 = vpop.xlane.xlu1 %2368  ;;  %v2718_v52 = vsel %vm2321_vm2, %v7963_v46, 0.0  ;;  %v2008_v17 = vpop.f32.mrf.mxu0 }
 0x46b   : > { %v2529_v56 = vsub.f32 %v7685_v59, %v2369_v24  ;;  %v7982_v54 = vadd.f32 %v7888_v27, %v2008_v17  ;;  %v2460_v59 = vsel %vm2321_vm2, %v7972_v32, -inf  ;;  %v5485_v24 = vpop.f32.mrf.mxu1 }
 0x46c   : > { %2725 = vadd.xlane.f32.xlu0 %v2724_v35  ;;  %v7979_v0 = vpop.eup %6221  ;;  %v2525_v35 = vsub.f32 %v7674_v26, %v2357_v63  ;;  %v7997_v55 = vadd.f32 %v5485_v24, %v7989_v5  ;;  %v8005_v26 = vld [vmem:[%s9123_s1 + $0xc0] sm:$0xff] }
 0x46d   : > { %v2608_v22 = vmul.f32 1.442695, %v2529_v56  ;;  %v2727_v40 = vsel %vm2321_vm2, %v7979_v0, 0.0  ;;  %v2454_v6 = vsel %vm2321_vm2, %v7982_v54, -inf  ;;  %v2093_v56 = vpop.f32.mrf.mxu1 }
 0x46e   : > { %2452 = vmax.xlane.f32.xlu1 %v2451_v51  ;;  %v2363_v2 = vpop.xlane.xlu1 %2362  ;;  %v2600_v63 = vmul.f32 1.442695, %v2525_v35 }
 0x46f   : > { %6231 = vpow2.f32 %v2608_v22  ;;  %v2527_v51 = vsub.f32 %v7693_v62, %v2363_v2  ;;  %v5474_v62 = vpop.f32.mrf.mxu0  ;;  %v8014_v22 = vadd.f32 %v8005_v26, %v2093_v56  ;;  %v2360_v2 = vpop.xlane.xlu0 %2359 }
 0x470   : > { %2719 = vadd.xlane.f32.xlu0 %v2718_v52  ;;  %v7994_v27 = vpop.eup %6223  ;;  %v2523_v52 = vsub.f32 %v7679_v53, %v7947_v11  ;;  %6233 = vpow2.f32 %v2600_v63  ;;  %v8019_v24 = vadd.f32 %v5474_v62, %v7893_v37  ;;  %v5486_v35 = vpop.f32.mrf.mxu1 }
 0x471   : > { %v2721_v17 = vsel %vm2321_vm2, %v7994_v27, 0.0  ;;  %v8011_v7 = vpop.eup %6225  ;;  %v2011_v63 = vpop.f32.mrf.mxu0 }
 0x472   : > { %2446 = vmax.xlane.f32.xlu1 %v2445_v16  ;;  %9213 = vst [vmem:[#allocation29_spill] sm:$0xff] %v8011_v7  ;;  %v2604_v16 = vmul.f32 1.442695, %v2527_v51  ;;  %v2596_v53 = vmul.f32 1.442695, %v2523_v52  ;;  %v2736_v11 = vsel %vm2321_vm2, %v8011_v7, 0.0  ;;  %v8025_v51 = vpop.eup %6227  ;;  %v2096_v52 = vpop.f32.mrf.mxu1 }
 0x473   : > { %9214 = vst [vmem:[#allocation30_spill] sm:$0xff] %v8025_v51  ;;  %v2463_v37 = vsel %vm2321_vm2, %v8019_v24, -inf  ;;  %v8030_v56 = vpop.eup %6229 }
 0x474   : > { %2461 = vmax.xlane.f32.xlu0 %v2460_v59  ;;  %v2472_v59 = vsel %vm2321_vm2, %v7997_v55, -inf  ;;  %6235 = vpow2.f32 %v2604_v16  ;;  %9215 = vst [vmem:[#allocation31_spill] sm:$0xff] %v8030_v56 }
 0x475   : > { %6237 = vpow2.f32 %v2596_v53  ;;  %v8042_v53 = vadd.f32 %v7911_v36, %v2011_v63 }
 0x476   : > { %2728 = vadd.xlane.f32.xlu1 %v2727_v40  ;;  %v2466_v40 = vsel %vm2321_vm2, %v8014_v22, -inf }
 0x477   : > { %9217 = vst [vmem:[#allocation33_spill] sm:$0xff] %v8042_v53 }
 0x478   : > { %2455 = vmax.xlane.f32.xlu0 %v2454_v6  ;;  %v2526_v6 = vsub.f32 %v7658_v25, %v2360_v2  ;;  %v8039_v25 = vld [vmem:[%s9123_s1 + $0xf0] sm:$0xff] }
 0x47a   : > { %2722 = vadd.xlane.f32.xlu1 %v2721_v17  ;;  %v2748_v17 = vsel %vm2321_vm2, %v8025_v51, 0.0 }
 0x47c   : > { %2473 = vmax.xlane.f32.xlu0 %v2472_v59  ;;  %v8034_v62 = vpop.eup %6231  ;;  %v2602_v59 = vmul.f32 1.442695, %v2526_v6 }
 0x47d   : > { %9216 = vst [vmem:[#allocation32_spill] sm:$0xff] %v8034_v62 }
 0x47e   : > { %2737 = vadd.xlane.f32.xlu1 %v2736_v11  ;;  %v2730_v11 = vsel %vm2321_vm2, %v8030_v56, 0.0  ;;  %6239 = vpow2.f32 %v2602_v59 }
 0x480   : > { %2467 = vmax.xlane.f32.xlu0 %v2466_v40  ;;  %v2751_v40 = vsel %vm2321_vm2, %v8034_v62, 0.0 }
 0x482   : > { %2464 = vmax.xlane.f32.xlu1 %v2463_v37  ;;  %v2457_v37 = vsel %vm2321_vm2, %v8042_v53, -inf }
 0x484   : > { %2749 = vadd.xlane.f32.xlu0 %v2748_v17  ;;  %v5489_v16 = vpop.f32.mrf.mxu1  ;;  %v8053_v17 = vpop.eup %6233 }
 0x485   : > { %v8047_v2 = vadd.f32 %v5489_v16, %v8039_v25  ;;  %9219 = vst [vmem:[#allocation35_spill] sm:$0xff] %v8053_v17  ;;  %v8057_v6 = vpop.eup %6235  ;;  %v8062_v16 = vld [vmem:[%s9123_s1 + $0xe0] sm:$0xff]  ;;  %v2739_v59 = vsel %vm2321_vm2, %v8053_v17, 0.0 }
 0x486   : > { %2731 = vadd.xlane.f32.xlu1 %v2730_v11  ;;  %9220 = vst [vmem:[#allocation36_spill] sm:$0xff] %v8057_v6  ;;  %v2109_v63 = vpop.f32.mrf.mxu1  ;;  %v8066_v11 = vpop.eup %6237  ;;  %v2745_v51 = vsel %vm2321_vm2, %v8057_v6, 0.0 }
 0x487   : > { %9218 = vst [vmem:[#allocation34_spill] sm:$0xff] %v8047_v2  ;;  %v2484_v36 = vsel %vm2321_vm2, %v8047_v2, -inf  ;;  %9221 = vst [vmem:[#allocation37_spill] sm:$0xff] %v8066_v11 }
 0x488   : > { %2752 = vadd.xlane.f32.xlu0 %v2751_v40  ;;  %v2252_v40 = vld [vmem:[%s9123_s1 + $0xd8] sm:$0xff] }
 0x489   : > { %v8076_v62 = vadd.f32 %v5486_v35, %v2252_v40 }
 0x48a   : > { %2458 = vmax.xlane.f32.xlu1 %v2457_v37  ;;  %v8072_v37 = vadd.f32 %v8062_v16, %v2109_v63  ;;  %v2250_v63 = vld [vmem:[%s9123_s1 + $0xc8] sm:$0xff] }
 0x48b   : > { %9223 = vst [vmem:[#allocation39_spill] sm:$0xff] %v8076_v62  ;;  %v8084_v56 = vpop.eup %6239  ;;  %v8089_v35 = vadd.f32 %v2250_v63, %v2096_v52  ;;  %v2254_v52 = vld [vmem:[%s9123_s1 + $0xe8] sm:$0xff] }
 0x48c   : > { %2485 = vmax.xlane.f32.xlu0 %v2484_v36  ;;  %9222 = vst [vmem:[#allocation38_spill] sm:$0xff] %v8072_v37  ;;  %v2733_v36 = vsel %vm2321_vm2, %v8066_v11, 0.0  ;;  %v2478_v7 = vsel %vm2321_vm2, %v8072_v37, -inf  ;;  %9224 = vst [vmem:[#allocation40_spill] sm:$0xff] %v8084_v56 }
 0x48d   : > { %9225 = vst [vmem:[#allocation41_spill] sm:$0xff] %v8089_v35  ;;  %v2469_v11 = vsel %vm2321_vm2, %v8089_v35, -inf }
 0x48e   : > { %2740 = vadd.xlane.f32.xlu1 %v2739_v59  ;;  %v2475_v59 = vsel %vm2321_vm2, %v8076_v62, -inf }
 0x490   : > { %2746 = vadd.xlane.f32.xlu0 %v2745_v51  ;;  %v2742_v51 = vsel %vm2321_vm2, %v8084_v56, 0.0 }
 0x492   : > { %2734 = vadd.xlane.f32.xlu1 %v2733_v36  ;;  %v5490_v36 = vpop.f32.mrf.mxu1 }
 0x494   : > { %2479 = vmax.xlane.f32.xlu0 %v2478_v7  ;;  %v2256_v7 = vld [vmem:[%s9123_s1 + $0xf8] sm:$0xff]  ;;  %v2112_v37 = vpop.f32.mrf.mxu1 }
 0x495   : > { %v8096_v6 = vadd.f32 %v5490_v36, %v2256_v7 }
 0x496   : > { %2476 = vmax.xlane.f32.xlu1 %v2475_v59  ;;  %v8103_v59 = vadd.f32 %v2254_v52, %v2112_v37 }
 0x497   : > { %9226 = vst [vmem:[#allocation42_spill] sm:$0xff] %v8096_v6  ;;  %v2487_v56 = vsel %vm2321_vm2, %v8096_v6, -inf }
 0x498   : > { %9227 = vst [vmem:[#allocation43_spill] sm:$0xff] %v8103_v59  ;;  %v2481_v36 = vsel %vm2321_vm2, %v8103_v59, -inf }
 0x49a   : > { %2743 = vadd.xlane.f32.xlu1 %v2742_v51 }
 0x49e   : > { %2470 = vmax.xlane.f32.xlu1 %v2469_v11 }
 0x4a2   : > { %2488 = vmax.xlane.f32.xlu1 %v2487_v56 }
 0x4a4   : > { %v2378_v17 = vpop.xlane.xlu0 %2377 }
 0x4a5   : > { %v2532_v51 = vsub.f32 %v7726_v48, %v2378_v17 }
 0x4a6   : > { %2482 = vmax.xlane.f32.xlu1 %v2481_v36 }
 0x4a7   : > { %v2614_v35 = vmul.f32 1.442695, %v2532_v51  ;;  %v5501_v2 = vpop.f32.mrf.mxu0 }
 0x4a8   : > { %v8111_v62 = vadd.f32 %v5501_v2, %v7989_v5  ;;  %v8113_v53 = vpop.xlane.xlu0 %2371  ;;  %v8115_v11 = vpop.xlane.xlu1 %2380 }
 0x4a9   : > { %v2194_v37 = vpop.f32.mrf.mxu0  ;;  %6241 = vpow2.f32 %v2614_v35 }
 0x4aa   : > { %9228 = vst [vmem:[#allocation44_spill] sm:$0xff] %v8111_v62  ;;  %v8118_v56 = vadd.f32 %v8005_v26, %v2194_v37  ;;  %v2496_v48 = vsel %vm2321_vm2, %v8111_v62, -inf }
 0x4ab   : > { %2497 = vmax.xlane.f32.xlu0 %v2496_v48  ;;  %v5502_v17 = vpop.f32.mrf.mxu0 }
 0x4ac   : > { %v8122_v36 = vadd.f32 %v5502_v17, %v2252_v40  ;;  %v2390_v51 = vpop.xlane.xlu0 %2389  ;;  %v8124_v59 = vpop.xlane.xlu1 %2374  ;;  %v2490_v35 = vsel %vm2321_vm2, %v8118_v56, -inf }
 0x4ad   : > { %v2536_v5 = vsub.f32 %v7758_v60, %v2390_v51  ;;  %v2197_v2 = vpop.f32.mrf.mxu0 }
 0x4ae   : > { %v8127_v6 = vadd.f32 %v2250_v63, %v2197_v2  ;;  %v2499_v26 = vsel %vm2321_vm2, %v8122_v36, -inf }
 0x4af   : > { %v2622_v37 = vmul.f32 1.442695, %v2536_v5  ;;  %2491 = vmax.xlane.f32.xlu0 %v2490_v35  ;;  %2500 = vmax.xlane.f32.xlu1 %v2499_v26  ;;  %v5505_v48 = vpop.f32.mrf.mxu0 }
 0x4b0   : > { %v8134_v40 = vadd.f32 %v5505_v48, %v8039_v25  ;;  %v2384_v17 = vpop.xlane.xlu0 %2383  ;;  %v2393_v62 = vpop.xlane.xlu1 %2392  ;;  %v2493_v5 = vsel %vm2321_vm2, %v8127_v6, -inf }
 0x4b1   : > { %6243 = vpow2.f32 %v2622_v37  ;;  %v2534_v60 = vsub.f32 %v7765_v18, %v2384_v17  ;;  %v2537_v63 = vsub.f32 %v7774_v43, %v2393_v62  ;;  %v2210_v51 = vpop.f32.mrf.mxu0 }
 0x4b2   : > { %v8139_v2 = vadd.f32 %v8062_v16, %v2210_v51  ;;  %v2508_v35 = vsel %vm2321_vm2, %v8134_v40, -inf }
 0x4b3   : > { %v2618_v26 = vmul.f32 1.442695, %v2534_v60  ;;  %v2624_v25 = vmul.f32 1.442695, %v2537_v63  ;;  %2494 = vmax.xlane.f32.xlu1 %v2493_v5  ;;  %2509 = vmax.xlane.f32.xlu0 %v2508_v35  ;;  %v5506_v48 = vpop.f32.mrf.mxu0 }
 0x4b4   : > { %v8145_v37 = vadd.f32 %v5506_v48, %v2256_v7  ;;  %v2387_v18 = vpop.xlane.xlu1 %2386  ;;  %v2502_v17 = vsel %vm2321_vm2, %v8139_v2, -inf }
 0x4b5   : > { %6245 = vpow2.f32 %v2618_v26  ;;  %v2535_v43 = vsub.f32 %v7776_v20, %v2387_v18  ;;  %v2213_v62 = vpop.f32.mrf.mxu0 }
 0x4b6   : > { %v8148_v16 = vadd.f32 %v2254_v52, %v2213_v62  ;;  %v2511_v51 = vsel %vm2321_vm2, %v8145_v37, -inf  ;;  %v8154_v60 = vpop.eup %6241  ;;  %6247 = vpow2.f32 %v2624_v25 }
 0x4b7   : > { %v2620_v63 = vmul.f32 1.442695, %v2535_v43  ;;  %2503 = vmax.xlane.f32.xlu0 %v2502_v17  ;;  %2512 = vmax.xlane.f32.xlu1 %v2511_v51  ;;  %v2760_v7 = vsel %vm2321_vm2, %v8154_v60, 0.0 }
 0x4b8   : > { %v2505_v20 = vsel %vm2321_vm2, %v8148_v16, -inf }
 0x4b9   : > { %6249 = vpow2.f32 %v2620_v63 }
 0x4bb   : > { %2761 = vadd.xlane.f32.xlu0 %v2760_v7  ;;  %2506 = vmax.xlane.f32.xlu1 %v2505_v20 }
 0x4be   : > { %v8160_v52 = vpop.eup %6243 }
 0x4bf   : > { %9229 = vst [vmem:[#allocation45_spill] sm:$0xff] %v8160_v52  ;;  %v2772_v5 = vsel %vm2321_vm2, %v8160_v52, 0.0 }
 0x4c0   : > { %2773 = vadd.xlane.f32.xlu0 %v2772_v5 }
 0x4c2   : > { %v8164_v35 = vpop.eup %6245 }
 0x4c3   : > { %v2766_v26 = vsel %vm2321_vm2, %v8164_v35, 0.0  ;;  %v8168_v25 = vpop.eup %6247 }
 0x4c4   : > { %2767 = vadd.xlane.f32.xlu0 %v2766_v26  ;;  %v2775_v43 = vsel %vm2321_vm2, %v8168_v25, 0.0 }
 0x4c5   : > { %v2402_v48 = vpop.xlane.xlu0 %2401 }
 0x4c6   : > { %v2540_v18 = vsub.f32 %v7798_v38, %v2402_v48  ;;  %v8173_v62 = vpop.eup %6249 }
 0x4c7   : > { %v2769_v20 = vsel %vm2321_vm2, %v8173_v62, 0.0 }
 0x4c8   : > { %v2630_v17 = vmul.f32 1.442695, %v2540_v18  ;;  %2776 = vadd.xlane.f32.xlu0 %v2775_v43 }
 0x4c9   : > { %v2396_v51 = vpop.xlane.xlu0 %2395  ;;  %v8175_v63 = vpop.xlane.xlu1 %2404 }
 0x4ca   : > { %6251 = vpow2.f32 %v2630_v17  ;;  %v2538_v7 = vsub.f32 %v7800_v34, %v2396_v51 }
 0x4cc   : > { %v2626_v5 = vmul.f32 1.442695, %v2538_v7  ;;  %3685 = vrot.lane.b32.xlu1 %v7434_v8, %s6605_s26  ;;  %2770 = vadd.xlane.f32.xlu0 %v2769_v20 }
 0x4cd   : > { %v2414_v38 = vpop.xlane.xlu0 %2413  ;;  %v8182_v26 = vpop.xlane.xlu1 %2398 }
 0x4ce   : > { %6253 = vpow2.f32 %v2626_v5  ;;  %v2544_v48 = vsub.f32 %v7814_v10, %v2414_v38  ;;  %v2530_v5 = vsub.f32 %v7733_v47, %v8113_v53 }
 0x4d0   : > { %v2638_v18 = vmul.f32 1.442695, %v2544_v48 }
 0x4d1   : > { %v2408_v43 = vpop.xlane.xlu0 %2407  ;;  %v8185_v52 = vpop.xlane.xlu1 %2416 }
 0x4d2   : > { %6255 = vpow2.f32 %v2638_v18  ;;  %v2542_v34 = vsub.f32 %v7817_v28, %v2408_v43  ;;  %v2533_v28 = vsub.f32 %v7742_v31, %v8115_v11 }
 0x4d4   : > { %v2634_v17 = vmul.f32 1.442695, %v2542_v34  ;;  %v2610_v34 = vmul.f32 1.442695, %v2530_v5 }
 0x4d5   : > { %v2426_v51 = vpop.xlane.xlu0 %2425  ;;  %v8188_v7 = vpop.xlane.xlu1 %2410 }
 0x4d6   : > { %6257 = vpow2.f32 %v2634_v17  ;;  %v2548_v8 = vsub.f32 %v7835_v21, %v2426_v51 }
 0x4d7   : > { %v8191_v20 = vpop.eup %6251 }
 0x4d8   : > { %9230 = vst [vmem:[#allocation46_spill] sm:$0xff] %v8191_v20  ;;  %v2646_v10 = vmul.f32 1.442695, %v2548_v8  ;;  %v2784_v38 = vsel %vm2321_vm2, %v8191_v20, 0.0  ;;  %v2616_v8 = vmul.f32 1.442695, %v2533_v28 }
 0x4d9   : > { %v2420_v48 = vpop.xlane.xlu0 %2419  ;;  %v8197_v18 = vpop.xlane.xlu1 %2428  ;;  %2785 = vadd.xlane.f32.xlu0 %v2784_v38 }
 0x4da   : > { %6259 = vpow2.f32 %v2646_v10  ;;  %v2546_v43 = vsub.f32 %v7854_v12, %v2420_v48  ;;  %v2531_v12 = vsub.f32 %v7747_v9, %v8124_v59 }
 0x4db   : > { %v8202_v21 = vpop.eup %6253 }
 0x4dc   : > { %v2642_v17 = vmul.f32 1.442695, %v2546_v43  ;;  %v2778_v47 = vsel %vm2321_vm2, %v8202_v21, 0.0 }
 0x4dd   : > { %v2438_v53 = vpop.xlane.xlu0 %2437  ;;  %v2423_v51 = vpop.xlane.xlu1 %2422  ;;  %2779 = vadd.xlane.f32.xlu0 %v2778_v47  ;;  %v2539_v47 = vsub.f32 %v7808_v30, %v8182_v26 }
 0x4de   : > { %6261 = vpow2.f32 %v2642_v17  ;;  %v2552_v38 = vsub.f32 %v7879_v57, %v2438_v53  ;;  %v2547_v20 = vsub.f32 %v7876_v39, %v2423_v51  ;;  %v2612_v39 = vmul.f32 1.442695, %v2531_v12 }
 0x4df   : > { %v8208_v31 = vpop.eup %6255  ;;  %6263 = vpow2.f32 %v2610_v34  ;;  %v2541_v34 = vsub.f32 %v7804_v45, %v8175_v63  ;;  %v2545_v45 = vsub.f32 %v7829_v50, %v8185_v52  ;;  %v2628_v12 = vmul.f32 1.442695, %v2539_v47 }
 0x4e0   : > { %v2644_v11 = vmul.f32 1.442695, %v2547_v20  ;;  %v2796_v5 = vsel %vm2321_vm2, %v8208_v31, 0.0  ;;  %v2654_v10 = vmul.f32 1.442695, %v2552_v38  ;;  %6265 = vpow2.f32 %v2616_v8 }
 0x4e1   : > { %v2432_v48 = vpop.xlane.xlu0 %2431  ;;  %v8214_v43 = vpop.xlane.xlu1 %2440  ;;  %2797 = vadd.xlane.f32.xlu0 %v2796_v5  ;;  %v2632_v51 = vmul.f32 1.442695, %v2541_v34  ;;  %v2640_v30 = vmul.f32 1.442695, %v2545_v45 }
 0x4e2   : > { %v2550_v57 = vsub.f32 %v7899_v61, %v2432_v48  ;;  %6267 = vpow2.f32 %v2644_v11  ;;  %v2543_v48 = vsub.f32 %v7837_v41, %v8188_v7  ;;  %v2549_v7 = vsub.f32 %v7857_v58, %v8197_v18 }
 0x4e3   : > { %v8217_v28 = vpop.eup %6257  ;;  %6269 = vpow2.f32 %v2654_v10 }
 0x4e4   : > { %v2790_v9 = vsel %vm2321_vm2, %v8217_v28, 0.0  ;;  %v2650_v59 = vmul.f32 1.442695, %v2550_v57  ;;  %6271 = vpow2.f32 %v2612_v39  ;;  %v2636_v41 = vmul.f32 1.442695, %v2543_v48 }
 0x4e5   : > { %v2714_v20 = vpop.xlane.xlu0 %2713  ;;  %v2435_v17 = vpop.xlane.xlu1 %2434  ;;  %2791 = vadd.xlane.f32.xlu0 %v2790_v9  ;;  %v2648_v58 = vmul.f32 1.442695, %v2549_v7 }
 0x4e6   : > { %v2551_v61 = vsub.f32 %v7917_v42, %v2435_v17  ;;  %6273 = vpow2.f32 %v2650_v59 }
 0x4e7   : > { %v8226_v53 = vpop.eup %6259  ;;  %6275 = vpow2.f32 %v2632_v51 }
 0x4e8   : > { %v2808_v63 = vsel %vm2321_vm2, %v8226_v53, 0.0  ;;  %v2652_v8 = vmul.f32 1.442695, %v2551_v61 }
 0x4e9   : > { %v2708_v38 = vpop.xlane.xlu0 %2707  ;;  %2809 = vadd.xlane.f32.xlu0 %v2808_v63  ;;  %v2717_v50 = vpop.xlane.xlu1 %2716 }
 0x4ea   : > { %6277 = vpow2.f32 %v2652_v8 }
 0x4eb   : > { %v8232_v11 = vpop.eup %6261  ;;  %6279 = vpow2.f32 %v2628_v12 }
 0x4ec   : > { %v8234_v42 = vpop.eup %6263  ;;  %v2802_v26 = vsel %vm2321_vm2, %v8232_v11, 0.0  ;;  %6281 = vpow2.f32 %v2640_v30 }
 0x4ed   : > { %v2450_v5 = vpop.xlane.xlu0 %2449  ;;  %2803 = vadd.xlane.f32.xlu0 %v2802_v26  ;;  %v8239_v10 = vpop.eup %6265  ;;  %v2754_v57 = vsel %vm2321_vm2, %v8234_v42, 0.0  ;;  %6283 = vrcp.f32 %v2708_v38  ;;  %v2553_v38 = vsub.f32 %v7902_v44, %v8214_v43 }
 0x4ee   : > { %v2556_v52 = vsub.f32 %v7934_v14, %v2450_v5  ;;  %6285 = vrcp.f32 %v2717_v50  ;;  %v2763_v61 = vsel %vm2321_vm2, %v8239_v10, 0.0 }
 0x4ef   : > { %v8245_v39 = vpop.eup %6267  ;;  %v2656_v50 = vmul.f32 1.442695, %v2553_v38 }
 0x4f0   : > { %v2662_v34 = vmul.f32 1.442695, %v2556_v52  ;;  %2755 = vadd.xlane.f32.xlu1 %v2754_v57  ;;  %v2805_v59 = vsel %vm2321_vm2, %v8245_v39, 0.0  ;;  %v8249_v14 = vpop.eup %6269 }
 0x4f1   : > { %v2444_v9 = vpop.xlane.xlu0 %2443  ;;  %2806 = vadd.xlane.f32.xlu0 %v2805_v59  ;;  %v8256_v51 = vpop.eup %6271  ;;  %v2820_v8 = vsel %vm2321_vm2, %v8249_v14, 0.0 }
 0x4f2   : > { %6287 = vpow2.f32 %v2662_v34  ;;  %v2554_v17 = vsub.f32 %v7942_v23, %v2444_v9 }
 0x4f3   : > { %6289 = vrcp.f32 %v2714_v20  ;;  %v2711_v47 = vpop.xlane.xlu1 %2710  ;;  %v8260_v23 = vpop.eup %6273  ;;  %v2757_v20 = vsel %vm2321_vm2, %v8256_v51, 0.0 }
 0x4f4   : > { %v2658_v45 = vmul.f32 1.442695, %v2554_v17  ;;  %6291 = vrcp.f32 %v2711_v47  ;;  %2764 = vadd.xlane.f32.xlu1 %v2763_v61  ;;  %v8266_v12 = vpop.eup %6275  ;;  %v2814_v26 = vsel %vm2321_vm2, %v8260_v23, 0.0 }
 0x4f5   : > { %v2726_v63 = vpop.xlane.xlu0 %2725  ;;  %2821 = vadd.xlane.f32.xlu0 %v2820_v8  ;;  %v2787_v48 = vsel %vm2321_vm2, %v8266_v12, 0.0 }
 0x4f6   : > { %6293 = vpow2.f32 %v2658_v45 }
 0x4f7   : > { %6295 = vpow2.f32 %v2636_v41  ;;  %v2453_v18 = vpop.xlane.xlu1 %2452  ;;  %v8270_v5 = vpop.eup %6277 }
 0x4f8   : > { %2758 = vadd.xlane.f32.xlu1 %v2757_v20  ;;  %v8272_v44 = vpop.eup %6279  ;;  %6297 = vpow2.f32 %v2648_v58  ;;  %v2557_v43 = vsub.f32 %v7956_v3, %v2453_v18  ;;  %v2817_v59 = vsel %vm2321_vm2, %v8270_v5, 0.0 }
 0x4f9   : > { %v2720_v30 = vpop.xlane.xlu0 %2719  ;;  %2815 = vadd.xlane.f32.xlu0 %v2814_v26  ;;  %v8277_v57 = vpop.eup %6281  ;;  %6299 = vpow2.f32 %v2656_v50  ;;  %v2781_v45 = vsel %vm2321_vm2, %v8272_v44, 0.0 }
 0x4fa   : > { %v6284_v34 = vpop.eup %6283  ;;  %6301 = vrcp.f32 %v2726_v63  ;;  %v2664_v3 = vmul.f32 1.442695, %v2557_v43 }
 0x4fb   : > { %v2447_v52 = vpop.xlane.xlu1 %2446  ;;  %v6286_v17 = vpop.eup %6285  ;;  %6303 = vrcp.f32 %v2720_v30 }
 0x4fc   : > { %2788 = vadd.xlane.f32.xlu1 %v2787_v48  ;;  %v2555_v47 = vsub.f32 %v7967_v19, %v2447_v52  ;;  %v2962_v19 = vmul.f32 %v6284_v34, %v7924_v13 }
 0x4fd   : > { %v2462_v9 = vpop.xlane.xlu0 %2461  ;;  %2818 = vadd.xlane.f32.xlu0 %v2817_v59 }
 0x4fe   : > { %v2560_v41 = vsub.f32 %v7972_v32, %v2462_v9  ;;  %v2965_v32 = vmul.f32 %v6286_v17, %v7926_v33  ;;  %v2660_v43 = vmul.f32 1.442695, %v2555_v47  ;;  %v2799_v33 = vsel %vm2321_vm2, %v8277_v57, 0.0 }
 0x4ff   : > { %v8282_v7 = vpop.eup %6287  ;;  %v2729_v61 = vpop.xlane.xlu1 %2728 }
 0x500   : > { %v6290_v8 = vpop.eup %6289  ;;  %v2670_v38 = vmul.f32 1.442695, %v2560_v41  ;;  %2782 = vadd.xlane.f32.xlu1 %v2781_v45  ;;  %v2832_v58 = vsel %vm2321_vm2, %v8282_v7, 0.0  ;;  %6305 = vrcp.f32 %v2729_v61 }
 0x501   : > { %v6292_v18 = vpop.eup %6291  ;;  %v2456_v20 = vpop.xlane.xlu0 %2455  ;;  %2833 = vadd.xlane.f32.xlu0 %v2832_v58  ;;  %v2964_v30 = vmul.f32 %v6290_v8, %v7914_v4 }
 0x502   : > { %6307 = vpow2.f32 %v2670_v38  ;;  %v2558_v63 = vsub.f32 %v7982_v54, %v2456_v20  ;;  %v2963_v26 = vmul.f32 %v6292_v18, %v7953_v15 }
 0x503   : > { %v8293_v50 = vpop.eup %6293  ;;  %6309 = vpow2.f32 %v2664_v3  ;;  %v2723_v52 = vpop.xlane.xlu1 %2722  ;;  %v3027_v34 = vpack.c.bf16 %v2965_v32, %v2964_v30  ;;  %v9231_v32 = vld [vmem:[#allocation10_spill] sm:$0xff] }
 0x504   : > { %v8298_v48 = vpop.eup %6295  ;;  %v2666_v9 = vmul.f32 1.442695, %v2558_v63  ;;  %6311 = vrcp.f32 %v2723_v52  ;;  %2800 = vadd.xlane.f32.xlu1 %v2799_v33  ;;  %v3026_v54 = vpack.c.bf16 %v2963_v26, %v2962_v19  ;;  %v2826_v13 = vsel %vm2321_vm2, %v8293_v50, 0.0  ;;  %v9232_v52 = vld [vmem:[#allocation14_spill] sm:$0xff] }
 0x505   : > { %v2474_v15 = vpop.xlane.xlu0 %2473  ;;  %2827 = vadd.xlane.f32.xlu0 %v2826_v13  ;;  %v2793_v17 = vsel %vm2321_vm2, %v8298_v48, 0.0  ;;  %v8309_v41 = vpop.eup %6297 }
 0x506   : > { %6313 = vpow2.f32 %v2666_v9  ;;  %v2564_v4 = vsub.f32 %v7997_v55, %v2474_v15  ;;  %5515 = vmatprep.mubr.msk.bf16.mxu0 %vm2321_vm2, %v3026_v54  ;;  %v8314_v61 = vpop.eup %6299  ;;  %v2811_v8 = vsel %vm2321_vm2, %v8309_v41, 0.0 }
 0x507   : > { %6315 = vpow2.f32 %v2660_v43  ;;  %v8304_v59 = vpop.xlane.xlu1 %2737  ;;  %5516 = vmatmul.mubr.msk.bf16.vlgmr.msra.gmra.mxu0 %vm2321_vm2, %v3027_v34  ;;  %v6302_v38 = vpop.eup %6301  ;;  %v2823_v30 = vsel %vm2321_vm2, %v8314_v61, 0.0 }
 0x508   : > { %v2678_v3 = vmul.f32 1.442695, %v2564_v4  ;;  %5524 = vmatpush3.bf16.msra.mxu0 %v7671_v1  ;;  %2794 = vadd.xlane.f32.xlu1 %v2793_v17  ;;  %v6304_v1 = vpop.eup %6303  ;;  %v2968_v4 = vmul.f32 %v6302_v38, %v7949_v49 }
 0x509   : > { %5525 = vmatprep.subr.bf16.mxu0 %v7716_v29  ;;  %v2468_v55 = vpop.xlane.xlu0 %2467  ;;  %v2966_v9 = vmul.f32 %v6304_v1, %v7963_v46 }
 0x50a   : > { %6317 = vpow2.f32 %v2678_v3  ;;  %v2562_v47 = vsub.f32 %v8014_v22, %v2468_v55  ;;  %v9233_v55 = vld [vmem:[#allocation33_spill] sm:$0xff] }
 0x50b   : > { %v2465_v45 = vpop.xlane.xlu1 %2464 }
 0x50c   : > { %v2674_v58 = vmul.f32 1.442695, %v2562_v47  ;;  %v2561_v18 = vsub.f32 %v8019_v24, %v2465_v45  ;;  %5526 = vmatpush3.bf16.msra.mxu0 %v7716_v29  ;;  %2812 = vadd.xlane.f32.xlu1 %v2811_v8 }
 0x50d   : > { %5527 = vmatprep.subr.bf16.mxu0 %v9231_v32  ;;  %v6306_v20 = vpop.eup %6305  ;;  %v2750_v22 = vpop.xlane.xlu0 %2749 }
 0x50e   : > { %6319 = vpow2.f32 %v2674_v58  ;;  %v2672_v63 = vmul.f32 1.442695, %v2561_v18  ;;  %v2969_v33 = vmul.f32 %v6306_v20, %v7979_v0 }
 0x50f   : > { %v8321_v19 = vpop.eup %6307  ;;  %v2732_v26 = vpop.xlane.xlu1 %2731 }
 0x510   : > { %v8325_v43 = vpop.eup %6309  ;;  %6321 = vpow2.f32 %v2672_v63  ;;  %5528 = vmatpush3.bf16.msra.mxu0 %v9231_v32  ;;  %2824 = vadd.xlane.f32.xlu1 %v2823_v30  ;;  %v2844_v29 = vsel %vm2321_vm2, %v8321_v19, 0.0  ;;  %v3029_v45 = vpack.c.bf16 %v2969_v33, %v2968_v4 }
 0x511   : > { %v6312_v24 = vpop.eup %6311  ;;  %5529 = vmatprep.subr.bf16.mxu0 %v9232_v52  ;;  %2845 = vadd.xlane.f32.xlu0 %v2844_v29  ;;  %v2835_v34 = vsel %vm2321_vm2, %v8325_v43, 0.0  ;;  %v2753_v3 = vpop.xlane.xlu0 %2752 }
 0x512   : > { %v2967_v54 = vmul.f32 %v6312_v24, %v7994_v27  ;;  %v9234_v27 = vld [vmem:[#allocation11_spill] sm:$0xff] }
 0x513   : > { %v8334_v13 = vpop.eup %6313  ;;  %v2459_v15 = vpop.xlane.xlu1 %2458 }
 0x514   : > { %v8339_v17 = vpop.eup %6315  ;;  %v2559_v47 = vsub.f32 %v9233_v55, %v2459_v15  ;;  %5530 = vmatpush3.bf16.msra.mxu0 %v9232_v52  ;;  %2836 = vadd.xlane.f32.xlu1 %v2835_v34  ;;  %v3028_v0 = vpack.c.bf16 %v2967_v54, %v2966_v9  ;;  %v2838_v46 = vsel %vm2321_vm2, %v8334_v13, 0.0  ;;  %v9238_v15 = vld [vmem:[#allocation34_spill] sm:$0xff] }
 0x515   : > { %5555 = vmatprep.subr.bf16.mxu0 %v9234_v27  ;;  %2839 = vadd.xlane.f32.xlu0 %v2838_v46  ;;  %v2829_v58 = vsel %vm2321_vm2, %v8339_v17, 0.0  ;;  %v2486_v1 = vpop.xlane.xlu0 %2485 }
 0x516   : > { %v2668_v8 = vmul.f32 1.442695, %v2559_v47  ;;  %5519 = vmatprep.mubr.msk.bf16.mxu0 %vm2321_vm2, %v3028_v0  ;;  %v2568_v34 = vsub.f32 %v9238_v15, %v2486_v1  ;;  %v9242_v1 = vld [vmem:[#allocation31_spill] sm:$0xff]  ;;  %v9245_v15 = vld [vmem:[#allocation42_spill] sm:$0xff] }
 0x517   : > { %v8347_v49 = vpop.eup %6317  ;;  %v2741_v38 = vpop.xlane.xlu1 %2740  ;;  %5520 = vmatmul.mubr.msk.bf16.gmra.mxu0 %vm2321_vm2, %v3029_v45 }
 0x518   : > { %9235 = vst [vmem:[#allocation10_spill] sm:$0xff] %v8347_v49  ;;  %6323 = vpow2.f32 %v2668_v8  ;;  %2830 = vadd.xlane.f32.xlu1 %v2829_v58  ;;  %v2856_v18 = vsel %vm2321_vm2, %v8347_v49, 0.0  ;;  %v9240_v58 = vld [vmem:[#allocation35_spill] sm:$0xff] }
 0x519   : > { %6325 = vrcp.f32 %v2741_v38  ;;  %2857 = vadd.xlane.f32.xlu0 %v2856_v18  ;;  %v2747_v52 = vpop.xlane.xlu0 %2746  ;;  %v2686_v38 = vmul.f32 1.442695, %v2568_v34 }
 0x51a   : > { %6327 = vrcp.f32 %v2732_v26  ;;  %v9237_v26 = vld [vmem:[#allocation39_spill] sm:$0xff] }
 0x51b   : > { %v8354_v32 = vpop.eup %6319  ;;  %6329 = vrcp.f32 %v8304_v59  ;;  %v2735_v20 = vpop.xlane.xlu1 %2734 }
 0x51c   : > { %9236 = vst [vmem:[#allocation14_spill] sm:$0xff] %v8354_v32  ;;  %6331 = vrcp.f32 %v2735_v20  ;;  %v2850_v63 = vsel %vm2321_vm2, %v8354_v32, 0.0  ;;  %v9241_v20 = vld [vmem:[#allocation38_spill] sm:$0xff] }
 0x51d   : > { %v8359_v30 = vpop.eup %6321  ;;  %2851 = vadd.xlane.f32.xlu0 %v2850_v63  ;;  %6333 = vrcp.f32 %v2750_v22  ;;  %v2480_v0 = vpop.xlane.xlu0 %2479  ;;  %v9239_v22 = vld [vmem:[#allocation41_spill] sm:$0xff] }
 0x51e   : > { %v2847_v29 = vsel %vm2321_vm2, %v8359_v30, 0.0  ;;  %6335 = vrcp.f32 %v2753_v3  ;;  %v2566_v63 = vsub.f32 %v9241_v20, %v2480_v0  ;;  %v9248_v20 = vld [vmem:[#allocation32_spill] sm:$0xff] }
 0x51f   : > { %v2477_v24 = vpop.xlane.xlu1 %2476  ;;  %2848 = vadd.xlane.f32.xlu1 %v2847_v29  ;;  %6337 = vrcp.f32 %v2747_v52  ;;  %v9243_v52 = vld [vmem:[#allocation37_spill] sm:$0xff] }
 0x520   : > { %v2565_v33 = vsub.f32 %v9237_v26, %v2477_v24  ;;  %v2682_v34 = vmul.f32 1.442695, %v2566_v63 }
 0x522   : > { %v2680_v9 = vmul.f32 1.442695, %v2565_v33  ;;  %v9244_v33 = vld [vmem:[#allocation29_spill] sm:$0xff] }
 0x523   : > { %v2744_v59 = vpop.xlane.xlu1 %2743 }
 0x524   : > { %6339 = vpow2.f32 %v2680_v9 }
 0x525   : > { %v8364_v54 = vpop.eup %6323  ;;  %6341 = vrcp.f32 %v2744_v59 }
 0x526   : > { %v6326_v4 = vpop.eup %6325  ;;  %v2841_v55 = vsel %vm2321_vm2, %v8364_v54, 0.0 }
 0x527   : > { %v6328_v47 = vpop.eup %6327  ;;  %v2471_v46 = vpop.xlane.xlu1 %2470  ;;  %2842 = vadd.xlane.f32.xlu1 %v2841_v55  ;;  %v2973_v18 = vmul.f32 %v6326_v4, %v9240_v58  ;;  %v9247_v58 = vld [vmem:[#allocation20_spill] sm:$0xff] }
 0x528   : > { %v6330_v45 = vpop.eup %6329  ;;  %v2563_v3 = vsub.f32 %v9239_v22, %v2471_v46  ;;  %v2970_v24 = vmul.f32 %v6328_v47, %v9242_v1 }
 0x529   : > { %v6332_v8 = vpop.eup %6331  ;;  %v2972_v9 = vmul.f32 %v6330_v45, %v9244_v33  ;;  %v9252_v33 = vld [vmem:[#allocation15_spill] sm:$0xff] }
 0x52a   : > { %v2676_v29 = vmul.f32 1.442695, %v2563_v3  ;;  %v2971_v26 = vmul.f32 %v6332_v8, %v9243_v52  ;;  %v6334_v22 = vpop.eup %6333  ;;  %v9246_v3 = vld [vmem:[#allocation43_spill] sm:$0xff]  ;;  %v9251_v52 = vld [vmem:[#allocation30_spill] sm:$0xff] }
 0x52b   : > { %v2489_v59 = vpop.xlane.xlu1 %2488  ;;  %v3031_v46 = vpack.c.bf16 %v2973_v18, %v2972_v9  ;;  %v6336_v4 = vpop.eup %6335  ;;  %v9253_v9 = vld [vmem:[#allocation44_spill] sm:$0xff] }
 0x52c   : > { %6343 = vpow2.f32 %v2676_v29  ;;  %v2569_v55 = vsub.f32 %v9245_v15, %v2489_v59  ;;  %v3030_v49 = vpack.c.bf16 %v2971_v26, %v2970_v24  ;;  %v6338_v47 = vpop.eup %6337  ;;  %v2977_v63 = vmul.f32 %v6336_v4, %v9248_v20  ;;  %v9249_v29 = vld [vmem:[#allocation40_spill] sm:$0xff] }
 0x52d   : > { %6345 = vpow2.f32 %v2686_v38  ;;  %v2976_v26 = vmul.f32 %v6334_v22, %v9251_v52 }
 0x52e   : > { %v2688_v32 = vmul.f32 1.442695, %v2569_v55  ;;  %5531 = vmatprep.mubr.msk.bf16.mxu0 %vm2321_vm2, %v3030_v49 }
 0x52f   : > { %v2483_v0 = vpop.xlane.xlu1 %2482  ;;  %5532 = vmatmul.mubr.msk.bf16.vlgmr.msra.gmra.mxu0 %vm2321_vm2, %v3031_v46  ;;  %v3033_v55 = vpack.c.bf16 %v2977_v63, %v2976_v26 }
 0x530   : > { %6347 = vpow2.f32 %v2688_v32  ;;  %v2567_v45 = vsub.f32 %v9246_v3, %v2483_v0  ;;  %5556 = vmatpush3.bf16.msra.mxu0 %v9234_v27  ;;  %v9250_v32 = vld [vmem:[#allocation36_spill] sm:$0xff] }
 0x531   : > { %v8380_v8 = vpop.eup %6339  ;;  %5557 = vmatprep.subr.bf16.mxu0 %v9247_v58  ;;  %6349 = vpow2.f32 %v2682_v34  ;;  %v2975_v24 = vmul.f32 %v6338_v47, %v9250_v32  ;;  %v9254_v3 = vld [vmem:[#allocation16_spill] sm:$0xff] }
 0x532   : > { %v6342_v38 = vpop.eup %6341  ;;  %v2684_v18 = vmul.f32 1.442695, %v2567_v45  ;;  %v2859_v49 = vsel %vm2321_vm2, %v8380_v8, 0.0 }
 0x533   : > { %2860 = vadd.xlane.f32.xlu1 %v2859_v49  ;;  %v2974_v1 = vmul.f32 %v6342_v38, %v9249_v29 }
 0x534   : > { %5558 = vmatpush3.bf16.msra.mxu0 %v9247_v58  ;;  %v2498_v27 = vpop.xlane.xlu0 %2497  ;;  %6351 = vpow2.f32 %v2684_v18 }
 0x535   : > { %5559 = vmatprep.subr.bf16.mxu0 %v9252_v33  ;;  %v2572_v59 = vsub.f32 %v9253_v9, %v2498_v27  ;;  %v3032_v15 = vpack.c.bf16 %v2975_v24, %v2974_v1  ;;  %v9255_v1 = vld [vmem:[#allocation21_spill] sm:$0xff] }
 0x537   : > { %v2694_v46 = vmul.f32 1.442695, %v2572_v59  ;;  %5535 = vmatprep.mubr.msk.bf16.mxu0 %vm2321_vm2, %v3032_v15 }
 0x538   : > { %5536 = vmatmul.mubr.msk.bf16.gmra.mxu0 %vm2321_vm2, %v3033_v55  ;;  %v2492_v34 = vpop.xlane.xlu0 %2491  ;;  %v2501_v4 = vpop.xlane.xlu1 %2500 }
 0x539   : > { %v8394_v0 = vpop.eup %6343  ;;  %5560 = vmatpush3.bf16.msra.mxu0 %v9252_v33  ;;  %v2570_v22 = vsub.f32 %v8118_v56, %v2492_v34  ;;  %6353 = vpow2.f32 %v2694_v46  ;;  %v2573_v45 = vsub.f32 %v8122_v36, %v2501_v4 }
 0x53a   : > { %v8398_v47 = vpop.eup %6345  ;;  %5561 = vmatprep.subr.bf16.mxu0 %v9254_v3  ;;  %v2853_v58 = vsel %vm2321_vm2, %v8394_v0, 0.0 }
 0x53b   : > { %v2690_v38 = vmul.f32 1.442695, %v2570_v22  ;;  %2854 = vadd.xlane.f32.xlu0 %v2853_v58  ;;  %v2868_v63 = vsel %vm2321_vm2, %v8398_v47, 0.0  ;;  %v2696_v29 = vmul.f32 1.442695, %v2573_v45 }
 0x53c   : > { %v2495_v18 = vpop.xlane.xlu1 %2494  ;;  %v2510_v49 = vpop.xlane.xlu0 %2509 }
 0x53d   : > { %v8404_v20 = vpop.eup %6347  ;;  %5562 = vmatpush3.bf16.msra.mxu0 %v9254_v3  ;;  %v2571_v56 = vsub.f32 %v8127_v6, %v2495_v18  ;;  %6355 = vpow2.f32 %v2690_v38  ;;  %v2576_v36 = vsub.f32 %v8134_v40, %v2510_v49 }
 0x53e   : > { %5587 = vmatprep.subr.bf16.mxu0 %v9255_v1  ;;  %v2871_v32 = vsel %vm2321_vm2, %v8404_v20, 0.0  ;;  %v8414_v24 = vpop.eup %6349 }
 0x53f   : > { %v2692_v27 = vmul.f32 1.442695, %v2571_v56  ;;  %2869 = vadd.xlane.f32.xlu0 %v2868_v63  ;;  %2872 = vadd.xlane.f32.xlu1 %v2871_v32  ;;  %v2702_v6 = vmul.f32 1.442695, %v2576_v36  ;;  %v2862_v9 = vsel %vm2321_vm2, %v8414_v24, 0.0 }
 0x540   : > { %v2504_v52 = vpop.xlane.xlu0 %2503  ;;  %v2513_v26 = vpop.xlane.xlu1 %2512 }
 0x541   : > { %6357 = vpow2.f32 %v2692_v27  ;;  %v2574_v33 = vsub.f32 %v8139_v2, %v2504_v52  ;;  %v8419_v59 = vpop.eup %6351  ;;  %v2577_v46 = vsub.f32 %v8145_v37, %v2513_v26 }
 0x542   : > { %6359 = vpow2.f32 %v2696_v29  ;;  %v2865_v34 = vsel %vm2321_vm2, %v8419_v59, 0.0 }
 0x543   : > { %2863 = vadd.xlane.f32.xlu0 %v2862_v9  ;;  %6361 = vpow2.f32 %v2702_v6  ;;  %v2698_v55 = vmul.f32 1.442695, %v2574_v33  ;;  %v2704_v3 = vmul.f32 1.442695, %v2577_v46  ;;  %v9261_v46 = vld [vmem:[#allocation9_spill] sm:$0xff] }
 0x544   : > { %v2507_v40 = vpop.xlane.xlu1 %2506  ;;  %v2762_v2 = vpop.xlane.xlu0 %2761 }
 0x545   : > { %v2575_v15 = vsub.f32 %v8148_v16, %v2507_v40 }
 0x546   : > { %v8425_v4 = vpop.eup %6353 }
 0x547   : > { %9256 = vst [vmem:[#allocation33_spill] sm:$0xff] %v8425_v4  ;;  %v2700_v22 = vmul.f32 1.442695, %v2575_v15  ;;  %2866 = vadd.xlane.f32.xlu0 %v2865_v34  ;;  %v2880_v45 = vsel %vm2321_vm2, %v8425_v4, 0.0 }
 0x549   : > { %6363 = vpow2.f32 %v2700_v22  ;;  %v2774_v16 = vpop.xlane.xlu0 %2773 }
 0x54a   : > { %6365 = vpow2.f32 %v2698_v55  ;;  %v8429_v58 = vpop.eup %6355 }
 0x54b   : > { %2881 = vadd.xlane.f32.xlu0 %v2880_v45  ;;  %6367 = vpow2.f32 %v2704_v3  ;;  %v2874_v37 = vsel %vm2321_vm2, %v8429_v58, 0.0  ;;  %v8459_v45 = vpop.permute.xlu1 %3685 }
 0x54c   : > { %6369 = vrcp.f32 %v2762_v2 }
 0x54d   : > { %v2768_v56 = vpop.xlane.xlu0 %2767 }
 0x54e   : > { %v8431_v38 = vpop.eup %6357 }
 0x54f   : > { %v8435_v18 = vpop.eup %6359  ;;  %2875 = vadd.xlane.f32.xlu0 %v2874_v37  ;;  %v2877_v49 = vsel %vm2321_vm2, %v8431_v38, 0.0  ;;  %v9262_v37 = vld [vmem:[#allocation8_spill] sm:$0xff] }
 0x550   : > { %2878 = vadd.xlane.f32.xlu1 %v2877_v49  ;;  %v2883_v63 = vsel %vm2321_vm2, %v8435_v18, 0.0  ;;  %v8441_v29 = vpop.eup %6361 }
 0x551   : > { %9257 = vst [vmem:[#allocation11_spill] sm:$0xff] %v8441_v29  ;;  %v2892_v32 = vsel %vm2321_vm2, %v8441_v29, 0.0  ;;  %v2777_v26 = vpop.xlane.xlu0 %2776 }
 0x553   : > { %2884 = vadd.xlane.f32.xlu0 %v2883_v63 }
 0x555   : > { %v2771_v9 = vpop.xlane.xlu0 %2770 }
 0x556   : > { %v8443_v36 = vpop.eup %6363  ;;  %6371 = vrcp.f32 %v2771_v9 }
 0x557   : > { %9258 = vst [vmem:[#allocation39_spill] sm:$0xff] %v8443_v36  ;;  %v8447_v27 = vpop.eup %6365  ;;  %2893 = vadd.xlane.f32.xlu0 %v2892_v32  ;;  %v2889_v52 = vsel %vm2321_vm2, %v8443_v36, 0.0 }
 0x558   : > { %9259 = vst [vmem:[#allocation34_spill] sm:$0xff] %v8447_v27  ;;  %2890 = vadd.xlane.f32.xlu1 %v2889_v52  ;;  %v2886_v6 = vsel %vm2321_vm2, %v8447_v27, 0.0  ;;  %v8453_v33 = vpop.eup %6367 }
 0x559   : > { %9260 = vst [vmem:[#allocation41_spill] sm:$0xff] %v8453_v33  ;;  %v2895_v40 = vsel %vm2321_vm2, %v8453_v33, 0.0  ;;  %v6370_v29 = vpop.eup %6369 }
 0x55b   : > { %2887 = vadd.xlane.f32.xlu0 %v2886_v6 }
 0x55f   : > { %2896 = vadd.xlane.f32.xlu0 %v2895_v40 }
 0x562   : > { %v2786_v15 = vpop.xlane.xlu0 %2785 }
 0x563   : > { %v6372_v9 = vpop.eup %6371 }
 0x566   : > { %v2780_v55 = vpop.xlane.xlu0 %2779 }
 0x569   : > { %3681 = vrot.lane.b32.xlu1 %v9261_v46, %s6605_s26 }
 0x56a   : > { %v2798_v34 = vpop.xlane.xlu0 %2797 }
 0x56e   : > { %v2792_v22 = vpop.xlane.xlu0 %2791 }
 0x572   : > { %v2810_v3 = vpop.xlane.xlu0 %2809 }
 0x575   : > { %3683 = vrot.lane.b32.xlu0 %v9262_v37, %s6605_s26  ;;  %s6606_s26 = smov 8  }
 0x576   : > { %v2804_v49 = vpop.xlane.xlu0 %2803 }
 0x579   : > { %v2756_v63 = vpop.xlane.xlu1 %2755 }
 0x57a   : > { %v2807_v52 = vpop.xlane.xlu0 %2806 }
 0x57d   : > { %v2765_v32 = vpop.xlane.xlu1 %2764 }
 0x57e   : > { %6373 = vrcp.f32 %v2765_v32  ;;  %v8463_v40 = vpop.xlane.xlu0 %2821 }
 0x57f   : > { %6375 = vrcp.f32 %v2756_v63 }
 0x580   : > { %6377 = vrcp.f32 %v2768_v56 }
 0x581   : > { %v2759_v6 = vpop.xlane.xlu1 %2758 }
 0x582   : > { %6379 = vrcp.f32 %v2759_v6  ;;  %v2816_v2 = vpop.xlane.xlu0 %2815 }
 0x583   : > { %6381 = vrcp.f32 %v2774_v16 }
 0x584   : > { %6383 = vrcp.f32 %v2777_v26 }
 0x585   : > { %v2789_v46 = vpop.xlane.xlu1 %2788  ;;  %6385 = vrcp.f32 %v2786_v15 }
 0x586   : > { %6387 = vrcp.f32 %v2789_v46  ;;  %v2819_v26 = vpop.xlane.xlu0 %2818 }
 0x587   : > { %6389 = vrcp.f32 %v2780_v55 }
 0x588   : > { %6391 = vrcp.f32 %v2807_v52  ;;  %v2983_v52 = vmul.f32 %v6372_v9, %v8173_v62  ;;  %v9264_v9 = vld [vmem:[#allocation13_spill] sm:$0xff] }
 0x589   : > { %v2783_v37 = vpop.xlane.xlu1 %2782 }
 0x58a   : > { %6393 = vrcp.f32 %v2783_v37  ;;  %v2980_v37 = vmul.f32 %v6370_v29, %v8154_v60  ;;  %v9263_v29 = vld [vmem:[#allocation12_spill] sm:$0xff] }
 0x58b   : > { %6395 = vrcp.f32 %v2804_v49  ;;  %v6374_v32 = vpop.eup %6373 }
 0x58c   : > { %v6376_v63 = vpop.eup %6375  ;;  %v2981_v16 = vmul.f32 %v6374_v32, %v8239_v10 }
 0x58d   : > { %v2801_v56 = vpop.xlane.xlu1 %2800  ;;  %v6378_v33 = vpop.eup %6377  ;;  %v2978_v15 = vmul.f32 %v6376_v63, %v8234_v42  ;;  %v9265_v63 = vld [vmem:[#allocation46_spill] sm:$0xff] }
 0x58e   : > { %6397 = vrcp.f32 %v2801_v56  ;;  %v2982_v4 = vmul.f32 %v6378_v33, %v8164_v35  ;;  %v3035_v32 = vpack.c.bf16 %v2981_v16, %v2980_v37  ;;  %v9266_v16 = vld [vmem:[#allocation45_spill] sm:$0xff] }
 0x58f   : > { %v6380_v6 = vpop.eup %6379  ;;  %6399 = vrcp.f32 %v2792_v22 }
 0x590   : > { %v2979_v55 = vmul.f32 %v6380_v6, %v8256_v51  ;;  %v6382_v46 = vpop.eup %6381  ;;  %6401 = vrcp.f32 %v2798_v34  ;;  %v3036_v42 = vpack.c.bf16 %v2983_v52, %v2982_v4  ;;  %v2834_v34 = vpop.xlane.xlu0 %2833  ;;  %v9267_v52 = vld [vmem:[#allocation17_spill] sm:$0xff] }
 0x591   : > { %v2795_v49 = vpop.xlane.xlu1 %2794  ;;  %v6384_v36 = vpop.eup %6383 }
 0x592   : > { %6403 = vrcp.f32 %v2795_v49  ;;  %v3034_v27 = vpack.c.bf16 %v2979_v55, %v2978_v15  ;;  %v6386_v10 = vpop.eup %6385 }
 0x593   : > { %6405 = vrcp.f32 %v2819_v26  ;;  %v6388_v22 = vpop.eup %6387  ;;  %v2988_v56 = vmul.f32 %v6386_v10, %v9265_v63  ;;  %v2984_v26 = vmul.f32 %v6382_v46, %v9266_v16  ;;  %v9272_v63 = vld [vmem:[#allocation18_spill] sm:$0xff] }
 0x594   : > { %6407 = vrcp.f32 %v2810_v3  ;;  %5547 = vmatprep.mubr.msk.bf16.mxu1 %vm2321_vm2, %v3034_v27  ;;  %v6390_v51 = vpop.eup %6389  ;;  %v2989_v33 = vmul.f32 %v6388_v22, %v8266_v12  ;;  %v2985_v27 = vmul.f32 %v6384_v36, %v8168_v25  ;;  %v2828_v37 = vpop.xlane.xlu0 %2827  ;;  %v9269_v22 = vld [vmem:[#allocation22_spill] sm:$0xff] }
 0x595   : > { %6409 = vrcp.f32 %v2816_v2  ;;  %5548 = vmatmul.mubr.msk.bf16.vlgmr.msra.gmra.mxu1 %vm2321_vm2, %v3035_v32  ;;  %v2813_v60 = vpop.xlane.xlu1 %2812  ;;  %v6392_v62 = vpop.eup %6391  ;;  %v2986_v3 = vmul.f32 %v6390_v51, %v8202_v21 }
 0x596   : > { %5572 = vmatpush3.bf16.msra.mxu1 %v9263_v29  ;;  %6411 = vrcp.f32 %v2813_v60  ;;  %5551 = vmatprep.mubr.msk.bf16.mxu1 %vm2321_vm2, %v3036_v42  ;;  %v2995_v15 = vmul.f32 %v6392_v62, %v8245_v39  ;;  %v3039_v55 = vpack.c.bf16 %v2989_v33, %v2988_v56  ;;  %v3037_v25 = vpack.c.bf16 %v2985_v27, %v2984_v26  ;;  %v9270_v33 = vld [vmem:[#allocation25_spill] sm:$0xff] }
 0x597   : > { %v6394_v35 = vpop.eup %6393  ;;  %5573 = vmatprep.subr.bf16.mxu1 %v9264_v9 }
 0x598   : > { %v6396_v4 = vpop.eup %6395  ;;  %v2987_v2 = vmul.f32 %v6394_v35, %v8272_v44 }
 0x599   : > { %v2825_v6 = vpop.xlane.xlu1 %2824  ;;  %v2994_v36 = vmul.f32 %v6396_v4, %v8232_v11  ;;  %v9268_v11 = vld [vmem:[#allocation19_spill] sm:$0xff] }
 0x59a   : > { %5574 = vmatpush3.bf16.msra.mxu1 %v9264_v9  ;;  %6413 = vrcp.f32 %v2825_v6  ;;  %v3038_v12 = vpack.c.bf16 %v2987_v2, %v2986_v3  ;;  %v9271_v9 = vld [vmem:[#allocation23_spill] sm:$0xff]  ;;  %v2846_v3 = vpop.xlane.xlu0 %2845  ;;  %v9274_v6 = vld [vmem:[#allocation28_spill] sm:$0xff] }
 0x59b   : > { %5575 = vmatprep.subr.bf16.mxu1 %v9267_v52  ;;  %v6398_v21 = vpop.eup %6397  ;;  %6415 = vrcp.f32 %v8463_v40  ;;  %v3042_v46 = vpack.c.bf16 %v2995_v15, %v2994_v36 }
 0x59c   : > { %5563 = vmatprep.mubr.msk.bf16.mxu0 %vm2321_vm2, %v3038_v12  ;;  %v6400_v44 = vpop.eup %6399  ;;  %v2993_v40 = vmul.f32 %v6398_v21, %v8277_v57 }
 0x59d   : > { %5552 = vmatmul.mubr.msk.bf16.gmra.mxu1 %vm2321_vm2, %v3037_v25  ;;  %5564 = vmatmul.mubr.msk.bf16.vlgmr.msra.gmra.mxu0 %vm2321_vm2, %v3039_v55  ;;  %v2837_v39 = vpop.xlane.xlu1 %2836  ;;  %v6402_v49 = vpop.eup %6401  ;;  %v2990_v42 = vmul.f32 %v6400_v44, %v8217_v28 }
 0x59e   : > { %5576 = vmatpush3.bf16.msra.mxu1 %v9267_v52  ;;  %5588 = vmatpush3.bf16.msra.mxu0 %v9255_v1  ;;  %6417 = vrcp.f32 %v2837_v39  ;;  %v2992_v1 = vmul.f32 %v6402_v49, %v8208_v31  ;;  %v2840_v26 = vpop.xlane.xlu0 %2839  ;;  %v9275_v52 = vld [vmem:[#allocation26_spill] sm:$0xff]  ;;  %v9276_v39 = vld [vmem:[#allocation27_spill] sm:$0xff] }
 0x59f   : > { %v6404_v10 = vpop.eup %6403  ;;  %5577 = vmatprep.subr.bf16.mxu1 %v9268_v11  ;;  %5579 = vmatprep.mubr.msk.bf16.mxu1 %vm2321_vm2, %v3042_v46  ;;  %6419 = vrcp.f32 %v2828_v37 }
 0x5a0   : > { %v6406_v32 = vpop.eup %6405  ;;  %5589 = vmatprep.subr.bf16.mxu0 %v9269_v22  ;;  %v2991_v51 = vmul.f32 %v6404_v10, %v8298_v48  ;;  %6421 = vrcp.f32 %v2834_v34  ;;  %v3041_v28 = vpack.c.bf16 %v2993_v40, %v2992_v1 }
 0x5a1   : > { %v6408_v60 = vpop.eup %6407  ;;  %v2831_v62 = vpop.xlane.xlu1 %2830  ;;  %v2999_v48 = vmul.f32 %v6406_v32, %v8270_v5 }
 0x5a2   : > { %v6410_v29 = vpop.eup %6409  ;;  %5578 = vmatpush3.bf16.msra.mxu1 %v9268_v11  ;;  %5590 = vmatpush3.bf16.msra.mxu0 %v9269_v22  ;;  %6423 = vrcp.f32 %v2831_v62  ;;  %v3040_v57 = vpack.c.bf16 %v2991_v51, %v2990_v42  ;;  %v2996_v34 = vmul.f32 %v6408_v60, %v8226_v53  ;;  %v9273_v53 = vld [vmem:[#allocation24_spill] sm:$0xff] }
 0x5a3   : > { %v6412_v35 = vpop.eup %6411  ;;  %5591 = vmatprep.subr.bf16.mxu0 %v9270_v33  ;;  %5603 = vmatprep.subr.bf16.mxu1 %v9271_v9  ;;  %v2998_v31 = vmul.f32 %v6410_v29, %v8260_v23 }
 0x5a4   : > { %v2997_v27 = vmul.f32 %v6412_v35, %v8309_v41  ;;  %5567 = vmatprep.mubr.msk.bf16.mxu0 %vm2321_vm2, %v3040_v57 }
 0x5a5   : > { %5568 = vmatmul.mubr.msk.bf16.gmra.mxu0 %vm2321_vm2, %v3041_v28  ;;  %v3044_v56 = vpack.c.bf16 %v2999_v48, %v2998_v31 }
 0x5a6   : > { %v3043_v4 = vpack.c.bf16 %v2997_v27, %v2996_v34  ;;  %5592 = vmatpush3.bf16.msra.mxu0 %v9270_v33  ;;  %v9278_v34 = vld [vmem:[#allocation10_spill] sm:$0xff] }
 0x5a7   : > { %v6414_v2 = vpop.eup %6413  ;;  %5593 = vmatprep.subr.bf16.mxu0 %v9272_v63 }
 0x5a8   : > { %5580 = vmatmul.mubr.msk.bf16.vlgmr.msra.gmra.mxu1 %vm2321_vm2, %v3043_v4  ;;  %v6416_v5 = vpop.eup %6415  ;;  %v3001_v23 = vmul.f32 %v6414_v2, %v8314_v61  ;;  %v2849_v41 = vpop.xlane.xlu1 %2848 }
 0x5a9   : > { %5604 = vmatpush3.bf16.msra.mxu1 %v9271_v9  ;;  %5583 = vmatprep.mubr.msk.bf16.mxu1 %vm2321_vm2, %v3044_v56  ;;  %v3000_v15 = vmul.f32 %v6416_v5, %v8249_v14  ;;  %6425 = vrcp.f32 %v2849_v41  ;;  %v9277_v9 = vld [vmem:[#allocation14_spill] sm:$0xff] }
 0x5aa   : > { %5594 = vmatpush3.bf16.msra.mxu0 %v9272_v63  ;;  %5605 = vmatprep.subr.bf16.mxu1 %v9273_v53  ;;  %6427 = vrcp.f32 %v2840_v26 }
 0x5ab   : > { %5619 = vmatprep.subr.bf16.mxu0 %v9274_v6  ;;  %v6418_v16 = vpop.eup %6417  ;;  %v3045_v25 = vpack.c.bf16 %v3001_v23, %v3000_v15  ;;  %6429 = vrcp.f32 %v2846_v3 }
 0x5ac   : > { %v6420_v12 = vpop.eup %6419  ;;  %v3005_v21 = vmul.f32 %v6418_v16, %v8325_v43 }
 0x5ad   : > { %5606 = vmatpush3.bf16.msra.mxu1 %v9273_v53  ;;  %v6422_v55 = vpop.eup %6421  ;;  %v3002_v44 = vmul.f32 %v6420_v12, %v8293_v50  ;;  %v2858_v50 = vpop.xlane.xlu0 %2857 }
 0x5ae   : > { %5607 = vmatprep.subr.bf16.mxu1 %v9275_v52  ;;  %v3004_v37 = vmul.f32 %v6422_v55, %v8282_v7 }
 0x5af   : > { %v6424_v36 = vpop.eup %6423 }
 0x5b0   : > { %v2843_v61 = vpop.xlane.xlu1 %2842  ;;  %5584 = vmatmul.mubr.msk.bf16.gmra.mxu1 %vm2321_vm2, %v3045_v25  ;;  %v3003_v14 = vmul.f32 %v6424_v36, %v8339_v17  ;;  %v3047_v49 = vpack.c.bf16 %v3005_v21, %v3004_v37 }
 0x5b1   : > { %6431 = vrcp.f32 %v2843_v61  ;;  %5608 = vmatpush3.bf16.msra.mxu1 %v9275_v52  ;;  %v2852_v42 = vpop.xlane.xlu0 %2851 }
 0x5b2   : > { %5609 = vmatprep.subr.bf16.mxu1 %v9276_v39  ;;  %v3046_v46 = vpack.c.bf16 %v3003_v14, %v3002_v44 }
 0x5b4   : > { %5595 = vmatprep.mubr.msk.bf16.mxu0 %vm2321_vm2, %v3046_v46  ;;  %v9279_v46 = vld [vmem:[#allocation33_spill] sm:$0xff] }
 0x5b5   : > { %5610 = vmatpush3.bf16.msra.mxu1 %v9276_v39  ;;  %5596 = vmatmul.mubr.msk.bf16.vlgmr.msra.gmra.mxu0 %vm2321_vm2, %v3047_v49 }
 0x5b6   : > { %5620 = vmatpush3.bf16.msra.mxu0 %v9274_v6  ;;  %v6426_v7 = vpop.eup %6425 }
 0x5b7   : > { %5621 = vmatprep.subr.bf16.mxu0 %v8459_v45  ;;  %v6428_v43 = vpop.eup %6427  ;;  %v3009_v11 = vmul.f32 %v6426_v7, %v8359_v30 }
 0x5b8   : > { %v6430_v17 = vpop.eup %6429  ;;  %v3006_v32 = vmul.f32 %v6428_v43, %v8334_v13  ;;  %v9281_v43 = vld [vmem:[#allocation39_spill] sm:$0xff] }
 0x5b9   : > { %v3008_v51 = vmul.f32 %v6430_v17, %v8321_v19 }
 0x5ba   : > { %5622 = vmatpush3.bf16.msra.mxu0 %v8459_v45 }
 0x5bb   : > { %v3049_v62 = vpack.c.bf16 %v3009_v11, %v3008_v51 }
 0x5bc   : > { %v2861_v40 = vpop.xlane.xlu1 %2860 }
 0x5bd   : > { %6433 = vrcp.f32 %v2861_v40 }
 0x5be   : > { %v6432_v10 = vpop.eup %6431  ;;  %6435 = vrcp.f32 %v2852_v42 }
 0x5bf   : > { %v3007_v22 = vmul.f32 %v6432_v10, %v8364_v54  ;;  %6437 = vrcp.f32 %v2858_v50 }
 0x5c1   : > { %v3048_v60 = vpack.c.bf16 %v3007_v22, %v3006_v32  ;;  %v9282_v32 = vld [vmem:[#allocation41_spill] sm:$0xff]  ;;  %v9283_v22 = vld [vmem:[#allocation11_spill] sm:$0xff] }
 0x5c3   : > { %5599 = vmatprep.mubr.msk.bf16.mxu0 %vm2321_vm2, %v3048_v60 }
 0x5c4   : > { %v2855_v45 = vpop.xlane.xlu0 %2854  ;;  %5600 = vmatmul.mubr.msk.bf16.gmra.mxu0 %vm2321_vm2, %v3049_v62 }
 0x5c5   : > { %6439 = vrcp.f32 %v2855_v45 }
 0x5c7   : > { %v8564_v60 = vpop.f32.mrf.mxu0 }
 0x5c8   : > { %v2870_v30 = vpop.xlane.xlu0 %2869  ;;  %v2873_v1 = vpop.xlane.xlu1 %2872 }
 0x5c9   : > { %6441 = vrcp.f32 %v2870_v30  ;;  %v8566_v62 = vpop.f32.mrf.mxu0 }
 0x5ca   : > { %6443 = vrcp.f32 %v2873_v1  ;;  %v6434_v13 = vpop.eup %6433 }
 0x5cb   : > { %v6436_v54 = vpop.eup %6435  ;;  %v3013_v33 = vmul.f32 %v6434_v13, %v8380_v8  ;;  %v8568_v45 = vpop.f32.mrf.mxu0 }
 0x5cc   : > { %v2864_v29 = vpop.xlane.xlu0 %2863  ;;  %v6438_v57 = vpop.eup %6437  ;;  %v3010_v28 = vmul.f32 %v6436_v54, %v9277_v9 }
 0x5cd   : > { %6445 = vrcp.f32 %v2864_v29  ;;  %v3012_v27 = vmul.f32 %v6438_v57, %v9278_v34  ;;  %v8570_v30 = vpop.f32.mrf.mxu0 }
 0x5cf   : > { %v3051_v3 = vpack.c.bf16 %v3013_v33, %v3012_v27 }
 0x5d0   : > { %v2867_v19 = vpop.xlane.xlu0 %2866 }
 0x5d1   : > { %6447 = vrcp.f32 %v2867_v19 }
 0x5d2   : > { %v6440_v35 = vpop.eup %6439 }
 0x5d3   : > { %v3011_v48 = vmul.f32 %v6440_v35, %v8394_v0 }
 0x5d4   : > { %v2882_v31 = vpop.xlane.xlu0 %2881 }
 0x5d5   : > { %v3050_v4 = vpack.c.bf16 %v3011_v48, %v3010_v28 }
 0x5d6   : > { %v6442_v56 = vpop.eup %6441 }
 0x5d7   : > { %5611 = vmatprep.mubr.msk.bf16.mxu1 %vm2321_vm2, %v3050_v4  ;;  %v6444_v5 = vpop.eup %6443  ;;  %v3016_v0 = vmul.f32 %v6442_v56, %v8398_v47  ;;  %v8572_v1 = vpop.f32.mrf.mxu0 }
 0x5d8   : > { %v2876_v2 = vpop.xlane.xlu0 %2875  ;;  %5612 = vmatmul.mubr.msk.bf16.vlgmr.msra.gmra.mxu1 %vm2321_vm2, %v3051_v3  ;;  %v3017_v41 = vmul.f32 %v6444_v5, %v8404_v20 }
 0x5d9   : > { %6449 = vrcp.f32 %v2876_v2  ;;  %v2879_v63 = vpop.xlane.xlu1 %2878  ;;  %v8574_v29 = vpop.f32.mrf.mxu0 }
 0x5da   : > { %6451 = vrcp.f32 %v2879_v63  ;;  %v6446_v8 = vpop.eup %6445  ;;  %v3053_v55 = vpack.c.bf16 %v3017_v41, %v3016_v0 }
 0x5db   : > { %v3014_v6 = vmul.f32 %v6446_v8, %v8414_v24  ;;  %v8576_v13 = vpop.f32.mrf.mxu0 }
 0x5dc   : > { %v2885_v53 = vpop.xlane.xlu0 %2884 }
 0x5dd   : > { %6453 = vrcp.f32 %v2885_v53  ;;  %v8578_v54 = vpop.f32.mrf.mxu0 }
 0x5de   : > { %v6448_v23 = vpop.eup %6447  ;;  %6455 = vrcp.f32 %v2882_v31 }
 0x5df   : > { %v3015_v16 = vmul.f32 %v6448_v23, %v8419_v59 }
 0x5e0   : > { %v2894_v26 = vpop.xlane.xlu0 %2893 }
 0x5e1   : > { %v2891_v15 = vpop.xlane.xlu1 %2890  ;;  %v3052_v12 = vpack.c.bf16 %v3015_v16, %v3014_v6 }
 0x5e2   : > { %6457 = vrcp.f32 %v2891_v15 }
 0x5e3   : > { %5615 = vmatprep.mubr.msk.bf16.mxu1 %vm2321_vm2, %v3052_v12 }
 0x5e4   : > { %v2888_v52 = vpop.xlane.xlu0 %2887  ;;  %5616 = vmatmul.mubr.msk.bf16.gmra.mxu1 %vm2321_vm2, %v3053_v55 }
 0x5e5   : > { %6459 = vrcp.f32 %v2888_v52  ;;  %v3682_v14 = vpop.permute.xlu1 %3681 }
 0x5e6   : > { %v6450_v47 = vpop.eup %6449  ;;  %6461 = vrcp.f32 %v2894_v26 }
 0x5e7   : > { %v6452_v25 = vpop.eup %6451  ;;  %v3018_v24 = vmul.f32 %v6450_v47, %v8429_v58 }
 0x5e8   : > { %v2897_v20 = vpop.xlane.xlu0 %2896  ;;  %v3019_v59 = vmul.f32 %v6452_v25, %v8431_v38  ;;  %v9280_v38 = vld [vmem:[#allocation34_spill] sm:$0xff] }
 0x5e9   : > { %6463 = vrcp.f32 %v2897_v20 }
 0x5ea   : > { %v3054_v36 = vpack.c.bf16 %v3019_v59, %v3018_v24  ;;  %v6454_v21 = vpop.eup %6453 }
 0x5eb   : > { %v6456_v44 = vpop.eup %6455  ;;  %v3021_v37 = vmul.f32 %v6454_v21, %v8435_v18 }
 0x5ec   : > { %v3684_v61 = vpop.permute.xlu0 %3683  ;;  %5627 = vmatprep.mubr.msk.bf16.mxu0 %vm2321_vm2, %v3054_v36  ;;  %v3020_v49 = vmul.f32 %v6456_v44, %v9279_v46 }
 0x5ed   : > { %5623 = vmatprep.subr.bf16.mxu0 %v3684_v61 }
 0x5ee   : > { %5624 = vmatpush3.bf16.msra.mxu0 %v3684_v61  ;;  %v3055_v58 = vpack.c.bf16 %v3021_v37, %v3020_v49 }
 0x5ef   : > { %5625 = vmatprep.subr.bf16.mxu0 %v3682_v14  ;;  %v6458_v39 = vpop.eup %6457  ;;  %v8580_v19 = vpop.f32.mrf.mxu0 }
 0x5f0   : > { %v3023_v17 = vmul.f32 %v6458_v39, %v9281_v43 }
 0x5f1   : > { %v8582_v57 = vpop.f32.mrf.mxu0 }
 0x5f2   : > { %v6460_v50 = vpop.eup %6459  ;;  %5626 = vmatpush3.bf16.msra.mxu0 %v3682_v14 }
 0x5f3   : > { %v3022_v7 = vmul.f32 %v6460_v50, %v9280_v38  ;;  %v6462_v10 = vpop.eup %6461  ;;  %v8584_v35 = vpop.f32.mrf.mxu0  ;;  %v6165_v50 = vld [vmem:[%s9128_s6 + $0x8] sm:$0xff]   ;;  %v6166_v38 = vld [vmem:[%s9128_s6] sm:$0xff]  }
 0x5f4   : > { %v3024_v42 = vmul.f32 %v6462_v10, %v9283_v22  ;;  %5635 = vmatprep.subr.bf16.mxu1 %v6165_v50 }
 0x5f5   : > { %5628 = vmatmul.mubr.msk.bf16.vlgmr.msra.gmra.mxu0 %vm2321_vm2, %v3055_v58  ;;  %v3056_v11 = vpack.c.bf16 %v3023_v17, %v3022_v7  ;;  %v8586_v33 = vpop.f32.mrf.mxu0  ;;  %5636 = vmatpush3.bf16.msra.mxu1 %v6165_v50 }
 0x5f6   : > { %v6464_v40 = vpop.eup %6463  ;;  %5637 = vmatprep.subr.bf16.mxu1 %v6166_v38 }
 0x5f7   : > { %5631 = vmatprep.mubr.msk.bf16.mxu0 %vm2321_vm2, %v3056_v11  ;;  %v3025_v18 = vmul.f32 %v6464_v40, %v9282_v32 }
 0x5f8   : > { %v8588_v9 = vpop.f32.mrf.mxu0 }
 0x5f9   : > { %v3057_v51 = vpack.c.bf16 %v3025_v18, %v3024_v42  ;;  %5638 = vmatpush3.bf16.msra.mxu1 %v6166_v38 }
 0x5fa   : > { %v8590_v28 = vpop.f32.mrf.mxu0 }
 0x5fc   : > { %v8592_v34 = vpop.f32.mrf.mxu0 }
 0x5fd   : > { %5632 = vmatmul.mubr.msk.bf16.gmra.mxu0 %vm2321_vm2, %v3057_v51 }
 0x5fe   : > { %v8594_v3 = vpop.f32.mrf.mxu0 }
 0x655   : > { %v5549_v48 = vpop.f32.mrf.mxu1 }
 0x657   : > { %v3294_v27 = vpop.f32.mrf.mxu1 }
 0x659   : > { %v5550_v31 = vpop.f32.mrf.mxu1 }
 0x65a   : > { %v6043_v4 = vpack.i.bf16 %v5550_v31, %v5549_v48 }
 0x65b   : > { %v3297_v2 = vpop.f32.mrf.mxu1 }
 0x65c   : > { %v6048_v63 = vpack.i.bf16 %v3297_v2, %v3294_v27  ;;  %6044 = vrot.lane.b32.xlu1 %v6043_v4, %s6606_s26 }
 0x65d   : > { %v5553_v56 = vpop.f32.mrf.mxu1  ;;  %v5565_v5 = vpop.f32.mrf.mxu0 }
 0x65e   : > { %6049 = vrot.lane.b32.xlu0 %v6048_v63, %s6606_s26 }
 0x65f   : > { %v3310_v8 = vpop.f32.mrf.mxu1  ;;  %v3383_v53 = vpop.f32.mrf.mxu0 }
 0x661   : > { %v5554_v23 = vpop.f32.mrf.mxu1  ;;  %v5566_v0 = vpop.f32.mrf.mxu0 }
 0x662   : > { %v6053_v41 = vpack.i.bf16 %v5554_v23, %v5553_v56  ;;  %v6063_v15 = vpack.i.bf16 %v5566_v0, %v5565_v5 }
 0x663   : > { %v3313_v6 = vpop.f32.mrf.mxu1  ;;  %v3386_v26 = vpop.f32.mrf.mxu0 }
 0x664   : > { %v6058_v16 = vpack.i.bf16 %v3313_v6, %v3310_v8  ;;  %6054 = vrot.lane.b32.xlu1 %v6053_v41, %s6606_s26  ;;  %v6068_v12 = vpack.i.bf16 %v3386_v26, %v3383_v53 }
 0x665   : > { %v5569_v37 = vpop.f32.mrf.mxu0 }
 0x666   : > { %6059 = vrot.lane.b32.xlu0 %v6058_v16, %s6606_s26 }
 0x667   : > { %v3399_v39 = vpop.f32.mrf.mxu0 }
 0x668   : > { %6064 = vrot.lane.b32.xlu1 %v6063_v15, %s6606_s26  ;;  %v5581_v55 = vpop.f32.mrf.mxu1 }
 0x669   : > { %v5570_v46 = vpop.f32.mrf.mxu0 }
 0x66a   : > { %6069 = vrot.lane.b32.xlu0 %v6068_v12, %s6606_s26  ;;  %v3472_v52 = vpop.f32.mrf.mxu1  ;;  %v6128_v8 = vpack.i.bf16 %v5570_v46, %v5569_v37 }
 0x66b   : > { %v3402_v49 = vpop.f32.mrf.mxu0 }
 0x66c   : > { %v5582_v47 = vpop.f32.mrf.mxu1  ;;  %v6123_v53 = vpack.i.bf16 %v3402_v49, %v3399_v39 }
 0x66d   : > { %v6073_v25 = vpack.i.bf16 %v5582_v47, %v5581_v55 }
 0x66e   : > { %v3475_v20 = vpop.f32.mrf.mxu1 }
 0x66f   : > { %v6078_v24 = vpack.i.bf16 %v3475_v20, %v3472_v52  ;;  %6074 = vrot.lane.b32.xlu1 %v6073_v25, %s6607_s22 }
 0x670   : > { %v5585_v59 = vpop.f32.mrf.mxu1 }
 0x671   : > { %6079 = vrot.lane.b32.xlu0 %v6078_v24, %s6607_s22 }
 0x672   : > { %v3488_v36 = vpop.f32.mrf.mxu1 }
 0x674   : > { %v5586_v21 = vpop.f32.mrf.mxu1 }
 0x675   : > { %v6083_v61 = vpack.i.bf16 %v5586_v21, %v5585_v59  ;;  %v5597_v58 = vpop.f32.mrf.mxu0 }
 0x676   : > { %v3491_v44 = vpop.f32.mrf.mxu1 }
 0x677   : > { %v6088_v14 = vpack.i.bf16 %v3491_v44, %v3488_v36  ;;  %6084 = vrot.lane.b32.xlu1 %v6083_v61, %s6607_s22  ;;  %v3561_v7 = vpop.f32.mrf.mxu0 }
 0x679   : > { %6089 = vrot.lane.b32.xlu0 %v6088_v14, %s6607_s22  ;;  %v5598_v10 = vpop.f32.mrf.mxu0 }
 0x67a   : > { %v6108_v42 = vpack.i.bf16 %v5598_v10, %v5597_v58 }
 0x67b   : > { %v3564_v22 = vpop.f32.mrf.mxu0 }
 0x67c   : > { %v6103_v51 = vpack.i.bf16 %v3564_v22, %v3561_v7 }
 0x684   : > { %v5601_v31 = vpop.f32.mrf.mxu0 }
 0x686   : > { %v3577_v56 = vpop.f32.mrf.mxu0 }
 0x688   : > { %v5602_v23 = vpop.f32.mrf.mxu0 }
 0x689   : > { %v6148_v52 = vpack.i.bf16 %v5602_v23, %v5601_v31 }
 0x68a   : > { %v3580_v0 = vpop.f32.mrf.mxu0 }
 0x68b   : > { %v6143_v25 = vpack.i.bf16 %v3580_v0, %v3577_v56 }
 0x698   : > { %v5613_v43 = vpop.f32.mrf.mxu1 }
 0x69a   : > { %v3650_v17 = vpop.f32.mrf.mxu1 }
 0x69c   : > { %v5614_v11 = vpop.f32.mrf.mxu1 }
 0x69d   : > { %v6093_v40 = vpack.i.bf16 %v5614_v11, %v5613_v43 }
 0x69e   : > { %v3653_v32 = vpop.f32.mrf.mxu1 }
 0x69f   : > { %v6098_v18 = vpack.i.bf16 %v3653_v32, %v3650_v17  ;;  %6094 = vrot.lane.b32.xlu1 %v6093_v40, %s6608_s16 }
 0x6a1   : > { %6099 = vrot.lane.b32.xlu0 %v6098_v18, %s6608_s16 }
 0x6a3   : > { %6109 = vrot.lane.b32.xlu1 %v6108_v42, %s6607_s22 }
 0x6a4   : > { %v5617_v48 = vpop.f32.mrf.mxu1 }
 0x6a5   : > { %6104 = vrot.lane.b32.xlu0 %v6103_v51, %s6607_s22 }
 0x6a6   : > { %v3666_v27 = vpop.f32.mrf.mxu1 }
 0x6a8   : > { %v5618_v4 = vpop.f32.mrf.mxu1 }
 0x6a9   : > { %v6113_v2 = vpack.i.bf16 %v5618_v4, %v5617_v48 }
 0x6aa   : > { %v3669_v63 = vpop.f32.mrf.mxu1 }
 0x6ab   : > { %v6118_v5 = vpack.i.bf16 %v3669_v63, %v3666_v27  ;;  %6114 = vrot.lane.b32.xlu1 %v6113_v2, %s6608_s16 }
 0x6ad   : > { %6119 = vrot.lane.b32.xlu0 %v6118_v5, %s6608_s16 }
 0x6af   : > { %6129 = vrot.lane.b32.xlu1 %v6128_v8, %s6606_s26 }
 0x6b1   : > { %6124 = vrot.lane.b32.xlu0 %v6123_v53, %s6606_s26 }
 0x6b5   : > { %v5629_v41 = vpop.f32.mrf.mxu0 }
 0x6b7   : > { %v3739_v6 = vpop.f32.mrf.mxu0 }
 0x6b9   : > { %v5630_v16 = vpop.f32.mrf.mxu0 }
 0x6ba   : > { %v6133_v26 = vpack.i.bf16 %v5630_v16, %v5629_v41 }
 0x6bb   : > { %v3742_v15 = vpop.f32.mrf.mxu0 }
 0x6bc   : > { %v6138_v12 = vpack.i.bf16 %v3742_v15, %v3739_v6  ;;  %6134 = vrot.lane.b32.xlu1 %v6133_v26, %s6608_s16 }
 0x6bd   : > { %v5633_v55 = vpop.f32.mrf.mxu0 }
 0x6be   : > { %6139 = vrot.lane.b32.xlu0 %v6138_v12, %s6608_s16 }
 0x6bf   : > { %v3755_v47 = vpop.f32.mrf.mxu0 }
 0x6c0   : > { %6149 = vrot.lane.b32.xlu1 %v6148_v52, %s6607_s22 }
 0x6c1   : > { %v5634_v20 = vpop.f32.mrf.mxu0 }
 0x6c2   : > { %v6158_v24 = vpack.i.bf16 %v5634_v20, %v5633_v55  ;;  %6144 = vrot.lane.b32.xlu0 %v6143_v25, %s6607_s22 }
 0x6c3   : > { %v3758_v59 = vpop.f32.mrf.mxu0 }
 0x6c4   : > { %v6153_v36 = vpack.i.bf16 %v3758_v59, %v3755_v47  ;;  %6159 = vrot.lane.b32.xlu1 %v6158_v24, %s6608_s16 }
 0x6c6   : > { %6154 = vrot.lane.b32.xlu0 %v6153_v36, %s6608_s16  ;;  %s9286_s16 = sld [smem:[#allocation5_spill]] (%p6732_p6) }
 0x6cc   : > { %s5181_s24 = sshll.u32 (%p6732_p6), %s9286_s16, 5 }
 0x6ce   : > { %v6045_v21 = vpop.permute.xlu1 %6044 }
 0x6cf   : > { %v6047_v58 = vunpack.i.h.bf16 %v6045_v21  ;;  %v6046_v38 = vunpack.i.l.bf16 %v6045_v21 }
 0x6d0   : > { %v6050_v61 = vpop.permute.xlu0 %6049 }
 0x6d1   : > { %v6052_v7 = vunpack.i.h.bf16 %v6050_v61  ;;  %v6051_v43 = vunpack.i.l.bf16 %v6050_v61  ;;  %v3965_v51 = vsel %vm1428_vm1, %v8568_v45, %v6047_v58  ;;  %v3964_v48 = vsel %vm1428_vm1, %v8564_v60, %v6046_v38 }
 0x6d3   : > { %v3963_v27 = vsel %vm1428_vm1, %v8570_v30, %v6052_v7  ;;  %v3962_v31 = vsel %vm1428_vm1, %v8566_v62, %v6051_v43 }
 0x6d6   : > { %v6055_v44 = vpop.permute.xlu1 %6054 }
 0x6d7   : > { %v6057_v6 = vunpack.i.h.bf16 %v6055_v44  ;;  %v6056_v16 = vunpack.i.l.bf16 %v6055_v44 }
 0x6d8   : > { %v6060_v14 = vpop.permute.xlu0 %6059 }
 0x6d9   : > { %v6062_v26 = vunpack.i.h.bf16 %v6060_v14  ;;  %v6061_v15 = vunpack.i.l.bf16 %v6060_v14  ;;  %v3969_v36 = vsel %vm1428_vm1, %v8576_v13, %v6057_v6  ;;  %v3968_v21 = vsel %vm1428_vm1, %v8572_v1, %v6056_v16 }
 0x6da   : > { %v8626_v37 = vpop.permute.xlu1 %6064 }
 0x6db   : > { %v3967_v61 = vsel %vm1428_vm1, %v8578_v54, %v6062_v26  ;;  %v3966_v44 = vsel %vm1428_vm1, %v8574_v29, %v6061_v15 }
 0x6dc   : > { %v8628_v39 = vpop.permute.xlu0 %6069 }
 0x6e1   : > { %v6075_v46 = vpop.permute.xlu1 %6074 }
 0x6e2   : > { %v6077_v10 = vunpack.i.h.bf16 %v6075_v46  ;;  %v6076_v11 = vunpack.i.l.bf16 %v6075_v46 }
 0x6e3   : > { %v6080_v49 = vpop.permute.xlu0 %6079 }
 0x6e4   : > { %v6082_v40 = vunpack.i.h.bf16 %v6080_v49  ;;  %v6081_v32 = vunpack.i.l.bf16 %v6080_v49  ;;  %v3981_v2 = vsel %vm3978_vm3, %v3964_v48, %v6076_v11  ;;  %v3982_v63 = vsel %vm3978_vm3, %v3965_v51, %v6077_v10 }
 0x6e5   : > { %v6067_v11 = vunpack.i.h.bf16 %v8626_v37 }
 0x6e6   : > { %v3980_v8 = vsel %vm3978_vm3, %v3963_v27, %v6082_v40  ;;  %v3979_v45 = vsel %vm3978_vm3, %v3962_v31, %v6081_v32  ;;  %v6066_v40 = vunpack.i.l.bf16 %v8626_v37  ;;  %v6072_v32 = vunpack.i.h.bf16 %v8628_v39 }
 0x6e8   : > { %v3971_v37 = vsel %vm1428_vm1, %v8586_v33, %v6072_v32 }
 0x6e9   : > { %v6085_v50 = vpop.permute.xlu1 %6084 }
 0x6ea   : > { %v6087_v55 = vunpack.i.h.bf16 %v6085_v50  ;;  %v6086_v52 = vunpack.i.l.bf16 %v6085_v50 }
 0x6eb   : > { %v6090_v17 = vpop.permute.xlu0 %6089 }
 0x6ec   : > { %v6092_v47 = vunpack.i.h.bf16 %v6090_v17  ;;  %v6091_v25 = vunpack.i.l.bf16 %v6090_v17  ;;  %v3985_v46 = vsel %vm3978_vm3, %v3968_v21, %v6086_v52  ;;  %v3986_v49 = vsel %vm3978_vm3, %v3969_v36, %v6087_v55 }
 0x6ee   : > { %v3984_v38 = vsel %vm3978_vm3, %v3967_v61, %v6092_v47  ;;  %v3983_v13 = vsel %vm3978_vm3, %v3966_v44, %v6091_v25 }
 0x711   : > { %v6095_v18 = vpop.permute.xlu1 %6094 }
 0x712   : > { %v6097_v22 = vunpack.i.h.bf16 %v6095_v18  ;;  %v6096_v42 = vunpack.i.l.bf16 %v6095_v18  ;;  %v6071_v18 = vunpack.i.l.bf16 %v8628_v39 }
 0x713   : > { %v6100_v4 = vpop.permute.xlu0 %6099 }
 0x714   : > { %v6102_v56 = vunpack.i.h.bf16 %v6100_v4  ;;  %v6101_v5 = vunpack.i.l.bf16 %v6100_v4  ;;  %v3998_v53 = vsel %vm3995_vm4, %v3981_v2, %v6096_v42  ;;  %v3999_v60 = vsel %vm3995_vm4, %v3982_v63, %v6097_v22 }
 0x715   : > { %v4013_v0 = vpack.c.bf16 %v3999_v60, %v3998_v53  ;;  %v6110_v41 = vpop.permute.xlu1 %6109  ;;  %v3973_v63 = vsel %vm1428_vm1, %v8584_v35, %v6067_v11  ;;  %v3970_v39 = vsel %vm1428_vm1, %v8582_v57, %v6071_v18 }
 0x716   : > { %v3997_v30 = vsel %vm3995_vm4, %v3980_v8, %v6102_v56  ;;  %v3996_v23 = vsel %vm3995_vm4, %v3979_v45, %v6101_v5  ;;  %v6112_v42 = vunpack.i.h.bf16 %v6110_v41  ;;  %v6111_v51 = vunpack.i.l.bf16 %v6110_v41 }
 0x717   : > { %v4012_v62 = vpack.c.bf16 %v3997_v30, %v3996_v23  ;;  %v6105_v12 = vpop.permute.xlu0 %6104  ;;  %v3972_v56 = vsel %vm1428_vm1, %v8580_v19, %v6066_v40  ;;  %v6529_v40 = vld [vmem:[%s6773_s15] sm:$0xff] }
 0x718   : > { %v6107_v48 = vunpack.i.h.bf16 %v6105_v12  ;;  %v6106_v27 = vunpack.i.l.bf16 %v6105_v12  ;;  %v3989_v8 = vsel %vm3978_vm3, %v3972_v56, %v6111_v51  ;;  %v3990_v45 = vsel %vm3978_vm3, %v3973_v63, %v6112_v42 }
 0x719   : > { %5639 = vmatprep.mubr.msk.bf16.mxu1 %vm608_vm0, %v4012_v62 }
 0x71a   : > { %5640 = vmatmul.mubr.msk.bf16.vlgmr.msra.gmra.mxu1 %vm608_vm0, %v4013_v0  ;;  %v3988_v30 = vsel %vm3978_vm3, %v3971_v37, %v6107_v48  ;;  %v3987_v35 = vsel %vm3978_vm3, %v3970_v39, %v6106_v27 }
 0x71d   : > { %v6115_v20 = vpop.permute.xlu1 %6114 }
 0x71e   : > { %v6117_v24 = vunpack.i.h.bf16 %v6115_v20  ;;  %v6116_v59 = vunpack.i.l.bf16 %v6115_v20 }
 0x71f   : > { %v6120_v14 = vpop.permute.xlu0 %6119 }
 0x720   : > { %v6122_v50 = vunpack.i.h.bf16 %v6120_v14  ;;  %v6121_v58 = vunpack.i.l.bf16 %v6120_v14  ;;  %v4002_v7 = vsel %vm3995_vm4, %v3985_v46, %v6116_v59  ;;  %v4003_v1 = vsel %vm3995_vm4, %v3986_v49, %v6117_v24 }
 0x721   : > { %v4015_v17 = vpack.c.bf16 %v4003_v1, %v4002_v7  ;;  %v6130_v10 = vpop.permute.xlu1 %6129 }
 0x722   : > { %v4001_v54 = vsel %vm3995_vm4, %v3984_v38, %v6122_v50  ;;  %v4000_v43 = vsel %vm3995_vm4, %v3983_v13, %v6121_v58  ;;  %v6132_v33 = vunpack.i.h.bf16 %v6130_v10  ;;  %v6131_v41 = vunpack.i.l.bf16 %v6130_v10 }
 0x723   : > { %v4014_v29 = vpack.c.bf16 %v4001_v54, %v4000_v43  ;;  %v6125_v22 = vpop.permute.xlu0 %6124  ;;  %v8709_v43 = vld [vmem:[%s9129_s7] ss:$0 sm:$0xff] }
 0x724   : > { %v6127_v6 = vunpack.i.h.bf16 %v6125_v22  ;;  %v6126_v16 = vunpack.i.l.bf16 %v6125_v22  ;;  %v3977_v36 = vsel %vm1428_vm1, %v8592_v34, %v6132_v33  ;;  %v3976_v21 = vsel %vm1428_vm1, %v8588_v9, %v6131_v41  ;;  %v6530_v22 = vld [vmem:[%s6773_s15 + $0x10] sm:$0xff]  ;;  %v6535_v41 = vld [vmem:[%s6773_s15 + $0x28] sm:$0xff] }
 0x725   : > { %5643 = vmatprep.mubr.msk.bf16.mxu1 %vm608_vm0, %v4014_v29 }
 0x726   : > { %5644 = vmatmul.mubr.msk.bf16.gmra.mxu1 %vm608_vm0, %v4015_v17  ;;  %v3975_v61 = vsel %vm1428_vm1, %v8594_v3, %v6127_v6  ;;  %v3974_v44 = vsel %vm1428_vm1, %v8590_v28, %v6126_v16  ;;  %v6536_v16 = vld [vmem:[%s6773_s15 + $0x38] sm:$0xff] }
 0x72e   : > { %v6135_v31 = vpop.permute.xlu1 %6134 }
 0x72f   : > { %v6137_v4 = vunpack.i.h.bf16 %v6135_v31  ;;  %v6136_v2 = vunpack.i.l.bf16 %v6135_v31  ;;  %v6531_v31 = vld [vmem:[%s6773_s15 + $0x8] sm:$0xff] }
 0x730   : > { %v6140_v5 = vpop.permute.xlu0 %6139 }
 0x731   : > { %v6142_v53 = vunpack.i.h.bf16 %v6140_v5  ;;  %v6141_v60 = vunpack.i.l.bf16 %v6140_v5  ;;  %v4006_v23 = vsel %vm3995_vm4, %v3989_v8, %v6136_v2  ;;  %v4007_v19 = vsel %vm3995_vm4, %v3990_v45, %v6137_v4  ;;  %v6532_v2 = vld [vmem:[%s6773_s15 + $0x18] sm:$0xff] }
 0x732   : > { %v6150_v62 = vpop.permute.xlu1 %6149  ;;  %v4017_v12 = vpack.c.bf16 %v4007_v19, %v4006_v23  ;;  %v6534_v19 = vld [vmem:[%s6773_s15 + $0x30] sm:$0xff] }
 0x733   : > { %v4005_v0 = vsel %vm3995_vm4, %v3988_v30, %v6142_v53  ;;  %v4004_v57 = vsel %vm3995_vm4, %v3987_v35, %v6141_v60  ;;  %v6152_v55 = vunpack.i.h.bf16 %v6150_v62  ;;  %v6151_v52 = vunpack.i.l.bf16 %v6150_v62  ;;  %v6533_v30 = vld [vmem:[%s6773_s15 + $0x20] sm:$0xff] }
 0x734   : > { %v4016_v26 = vpack.c.bf16 %v4005_v0, %v4004_v57  ;;  %v6145_v15 = vpop.permute.xlu0 %6144 }
 0x735   : > { %v6147_v47 = vunpack.i.h.bf16 %v6145_v15  ;;  %v6146_v25 = vunpack.i.l.bf16 %v6145_v15  ;;  %v3993_v46 = vsel %vm3978_vm3, %v3976_v21, %v6151_v52  ;;  %v3994_v49 = vsel %vm3978_vm3, %v3977_v36, %v6152_v55 }
 0x736   : > { %v6160_v20 = vpop.permute.xlu1 %6159  ;;  %5647 = vmatprep.mubr.msk.bf16.mxu1 %vm608_vm0, %v4016_v26 }
 0x737   : > { %v6162_v24 = vunpack.i.h.bf16 %v6160_v20  ;;  %v6161_v59 = vunpack.i.l.bf16 %v6160_v20  ;;  %5648 = vmatmul.mubr.msk.bf16.gmra.mxu1 %vm608_vm0, %v4017_v12  ;;  %v3992_v38 = vsel %vm3978_vm3, %v3975_v61, %v6147_v47  ;;  %v3991_v34 = vsel %vm3978_vm3, %v3974_v44, %v6146_v25  ;;  %v6538_v44 = vld [vmem:[%s6773_s15 + $0x50] sm:$0xff] }
 0x738   : > { %v6155_v14 = vpop.permute.xlu0 %6154 }
 0x739   : > { %v6157_v50 = vunpack.i.h.bf16 %v6155_v14  ;;  %v6156_v58 = vunpack.i.l.bf16 %v6155_v14  ;;  %v4010_v9 = vsel %vm3995_vm4, %v3993_v46, %v6161_v59  ;;  %v4011_v13 = vsel %vm3995_vm4, %v3994_v49, %v6162_v24  ;;  %v6537_v59 = vld [vmem:[%s6773_s15 + $0x40] sm:$0xff] }
 0x73a   : > { %v4019_v1 = vpack.c.bf16 %v4011_v13, %v4010_v9 }
 0x73b   : > { %v4009_v3 = vsel %vm3995_vm4, %v3992_v38, %v6157_v50  ;;  %v4008_v28 = vsel %vm3995_vm4, %v3991_v34, %v6156_v58  ;;  %v6539_v58 = vld [vmem:[%s6773_s15 + $0x48] sm:$0xff]  ;;  %v6540_v34 = vld [vmem:[%s6773_s15 + $0x58] sm:$0xff] }
 0x73c   : > { %v4018_v7 = vpack.c.bf16 %v4009_v3, %v4008_v28 }
 0x73e   : > { %5651 = vmatprep.mubr.msk.bf16.mxu1 %vm608_vm0, %v4018_v7 }
 0x73f   : > { %5652 = vmatmul.mubr.msk.bf16.gmra.mxu1 %vm608_vm0, %v4019_v1 }
 0x7da   : > { %v5641_v54 = vpop.f32.mrf.mxu1 }
 0x7db   : > { %v4110_v17 = vadd.f32 %v5641_v54, %v8709_v43 }
 0x7dc   : > { %v4101_v29 = vpop.f32.mrf.mxu1 }
 0x7dd   : > { %v4102_v10 = vadd.f32 %v8709_v43, %v4101_v29  ;;  %v8717_v42 = vadd.f32 %v6530_v22, %v4110_v17  ;;  %v6541_v29 = vld [vmem:[%s6773_s15 + $0x60] sm:$0xff] }
 0x7de   : > { %v5642_v11 = vpop.f32.mrf.mxu1 }
 0x7df   : > { %v8714_v32 = vadd.f32 %v6529_v40, %v4102_v10  ;;  %v4113_v51 = vadd.f32 %v5642_v11, %v8709_v43  ;;  %v4186_v37 = vsel %vm608_vm0, %v8717_v42, 0.0  ;;  %v6542_v40 = vld [vmem:[%s6773_s15 + $0x70] sm:$0xff] }
 0x7e0   : > { %v4104_v18 = vpop.f32.mrf.mxu1 }
 0x7e1   : > { %v4105_v48 = vadd.f32 %v8709_v43, %v4104_v18  ;;  %v4180_v27 = vsel %vm608_vm0, %v8714_v32, 0.0  ;;  %v8727_v63 = vadd.f32 %v6532_v2, %v4113_v51  ;;  %v6544_v2 = vld [vmem:[%s6773_s15 + $0x78] sm:$0xff] }
 0x7e2   : > { %4181 = vadd.xlane.f32.xlu0 %v4180_v27  ;;  %v6543_v27 = vld [vmem:[%s6773_s15 + $0x68] sm:$0xff]  ;;  %s4885_s15 = sadd.s32 (%p6732_p6), %s9287_s20, %s5181_s24 }
 0x7e3   : > { %v8724_v4 = vadd.f32 %v6531_v31, %v4105_v48  ;;  %v4189_v53 = vsel %vm608_vm0, %v8727_v63, 0.0  ;;  %s5182_s27 = sshll.u32 (%p6732_p6), %s4885_s15, 3 }
 0x7e4   : > { %s4887_s25 = scalar_lea.vmem (%p6732_p6), %s9288_s23, %s5182_s27 }
 0x7e5   : > { %v4183_v56 = vsel %vm608_vm0, %v8724_v4, 0.0 }
 0x7e6   : > { %v5645_v39 = vpop.f32.mrf.mxu1  ;;  %4184 = vadd.xlane.f32.xlu1 %v4183_v56  ;;  %4187 = vadd.xlane.f32.xlu0 %v4186_v37 }
 0x7e7   : > { %v4126_v8 = vadd.f32 %v5645_v39, %v8709_v43 }
 0x7e8   : > { %v4117_v5 = vpop.f32.mrf.mxu1 }
 0x7e9   : > { %v4118_v45 = vadd.f32 %v8709_v43, %v4117_v5  ;;  %v8741_v62 = vadd.f32 %v6534_v19, %v4126_v8 }
 0x7ea   : > { %v5646_v60 = vpop.f32.mrf.mxu1  ;;  %4190 = vadd.xlane.f32.xlu0 %v4189_v53 }
 0x7eb   : > { %v8738_v35 = vadd.f32 %v6533_v30, %v4118_v45  ;;  %v4129_v33 = vadd.f32 %v5646_v60, %v8709_v43  ;;  %v4198_v12 = vsel %vm608_vm0, %v8741_v62, 0.0 }
 0x7ec   : > { %v4120_v23 = vpop.f32.mrf.mxu1 }
 0x7ed   : > { %v4121_v0 = vadd.f32 %v8709_v43, %v4120_v23  ;;  %v4192_v57 = vsel %vm608_vm0, %v8738_v35, 0.0  ;;  %v8751_v26 = vadd.f32 %v6536_v16, %v4129_v33 }
 0x7ee   : > { %4193 = vadd.xlane.f32.xlu0 %v4192_v57 }
 0x7ef   : > { %v8748_v6 = vadd.f32 %v6535_v41, %v4121_v0  ;;  %v4201_v55 = vsel %vm608_vm0, %v8751_v26, 0.0 }
 0x7f1   : > { %v4195_v15 = vsel %vm608_vm0, %v8748_v6, 0.0 }
 0x7f2   : > { %4196 = vadd.xlane.f32.xlu1 %v4195_v15  ;;  %4199 = vadd.xlane.f32.xlu0 %v4198_v12 }
 0x7f6   : > { %4202 = vadd.xlane.f32.xlu1 %v4201_v55 }
 0x7f7   : > { %v5649_v52 = vpop.f32.mrf.mxu1 }
 0x7f8   : > { %v4142_v25 = vadd.f32 %v5649_v52, %v8709_v43 }
 0x7f9   : > { %v4133_v47 = vpop.f32.mrf.mxu1 }
 0x7fa   : > { %v4134_v20 = vadd.f32 %v8709_v43, %v4133_v47  ;;  %v8766_v14 = vadd.f32 %v6538_v44, %v4142_v25 }
 0x7fb   : > { %v5650_v24 = vpop.f32.mrf.mxu1 }
 0x7fc   : > { %v8762_v36 = vadd.f32 %v6537_v59, %v4134_v20  ;;  %v4145_v21 = vadd.f32 %v5650_v24, %v8709_v43  ;;  %v4210_v1 = vsel %vm608_vm0, %v8766_v14, 0.0 }
 0x7fd   : > { %v4136_v61 = vpop.f32.mrf.mxu1 }
 0x7fe   : > { %v4137_v46 = vadd.f32 %v8709_v43, %v4136_v61  ;;  %v4204_v49 = vsel %vm608_vm0, %v8762_v36, 0.0  ;;  %v8775_v9 = vadd.f32 %v6540_v34, %v4145_v21 }
 0x7ff   : > { %v5653_v50 = vpop.f32.mrf.mxu1  ;;  %4205 = vadd.xlane.f32.xlu0 %v4204_v49 }
 0x800   : > { %v8772_v38 = vadd.f32 %v6539_v58, %v4137_v46  ;;  %v4158_v3 = vadd.f32 %v5653_v50, %v8709_v43  ;;  %v4213_v11 = vsel %vm608_vm0, %v8775_v9, 0.0 }
 0x801   : > { %v4149_v13 = vpop.f32.mrf.mxu1 }
 0x802   : > { %v4150_v28 = vadd.f32 %v8709_v43, %v4149_v13  ;;  %v4207_v7 = vsel %vm608_vm0, %v8772_v38, 0.0  ;;  %v8789_v18 = vadd.f32 %v6542_v40, %v4158_v3 }
 0x803   : > { %v5654_v54 = vpop.f32.mrf.mxu1  ;;  %4208 = vadd.xlane.f32.xlu1 %v4207_v7  ;;  %4211 = vadd.xlane.f32.xlu0 %v4210_v1 }
 0x804   : > { %v8784_v17 = vadd.f32 %v6541_v29, %v4150_v28  ;;  %v4161_v22 = vadd.f32 %v5654_v54, %v8709_v43  ;;  %v4222_v39 = vsel %vm608_vm0, %v8789_v18, 0.0 }
 0x805   : > { %v4152_v10 = vpop.f32.mrf.mxu1 }
 0x806   : > { %v4153_v51 = vadd.f32 %v8709_v43, %v4152_v10  ;;  %v4216_v48 = vsel %vm608_vm0, %v8784_v17, 0.0  ;;  %v8799_v56 = vadd.f32 %v6544_v2, %v4161_v22 }
 0x807   : > { %4214 = vadd.xlane.f32.xlu1 %v4213_v11  ;;  %4217 = vadd.xlane.f32.xlu0 %v4216_v48 }
 0x808   : > { %v8796_v31 = vadd.f32 %v6543_v27, %v4153_v51  ;;  %v4225_v43 = vsel %vm608_vm0, %v8799_v56, 0.0 }
 0x80a   : > { %v4219_v37 = vsel %vm608_vm0, %v8796_v31, 0.0 }
 0x80b   : > { %4220 = vadd.xlane.f32.xlu1 %v4219_v37  ;;  %4223 = vadd.xlane.f32.xlu0 %v4222_v39 }
 0x80f   : > { %4226 = vadd.xlane.f32.xlu1 %v4225_v43 }
 0x86b   : > { %v4182_v5 = vpop.xlane.xlu0 %4181 }
 0x86c   : > { %v4228_v8 = vmul.f32 0.03125, %v4182_v5 }
 0x86e   : > { %v8808_v45 = vsub.f32 %v8714_v32, %v4228_v8 }
 0x86f   : > { %v4185_v53 = vpop.xlane.xlu1 %4184  ;;  %v4188_v60 = vpop.xlane.xlu0 %4187 }
 0x870   : > { %v4229_v30 = vmul.f32 0.03125, %v4185_v53  ;;  %v4230_v23 = vmul.f32 0.03125, %v4188_v60  ;;  %v4260_v19 = vmul.f32 %v8808_v45, %v8808_v45 }
 0x872   : > { %v8813_v33 = vsub.f32 %v8724_v4, %v4229_v30  ;;  %v8816_v0 = vsub.f32 %v8717_v42, %v4230_v23  ;;  %v4276_v57 = vsel %vm608_vm0, %v4260_v19, 0.0 }
 0x873   : > { %4277 = vadd.xlane.f32.xlu0 %v4276_v57  ;;  %v4191_v41 = vpop.xlane.xlu0 %4190 }
 0x874   : > { %v4231_v16 = vmul.f32 0.03125, %v4191_v41  ;;  %v4261_v15 = vmul.f32 %v8813_v33, %v8813_v33  ;;  %v4262_v12 = vmul.f32 %v8816_v0, %v8816_v0 }
 0x876   : > { %v8824_v55 = vsub.f32 %v8727_v63, %v4231_v16  ;;  %v4279_v52 = vsel %vm608_vm0, %v4261_v15, 0.0  ;;  %v4282_v47 = vsel %vm608_vm0, %v4262_v12, 0.0 }
 0x877   : > { %4280 = vadd.xlane.f32.xlu1 %v4279_v52  ;;  %4283 = vadd.xlane.f32.xlu0 %v4282_v47  ;;  %v4194_v25 = vpop.xlane.xlu0 %4193 }
 0x878   : > { %v4232_v20 = vmul.f32 0.03125, %v4194_v25  ;;  %v4263_v24 = vmul.f32 %v8824_v55, %v8824_v55 }
 0x87a   : > { %v8831_v59 = vsub.f32 %v8738_v35, %v4232_v20  ;;  %v4285_v21 = vsel %vm608_vm0, %v4263_v24, 0.0 }
 0x87b   : > { %v4197_v61 = vpop.xlane.xlu1 %4196  ;;  %4286 = vadd.xlane.f32.xlu1 %v4285_v21  ;;  %v4200_v44 = vpop.xlane.xlu0 %4199 }
 0x87c   : > { %v4233_v46 = vmul.f32 0.03125, %v4197_v61  ;;  %v4234_v49 = vmul.f32 0.03125, %v4200_v44  ;;  %v4264_v50 = vmul.f32 %v8831_v59, %v8831_v59 }
 0x87e   : > { %v8837_v58 = vsub.f32 %v8748_v6, %v4233_v46  ;;  %v8840_v34 = vsub.f32 %v8741_v62, %v4234_v49  ;;  %v4288_v13 = vsel %vm608_vm0, %v4264_v50, 0.0 }
 0x87f   : > { %v4203_v3 = vpop.xlane.xlu1 %4202  ;;  %4289 = vadd.xlane.f32.xlu0 %v4288_v13  ;;  %v6167_v13 = vld [vmem:[%s9132_s10 + $0x8] sm:$0xff]  }
 0x880   : > { %v4235_v28 = vmul.f32 0.03125, %v4203_v3  ;;  %v4265_v7 = vmul.f32 %v8837_v58, %v8837_v58  ;;  %v4266_v1 = vmul.f32 %v8840_v34, %v8840_v34  ;;  %5655 = vmatprep.subr.bf16.mxu0 %v6167_v13 }
 0x881   : > { %5656 = vmatpush3.bf16.msra.mxu0 %v6167_v13 }
 0x882   : > { %v8848_v54 = vsub.f32 %v8751_v26, %v4235_v28  ;;  %v4291_v29 = vsel %vm608_vm0, %v4265_v7, 0.0  ;;  %v4294_v10 = vsel %vm608_vm0, %v4266_v1, 0.0 }
 0x883   : > { %4292 = vadd.xlane.f32.xlu1 %v4291_v29  ;;  %4295 = vadd.xlane.f32.xlu0 %v4294_v10 }
 0x884   : > { %v4267_v11 = vmul.f32 %v8848_v54, %v8848_v54 }
 0x886   : > { %v4297_v40 = vsel %vm608_vm0, %v4267_v11, 0.0 }
 0x887   : > { %4298 = vadd.xlane.f32.xlu1 %v4297_v40  ;;  %v6168_v40 = vld [vmem:[%s9132_s10] sm:$0xff]  }
 0x888   : > { %v4206_v22 = vpop.xlane.xlu0 %4205  ;;  %5657 = vmatprep.subr.bf16.mxu0 %v6168_v40 }
 0x889   : > { %v4236_v51 = vmul.f32 0.03125, %v4206_v22  ;;  %5658 = vmatpush3.bf16.msra.mxu0 %v6168_v40 }
 0x88b   : > { %v8856_v48 = vsub.f32 %v8762_v36, %v4236_v51 }
 0x88c   : > { %v4209_v27 = vpop.xlane.xlu1 %4208  ;;  %v4212_v2 = vpop.xlane.xlu0 %4211 }
 0x88d   : > { %v4237_v37 = vmul.f32 0.03125, %v4209_v27  ;;  %v4238_v39 = vmul.f32 0.03125, %v4212_v2  ;;  %v4268_v43 = vmul.f32 %v8856_v48, %v8856_v48 }
 0x88f   : > { %v8861_v5 = vsub.f32 %v8772_v38, %v4237_v37  ;;  %v8864_v8 = vsub.f32 %v8766_v14, %v4238_v39  ;;  %v4300_v53 = vsel %vm608_vm0, %v4268_v43, 0.0 }
 0x890   : > { %v4215_v60 = vpop.xlane.xlu1 %4214  ;;  %4301 = vadd.xlane.f32.xlu0 %v4300_v53  ;;  %v4218_v30 = vpop.xlane.xlu0 %4217 }
 0x891   : > { %v4239_v23 = vmul.f32 0.03125, %v4215_v60  ;;  %v4240_v19 = vmul.f32 0.03125, %v4218_v30  ;;  %v4269_v57 = vmul.f32 %v8861_v5, %v8861_v5  ;;  %v4270_v41 = vmul.f32 %v8864_v8, %v8864_v8 }
 0x893   : > { %v8872_v16 = vsub.f32 %v8775_v9, %v4239_v23  ;;  %v8875_v15 = vsub.f32 %v8784_v17, %v4240_v19  ;;  %v4303_v12 = vsel %vm608_vm0, %v4269_v57, 0.0  ;;  %v4306_v52 = vsel %vm608_vm0, %v4270_v41, 0.0 }
 0x894   : > { %v4221_v47 = vpop.xlane.xlu1 %4220  ;;  %4304 = vadd.xlane.f32.xlu1 %v4303_v12  ;;  %4307 = vadd.xlane.f32.xlu0 %v4306_v52  ;;  %v4224_v25 = vpop.xlane.xlu0 %4223 }
 0x895   : > { %v4241_v20 = vmul.f32 0.03125, %v4221_v47  ;;  %v4242_v24 = vmul.f32 0.03125, %v4224_v25  ;;  %v4271_v21 = vmul.f32 %v8872_v16, %v8872_v16  ;;  %v4272_v61 = vmul.f32 %v8875_v15, %v8875_v15 }
 0x897   : > { %v8884_v44 = vsub.f32 %v8796_v31, %v4241_v20  ;;  %v8887_v46 = vsub.f32 %v8789_v18, %v4242_v24  ;;  %v4309_v49 = vsel %vm608_vm0, %v4271_v21, 0.0  ;;  %v4312_v50 = vsel %vm608_vm0, %v4272_v61, 0.0 }
 0x898   : > { %v4227_v3 = vpop.xlane.xlu1 %4226  ;;  %4310 = vadd.xlane.f32.xlu1 %v4309_v49  ;;  %4313 = vadd.xlane.f32.xlu0 %v4312_v50 }
 0x899   : > { %v4243_v28 = vmul.f32 0.03125, %v4227_v3  ;;  %v4273_v7 = vmul.f32 %v8884_v44, %v8884_v44  ;;  %v4274_v1 = vmul.f32 %v8887_v46, %v8887_v46  ;;  %v8913_v3 = vld [vmem:[%s9130_s8] ss:$0 sm:$0xff] }
 0x89b   : > { %v8899_v29 = vsub.f32 %v8799_v56, %v4243_v28  ;;  %v4315_v10 = vsel %vm608_vm0, %v4273_v7, 0.0  ;;  %v4318_v11 = vsel %vm608_vm0, %v4274_v1, 0.0 }
 0x89c   : > { %4316 = vadd.xlane.f32.xlu1 %v4315_v10  ;;  %4319 = vadd.xlane.f32.xlu0 %v4318_v11 }
 0x89d   : > { %v4275_v22 = vmul.f32 %v8899_v29, %v8899_v29 }
 0x89f   : > { %v4321_v51 = vsel %vm608_vm0, %v4275_v22, 0.0 }
 0x8a0   : > { %4322 = vadd.xlane.f32.xlu1 %v4321_v51 }
 0x8fc   : > { %v4278_v27 = vpop.xlane.xlu0 %4277 }
 0x8fd   : > { %v4324_v2 = vmul.f32 0.03125, %v4278_v27 }
 0x8ff   : > { %v4340_v37 = vadd.f32 1e-05, %v4324_v2 }
 0x900   : > { %v4281_v39 = vpop.xlane.xlu1 %4280  ;;  %v4284_v43 = vpop.xlane.xlu0 %4283 }
 0x901   : > { %6465 = vrsqrt.f32 %v4340_v37  ;;  %v4325_v53 = vmul.f32 0.03125, %v4281_v39  ;;  %v4326_v60 = vmul.f32 0.03125, %v4284_v43 }
 0x903   : > { %v4341_v30 = vadd.f32 1e-05, %v4325_v53  ;;  %v4342_v23 = vadd.f32 1e-05, %v4326_v60 }
 0x904   : > { %v4287_v19 = vpop.xlane.xlu1 %4286 }
 0x905   : > { %6467 = vrsqrt.f32 %v4341_v30  ;;  %v4327_v57 = vmul.f32 0.03125, %v4287_v19 }
 0x906   : > { %6469 = vrsqrt.f32 %v4342_v23 }
 0x907   : > { %v4343_v41 = vadd.f32 1e-05, %v4327_v57 }
 0x908   : > { %v4290_v12 = vpop.xlane.xlu0 %4289 }
 0x909   : > { %6471 = vrsqrt.f32 %v4343_v41  ;;  %v4328_v52 = vmul.f32 0.03125, %v4290_v12 }
 0x90b   : > { %v4344_v47 = vadd.f32 1e-05, %v4328_v52 }
 0x90c   : > { %v4293_v25 = vpop.xlane.xlu1 %4292  ;;  %v4296_v20 = vpop.xlane.xlu0 %4295 }
 0x90d   : > { %6473 = vrsqrt.f32 %v4344_v47  ;;  %v4329_v24 = vmul.f32 0.03125, %v4293_v25  ;;  %v4330_v21 = vmul.f32 0.03125, %v4296_v20 }
 0x90e   : > { %v6466_v61 = vpop.eup %6465 }
 0x90f   : > { %v4345_v49 = vadd.f32 1e-05, %v4329_v24  ;;  %v4346_v50 = vadd.f32 1e-05, %v4330_v21  ;;  %v4372_v13 = vmul.f32 %v6466_v61, %v8808_v45  ;;  %v8921_v45 = vld [vmem:[%s9131_s9] ss:$0 sm:$0xff] }
 0x910   : > { %v4299_v28 = vpop.xlane.xlu1 %4298 }
 0x911   : > { %6475 = vrsqrt.f32 %v4345_v49  ;;  %v4331_v7 = vmul.f32 0.03125, %v4299_v28  ;;  %v4395_v22 = vmul.f32 %v8913_v3, %v4372_v13 }
 0x912   : > { %v6468_v1 = vpop.eup %6467  ;;  %6477 = vrsqrt.f32 %v4346_v50 }
 0x913   : > { %v6470_v10 = vpop.eup %6469  ;;  %v4347_v11 = vadd.f32 1e-05, %v4331_v7  ;;  %v4373_v40 = vmul.f32 %v6468_v1, %v8813_v33  ;;  %v4418_v43 = vadd.f32 %v8921_v45, %v4395_v22 }
 0x914   : > { %v4374_v51 = vmul.f32 %v6470_v10, %v8816_v0 }
 0x915   : > { %6479 = vrsqrt.f32 %v4347_v11  ;;  %v4396_v27 = vmul.f32 %v8913_v3, %v4373_v40 }
 0x916   : > { %v6472_v2 = vpop.eup %6471  ;;  %v4397_v37 = vmul.f32 %v8913_v3, %v4374_v51 }
 0x917   : > { %v4375_v39 = vmul.f32 %v6472_v2, %v8824_v55  ;;  %v4419_v33 = vadd.f32 %v8921_v45, %v4396_v27 }
 0x918   : > { %v4420_v19 = vadd.f32 %v8921_v45, %v4397_v37 }
 0x919   : > { %v4398_v53 = vmul.f32 %v8913_v3, %v4375_v39  ;;  %v4302_v0 = vpop.xlane.xlu0 %4301  ;;  %v4434_v60 = vpack.c.bf16 %v4419_v33, %v4418_v43 }
 0x91a   : > { %v6474_v30 = vpop.eup %6473  ;;  %v4332_v23 = vmul.f32 0.03125, %v4302_v0 }
 0x91b   : > { %5659 = vmatprep.mubr.msk.bf16.mxu0 %vm608_vm0, %v4434_v60  ;;  %v4421_v57 = vadd.f32 %v8921_v45, %v4398_v53  ;;  %v4376_v41 = vmul.f32 %v6474_v30, %v8831_v59 }
 0x91c   : > { %v4348_v12 = vadd.f32 1e-05, %v4332_v23 }
 0x91d   : > { %v4305_v55 = vpop.xlane.xlu1 %4304  ;;  %v4308_v52 = vpop.xlane.xlu0 %4307  ;;  %v4435_v47 = vpack.c.bf16 %v4421_v57, %v4420_v19  ;;  %v4399_v21 = vmul.f32 %v8913_v3, %v4376_v41 }
 0x91e   : > { %v6476_v25 = vpop.eup %6475  ;;  %6481 = vrsqrt.f32 %v4348_v12  ;;  %v4333_v20 = vmul.f32 0.03125, %v4305_v55  ;;  %v4334_v24 = vmul.f32 0.03125, %v4308_v52 }
 0x91f   : > { %v6478_v61 = vpop.eup %6477  ;;  %5660 = vmatmul.mubr.msk.bf16.vlgmr.msra.gmra.mxu0 %vm608_vm0, %v4435_v47  ;;  %v4377_v49 = vmul.f32 %v6476_v25, %v8837_v58  ;;  %v4422_v22 = vadd.f32 %v8921_v45, %v4399_v21 }
 0x920   : > { %v4349_v50 = vadd.f32 1e-05, %v4333_v20  ;;  %v4350_v13 = vadd.f32 1e-05, %v4334_v24  ;;  %v4378_v28 = vmul.f32 %v6478_v61, %v8840_v34 }
 0x921   : > { %v4311_v59 = vpop.xlane.xlu1 %4310  ;;  %v4314_v7 = vpop.xlane.xlu0 %4313  ;;  %v4400_v1 = vmul.f32 %v8913_v3, %v4377_v49 }
 0x922   : > { %v6480_v10 = vpop.eup %6479  ;;  %6483 = vrsqrt.f32 %v4349_v50  ;;  %v4335_v11 = vmul.f32 0.03125, %v4311_v59  ;;  %v4336_v40 = vmul.f32 0.03125, %v4314_v7  ;;  %v4401_v58 = vmul.f32 %v8913_v3, %v4378_v28 }
 0x923   : > { %6485 = vrsqrt.f32 %v4350_v13  ;;  %v4423_v51 = vadd.f32 %v8921_v45, %v4400_v1  ;;  %v4379_v27 = vmul.f32 %v6480_v10, %v8848_v54 }
 0x924   : > { %v4351_v2 = vadd.f32 1e-05, %v4335_v11  ;;  %v4352_v37 = vadd.f32 1e-05, %v4336_v40  ;;  %v4424_v60 = vadd.f32 %v8921_v45, %v4401_v58 }
 0x925   : > { %v4317_v34 = vpop.xlane.xlu1 %4316  ;;  %v4320_v39 = vpop.xlane.xlu0 %4319  ;;  %v4436_v43 = vpack.c.bf16 %v4423_v51, %v4422_v22  ;;  %v4402_v33 = vmul.f32 %v8913_v3, %v4379_v27 }
 0x926   : > { %6487 = vrsqrt.f32 %v4351_v2  ;;  %v4337_v53 = vmul.f32 0.03125, %v4317_v34  ;;  %v4338_v0 = vmul.f32 0.03125, %v4320_v39 }
 0x927   : > { %6489 = vrsqrt.f32 %v4352_v37  ;;  %5663 = vmatprep.mubr.msk.bf16.mxu0 %vm608_vm0, %v4436_v43  ;;  %v4425_v30 = vadd.f32 %v8921_v45, %v4402_v33 }
 0x928   : > { %v4353_v54 = vadd.f32 1e-05, %v4337_v53  ;;  %v4354_v23 = vadd.f32 1e-05, %v4338_v0  ;;  %v6169_v0 = vld [vmem:[%s9134_s12 + $0x38] sm:$0xff]  }
 0x929   : > { %v4323_v19 = vpop.xlane.xlu1 %4322  ;;  %v4437_v57 = vpack.c.bf16 %v4425_v30, %v4424_v60  ;;  %5675 = vmatprep.subr.bf16.mxu1 %v6169_v0  ;;  %v6173_v60 = vld [vmem:[%s9134_s12 + $0x18] sm:$0xff]   ;;  %v6174_v30 = vld [vmem:[%s9134_s12 + $0x10] sm:$0xff]  }
 0x92a   : > { %6491 = vrsqrt.f32 %v4353_v54  ;;  %v4339_v41 = vmul.f32 0.03125, %v4323_v19  ;;  %5676 = vmatpush3.bf16.msra.mxu1 %v6169_v0  ;;  %v6175_v54 = vld [vmem:[%s9134_s12 + $0x8] sm:$0xff]   ;;  %v9002_v19 = vld [vmem:[%s9133_s11] ss:$0 sm:$0xff] }
 0x92b   : > { %v6482_v12 = vpop.eup %6481  ;;  %6493 = vrsqrt.f32 %v4354_v23  ;;  %5664 = vmatmul.mubr.msk.bf16.gmra.mxu0 %vm608_vm0, %v4437_v57  ;;  %v6176_v23 = vld [vmem:[%s9134_s12] sm:$0xff]  }
 0x92c   : > { %v4355_v55 = vadd.f32 1e-05, %v4339_v41  ;;  %v4380_v52 = vmul.f32 %v6482_v12, %v8856_v48 }
 0x92e   : > { %6495 = vrsqrt.f32 %v4355_v55  ;;  %v4403_v24 = vmul.f32 %v8913_v3, %v4380_v52 }
 0x92f   : > { %v6484_v47 = vpop.eup %6483 }
 0x930   : > { %v6486_v25 = vpop.eup %6485  ;;  %v4381_v20 = vmul.f32 %v6484_v47, %v8861_v5  ;;  %v4426_v13 = vadd.f32 %v8921_v45, %v4403_v24 }
 0x931   : > { %v4382_v21 = vmul.f32 %v6486_v25, %v8864_v8 }
 0x932   : > { %v4404_v61 = vmul.f32 %v8913_v3, %v4381_v20 }
 0x933   : > { %v6488_v49 = vpop.eup %6487  ;;  %v4405_v48 = vmul.f32 %v8913_v3, %v4382_v21 }
 0x934   : > { %v6490_v50 = vpop.eup %6489  ;;  %v4427_v28 = vadd.f32 %v8921_v45, %v4404_v61  ;;  %v4383_v59 = vmul.f32 %v6488_v49, %v8872_v16 }
 0x935   : > { %v4384_v7 = vmul.f32 %v6490_v50, %v8875_v15  ;;  %v4428_v8 = vadd.f32 %v8921_v45, %v4405_v48 }
 0x936   : > { %v4438_v1 = vpack.c.bf16 %v4427_v28, %v4426_v13  ;;  %v4406_v5 = vmul.f32 %v8913_v3, %v4383_v59 }
 0x937   : > { %v6492_v10 = vpop.eup %6491  ;;  %v4407_v51 = vmul.f32 %v8913_v3, %v4384_v7 }
 0x938   : > { %v6494_v11 = vpop.eup %6493  ;;  %5667 = vmatprep.mubr.msk.bf16.mxu0 %vm608_vm0, %v4438_v1  ;;  %v4429_v40 = vadd.f32 %v8921_v45, %v4406_v5  ;;  %v4385_v22 = vmul.f32 %v6492_v10, %v8884_v44 }
 0x939   : > { %v4386_v16 = vmul.f32 %v6494_v11, %v8887_v46  ;;  %v4430_v2 = vadd.f32 %v8921_v45, %v4407_v51 }
 0x93a   : > { %v4439_v27 = vpack.c.bf16 %v4429_v40, %v4428_v8  ;;  %v4408_v15 = vmul.f32 %v8913_v3, %v4385_v22 }
 0x93b   : > { %v6496_v58 = vpop.eup %6495  ;;  %v4409_v39 = vmul.f32 %v8913_v3, %v4386_v16 }
 0x93c   : > { %5668 = vmatmul.mubr.msk.bf16.gmra.mxu0 %vm608_vm0, %v4439_v27  ;;  %v4431_v37 = vadd.f32 %v8921_v45, %v4408_v15  ;;  %v4387_v34 = vmul.f32 %v6496_v58, %v8899_v29  ;;  %v6170_v29 = vld [vmem:[%s9134_s12 + $0x30] sm:$0xff]  }
 0x93d   : > { %v4432_v46 = vadd.f32 %v8921_v45, %v4409_v39  ;;  %5677 = vmatprep.subr.bf16.mxu1 %v6170_v29 }
 0x93e   : > { %v4440_v43 = vpack.c.bf16 %v4431_v37, %v4430_v2  ;;  %v4410_v44 = vmul.f32 %v8913_v3, %v4387_v34  ;;  %5678 = vmatpush3.bf16.msra.mxu1 %v6170_v29  ;;  %v6171_v3 = vld [vmem:[%s9134_s12 + $0x28] sm:$0xff]  }
 0x93f   : > { %5679 = vmatprep.subr.bf16.mxu1 %v6171_v3 }
 0x940   : > { %5671 = vmatprep.mubr.msk.bf16.mxu0 %vm608_vm0, %v4440_v43  ;;  %v4433_v33 = vadd.f32 %v8921_v45, %v4410_v44  ;;  %v6172_v45 = vld [vmem:[%s9134_s12 + $0x20] sm:$0xff]  }
 0x942   : > { %v4441_v53 = vpack.c.bf16 %v4433_v33, %v4432_v46  ;;  %5680 = vmatpush3.bf16.msra.mxu1 %v6171_v3 }
 0x943   : > { %5681 = vmatprep.subr.bf16.mxu1 %v6172_v45 }
 0x944   : > { %5672 = vmatmul.mubr.msk.bf16.gmra.mxu0 %vm608_vm0, %v4441_v53 }
 0x946   : > { %5682 = vmatpush3.bf16.msra.mxu1 %v6172_v45 }
 0x947   : > { %5683 = vmatprep.subr.bf16.mxu1 %v6173_v60 }
 0x94a   : > { %5684 = vmatpush3.bf16.msra.mxu1 %v6173_v60 }
 0x94b   : > { %5685 = vmatprep.subr.bf16.mxu1 %v6174_v30 }
 0x94e   : > { %5686 = vmatpush3.bf16.msra.mxu1 %v6174_v30 }
 0x94f   : > { %5687 = vmatprep.subr.bf16.mxu1 %v6175_v54 }
 0x952   : > { %5688 = vmatpush3.bf16.msra.mxu1 %v6175_v54 }
 0x953   : > { %5689 = vmatprep.subr.bf16.mxu1 %v6176_v23 }
 0x956   : > { %5690 = vmatpush3.bf16.msra.mxu1 %v6176_v23 }
 0x9df   : > { %v5661_v57 = vpop.f32.mrf.mxu0 }
 0x9e0   : > { %v4532_v41 = vadd.f32 %v5661_v57, %v9002_v19 }
 0x9e1   : > { %v4523_v12 = vpop.f32.mrf.mxu0 }
 0x9e2   : > { %v4524_v55 = vadd.f32 %v9002_v19, %v4523_v12  ;;  %v4604_v52 = vmul.f32 0.70710677, %v4532_v41  ;;  %v4588_v44 = vmul.f32 0.5, %v4532_v41 }
 0x9e3   : > { %v5662_v47 = vpop.f32.mrf.mxu0 }
 0x9e4   : > { %v4602_v25 = vmul.f32 0.70710677, %v4524_v55  ;;  %v4535_v20 = vadd.f32 %v5662_v47, %v9002_v19  ;;  %v4586_v34 = vmul.f32 0.5, %v4524_v55 }
 0x9e5   : > { %v4526_v24 = vpop.f32.mrf.mxu0 }
 0x9e6   : > { %6497 = verf.f32 %v4602_v25  ;;  %v4605_v21 = vmul.f32 0.70710677, %v4535_v20  ;;  %v4527_v61 = vadd.f32 %v9002_v19, %v4526_v24  ;;  %v4589_v37 = vmul.f32 0.5, %v4535_v20 }
 0x9e7   : > { %6499 = verf.f32 %v4604_v52 }
 0x9e8   : > { %6501 = verf.f32 %v4605_v21  ;;  %v4603_v49 = vmul.f32 0.70710677, %v4527_v61  ;;  %v4587_v39 = vmul.f32 0.5, %v4527_v61 }
 0x9ea   : > { %6503 = verf.f32 %v4603_v49 }
 0x9eb   : > { %v5665_v50 = vpop.f32.mrf.mxu0 }
 0x9ec   : > { %v4548_v13 = vadd.f32 %v5665_v50, %v9002_v19 }
 0x9ed   : > { %v4539_v28 = vpop.f32.mrf.mxu0 }
 0x9ee   : > { %v4608_v59 = vmul.f32 0.70710677, %v4548_v13  ;;  %v4540_v48 = vadd.f32 %v9002_v19, %v4539_v28 }
 0x9ef   : > { %v5666_v7 = vpop.f32.mrf.mxu0 }
 0x9f0   : > { %v4606_v1 = vmul.f32 0.70710677, %v4540_v48  ;;  %v4551_v5 = vadd.f32 %v5666_v7, %v9002_v19  ;;  %6505 = verf.f32 %v4608_v59  ;;  %v4590_v28 = vmul.f32 0.5, %v4540_v48 }
 0x9f1   : > { %v4542_v10 = vpop.f32.mrf.mxu0 }
 0x9f2   : > { %v4609_v11 = vmul.f32 0.70710677, %v4551_v5  ;;  %6507 = verf.f32 %v4606_v1  ;;  %v4543_v40 = vadd.f32 %v9002_v19, %v4542_v10  ;;  %v4593_v59 = vmul.f32 0.5, %v4551_v5 }
 0x9f3   : > { %v6498_v8 = vpop.eup %6497 }
 0x9f4   : > { %v6500_v22 = vpop.eup %6499  ;;  %6509 = verf.f32 %v4609_v11  ;;  %v4607_v16 = vmul.f32 0.70710677, %v4543_v40  ;;  %v4634_v27 = vadd.f32 1.0, %v6498_v8  ;;  %v4591_v1 = vmul.f32 0.5, %v4543_v40 }
 0x9f5   : > { %v6502_v51 = vpop.eup %6501  ;;  %v4636_v2 = vadd.f32 1.0, %v6500_v22  ;;  %v4592_v8 = vmul.f32 0.5, %v4548_v13 }
 0x9f6   : > { %v4637_v15 = vadd.f32 1.0, %v6502_v51  ;;  %6511 = verf.f32 %v4607_v16  ;;  %v4650_v33 = vmul.f32 %v4634_v27, %v4586_v34 }
 0x9f7   : > { %v6504_v58 = vpop.eup %6503  ;;  %v4652_v0 = vmul.f32 %v4636_v2, %v4588_v44 }
 0x9f8   : > { %v4635_v43 = vadd.f32 1.0, %v6504_v58  ;;  %v4653_v46 = vmul.f32 %v4637_v15, %v4589_v37 }
 0x9fa   : > { %v4651_v53 = vmul.f32 %v4635_v43, %v4587_v39  ;;  %v4667_v45 = vpack.c.bf16 %v4653_v46, %v4652_v0 }
 0x9fc   : > { %v5669_v29 = vpop.f32.mrf.mxu0  ;;  %v4666_v3 = vpack.c.bf16 %v4651_v53, %v4650_v33 }
 0x9fd   : > { %v9013_v60 = vadd.f32 %v5669_v29, %v9002_v19  ;;  %v6506_v54 = vpop.eup %6505 }
 0x9fe   : > { %v4555_v30 = vpop.f32.mrf.mxu0  ;;  %5691 = vmatprep.mubr.bf16.mxu1 %v4666_v3  ;;  %v4640_v50 = vadd.f32 1.0, %v6506_v54 }
 0x9ff   : > { %v4556_v23 = vadd.f32 %v9002_v19, %v4555_v30  ;;  %5692 = vmatmul.mubr.bf16.vlgmr.msra.gmra.mxu1 %v4667_v45  ;;  %v6508_v57 = vpop.eup %6507  ;;  %v4612_v12 = vmul.f32 0.70710677, %v9013_v60 }
 0xa00   : > { %v5670_v41 = vpop.f32.mrf.mxu0  ;;  %v4638_v24 = vadd.f32 1.0, %v6508_v57  ;;  %v4656_v2 = vmul.f32 %v4640_v50, %v4592_v8 }
 0xa01   : > { %v6510_v55 = vpop.eup %6509  ;;  %v4610_v52 = vmul.f32 0.70710677, %v4556_v23  ;;  %v4567_v47 = vadd.f32 %v5670_v41, %v9002_v19  ;;  %v4594_v57 = vmul.f32 0.5, %v4556_v23 }
 0xa02   : > { %v4641_v25 = vadd.f32 1.0, %v6510_v55  ;;  %v4558_v20 = vpop.f32.mrf.mxu0  ;;  %v4654_v27 = vmul.f32 %v4638_v24, %v4590_v28  ;;  %v4596_v55 = vmul.f32 0.5, %v9013_v60 }
 0xa03   : > { %6513 = verf.f32 %v4610_v52  ;;  %v4613_v21 = vmul.f32 0.70710677, %v4567_v47  ;;  %v4559_v61 = vadd.f32 %v9002_v19, %v4558_v20  ;;  %v6512_v49 = vpop.eup %6511  ;;  %v4597_v54 = vmul.f32 0.5, %v4567_v47 }
 0xa04   : > { %6515 = verf.f32 %v4612_v12  ;;  %v5673_v7 = vpop.f32.mrf.mxu0  ;;  %v4639_v10 = vadd.f32 1.0, %v6512_v49  ;;  %v4657_v22 = vmul.f32 %v4641_v25, %v4593_v59 }
 0xa05   : > { %6517 = verf.f32 %v4613_v21  ;;  %v4611_v11 = vmul.f32 0.70710677, %v4559_v61  ;;  %v4580_v51 = vadd.f32 %v5673_v7, %v9002_v19  ;;  %v4595_v12 = vmul.f32 0.5, %v4559_v61 }
 0xa06   : > { %v4571_v16 = vpop.f32.mrf.mxu0  ;;  %v4655_v15 = vmul.f32 %v4639_v10, %v4591_v1  ;;  %v4669_v43 = vpack.c.bf16 %v4657_v22, %v4656_v2 }
 0xa07   : > { %6519 = verf.f32 %v4611_v11  ;;  %v4572_v58 = vadd.f32 %v9002_v19, %v4571_v16  ;;  %v4616_v37 = vmul.f32 0.70710677, %v4580_v51  ;;  %v4600_v60 = vmul.f32 0.5, %v4580_v51 }
 0xa08   : > { %v5674_v48 = vpop.f32.mrf.mxu0  ;;  %v4668_v40 = vpack.c.bf16 %v4655_v15, %v4654_v27 }
 0xa09   : > { %v4614_v5 = vmul.f32 0.70710677, %v4572_v58  ;;  %v4583_v34 = vadd.f32 %v5674_v48, %v9002_v19  ;;  %v4598_v23 = vmul.f32 0.5, %v4572_v58 }
 0xa0a   : > { %v4574_v39 = vpop.f32.mrf.mxu0  ;;  %5695 = vmatprep.mubr.bf16.mxu1 %v4668_v40 }
 0xa0b   : > { %6521 = verf.f32 %v4614_v5  ;;  %v4617_v13 = vmul.f32 0.70710677, %v4583_v34  ;;  %v4575_v44 = vadd.f32 %v9002_v19, %v4574_v39  ;;  %5696 = vmatmul.mubr.bf16.gmra.mxu1 %v4669_v43  ;;  %v4601_v47 = vmul.f32 0.5, %v4583_v34 }
 0xa0c   : > { %6523 = verf.f32 %v4616_v37  ;;  %v5171_v37 = vld [vmem:[%s9284_s13] ss:$0 sm:$0xff] }
 0xa0d   : > { %6525 = verf.f32 %v4617_v13  ;;  %v4615_v46 = vmul.f32 0.70710677, %v4575_v44  ;;  %v4599_v61 = vmul.f32 0.5, %v4575_v44 }
 0xa0f   : > { %6527 = verf.f32 %v4615_v46 }
 0xa10   : > { %v6514_v33 = vpop.eup %6513 }
 0xa11   : > { %v6516_v53 = vpop.eup %6515  ;;  %v4642_v29 = vadd.f32 1.0, %v6514_v33 }
 0xa12   : > { %v6518_v0 = vpop.eup %6517  ;;  %v4644_v30 = vadd.f32 1.0, %v6516_v53 }
 0xa13   : > { %v4645_v3 = vadd.f32 1.0, %v6518_v0  ;;  %v4658_v52 = vmul.f32 %v4642_v29, %v4594_v57 }
 0xa14   : > { %v6520_v45 = vpop.eup %6519  ;;  %v4660_v24 = vmul.f32 %v4644_v30, %v4596_v55 }
 0xa15   : > { %v4643_v41 = vadd.f32 1.0, %v6520_v45  ;;  %v4661_v19 = vmul.f32 %v4645_v3, %v4597_v54 }
 0xa17   : > { %v4659_v25 = vmul.f32 %v4643_v41, %v4595_v12  ;;  %v4671_v28 = vpack.c.bf16 %v4661_v19, %v4660_v24 }
 0xa18   : > { %v6522_v20 = vpop.eup %6521 }
 0xa19   : > { %v6524_v21 = vpop.eup %6523  ;;  %v4670_v49 = vpack.c.bf16 %v4659_v25, %v4658_v52  ;;  %v4646_v59 = vadd.f32 1.0, %v6522_v20 }
 0xa1a   : > { %v6526_v50 = vpop.eup %6525  ;;  %v4648_v10 = vadd.f32 1.0, %v6524_v21 }
 0xa1b   : > { %v4649_v7 = vadd.f32 1.0, %v6526_v50  ;;  %5699 = vmatprep.mubr.bf16.mxu1 %v4670_v49  ;;  %v4662_v22 = vmul.f32 %v4646_v59, %v4598_v23 }
 0xa1c   : > { %v6528_v1 = vpop.eup %6527  ;;  %5700 = vmatmul.mubr.bf16.gmra.mxu1 %v4671_v28  ;;  %v4664_v27 = vmul.f32 %v4648_v10, %v4600_v60 }
 0xa1d   : > { %v4647_v11 = vadd.f32 1.0, %v6528_v1  ;;  %v4665_v8 = vmul.f32 %v4649_v7, %v4601_v47 }
 0xa1f   : > { %v4663_v16 = vmul.f32 %v4647_v11, %v4599_v61  ;;  %v4673_v2 = vpack.c.bf16 %v4665_v8, %v4664_v27 }
 0xa21   : > { %v4672_v15 = vpack.c.bf16 %v4663_v16, %v4662_v22 }
 0xa23   : > { %5703 = vmatprep.mubr.bf16.mxu1 %v4672_v15 }
 0xa24   : > { %5704 = vmatmul.mubr.bf16.gmra.mxu1 %v4673_v2 }
 0xabf   : > { %v5693_v48 = vpop.f32.mrf.mxu1 }
 0xac0   : > { %v4788_v5 = vadd.f32 %v5693_v48, %v5171_v37 }
 0xac1   : > { %v4779_v34 = vpop.f32.mrf.mxu1 }
 0xac2   : > { %v4844_v58 = vadd.f32 %v4788_v5, %v8717_v42  ;;  %v4780_v40 = vadd.f32 %v5171_v37, %v4779_v34 }
 0xac3   : > { %v5694_v51 = vpop.f32.mrf.mxu1 }
 0xac4   : > { %4860 = vst.msk [vmem:[%s9029_s29 + $0x10] sm:$0xff] %vm608_vm0, %v4844_v58  ;;  %v4842_v39 = vadd.f32 %v4780_v40, %v8714_v32  ;;  %v4791_v43 = vadd.f32 %v5694_v51, %v5171_v37 }
 0xac5   : > { %v4782_v13 = vpop.f32.mrf.mxu1 }
 0xac6   : > { %4858 = vst.msk [vmem:[%s9029_s29] sm:$0xff] %vm608_vm0, %v4842_v39  ;;  %v4845_v42 = vadd.f32 %v4791_v43, %v8727_v63  ;;  %v4783_v44 = vadd.f32 %v5171_v37, %v4782_v13 }
 0xac8   : > { %4861 = vst.msk [vmem:[%s9029_s29 + $0x18] sm:$0xff] %vm608_vm0, %v4845_v42  ;;  %v4843_v46 = vadd.f32 %v4783_v44, %v8724_v4 }
 0xaca   : > { %4859 = vst.msk [vmem:[%s9029_s29 + $0x8] sm:$0xff] %vm608_vm0, %v4843_v46 }
 0xacb   : > { %v5697_v33 = vpop.f32.mrf.mxu1 }
 0xacc   : > { %v4804_v53 = vadd.f32 %v5697_v33, %v5171_v37 }
 0xacd   : > { %v4795_v0 = vpop.f32.mrf.mxu1 }
 0xace   : > { %v4848_v32 = vadd.f32 %v4804_v53, %v8741_v62  ;;  %v4796_v29 = vadd.f32 %v5171_v37, %v4795_v0 }
 0xacf   : > { %v5698_v3 = vpop.f32.mrf.mxu1 }
 0xad0   : > { %4864 = vst.msk [vmem:[%s9029_s29 + $0x30] sm:$0xff] %vm608_vm0, %v4848_v32  ;;  %v4846_v63 = vadd.f32 %v4796_v29, %v8738_v35  ;;  %v4807_v45 = vadd.f32 %v5698_v3, %v5171_v37 }
 0xad1   : > { %v4798_v30 = vpop.f32.mrf.mxu1 }
 0xad2   : > { %4862 = vst.msk [vmem:[%s9029_s29 + $0x20] sm:$0xff] %vm608_vm0, %v4846_v63  ;;  %v4849_v4 = vadd.f32 %v4807_v45, %v8751_v26  ;;  %v4799_v54 = vadd.f32 %v5171_v37, %v4798_v30 }
 0xad4   : > { %4865 = vst.msk [vmem:[%s9029_s29 + $0x38] sm:$0xff] %vm608_vm0, %v4849_v4  ;;  %v4847_v57 = vadd.f32 %v4799_v54, %v8748_v6 }
 0xad6   : > { %4863 = vst.msk [vmem:[%s9029_s29 + $0x28] sm:$0xff] %vm608_vm0, %v4847_v57 }
 0xad7   : > { %v4958_v61 = vld [vmem:[%s9029_s29 + $0x30] sm:$0xff] (%p6732_p6) }
 0xad8   : > { %4959 = vst [vmem:[%s4887_s25 + $0x60] sm:$0xff] (%p6732_p6), %v4958_v61 }
 0xad9   : > { %v4954_v47 = vld [vmem:[%s9029_s29 + $0x20] sm:$0xff] (%p6732_p6) }
 0xada   : > { %4955 = vst [vmem:[%s4887_s25 + $0x40] sm:$0xff] (%p6732_p6), %v4954_v47 }
 0xadb   : > { %v4960_v11 = vld [vmem:[%s9029_s29 + $0x38] sm:$0xff] (%p6732_p6) }
 0xadc   : > { %v5701_v62 = vpop.f32.mrf.mxu1  ;;  %4961 = vst [vmem:[%s4887_s25 + $0x70] sm:$0xff] (%p6732_p6), %v4960_v11 }
 0xadd   : > { %v4820_v12 = vadd.f32 %v5701_v62, %v5171_v37  ;;  %v4956_v23 = vld [vmem:[%s9029_s29 + $0x28] sm:$0xff] (%p6732_p6) }
 0xade   : > { %v4811_v41 = vpop.f32.mrf.mxu1  ;;  %4957 = vst [vmem:[%s4887_s25 + $0x50] sm:$0xff] (%p6732_p6), %v4956_v23 }
 0xadf   : > { %v4852_v35 = vadd.f32 %v4820_v12, %v8766_v14  ;;  %v4812_v55 = vadd.f32 %v5171_v37, %v4811_v41 }
 0xae0   : > { %v5702_v19 = vpop.f32.mrf.mxu1 }
 0xae1   : > { %4868 = vst.msk [vmem:[%s9029_s29 + $0x50] sm:$0xff] %vm608_vm0, %v4852_v35  ;;  %v4850_v26 = vadd.f32 %v4812_v55, %v8762_v36  ;;  %v4823_v52 = vadd.f32 %v5702_v19, %v5171_v37 }
 0xae2   : > { %v4814_v25 = vpop.f32.mrf.mxu1 }
 0xae3   : > { %4866 = vst.msk [vmem:[%s9029_s29 + $0x40] sm:$0xff] %vm608_vm0, %v4850_v26  ;;  %v4853_v6 = vadd.f32 %v4823_v52, %v8775_v9  ;;  %v4815_v20 = vadd.f32 %v5171_v37, %v4814_v25 }
 0xae4   : > { %v5705_v24 = vpop.f32.mrf.mxu1 }
 0xae5   : > { %4869 = vst.msk [vmem:[%s9029_s29 + $0x58] sm:$0xff] %vm608_vm0, %v4853_v6  ;;  %v4851_v14 = vadd.f32 %v4815_v20, %v8772_v38  ;;  %v4836_v21 = vadd.f32 %v5705_v24, %v5171_v37 }
 0xae6   : > { %v4827_v49 = vpop.f32.mrf.mxu1 }
 0xae7   : > { %4867 = vst.msk [vmem:[%s9029_s29 + $0x48] sm:$0xff] %vm608_vm0, %v4851_v14  ;;  %v4856_v36 = vadd.f32 %v4836_v21, %v8789_v18  ;;  %v4828_v50 = vadd.f32 %v5171_v37, %v4827_v49  ;;  %v4948_v18 = vld [vmem:[%s9029_s29 + $0x8] sm:$0xff] (%p6732_p6) }
 0xae8   : > { %v5706_v28 = vpop.f32.mrf.mxu1  ;;  %v4966_v22 = vld [vmem:[%s9029_s29 + $0x50] sm:$0xff] (%p6732_p6)  ;;  %4949 = vst [vmem:[%s4887_s25 + $0x10] sm:$0xff] (%p6732_p6), %v4948_v18 }
 0xae9   : > { %4872 = vst.msk [vmem:[%s9029_s29 + $0x70] sm:$0xff] %vm608_vm0, %v4856_v36  ;;  %v4854_v9 = vadd.f32 %v4828_v50, %v8784_v17  ;;  %v4839_v59 = vadd.f32 %v5706_v28, %v5171_v37  ;;  %v4946_v17 = vld [vmem:[%s9029_s29] sm:$0xff] (%p6732_p6)  ;;  %4967 = vst [vmem:[%s4887_s25 + $0xa0] sm:$0xff] (%p6732_p6), %v4966_v22 }
 0xaea   : > { %v4830_v7 = vpop.f32.mrf.mxu1  ;;  %v4962_v60 = vld [vmem:[%s9029_s29 + $0x40] sm:$0xff] (%p6732_p6)  ;;  %4947 = vst [vmem:[%s4887_s25] sm:$0xff] (%p6732_p6), %v4946_v17 }
 0xaeb   : > { %4870 = vst.msk [vmem:[%s9029_s29 + $0x60] sm:$0xff] %vm608_vm0, %v4854_v9  ;;  %v4857_v1 = vadd.f32 %v4839_v59, %v8799_v56  ;;  %v4831_v38 = vadd.f32 %v5171_v37, %v4830_v7  ;;  %4880 = sbr.rel (!%p6732_p6) target bundleno = 2808 (0xaf8), region = 118  ;;  %v4952_v56 = vld [vmem:[%s9029_s29 + $0x18] sm:$0xff] (%p6732_p6)  ;;  %4963 = vst [vmem:[%s4887_s25 + $0x80] sm:$0xff] (%p6732_p6), %v4962_v60 }
 0xaec   : > { %v4968_v16 = vld [vmem:[%s9029_s29 + $0x58] sm:$0xff] (%p6732_p6)  ;;  %4953 = vst [vmem:[%s4887_s25 + $0x30] sm:$0xff] (%p6732_p6), %v4952_v56 }
 0xaed   : > { %4873 = vst.msk [vmem:[%s9029_s29 + $0x78] sm:$0xff] %vm608_vm0, %v4857_v1  ;;  %v4855_v10 = vadd.f32 %v4831_v38, %v8796_v31  ;;  %v4950_v31 = vld [vmem:[%s9029_s29 + $0x10] sm:$0xff] (%p6732_p6)  ;;  %4969 = vst [vmem:[%s4887_s25 + $0xb0] sm:$0xff] (%p6732_p6), %v4968_v16 }
 0xaee   : > { %v4964_v8 = vld [vmem:[%s9029_s29 + $0x48] sm:$0xff] (%p6732_p6)  ;;  %4951 = vst [vmem:[%s4887_s25 + $0x20] sm:$0xff] (%p6732_p6), %v4950_v31 }
 0xaef   : > { %4871 = vst.msk [vmem:[%s9029_s29 + $0x68] sm:$0xff] %vm608_vm0, %v4855_v10  ;;  %4965 = vst [vmem:[%s4887_s25 + $0x90] sm:$0xff] (%p6732_p6), %v4964_v8 }
 0xaf0   : > { %v4974_v2 = vld [vmem:[%s9029_s29 + $0x70] sm:$0xff] }
 0xaf1   : > { %4975 = vst [vmem:[%s4887_s25 + $0xe0] sm:$0xff] %v4974_v2 }
 0xaf2   : > { %v4970_v27 = vld [vmem:[%s9029_s29 + $0x60] sm:$0xff] }
 0xaf3   : > { %4971 = vst [vmem:[%s4887_s25 + $0xc0] sm:$0xff] %v4970_v27 }
 0xaf4   : > { %v4976_v37 = vld [vmem:[%s9029_s29 + $0x78] sm:$0xff] }
 0xaf5   : > { %4977 = vst [vmem:[%s4887_s25 + $0xf0] sm:$0xff] %v4976_v37 }
 0xaf6   : > { %v4972_v15 = vld [vmem:[%s9029_s29 + $0x68] sm:$0xff] }
 0xaf7   : > { %4973 = vst [vmem:[%s4887_s25 + $0xd0] sm:$0xff] %v4972_v15 }
 0xaf8 PF: > { %s24_s19 = sadd.s32 1, %s6599_s19   ;;  %s9289_s13 = sld [smem:[#allocation6_spill]] }
 0xaf9   : > { %p21_p12 = scmp.ge.s32.totalorder %s24_s19, 6   ;;  %s9290_s29 = smov %s6579_s30 }
 0xafa   : > { %s9291_s30 = smov %s6740_s28  ;;  %s9292_s15 = smov %s6591_s17 }
 0xafb   : > { %s9293_s16 = smov %s6595_s18  ;;  %s9295_s18 = smov %s9301_s21 }
 0xafc   :  { %23 = sbr.rel (!%p21_p12) target bundleno = 7 (0x7), region = 187 }
 0xafe   : > { %s9294_s17 = smov %s9289_s13 }

// kernel: transformer_blocks_forward.3
= control target key start
LH: loop header
LB: loop body
LE: loop exit
PB: predicated region body
PF: predicated region fallthrough
CT: control target
= control target key end

     0   :  { %s9622_s0 = inlined_call_operand.vmem [shape: f32[2,16,16,32], index: 0, kind: input, shape index: {}, may-alias: {0,15}]   ;;  %s9623_s1 = inlined_call_operand.vmem [shape: f32[2,2,64,64], index: 1, kind: input, shape index: {}]   ;;  %s9624_s2 = inlined_call_operand.vmem [shape: f32[4,64,64], index: 2, kind: input, shape index: {}]   ;;  %s9625_s3 = inlined_call_operand.vmem [shape: f32[1,32], index: 3, kind: input, shape index: {}]   ;;  %s9626_s4 = inlined_call_operand.vmem [shape: f32[1,32], index: 4, kind: input, shape index: {}]   ;;  %s9627_s5 = inlined_call_operand.vmem [shape: bf16[32,96], index: 5, kind: input, shape index: {}]   ;;  %s9628_s6 = inlined_call_operand.vmem [shape: f32[1,96], index: 6, kind: input, shape index: {}]   ;;  %s9629_s7 = inlined_call_operand.vmem [shape: bf16[32,32], index: 7, kind: input, shape index: {}]   ;;  %s9630_s8 = inlined_call_operand.vmem [shape: f32[1,32], index: 8, kind: input, shape index: {}]   ;;  %s9631_s9 = inlined_call_operand.vmem [shape: f32[1,32], index: 9, kind: input, shape index: {}]   ;;  %s9632_s10 = inlined_call_operand.vmem [shape: f32[1,32], index: 10, kind: input, shape index: {}]   ;;  %s9633_s11 = inlined_call_operand.vmem [shape: bf16[32,128], index: 11, kind: input, shape index: {}]   ;;  %s9634_s12 = inlined_call_operand.vmem [shape: f32[1,128], index: 12, kind: input, shape index: {}]   ;;  %s9635_s13 = inlined_call_operand.vmem [shape: bf16[128,32], index: 13, kind: input, shape index: {}]   ;;  %s9636_s14 = inlined_call_operand.vmem [shape: f32[1,32], index: 14, kind: input, shape index: {}]   ;;  %s9637_s15 = inlined_call_operand.vmem [shape: f32[2,16,16,32], index: 15, kind: output, shape index: {}, may-alias: {0,15}]  }
   0x1   :  { %9695 = sst [smem:[#allocation55_spill]] %s9634_s12 }
   0x2   :  { %9696 = sst [smem:[#allocation56_spill]] %s9635_s13 }
   0x3   :  { %9697 = sst [smem:[#allocation57_spill]] %s9636_s14 }
   0x4   :  { %9698 = sst [smem:[#allocation58_spill]] %s9637_s15 }
   0x5   :  { %s6976_s18 = smov 0   ;;  %s6978_s19 = smov 0  }
   0x6   :  { %s6980_s20 = smov 0   ;;  %s6982_s21 = smov 0  }
   0x7   :  { %s6984_s22 = smov 0   ;;  %s6986_s23 = smov 0  }
   0x8   :  { %s6988_s24 = smov 0   ;;  %s6990_s25 = smov 0  }
   0x9   :  { %s6992_s26 = smov 0  }
   0xa LB: > { %9699 = sst [smem:[#allocation5_spill]] %s6870_s22  ;;  %s5310_s27 = sadd.s32 4294967295, %s6886_s26   ;;  %s6886_s26 = sphi %s6992_s26, %s25_s26   ;;  %s6882_s25 = sphi %s6990_s25, %s9832_s25   ;;  %s6878_s24 = sphi %s6988_s24, %s9831_s24   ;;  %s6874_s23 = sphi %s6986_s23, %s9830_s23   ;;  %s6870_s22 = sphi %s6984_s22, %s9829_s22   ;;  %s6866_s21 = sphi %s6982_s21, %s9828_s21   ;;  %s6862_s20 = sphi %s6980_s20, %s9827_s20   ;;  %s6858_s19 = sphi %s6978_s19, %s9826_s19   ;;  %s6854_s18 = sphi %s6976_s18, %s9825_s18  }
   0xb   : > { %9700 = sst [smem:[#allocation6_spill]] %s6874_s23  ;;  %s37_s28 = sadd.s32 1, %s6878_s24 }
   0xc   : > { %p38_p0 = scmp.ge.s32.totalorder %s37_s28, 2  ;;  %s44_s29 = sadd.s32 1, %s6882_s25 }
   0xd   : > { %s55_s30 = sadd.s32 1, %s6866_s21  ;;  %p62_p1 = scmp.ne.s32.totalorder %s6866_s21, %s6862_s20 }
   0xe   : > { %s9834_s28 = smov (%p38_p0, %s37_s28), 0  ;;  %s9836_s29 = smov (!%p38_p0, %s44_s29), %s6882_s25 }
   0xf   : > { %9701 = sst [smem:[#allocation7_spill]] %s9834_s28  ;;  %s51_s16 = ssub.s32 %s6878_s24, %s9834_s28 }
  0x10   : > { %p63_p2 = scmp.eq.s32.totalorder %s6886_s26, 0  ;;  %p46_p3 = scmp.ge.s32.totalorder %s9836_s29, 2 }
  0x11   : > { %p81_p4 = scmp.eq.s32.totalorder %s51_s16, 0  ;;  %s83_s15 = sadd.s32 1, %s6858_s19 }
  0x12   : > { %p7036_p5 = por %p63_p2, %p62_p1  ;;  %s9838_s29 = smov (%p46_p3, %s9836_s29), 0 }
  0x13   : > { %9703 = sst [smem:[#allocation8_spill]] %s9838_s29  ;;  %s48_s23 = ssub.s32 %s6882_s25, %s9838_s29 }
  0x14   : > { %s7044_s22 = scalar_select %p81_p4, %s6858_s19, %s83_s15  }
  0x15   : > { %p90_p6 = scmp.ne.s32.totalorder %s6858_s19, %s6854_s18  ;;  %s52_s14 = sor.u32 %s51_s16, %s48_s23 }
  0x16   : > { %9704 = sst [smem:[#allocation9_spill]] %s7044_s22  ;;  %p397_p7 = scmp.eq.s32.totalorder %s5310_s27, 3 }
  0x17   : > { %p53_p8 = scmp.eq.s32.totalorder %s52_s14, 0  ;;  %p7050_p9 = por %p90_p6, %p63_p2 }
  0x18   : > { %p7057_p10 = por %p397_p7, %p62_p1  ;;  %p5313_p11 = scmp.ge.s32.totalorder %s6886_s26, 4 }
  0x19   : > { %s7062_s13 = scalar_select %p53_p8, %s6866_s21, %s55_s30  }
  0x1a   : > { %s9706_s12 = scalar_select %p7057_p10, 1, 0 }
  0x1b   : > { %458 = sbr.rel (%p5313_p11) target bundleno = 58 (0x3a), region = 68 }
  0x1c   : > { %9707 = sst [smem:[#allocation10_spill]] %s9706_s12 }
  0x20   : > { %461 = sbr.rel (!%p7036_p5) target bundleno = 46 (0x2e), region = 72  ;;  %s463_s14 = sand.u32 (%p7036_p5), 1, %s6866_s21  }
  0x21   : > { %s5315_s15 = sshll.u32 (%p7036_p5), %s6882_s25, 5  ;;  %s5314_s23 = sshll.u32 (%p7036_p5), %s463_s14, 7 }
  0x22   : > { %s470_s27 = sadd.s32 (%p7036_p5), %s6878_s24, %s5315_s15  ;;  %s465_s30 = scalar_lea.vmem (%p7036_p5), [#allocation2], %s5314_s23 }
  0x23   : > { %s5316_s16 = sshll.u32 (%p7036_p5), %s470_s27, 3 }
  0x24   : > { %s7073_s12 = scalar_lea.vmem (%p7036_p5), %s9622_s0, %s5316_s16 }
  0x25   : > { %v531_v0 = vld [vmem:[%s7073_s12] sm:$0xff]  ;;  %v533_v1 = vld [vmem:[%s7073_s12 + $0x10] sm:$0xff] }
  0x26   : > { %v535_v2 = vld [vmem:[%s7073_s12 + $0x20] sm:$0xff]  ;;  %532 = vst [vmem:[%s465_s30] sm:$0xff] %v531_v0  ;;  %534 = vst [vmem:[%s465_s30 + $0x8] sm:$0xff] %v533_v1  ;;  %v537_v3 = vld [vmem:[%s7073_s12 + $0x30] sm:$0xff] }
  0x27   : > { %536 = vst [vmem:[%s465_s30 + $0x10] sm:$0xff] %v535_v2  ;;  %v539_v4 = vld [vmem:[%s7073_s12 + $0x40] sm:$0xff]  ;;  %v541_v5 = vld [vmem:[%s7073_s12 + $0x50] sm:$0xff]  ;;  %538 = vst [vmem:[%s465_s30 + $0x18] sm:$0xff] %v537_v3 }
  0x28   : > { %540 = vst [vmem:[%s465_s30 + $0x20] sm:$0xff] %v539_v4  ;;  %542 = vst [vmem:[%s465_s30 + $0x28] sm:$0xff] %v541_v5  ;;  %v543_v6 = vld [vmem:[%s7073_s12 + $0x60] sm:$0xff]  ;;  %v545_v7 = vld [vmem:[%s7073_s12 + $0x70] sm:$0xff] }
  0x29   : > { %v547_v8 = vld [vmem:[%s7073_s12 + $0x80] sm:$0xff]  ;;  %544 = vst [vmem:[%s465_s30 + $0x30] sm:$0xff] %v543_v6  ;;  %546 = vst [vmem:[%s465_s30 + $0x38] sm:$0xff] %v545_v7  ;;  %v549_v9 = vld [vmem:[%s7073_s12 + $0x90] sm:$0xff] }
  0x2a   : > { %548 = vst [vmem:[%s465_s30 + $0x40] sm:$0xff] %v547_v8  ;;  %v551_v10 = vld [vmem:[%s7073_s12 + $0xa0] sm:$0xff]  ;;  %v553_v11 = vld [vmem:[%s7073_s12 + $0xb0] sm:$0xff]  ;;  %550 = vst [vmem:[%s465_s30 + $0x48] sm:$0xff] %v549_v9 }
  0x2b   : > { %552 = vst [vmem:[%s465_s30 + $0x50] sm:$0xff] %v551_v10  ;;  %554 = vst [vmem:[%s465_s30 + $0x58] sm:$0xff] %v553_v11  ;;  %v555_v12 = vld [vmem:[%s7073_s12 + $0xc0] sm:$0xff]  ;;  %v557_v13 = vld [vmem:[%s7073_s12 + $0xd0] sm:$0xff] }
  0x2c   : > { %v559_v14 = vld [vmem:[%s7073_s12 + $0xe0] sm:$0xff]  ;;  %556 = vst [vmem:[%s465_s30 + $0x60] sm:$0xff] %v555_v12  ;;  %558 = vst [vmem:[%s465_s30 + $0x68] sm:$0xff] %v557_v13  ;;  %v561_v15 = vld [vmem:[%s7073_s12 + $0xf0] sm:$0xff] }
  0x2d   : > { %560 = vst [vmem:[%s465_s30 + $0x70] sm:$0xff] %v559_v14  ;;  %562 = vst [vmem:[%s465_s30 + $0x78] sm:$0xff] %v561_v15 }
  0x2e PF: > { %568 = sbr.rel (!%p7050_p9) target bundleno = 58 (0x3a), region = 110  ;;  %s570_s22 = sand.u32 (%p7050_p9), 1, %s6858_s19  }
  0x2f   : > { %s5439_s29 = sshll.u32 (%p7050_p9), %s6878_s24, 6  ;;  %s5317_s17 = sshll.u32 (%p7050_p9), %s570_s22, 7 }
  0x30   : > { %s7098_s23 = scalar_lea.vmem (%p7050_p9), %s9623_s1, %s5439_s29  ;;  %s572_s12 = scalar_lea.vmem (%p7050_p9), [#allocation3], %s5317_s17 }
  0x31   : > { %v637_v16 = vld [vmem:[%s7098_s23] sm:$0xff] (%p7050_p9)  ;;  %v639_v17 = vld [vmem:[%s7098_s23 + $0x8] sm:$0xff] (%p7050_p9)  ;;  %v641_v18 = vld [vmem:[%s7098_s23 + $0x10] sm:$0xff] (%p7050_p9) }
  0x32   : > { %638 = vst [vmem:[%s572_s12] sm:$0xff] (%p7050_p9), %v637_v16  ;;  %640 = vst [vmem:[%s572_s12 + $0x8] sm:$0xff] (%p7050_p9), %v639_v17  ;;  %v643_v19 = vld [vmem:[%s7098_s23 + $0x18] sm:$0xff] (%p7050_p9)  ;;  %v645_v20 = vld [vmem:[%s7098_s23 + $0x20] sm:$0xff] (%p7050_p9) }
  0x33   : > { %642 = vst [vmem:[%s572_s12 + $0x10] sm:$0xff] %v641_v18  ;;  %v647_v21 = vld [vmem:[%s7098_s23 + $0x28] sm:$0xff]  ;;  %644 = vst [vmem:[%s572_s12 + $0x18] sm:$0xff] %v643_v19  ;;  %v649_v22 = vld [vmem:[%s7098_s23 + $0x30] sm:$0xff] }
  0x34   : > { %646 = vst [vmem:[%s572_s12 + $0x20] sm:$0xff] %v645_v20  ;;  %648 = vst [vmem:[%s572_s12 + $0x28] sm:$0xff] %v647_v21  ;;  %v651_v23 = vld [vmem:[%s7098_s23 + $0x38] sm:$0xff]  ;;  %v653_v24 = vld [vmem:[%s7098_s23 + $0x80] sm:$0xff] }
  0x35   : > { %650 = vst [vmem:[%s572_s12 + $0x30] sm:$0xff] %v649_v22  ;;  %652 = vst [vmem:[%s572_s12 + $0x38] sm:$0xff] %v651_v23  ;;  %v655_v25 = vld [vmem:[%s7098_s23 + $0x88] sm:$0xff]  ;;  %v657_v26 = vld [vmem:[%s7098_s23 + $0x90] sm:$0xff] }
  0x36   : > { %654 = vst [vmem:[%s572_s12 + $0x40] sm:$0xff] %v653_v24  ;;  %v659_v27 = vld [vmem:[%s7098_s23 + $0x98] sm:$0xff]  ;;  %656 = vst [vmem:[%s572_s12 + $0x48] sm:$0xff] %v655_v25  ;;  %v661_v28 = vld [vmem:[%s7098_s23 + $0xa0] sm:$0xff] }
  0x37   : > { %658 = vst [vmem:[%s572_s12 + $0x50] sm:$0xff] %v657_v26  ;;  %660 = vst [vmem:[%s572_s12 + $0x58] sm:$0xff] %v659_v27  ;;  %v663_v29 = vld [vmem:[%s7098_s23 + $0xa8] sm:$0xff]  ;;  %v665_v30 = vld [vmem:[%s7098_s23 + $0xb0] sm:$0xff] }
  0x38   : > { %662 = vst [vmem:[%s572_s12 + $0x60] sm:$0xff] %v661_v28  ;;  %664 = vst [vmem:[%s572_s12 + $0x68] sm:$0xff] %v663_v29  ;;  %v667_v31 = vld [vmem:[%s7098_s23 + $0xb8] sm:$0xff] }
  0x39   : > { %666 = vst [vmem:[%s572_s12 + $0x70] sm:$0xff] %v665_v30  ;;  %668 = vst [vmem:[%s572_s12 + $0x78] sm:$0xff] %v667_v31 }
  0x3a PF: > { %p5320_p12 = scmp.ge.s32.totalorder %s6886_s26, 1  ;;  %p673_p13 = scmp.lt.s32.totalorder %s6886_s26, 5 }
  0x3c   : > { %p674_p0 = pnand %p5320_p12, %p673_p13 }
  0x3e   : > { %677 = sbr.rel (%p674_p0) target bundleno = 2826 (0xb0a), region = 148 }
  0x43   : > { %s680_s28 = sand.u32 1, %s6862_s20   ;;  %vm757_vm0 = vcmask 261120   ;;  %s6888_s20 = smov 120   ;;  %vm1577_vm1 = vcmask 64512   ;;  %vm2550_vm2 = vcmask 523264   ;;  %vm4207_vm3 = vcmask 130048  }
  0x44   : > { %s7119_s27 = sshll.u32 %s680_s28, 7  ;;  %s6889_s30 = smov 112   ;;  %vm4224_vm4 = vcmask 195584  }
  0x45   : > { %s7122_s16 = scalar_lea.vmem [#allocation2], %s7119_s27  ;;  %s6890_s22 = smov 96  }
  0x46   : > { %v741_v32 = vld [vmem:[%s7122_s16] sm:$0xff]  ;;  %v743_v33 = vld [vmem:[%s7122_s16 + $0x10] sm:$0xff]  ;;  %v742_v34 = vld [vmem:[%s7122_s16 + $0x8] sm:$0xff]  ;;  %s6891_s29 = smov 104   ;;  %s6892_s17 = smov 64  }
  0x47   : > { %v758_v35 = vsel %vm757_vm0, %v741_v32, 0.0  ;;  %v764_v36 = vsel %vm757_vm0, %v743_v33, 0.0  ;;  %v744_v37 = vld [vmem:[%s7122_s16 + $0x18] sm:$0xff]  ;;  %v7131_v38 = vld [vmem:[%s7122_s16 + $0x20] sm:$0xff]  ;;  %v7134_v39 = vld [vmem:[%s7122_s16 + $0x28] sm:$0xff]  ;;  %v761_v40 = vsel %vm757_vm0, %v742_v34, 0.0 }
  0x48   : > { %759 = vadd.xlane.f32.xlu0 %v758_v35  ;;  %765 = vadd.xlane.f32.xlu1 %v764_v36  ;;  %v767_v41 = vsel %vm757_vm0, %v744_v37, 0.0  ;;  %v7139_v42 = vld [vmem:[%s7122_s16 + $0x30] sm:$0xff]  ;;  %v7142_v43 = vld [vmem:[%s7122_s16 + $0x38] sm:$0xff]  ;;  %v770_v44 = vsel %vm757_vm0, %v7131_v38, 0.0  ;;  %v773_v45 = vsel %vm757_vm0, %v7134_v39, 0.0  ;;  %v7153_v48 = vld [vmem:[%s7122_s16 + $0x40] sm:$0xff] }
  0x49   : > { %v776_v46 = vsel %vm757_vm0, %v7139_v42, 0.0  ;;  %v779_v47 = vsel %vm757_vm0, %v7142_v43, 0.0  ;;  %v7156_v49 = vld [vmem:[%s7122_s16 + $0x48] sm:$0xff]  ;;  %v782_v50 = vsel %vm757_vm0, %v7153_v48, 0.0  ;;  %v7163_v52 = vld [vmem:[%s7122_s16 + $0x50] sm:$0xff]  ;;  %v7166_v53 = vld [vmem:[%s7122_s16 + $0x58] sm:$0xff] }
  0x4a   : > { %v785_v51 = vsel %vm757_vm0, %v7156_v49, 0.0  ;;  %v788_v54 = vsel %vm757_vm0, %v7163_v52, 0.0  ;;  %v791_v55 = vsel %vm757_vm0, %v7166_v53, 0.0  ;;  %v7173_v56 = vld [vmem:[%s7122_s16 + $0x60] sm:$0xff]  ;;  %v7176_v57 = vld [vmem:[%s7122_s16 + $0x68] sm:$0xff]  ;;  %v7183_v60 = vld [vmem:[%s7122_s16 + $0x70] sm:$0xff] }
  0x4b   : > { %v794_v58 = vsel %vm757_vm0, %v7173_v56, 0.0  ;;  %v797_v59 = vsel %vm757_vm0, %v7176_v57, 0.0  ;;  %v7186_v61 = vld [vmem:[%s7122_s16 + $0x78] sm:$0xff]  ;;  %v800_v62 = vsel %vm757_vm0, %v7183_v60, 0.0  ;;  %s687_s14 = sand.u32 1, %s6854_s18   ;;  %s6895_s18 = smov 24  }
  0x4c   : > { %762 = vadd.xlane.f32.xlu0 %v761_v40  ;;  %768 = vadd.xlane.f32.xlu1 %v767_v41  ;;  %v803_v63 = vsel %vm757_vm0, %v7186_v61, 0.0  ;;  %s5322_s15 = sshll.u32 %s687_s14, 7  ;;  %s9814_s23 = sld [smem:[#allocation56_spill]] }
  0x4d   : > { %s7920_s12 = scalar_lea.vmem [#allocation3], %s5322_s15  ;;  %s9817_s15 = sld [smem:[#allocation57_spill]] }
  0x50   : > { %771 = vadd.xlane.f32.xlu0 %v770_v44  ;;  %774 = vadd.xlane.f32.xlu1 %v773_v45 }
  0x52   : > { %s9815_s28 = smov %s9814_s23 }
  0x54   : > { %777 = vadd.xlane.f32.xlu0 %v776_v46  ;;  %780 = vadd.xlane.f32.xlu1 %v779_v47 }
  0x58   : > { %783 = vadd.xlane.f32.xlu0 %v782_v50  ;;  %786 = vadd.xlane.f32.xlu1 %v785_v51 }
  0x5c   : > { %789 = vadd.xlane.f32.xlu0 %v788_v54  ;;  %792 = vadd.xlane.f32.xlu1 %v791_v55 }
  0x60   : > { %795 = vadd.xlane.f32.xlu0 %v794_v58  ;;  %798 = vadd.xlane.f32.xlu1 %v797_v59 }
  0x64   : > { %801 = vadd.xlane.f32.xlu0 %v800_v62  ;;  %804 = vadd.xlane.f32.xlu1 %v803_v63 }
  0xd1   : > { %v760_v0 = vpop.xlane.xlu0 %759  ;;  %v766_v1 = vpop.xlane.xlu1 %765 }
  0xd2   : > { %v807_v2 = vmul.f32 0.03125, %v760_v0  ;;  %v809_v3 = vmul.f32 0.03125, %v766_v1 }
  0xd4   : > { %v7192_v4 = vsub.f32 %v741_v32, %v807_v2  ;;  %v7194_v5 = vsub.f32 %v743_v33, %v809_v3 }
  0xd5   : > { %v763_v6 = vpop.xlane.xlu0 %762  ;;  %v769_v7 = vpop.xlane.xlu1 %768 }
  0xd6   : > { %v808_v8 = vmul.f32 0.03125, %v763_v6  ;;  %v810_v9 = vmul.f32 0.03125, %v769_v7  ;;  %v839_v10 = vmul.f32 %v7192_v4, %v7192_v4  ;;  %v841_v11 = vmul.f32 %v7194_v5, %v7194_v5 }
  0xd8   : > { %v7200_v12 = vsub.f32 %v742_v34, %v808_v8  ;;  %v7202_v13 = vsub.f32 %v744_v37, %v810_v9  ;;  %v855_v14 = vsel %vm757_vm0, %v839_v10, 0.0  ;;  %v861_v17 = vsel %vm757_vm0, %v841_v11, 0.0 }
  0xd9   : > { %856 = vadd.xlane.f32.xlu0 %v855_v14  ;;  %v772_v15 = vpop.xlane.xlu0 %771  ;;  %v775_v16 = vpop.xlane.xlu1 %774 }
  0xda   : > { %v811_v18 = vmul.f32 0.03125, %v772_v15  ;;  %v812_v19 = vmul.f32 0.03125, %v775_v16  ;;  %v840_v20 = vmul.f32 %v7200_v12, %v7200_v12  ;;  %v842_v21 = vmul.f32 %v7202_v13, %v7202_v13 }
  0xdc   : > { %v7211_v22 = vsub.f32 %v7131_v38, %v811_v18  ;;  %v7214_v23 = vsub.f32 %v7134_v39, %v812_v19  ;;  %v858_v24 = vsel %vm757_vm0, %v840_v20, 0.0  ;;  %v864_v27 = vsel %vm757_vm0, %v842_v21, 0.0  ;;  %v6435_v21 = vld [vmem:[%s9627_s5] sm:$0xff]  }
  0xdd   : > { %862 = vadd.xlane.f32.xlu0 %v861_v17  ;;  %859 = vadd.xlane.f32.xlu1 %v858_v24  ;;  %v778_v25 = vpop.xlane.xlu0 %777  ;;  %v781_v26 = vpop.xlane.xlu1 %780 }
  0xde   : > { %v813_v28 = vmul.f32 0.03125, %v778_v25  ;;  %v814_v29 = vmul.f32 0.03125, %v781_v26  ;;  %v843_v30 = vmul.f32 %v7211_v22, %v7211_v22  ;;  %v844_v31 = vmul.f32 %v7214_v23, %v7214_v23 }
  0xe0   : > { %v7223_v32 = vsub.f32 %v7139_v42, %v813_v28  ;;  %v7226_v33 = vsub.f32 %v7142_v43, %v814_v29  ;;  %v867_v34 = vsel %vm757_vm0, %v843_v30, 0.0  ;;  %v870_v37 = vsel %vm757_vm0, %v844_v31, 0.0 }
  0xe1   : > { %865 = vadd.xlane.f32.xlu1 %v864_v27  ;;  %868 = vadd.xlane.f32.xlu0 %v867_v34  ;;  %v784_v35 = vpop.xlane.xlu0 %783  ;;  %v787_v36 = vpop.xlane.xlu1 %786 }
  0xe2   : > { %v815_v38 = vmul.f32 0.03125, %v784_v35  ;;  %v816_v39 = vmul.f32 0.03125, %v787_v36  ;;  %v845_v40 = vmul.f32 %v7223_v32, %v7223_v32  ;;  %v846_v41 = vmul.f32 %v7226_v33, %v7226_v33 }
  0xe4   : > { %v7235_v42 = vsub.f32 %v7153_v48, %v815_v38  ;;  %v7238_v43 = vsub.f32 %v7156_v49, %v816_v39  ;;  %v873_v44 = vsel %vm757_vm0, %v845_v40, 0.0  ;;  %v876_v47 = vsel %vm757_vm0, %v846_v41, 0.0 }
  0xe5   : > { %871 = vadd.xlane.f32.xlu1 %v870_v37  ;;  %874 = vadd.xlane.f32.xlu0 %v873_v44  ;;  %v790_v45 = vpop.xlane.xlu0 %789  ;;  %v793_v46 = vpop.xlane.xlu1 %792 }
  0xe6   : > { %v817_v50 = vmul.f32 0.03125, %v790_v45  ;;  %v818_v51 = vmul.f32 0.03125, %v793_v46  ;;  %v847_v54 = vmul.f32 %v7235_v42, %v7235_v42  ;;  %v848_v48 = vmul.f32 %v7238_v43, %v7238_v43 }
  0xe8   : > { %v7247_v55 = vsub.f32 %v7163_v52, %v817_v50  ;;  %v7250_v49 = vsub.f32 %v7166_v53, %v818_v51  ;;  %v879_v58 = vsel %vm757_vm0, %v847_v54, 0.0  ;;  %v882_v63 = vsel %vm757_vm0, %v848_v48, 0.0 }
  0xe9   : > { %877 = vadd.xlane.f32.xlu1 %v876_v47  ;;  %880 = vadd.xlane.f32.xlu0 %v879_v58  ;;  %v796_v59 = vpop.xlane.xlu0 %795  ;;  %v799_v62 = vpop.xlane.xlu1 %798 }
  0xea   : > { %v819_v0 = vmul.f32 0.03125, %v796_v59  ;;  %v820_v1 = vmul.f32 0.03125, %v799_v62  ;;  %v849_v2 = vmul.f32 %v7247_v55, %v7247_v55  ;;  %v850_v52 = vmul.f32 %v7250_v49, %v7250_v49 }
  0xec   : > { %v7259_v3 = vsub.f32 %v7173_v56, %v819_v0  ;;  %v7262_v53 = vsub.f32 %v7176_v57, %v820_v1  ;;  %v885_v6 = vsel %vm757_vm0, %v849_v2, 0.0  ;;  %v888_v9 = vsel %vm757_vm0, %v850_v52, 0.0  ;;  %v7294_v1 = vld [vmem:[%s9625_s3] ss:$0 sm:$0xff] }
  0xed   : > { %883 = vadd.xlane.f32.xlu1 %v882_v63  ;;  %886 = vadd.xlane.f32.xlu0 %v885_v6  ;;  %v802_v7 = vpop.xlane.xlu0 %801  ;;  %v805_v8 = vpop.xlane.xlu1 %804 }
  0xee   : > { %v821_v10 = vmul.f32 0.03125, %v802_v7  ;;  %v822_v11 = vmul.f32 0.03125, %v805_v8  ;;  %v851_v14 = vmul.f32 %v7259_v3, %v7259_v3  ;;  %v852_v56 = vmul.f32 %v7262_v53, %v7262_v53 }
  0xf0   : > { %v7271_v15 = vsub.f32 %v7183_v60, %v821_v10  ;;  %v7274_v57 = vsub.f32 %v7186_v61, %v822_v11  ;;  %v891_v16 = vsel %vm757_vm0, %v851_v14, 0.0  ;;  %v894_v17 = vsel %vm757_vm0, %v852_v56, 0.0  ;;  %v6434_v61 = vld [vmem:[%s9627_s5 + $0x8] sm:$0xff]  }
  0xf1   : > { %889 = vadd.xlane.f32.xlu1 %v888_v9  ;;  %892 = vadd.xlane.f32.xlu0 %v891_v16 }
  0xf2   : > { %v853_v18 = vmul.f32 %v7271_v15, %v7271_v15  ;;  %v854_v19 = vmul.f32 %v7274_v57, %v7274_v57  ;;  %5614 = vmatprep.subr.bf16.mxu0 %v6434_v61 }
  0xf3   : > { %5615 = vmatpush3.bf16.msra.mxu0 %v6434_v61 }
  0xf4   : > { %v897_v20 = vsel %vm757_vm0, %v853_v18, 0.0  ;;  %v900_v60 = vsel %vm757_vm0, %v854_v19, 0.0  ;;  %5616 = vmatprep.subr.bf16.mxu0 %v6435_v21 }
  0xf5   : > { %895 = vadd.xlane.f32.xlu1 %v894_v17  ;;  %898 = vadd.xlane.f32.xlu0 %v897_v20 }
  0xf7   : > { %5617 = vmatpush3.bf16.msra.mxu0 %v6435_v21 }
  0xf9   : > { %901 = vadd.xlane.f32.xlu1 %v900_v60 }
 0x162   : > { %v857_v24 = vpop.xlane.xlu0 %856 }
 0x163   : > { %v903_v25 = vmul.f32 0.03125, %v857_v24 }
 0x165   : > { %v919_v26 = vadd.f32 1e-05, %v903_v25 }
 0x166   : > { %v860_v27 = vpop.xlane.xlu1 %859  ;;  %v863_v28 = vpop.xlane.xlu0 %862 }
 0x167   : > { %6448 = vrsqrt.f32 %v919_v26  ;;  %v904_v29 = vmul.f32 0.03125, %v860_v27  ;;  %v905_v30 = vmul.f32 0.03125, %v863_v28 }
 0x169   : > { %v920_v31 = vadd.f32 1e-05, %v904_v29  ;;  %v921_v34 = vadd.f32 1e-05, %v905_v30 }
 0x16a   : > { %v866_v35 = vpop.xlane.xlu1 %865  ;;  %v869_v36 = vpop.xlane.xlu0 %868 }
 0x16b   : > { %6450 = vrsqrt.f32 %v920_v31  ;;  %v906_v37 = vmul.f32 0.03125, %v866_v35  ;;  %v907_v38 = vmul.f32 0.03125, %v869_v36 }
 0x16c   : > { %6452 = vrsqrt.f32 %v921_v34 }
 0x16d   : > { %v922_v39 = vadd.f32 1e-05, %v906_v37  ;;  %v923_v40 = vadd.f32 1e-05, %v907_v38 }
 0x16e   : > { %v872_v41 = vpop.xlane.xlu1 %871  ;;  %v875_v44 = vpop.xlane.xlu0 %874 }
 0x16f   : > { %6454 = vrsqrt.f32 %v922_v39  ;;  %v908_v45 = vmul.f32 0.03125, %v872_v41  ;;  %v909_v46 = vmul.f32 0.03125, %v875_v44 }
 0x170   : > { %6456 = vrsqrt.f32 %v923_v40 }
 0x171   : > { %v924_v47 = vadd.f32 1e-05, %v908_v45  ;;  %v925_v50 = vadd.f32 1e-05, %v909_v46 }
 0x172   : > { %v878_v51 = vpop.xlane.xlu1 %877  ;;  %v881_v54 = vpop.xlane.xlu0 %880 }
 0x173   : > { %6458 = vrsqrt.f32 %v924_v47  ;;  %v910_v48 = vmul.f32 0.03125, %v878_v51  ;;  %v911_v58 = vmul.f32 0.03125, %v881_v54 }
 0x174   : > { %v6449_v59 = vpop.eup %6448  ;;  %6460 = vrsqrt.f32 %v925_v50 }
 0x175   : > { %v926_v62 = vadd.f32 1e-05, %v910_v48  ;;  %v927_v63 = vadd.f32 1e-05, %v911_v58  ;;  %v951_v0 = vmul.f32 %v6449_v59, %v7192_v4  ;;  %v7301_v4 = vld [vmem:[%s9626_s4] ss:$0 sm:$0xff] }
 0x176   : > { %v884_v2 = vpop.xlane.xlu1 %883  ;;  %v887_v52 = vpop.xlane.xlu0 %886 }
 0x177   : > { %6462 = vrsqrt.f32 %v926_v62  ;;  %v912_v6 = vmul.f32 0.03125, %v884_v2  ;;  %v913_v7 = vmul.f32 0.03125, %v887_v52  ;;  %v974_v9 = vmul.f32 %v7294_v1, %v951_v0 }
 0x178   : > { %v6451_v8 = vpop.eup %6450  ;;  %6464 = vrsqrt.f32 %v927_v63 }
 0x179   : > { %v6453_v10 = vpop.eup %6452  ;;  %v928_v11 = vadd.f32 1e-05, %v912_v6  ;;  %v929_v14 = vadd.f32 1e-05, %v913_v7  ;;  %v952_v56 = vmul.f32 %v6451_v8, %v7200_v12  ;;  %v997_v21 = vadd.f32 %v7301_v4, %v974_v9 }
 0x17a   : > { %v890_v16 = vpop.xlane.xlu1 %889  ;;  %v893_v17 = vpop.xlane.xlu0 %892  ;;  %v953_v18 = vmul.f32 %v6453_v10, %v7194_v5 }
 0x17b   : > { %6466 = vrsqrt.f32 %v928_v11  ;;  %v914_v19 = vmul.f32 0.03125, %v890_v16  ;;  %v915_v20 = vmul.f32 0.03125, %v893_v17  ;;  %v975_v60 = vmul.f32 %v7294_v1, %v952_v56 }
 0x17c   : > { %v6455_v61 = vpop.eup %6454  ;;  %6468 = vrsqrt.f32 %v929_v14  ;;  %v976_v5 = vmul.f32 %v7294_v1, %v953_v18 }
 0x17d   : > { %v6457_v24 = vpop.eup %6456  ;;  %v930_v12 = vadd.f32 1e-05, %v914_v19  ;;  %v931_v25 = vadd.f32 1e-05, %v915_v20  ;;  %v998_v26 = vadd.f32 %v7301_v4, %v975_v60  ;;  %v954_v27 = vmul.f32 %v6455_v61, %v7202_v13 }
 0x17e   : > { %v896_v28 = vpop.xlane.xlu1 %895  ;;  %v899_v29 = vpop.xlane.xlu0 %898  ;;  %v955_v30 = vmul.f32 %v6457_v24, %v7211_v22  ;;  %v999_v22 = vadd.f32 %v7301_v4, %v976_v5 }
 0x17f   : > { %6470 = vrsqrt.f32 %v930_v12  ;;  %v916_v31 = vmul.f32 0.03125, %v896_v28  ;;  %v917_v34 = vmul.f32 0.03125, %v899_v29  ;;  %v1013_v35 = vpack.c.bf16 %v998_v26, %v997_v21 }
 0x180   : > { %v6459_v36 = vpop.eup %6458  ;;  %6472 = vrsqrt.f32 %v931_v25  ;;  %v977_v37 = vmul.f32 %v7294_v1, %v954_v27  ;;  %v978_v38 = vmul.f32 %v7294_v1, %v955_v30 }
 0x181   : > { %v6461_v39 = vpop.eup %6460  ;;  %v932_v40 = vadd.f32 1e-05, %v916_v31  ;;  %v933_v41 = vadd.f32 1e-05, %v917_v34  ;;  %5618 = vmatprep.mubr.msk.bf16.mxu0 %vm757_vm0, %v1013_v35  ;;  %v956_v13 = vmul.f32 %v6459_v36, %v7214_v23 }
 0x182   : > { %v902_v44 = vpop.xlane.xlu1 %901  ;;  %v1000_v45 = vadd.f32 %v7301_v4, %v977_v37  ;;  %v957_v46 = vmul.f32 %v6461_v39, %v7223_v32  ;;  %v1001_v48 = vadd.f32 %v7301_v4, %v978_v38 }
 0x183   : > { %6474 = vrsqrt.f32 %v932_v40  ;;  %v918_v47 = vmul.f32 0.03125, %v902_v44  ;;  %v979_v50 = vmul.f32 %v7294_v1, %v956_v13 }
 0x184   : > { %v6463_v51 = vpop.eup %6462  ;;  %6476 = vrsqrt.f32 %v933_v41  ;;  %v1014_v54 = vpack.c.bf16 %v1000_v45, %v999_v22  ;;  %v980_v63 = vmul.f32 %v7294_v1, %v957_v46 }
 0x185   : > { %v6465_v58 = vpop.eup %6464  ;;  %v934_v59 = vadd.f32 1e-05, %v918_v47  ;;  %v1002_v23 = vadd.f32 %v7301_v4, %v979_v50  ;;  %v958_v62 = vmul.f32 %v6463_v51, %v7226_v33 }
 0x186   : > { %5619 = vmatmul.mubr.msk.bf16.vlgmr.msra.gmra.mxu0 %vm757_vm0, %v1014_v54  ;;  %v959_v32 = vmul.f32 %v6465_v58, %v7235_v42  ;;  %v1003_v7 = vadd.f32 %v7301_v4, %v980_v63 }
 0x187   : > { %6478 = vrsqrt.f32 %v934_v59  ;;  %v1015_v0 = vpack.c.bf16 %v1002_v23, %v1001_v48  ;;  %v981_v2 = vmul.f32 %v7294_v1, %v958_v62 }
 0x188   : > { %v6467_v52 = vpop.eup %6466  ;;  %v982_v9 = vmul.f32 %v7294_v1, %v959_v32 }
 0x189   : > { %v6469_v6 = vpop.eup %6468  ;;  %5622 = vmatprep.mubr.msk.bf16.mxu0 %vm757_vm0, %v1015_v0  ;;  %v1004_v8 = vadd.f32 %v7301_v4, %v981_v2  ;;  %v960_v33 = vmul.f32 %v6467_v52, %v7238_v43 }
 0x18a   : > { %v961_v10 = vmul.f32 %v6469_v6, %v7247_v55  ;;  %v1005_v16 = vadd.f32 %v7301_v4, %v982_v9 }
 0x18b   : > { %v1016_v11 = vpack.c.bf16 %v1004_v8, %v1003_v7  ;;  %v983_v42 = vmul.f32 %v7294_v1, %v960_v33 }
 0x18c   : > { %v6471_v14 = vpop.eup %6470  ;;  %v984_v19 = vmul.f32 %v7294_v1, %v961_v10 }
 0x18d   : > { %v6473_v56 = vpop.eup %6472  ;;  %v1006_v17 = vadd.f32 %v7301_v4, %v983_v42  ;;  %v962_v18 = vmul.f32 %v6471_v14, %v7250_v49 }
 0x18e   : > { %5623 = vmatmul.mubr.msk.bf16.gmra.mxu0 %vm757_vm0, %v1016_v11  ;;  %v963_v43 = vmul.f32 %v6473_v56, %v7259_v3  ;;  %v1007_v21 = vadd.f32 %v7301_v4, %v984_v19 }
 0x18f   : > { %v1017_v20 = vpack.c.bf16 %v1006_v17, %v1005_v16  ;;  %v985_v55 = vmul.f32 %v7294_v1, %v962_v18 }
 0x190   : > { %v6475_v60 = vpop.eup %6474  ;;  %v986_v49 = vmul.f32 %v7294_v1, %v963_v43 }
 0x191   : > { %v6477_v61 = vpop.eup %6476  ;;  %5626 = vmatprep.mubr.msk.bf16.mxu0 %vm757_vm0, %v1017_v20  ;;  %v1008_v24 = vadd.f32 %v7301_v4, %v985_v55  ;;  %v964_v12 = vmul.f32 %v6475_v60, %v7262_v53 }
 0x192   : > { %v965_v25 = vmul.f32 %v6477_v61, %v7271_v15  ;;  %v1009_v28 = vadd.f32 %v7301_v4, %v986_v49 }
 0x193   : > { %v1018_v26 = vpack.c.bf16 %v1008_v24, %v1007_v21  ;;  %v987_v3 = vmul.f32 %v7294_v1, %v964_v12 }
 0x194   : > { %v6479_v27 = vpop.eup %6478  ;;  %v988_v30 = vmul.f32 %v7294_v1, %v965_v25 }
 0x195   : > { %v1010_v29 = vadd.f32 %v7301_v4, %v987_v3  ;;  %v966_v5 = vmul.f32 %v6479_v27, %v7274_v57  ;;  %v7359_v57 = vld [vmem:[%s9628_s6] ss:$0 sm:$0xff] }
 0x196   : > { %5627 = vmatmul.mubr.msk.bf16.gmra.mxu0 %vm757_vm0, %v1018_v26  ;;  %v1011_v15 = vadd.f32 %v7301_v4, %v988_v30 }
 0x197   : > { %v1019_v31 = vpack.c.bf16 %v1010_v29, %v1009_v28  ;;  %v989_v53 = vmul.f32 %v7294_v1, %v966_v5 }
 0x199   : > { %5630 = vmatprep.mubr.msk.bf16.mxu0 %vm757_vm0, %v1019_v31  ;;  %v1012_v34 = vadd.f32 %v7301_v4, %v989_v53 }
 0x19b   : > { %v1020_v35 = vpack.c.bf16 %v1012_v34, %v1011_v15 }
 0x19e   : > { %5631 = vmatmul.mubr.msk.bf16.gmra.mxu0 %vm757_vm0, %v1020_v35 }
 0x246   : > { %v5620_v36 = vpop.f32.mrf.mxu0 }
 0x247   : > { %v7362_v38 = vadd.f32 %v5620_v36, %v7359_v57 }
 0x248   : > { %v1102_v37 = vpop.f32.mrf.mxu0 }
 0x249   : > { %v7365_v39 = vadd.f32 %v7359_v57, %v1102_v37  ;;  %v7378_v22 = vmul.f32 0.35355338, %v7362_v38 }
 0x24a   : > { %v5621_v1 = vpop.f32.mrf.mxu0 }
 0x24b   : > { %v7368_v40 = vadd.f32 %v5621_v1, %v7359_v57  ;;  %v1165_v46 = vmul.f32 0.35355338, %v7365_v39 }
 0x24c   : > { %v1105_v4 = vpop.f32.mrf.mxu0 }
 0x24d   : > { %v7371_v41 = vadd.f32 %v7359_v57, %v1105_v4  ;;  %v7375_v13 = vpack.i.bf16 %v7368_v40, %v7362_v38  ;;  %v7381_v45 = vmul.f32 0.35355338, %v7368_v40  ;;  %v7475_v37 = vpack.c.bf16 %v7368_v40, %v7362_v38 }
 0x24e   : > { %v5624_v44 = vpop.f32.mrf.mxu0 }
 0x24f   : > { %6080 = vrot.lane.b32.xlu1 %v7375_v13, %s6888_s20  ;;  %v1166_v47 = vmul.f32 0.35355338, %v7371_v41  ;;  %v7389_v51 = vpack.i.bf16 %v7381_v45, %v7378_v22  ;;  %v7393_v54 = vpack.i.bf16 %v7371_v41, %v7365_v39  ;;  %v1127_v48 = vadd.f32 %v5624_v44, %v7359_v57 }
 0x250   : > { %v1118_v50 = vpop.f32.mrf.mxu0  ;;  %v1502_v62 = vpack.c.bf16 %v7381_v45, %v7378_v22 }
 0x251   : > { %v1501_v58 = vpack.c.bf16 %v1166_v47, %v1165_v46  ;;  %v7396_v59 = vpack.i.bf16 %v1166_v47, %v1165_v46  ;;  %v1119_v32 = vadd.f32 %v7359_v57, %v1118_v50  ;;  %v7404_v7 = vmul.f32 0.35355338, %v1127_v48 }
 0x252   : > { %v5625_v23 = vpop.f32.mrf.mxu0 }
 0x253   : > { %v1130_v63 = vadd.f32 %v5625_v23, %v7359_v57  ;;  %5642 = vmatprep.mubr.msk.bf16.mxu1 %vm1577_vm1, %v1501_v58  ;;  %v7413_v11 = vmul.f32 0.35355338, %v1119_v32 }
 0x254   : > { %v1121_v0 = vpop.f32.mrf.mxu0 }
 0x255   : > { %v1122_v2 = vadd.f32 %v7359_v57, %v1121_v0  ;;  %v6074_v52 = vpack.i.bf16 %v1130_v63, %v1127_v48  ;;  %v7406_v8 = vmul.f32 0.35355338, %v1130_v63  ;;  %v7437_v60 = vpack.c.bf16 %v1130_v63, %v1127_v48 }
 0x256   : > { %v5628_v6 = vpop.f32.mrf.mxu0  ;;  %v7508_v48 = vpack.c.bf16 %v7371_v41, %v7365_v39 }
 0x257   : > { %6075 = vrot.lane.b32.xlu0 %v6074_v52, %s6888_s20  ;;  %v6089_v33 = vpack.i.bf16 %v1122_v2, %v1119_v32  ;;  %v7411_v10 = vpack.i.bf16 %v7406_v8, %v7404_v7  ;;  %v7415_v42 = vmul.f32 0.35355338, %v1122_v2  ;;  %v1504_v14 = vpack.c.bf16 %v7406_v8, %v7404_v7 }
 0x258   : > { %v1134_v9 = vpop.f32.mrf.mxu0  ;;  %v7420_v56 = vadd.f32 %v5628_v6, %v7359_v57  ;;  %v7450_v26 = vpack.c.bf16 %v1122_v2, %v1119_v32 }
 0x259   : > { %6090 = vrot.lane.b32.xlu1 %v6089_v33, %s6888_s20  ;;  %v7425_v17 = vpack.i.bf16 %v7415_v42, %v7413_v11  ;;  %v1503_v18 = vpack.c.bf16 %v7415_v42, %v7413_v11  ;;  %v7430_v19 = vadd.f32 %v7359_v57, %v1134_v9 }
 0x25a   : > { %v5629_v16 = vpop.f32.mrf.mxu0  ;;  %v7443_v24 = vmul.f32 0.35355338, %v7420_v56 }
 0x25b   : > { %v1146_v43 = vadd.f32 %v5629_v16, %v7359_v57  ;;  %6085 = vrot.lane.b32.xlu0 %v7393_v54, %s6888_s20  ;;  %v1173_v49 = vmul.f32 0.35355338, %v7430_v19 }
 0x25c   : > { %v1137_v20 = vpop.f32.mrf.mxu0 }
 0x25d   : > { %v1138_v55 = vadd.f32 %v7359_v57, %v1137_v20  ;;  %6100 = vrot.lane.b32.xlu1 %v6089_v33, %s6889_s30  ;;  %v7440_v21 = vpack.i.bf16 %v1146_v43, %v7420_v56  ;;  %v7445_v12 = vmul.f32 0.35355338, %v1146_v43  ;;  %v7520_v23 = vpack.c.bf16 %v1146_v43, %v7420_v56 }
 0x25e   : > { %v5632_v61 = vpop.f32.mrf.mxu0 }
 0x25f   : > { %v1174_v25 = vmul.f32 0.35355338, %v1138_v55  ;;  %1575 = vrot.lane.b32.xlu0 %v7437_v60, %s6890_s22  ;;  %v7453_v27 = vpack.i.bf16 %v1138_v55, %v7430_v19  ;;  %v7457_v28 = vpack.i.bf16 %v7445_v12, %v7443_v24  ;;  %v1159_v29 = vadd.f32 %v5632_v61, %v7359_v57 }
 0x260   : > { %v1150_v3 = vpop.f32.mrf.mxu0  ;;  %v1506_v53 = vpack.c.bf16 %v7445_v12, %v7443_v24  ;;  %v7532_v41 = vpack.c.bf16 %v1138_v55, %v7430_v19 }
 0x261   : > { %1573 = vrot.lane.b32.xlu1 %v7450_v26, %s6890_s22  ;;  %v1505_v5 = vpack.c.bf16 %v1174_v25, %v1173_v49  ;;  %v7462_v30 = vpack.i.bf16 %v1174_v25, %v1173_v49  ;;  %v1151_v15 = vadd.f32 %v7359_v57, %v1150_v3  ;;  %v7477_v1 = vmul.f32 0.35355338, %v1159_v29 }
 0x262   : > { %v5633_v31 = vpop.f32.mrf.mxu0 }
 0x263   : > { %v1162_v34 = vadd.f32 %v5633_v31, %v7359_v57  ;;  %6095 = vrot.lane.b32.xlu0 %v6074_v52, %s6889_s30  ;;  %5658 = vmatprep.mubr.msk.bf16.mxu0 %vm1577_vm1, %v1505_v5  ;;  %v7483_v44 = vmul.f32 0.35355338, %v1151_v15 }
 0x264   : > { %v1153_v35 = vpop.f32.mrf.mxu0 }
 0x265   : > { %v1154_v36 = vadd.f32 %v7359_v57, %v1153_v35  ;;  %6105 = vrot.lane.b32.xlu1 %v7440_v21, %s6888_s20  ;;  %v7479_v4 = vmul.f32 0.35355338, %v1162_v34  ;;  %v6149_v50 = vpack.i.bf16 %v1162_v34, %v1159_v29  ;;  %v7524_v39 = vpack.c.bf16 %v1162_v34, %v1159_v29 }
 0x267   : > { %1571 = vrot.lane.b32.xlu0 %v7475_v37, %s6890_s22  ;;  %v7485_v46 = vmul.f32 0.35355338, %v1154_v36  ;;  %v7489_v57 = vpack.i.bf16 %v7479_v4, %v7477_v1  ;;  %v1508_v47 = vpack.c.bf16 %v7479_v4, %v7477_v1  ;;  %v6164_v58 = vpack.i.bf16 %v1154_v36, %v1151_v15 }
 0x268   : > { %v7536_v63 = vpack.c.bf16 %v1154_v36, %v1151_v15 }
 0x269   : > { %6130 = vrot.lane.b32.xlu1 %v6074_v52, %s6891_s29  ;;  %v7496_v38 = vpack.i.bf16 %v7485_v46, %v7483_v44  ;;  %v1507_v40 = vpack.c.bf16 %v7485_v46, %v7483_v44 }
 0x26b   : > { %6110 = vrot.lane.b32.xlu0 %v7453_v27, %s6888_s20 }
 0x26d   : > { %6135 = vrot.lane.b32.xlu1 %v6089_v33, %s6891_s29 }
 0x26f   : > { %6115 = vrot.lane.b32.xlu0 %v7375_v13, %s6889_s30 }
 0x271   : > { %6150 = vrot.lane.b32.xlu1 %v6149_v50, %s6888_s20 }
 0x273   : > { %1569 = vrot.lane.b32.xlu0 %v7508_v48, %s6890_s22 }
 0x275   : > { %6155 = vrot.lane.b32.xlu1 %v6149_v50, %s6889_s30 }
 0x277   : > { %6120 = vrot.lane.b32.xlu0 %v7393_v54, %s6889_s30 }
 0x279   : > { %6160 = vrot.lane.b32.xlu1 %v6149_v50, %s6891_s29 }
 0x27b   : > { %6125 = vrot.lane.b32.xlu0 %v7440_v21, %s6889_s30 }
 0x27d   : > { %6165 = vrot.lane.b32.xlu1 %v6164_v58, %s6888_s20 }
 0x27f   : > { %1673 = vrot.lane.b32.xlu0 %v7520_v23, %s6890_s22 }
 0x281   : > { %1677 = vrot.lane.b32.xlu1 %v7524_v39, %s6890_s22 }
 0x283   : > { %6140 = vrot.lane.b32.xlu0 %v7453_v27, %s6889_s30 }
 0x285   : > { %6170 = vrot.lane.b32.xlu1 %v6164_v58, %s6889_s30 }
 0x287   : > { %1671 = vrot.lane.b32.xlu0 %v7532_v41, %s6890_s22 }
 0x289   : > { %1675 = vrot.lane.b32.xlu1 %v7536_v63, %s6890_s22 }
 0x28b   : > { %6145 = vrot.lane.b32.xlu0 %v7375_v13, %s6891_s29 }
 0x28d   : > { %6180 = vrot.lane.b32.xlu1 %v6164_v58, %s6891_s29 }
 0x291   : > { %6190 = vrot.lane.b32.xlu1 %v7389_v51, %s6888_s20 }
 0x2c1   : > { %v6081_v32 = vpop.permute.xlu1 %6080 }
 0x2c2   : > { %v6083_v0 = vunpack.i.h.bf16 %v6081_v32  ;;  %v6082_v2 = vunpack.i.l.bf16 %v6081_v32 }
 0x2c4   : > { %v7545_v52 = vpack.c.bf16 %v6083_v0, %v6082_v2 }
 0x2c6   : > { %1774 = vrot.lane.b32.xlu0 %v7545_v52, %s6890_s22 }
 0x2c9   : > { %v6076_v6 = vpop.permute.xlu0 %6075 }
 0x2ca   : > { %v6078_v33 = vunpack.i.h.bf16 %v6076_v6  ;;  %v6077_v9 = vunpack.i.l.bf16 %v6076_v6  ;;  %6175 = vrot.lane.b32.xlu0 %v7393_v54, %s6891_s29 }
 0x2cb   : > { %v6091_v13 = vpop.permute.xlu1 %6090 }
 0x2cc   : > { %v7551_v56 = vpack.c.bf16 %v6078_v33, %v6077_v9  ;;  %v6093_v5 = vunpack.i.h.bf16 %v6091_v13  ;;  %v6092_v15 = vunpack.i.l.bf16 %v6091_v13 }
 0x2cd   : > { %v6086_v16 = vpop.permute.xlu0 %6085 }
 0x2ce   : > { %v6088_v19 = vunpack.i.h.bf16 %v6086_v16  ;;  %v6087_v43 = vunpack.i.l.bf16 %v6086_v16  ;;  %1778 = vrot.lane.b32.xlu1 %v7551_v56, %s6890_s22  ;;  %v7576_v2 = vpack.c.bf16 %v6093_v5, %v6092_v15 }
 0x2cf   : > { %v6101_v20 = vpop.permute.xlu1 %6100 }
 0x2d0   : > { %v7555_v55 = vpack.c.bf16 %v6088_v19, %v6087_v43  ;;  %v6103_v33 = vunpack.i.h.bf16 %v6101_v20  ;;  %v6102_v9 = vunpack.i.l.bf16 %v6101_v20 }
 0x2d1   : > { %v1576_v61 = vpop.permute.xlu0 %1575 }
 0x2d2   : > { %5962 = vmatprep.subr.msk.bf16.mxu1 %vm1577_vm1, %v1576_v61  ;;  %1772 = vrot.lane.b32.xlu0 %v7555_v55, %s6890_s22  ;;  %v1600_v54 = vsel %vm1577_vm1, %v1576_v61, 0  ;;  %v7587_v43 = vpack.c.bf16 %v6103_v33, %v6102_v9 }
 0x2d3   : > { %v1574_v49 = vpop.permute.xlu1 %1573  ;;  %5635 = vmatpush3.bf16.xpose.msra.mxu1 %v1600_v54 }
 0x2d4   : > { %5963 = vmatprep.subr.msk.bf16.mxu1 %vm1577_vm1, %v1574_v49  ;;  %v1597_v58 = vsel %vm1577_vm1, %v1574_v49, 0 }
 0x2d5   : > { %v6096_v25 = vpop.permute.xlu0 %6095 }
 0x2d6   : > { %v6098_v3 = vunpack.i.h.bf16 %v6096_v25  ;;  %v6097_v29 = vunpack.i.l.bf16 %v6096_v25  ;;  %6185 = vrot.lane.b32.xlu0 %v7396_v59, %s6888_s20 }
 0x2d7   : > { %v6106_v31 = vpop.permute.xlu1 %6105 }
 0x2d8   : > { %v6108_v34 = vunpack.i.h.bf16 %v6106_v31  ;;  %v6107_v35 = vunpack.i.l.bf16 %v6106_v31  ;;  %v7564_v36 = vpack.c.bf16 %v6098_v3, %v6097_v29 }
 0x2d9   : > { %v1572_v50 = vpop.permute.xlu0 %1571 }
 0x2da   : > { %1980 = vrot.lane.b32.xlu1 %v7564_v36, %s6890_s22  ;;  %v7569_v32 = vpack.c.bf16 %v6108_v34, %v6107_v35  ;;  %v1594_v19 = vsel %vm1577_vm1, %v1572_v50, 0 }
 0x2db   : > { %v7571_v0 = vpop.permute.xlu1 %6130  ;;  %5637 = vmatpush3.bf16.xpose.msra.mxu1 %v1597_v58 }
 0x2dc   : > { %5964 = vmatprep.subr.msk.bf16.mxu1 %vm1577_vm1, %v1572_v50  ;;  %1875 = vrot.lane.b32.xlu0 %v7569_v32, %s6890_s22 }
 0x2dd   : > { %v6111_v6 = vpop.permute.xlu0 %6110 }
 0x2de   : > { %1776 = vrot.lane.b32.xlu1 %v7576_v2, %s6890_s22  ;;  %v6113_v5 = vunpack.i.h.bf16 %v6111_v6  ;;  %v6112_v31 = vunpack.i.l.bf16 %v6111_v6 }
 0x2df   : > { %v7580_v13 = vpop.permute.xlu1 %6135 }
 0x2e0   : > { %6195 = vrot.lane.b32.xlu0 %v7440_v21, %s6891_s29  ;;  %v7609_v9 = vpack.c.bf16 %v6113_v5, %v6112_v31  ;;  %v6133_v5 = vunpack.i.h.bf16 %v7571_v0  ;;  %v6132_v31 = vunpack.i.l.bf16 %v7571_v0 }
 0x2e1   : > { %v6116_v16 = vpop.permute.xlu0 %6115 }
 0x2e2   : > { %6200 = vrot.lane.b32.xlu1 %v7453_v27, %s6891_s29  ;;  %v6118_v54 = vunpack.i.h.bf16 %v6116_v16  ;;  %v6117_v49 = vunpack.i.l.bf16 %v6116_v16  ;;  %v7656_v0 = vpack.c.bf16 %v6133_v5, %v6132_v31 }
 0x2e3   : > { %v6151_v61 = vpop.permute.xlu1 %6150  ;;  %5639 = vmatpush3.bf16.xpose.msra.mxu1 %v1594_v19 }
 0x2e4   : > { %1978 = vrot.lane.b32.xlu0 %v7587_v43, %s6890_s22  ;;  %v7599_v3 = vpack.c.bf16 %v6118_v54, %v6117_v49  ;;  %v6153_v58 = vunpack.i.h.bf16 %v6151_v61  ;;  %v6152_v33 = vunpack.i.l.bf16 %v6151_v61 }
 0x2e5   : > { %v1570_v20 = vpop.permute.xlu0 %1569 }
 0x2e6   : > { %5965 = vmatprep.subr.msk.bf16.mxu1 %vm1577_vm1, %v1570_v20  ;;  %6210 = vrot.lane.b32.xlu1 %v7457_v28, %s6888_s20  ;;  %v1591_v25 = vsel %vm1577_vm1, %v1570_v20, 0  ;;  %v7627_v45 = vpack.c.bf16 %v6153_v58, %v6152_v33  ;;  %v6138_v58 = vunpack.i.h.bf16 %v7580_v13  ;;  %v6137_v33 = vunpack.i.l.bf16 %v7580_v13 }
 0x2e7   : > { %v6156_v21 = vpop.permute.xlu1 %6155 }
 0x2e8   : > { %6205 = vrot.lane.b32.xlu0 %v7462_v30, %s6888_s20  ;;  %v6158_v61 = vunpack.i.h.bf16 %v6156_v21  ;;  %v6157_v20 = vunpack.i.l.bf16 %v6156_v21 }
 0x2e9   : > { %v6121_v27 = vpop.permute.xlu0 %6120 }
 0x2ea   : > { %6220 = vrot.lane.b32.xlu1 %v7411_v10, %s6888_s20  ;;  %v6123_v34 = vunpack.i.h.bf16 %v6121_v27  ;;  %v6122_v35 = vunpack.i.l.bf16 %v6121_v27  ;;  %v7633_v21 = vpack.c.bf16 %v6158_v61, %v6157_v20 }
 0x2eb   : > { %v7601_v29 = vpop.permute.xlu1 %6160  ;;  %5641 = vmatpush3.bf16.xpose.msra.mxu1 %v1591_v25 }
 0x2ec   : > { %1976 = vrot.lane.b32.xlu0 %v7599_v3, %s6890_s22  ;;  %v7617_v6 = vpack.c.bf16 %v6123_v34, %v6122_v35 }
 0x2ed   : > { %v6126_v15 = vpop.permute.xlu0 %6125 }
 0x2ee   : > { %6230 = vrot.lane.b32.xlu1 %v7389_v51, %s6889_s30  ;;  %v6127_v54 = vunpack.i.l.bf16 %v6126_v15 }
 0x2ef   : > { %v6166_v50 = vpop.permute.xlu1 %6165 }
 0x2f0   : > { %6215 = vrot.lane.b32.xlu0 %v7425_v17, %s6888_s20  ;;  %v6167_v49 = vunpack.i.l.bf16 %v6166_v50 }
 0x2f1   : > { %v1674_v16 = vpop.permute.xlu0 %1673 }
 0x2f2   : > { %5643 = vmatmul.mubr.msk.bf16.vlgmr.msra.gmra.mxu1 %vm1577_vm1, %v1502_v62  ;;  %1873 = vrot.lane.b32.xlu1 %v7609_v9, %s6890_s22  ;;  %v6128_v62 = vunpack.i.h.bf16 %v6126_v15 }
 0x2f3   : > { %v1678_v19 = vpop.permute.xlu1 %1677  ;;  %5646 = vmatprep.mubr.msk.bf16.mxu1 %vm1577_vm1, %v1503_v18  ;;  %v6168_v18 = vunpack.i.h.bf16 %v6166_v50 }
 0x2f4   : > { %5966 = vmatprep.subr.msk.bf16.mxu0 %vm1577_vm1, %v1678_v19  ;;  %1974 = vrot.lane.b32.xlu0 %v7617_v6, %s6890_s22  ;;  %v1701_v22 = vsel %vm1577_vm1, %v1678_v19, 0  ;;  %v7641_v27 = vpack.c.bf16 %v6128_v62, %v6127_v54  ;;  %v1695_v19 = vsel %vm1577_vm1, %v1674_v16, 0  ;;  %v6162_v62 = vunpack.i.l.bf16 %v7601_v29 }
 0x2f5   : > { %5651 = vmatpush3.bf16.xpose.msra.mxu0 %v1701_v22  ;;  %v6141_v11 = vpop.permute.xlu0 %6140  ;;  %v7649_v7 = vpack.c.bf16 %v6168_v18, %v6167_v49  ;;  %v7672_v22 = vpack.c.bf16 %v6138_v58, %v6137_v33 }
 0x2f6   : > { %1879 = vrot.lane.b32.xlu1 %v7627_v45, %s6890_s22  ;;  %v6142_v34 = vunpack.i.l.bf16 %v6141_v11 }
 0x2f7   : > { %v6171_v42 = vpop.permute.xlu1 %6170 }
 0x2f8   : > { %6225 = vrot.lane.b32.xlu0 %v7396_v59, %s6889_s30  ;;  %v6172_v18 = vunpack.i.l.bf16 %v6171_v42 }
 0x2f9   : > { %v1672_v8 = vpop.permute.xlu0 %1671 }
 0x2fa   : > { %5647 = vmatmul.mubr.msk.bf16.gmra.mxu1 %vm1577_vm1, %v1504_v14  ;;  %2081 = vrot.lane.b32.xlu1 %v7633_v21, %s6890_s22  ;;  %v6143_v14 = vunpack.i.h.bf16 %v6141_v11  ;;  %v1692_v54 = vsel %vm1577_vm1, %v1672_v8, 0 }
 0x2fb   : > { %v1676_v25 = vpop.permute.xlu1 %1675 }
 0x2fc   : > { %5967 = vmatprep.subr.msk.bf16.mxu0 %vm1577_vm1, %v1676_v25  ;;  %2077 = vrot.lane.b32.xlu0 %v7641_v27, %s6890_s22  ;;  %v1698_v15 = vsel %vm1577_vm1, %v1676_v25, 0  ;;  %v7660_v35 = vpack.c.bf16 %v6143_v14, %v6142_v34 }
 0x2fd   : > { %5653 = vmatpush3.bf16.xpose.msra.mxu0 %v1698_v15  ;;  %v6146_v50 = vpop.permute.xlu0 %6145 }
 0x2fe   : > { %5968 = vmatprep.subr.msk.bf16.mxu0 %vm1577_vm1, %v1674_v16  ;;  %1877 = vrot.lane.b32.xlu1 %v7649_v7, %s6890_s22  ;;  %v6148_v61 = vunpack.i.h.bf16 %v6146_v50  ;;  %v6147_v20 = vunpack.i.l.bf16 %v6146_v50  ;;  %v6163_v16 = vunpack.i.h.bf16 %v7601_v29  ;;  %v6173_v29 = vunpack.i.h.bf16 %v6171_v42 }
 0x2ff   : > { %v7715_v24 = vpop.permute.xlu1 %6180 }
 0x300   : > { %6235 = vrot.lane.b32.xlu0 %v7496_v38, %s6888_s20  ;;  %v7676_v13 = vpack.c.bf16 %v6148_v61, %v6147_v20  ;;  %v7687_v11 = vpack.c.bf16 %v6163_v16, %v6162_v62  ;;  %v7703_v49 = vpack.c.bf16 %v6173_v29, %v6172_v18 }
 0x302   : > { %2182 = vrot.lane.b32.xlu1 %v7656_v0, %s6890_s22 }
 0x304   : > { %2075 = vrot.lane.b32.xlu0 %v7660_v35, %s6890_s22 }
 0x305   : > { %5655 = vmatpush3.bf16.xpose.msra.mxu0 %v1695_v19 }
 0x306   : > { %5969 = vmatprep.subr.msk.bf16.mxu0 %vm1577_vm1, %v1672_v8  ;;  %6240 = vrot.lane.b32.xlu1 %v7489_v57, %s6888_s20 }
 0x308   : > { %6245 = vrot.lane.b32.xlu0 %v7462_v30, %s6889_s30 }
 0x30a   : > { %2180 = vrot.lane.b32.xlu1 %v7672_v22, %s6890_s22 }
 0x30c   : > { %2178 = vrot.lane.b32.xlu0 %v7676_v13, %s6890_s22 }
 0x30d   : > { %5657 = vmatpush3.bf16.xpose.msra.mxu0 %v1692_v54 }
 0x30e   : > { %6250 = vrot.lane.b32.xlu1 %v7457_v28, %s6889_s30 }
 0x310   : > { %6255 = vrot.lane.b32.xlu0 %v7425_v17, %s6889_s30 }
 0x312   : > { %2283 = vrot.lane.b32.xlu1 %v7687_v11, %s6890_s22 }
 0x314   : > { %5659 = vmatmul.mubr.msk.bf16.vlgmr.msra.gmra.mxu0 %vm1577_vm1, %v1506_v53 }
 0x315   : > { %5662 = vmatprep.mubr.msk.bf16.mxu0 %vm1577_vm1, %v1507_v40 }
 0x316   : > { %6260 = vrot.lane.b32.xlu1 %v7411_v10, %s6889_s30 }
 0x31a   : > { %6270 = vrot.lane.b32.xlu1 %v7389_v51, %s6891_s29  ;;  %v7717_v51 = vpop.permute.xlu1 %6190 }
 0x31c   : > { %5663 = vmatmul.mubr.msk.bf16.gmra.mxu0 %vm1577_vm1, %v1508_v47 }
 0x31e   : > { %2079 = vrot.lane.b32.xlu1 %v7703_v49, %s6890_s22 }
 0x322   : > { %6275 = vrot.lane.b32.xlu1 %v7496_v38, %s6889_s30 }
 0x326   : > { %6285 = vrot.lane.b32.xlu1 %v7489_v57, %s6889_s30 }
 0x338   : > { %v1775_v12 = vpop.permute.xlu0 %1774 }
 0x339   : > { %v1796_v29 = vsel %vm1577_vm1, %v1775_v12, 0 }
 0x33c   : > { %v6176_v53 = vpop.permute.xlu0 %6175 }
 0x33d   : > { %v6178_v44 = vunpack.i.h.bf16 %v6176_v53  ;;  %v6177_v46 = vunpack.i.l.bf16 %v6176_v53 }
 0x33f   : > { %v7719_v1 = vpack.c.bf16 %v6178_v44, %v6177_v46 }
 0x340   : > { %v1779_v4 = vpop.permute.xlu1 %1778 }
 0x341   : > { %2176 = vrot.lane.b32.xlu0 %v7719_v1, %s6890_s22  ;;  %5970 = vmatprep.subr.msk.bf16.mxu1 %vm1577_vm1, %v1779_v4  ;;  %v1802_v47 = vsel %vm1577_vm1, %v1779_v4, 0 }
 0x342   : > { %5667 = vmatpush3.bf16.xpose.msra.mxu1 %v1802_v47 }
 0x344   : > { %v1773_v40 = vpop.permute.xlu0 %1772 }
 0x345   : > { %6265 = vrot.lane.b32.xlu0 %v7396_v59, %s6891_s29 }
 0x348   : > { %v6186_v42 = vpop.permute.xlu0 %6185 }
 0x349   : > { %v6188_v25 = vunpack.i.h.bf16 %v6186_v42  ;;  %v6187_v5 = vunpack.i.l.bf16 %v6186_v42 }
 0x34b   : > { %v1509_v31 = vpack.c.bf16 %v6188_v25, %v6187_v5  ;;  %v6193_v25 = vunpack.i.h.bf16 %v7717_v51 }
 0x34c   : > { %v1981_v15 = vpop.permute.xlu1 %1980 }
 0x34d   : > { %5674 = vmatprep.mubr.msk.bf16.mxu1 %vm1577_vm1, %v1509_v31 }
 0x34e   : > { %v7728_v8 = vpop.permute.xlu0 %1875 }
 0x350   : > { %v1777_v14 = vpop.permute.xlu1 %1776 }
 0x351   : > { %5971 = vmatprep.subr.msk.bf16.mxu1 %vm1577_vm1, %v1777_v14  ;;  %v1799_v34 = vsel %vm1577_vm1, %v1777_v14, 0 }
 0x352   : > { %v6196_v50 = vpop.permute.xlu0 %6195  ;;  %5669 = vmatpush3.bf16.xpose.msra.mxu1 %v1799_v34 }
 0x353   : > { %v6198_v58 = vunpack.i.h.bf16 %v6196_v50  ;;  %v6197_v33 = vunpack.i.l.bf16 %v6196_v50  ;;  %5972 = vmatprep.subr.msk.bf16.mxu1 %vm1577_vm1, %v1775_v12 }
 0x354   : > { %v6201_v59 = vpop.permute.xlu1 %6200 }
 0x355   : > { %v7733_v19 = vpack.c.bf16 %v6198_v58, %v6197_v33  ;;  %v6203_v61 = vunpack.i.h.bf16 %v6201_v59  ;;  %v6202_v20 = vunpack.i.l.bf16 %v6201_v59 }
 0x356   : > { %v7735_v16 = vpop.permute.xlu0 %1978 }
 0x357   : > { %9708 = vst [vmem:[#allocation11_spill] sm:$0xff] %v7733_v19  ;;  %v7737_v62 = vpack.c.bf16 %v6203_v61, %v6202_v20  ;;  %2279 = vrot.lane.b32.xlu0 %v7733_v19, %s6890_s22 }
 0x358   : > { %v7741_v54 = vpop.permute.xlu1 %6210 }
 0x359   : > { %9709 = vst [vmem:[#allocation12_spill] sm:$0xff] %v7737_v62  ;;  %2277 = vrot.lane.b32.xlu1 %v7737_v62, %s6890_s22 }
 0x35a   : > { %v6206_v18 = vpop.permute.xlu0 %6205  ;;  %5671 = vmatpush3.bf16.xpose.msra.mxu1 %v1796_v29 }
 0x35b   : > { %v6208_v53 = vunpack.i.h.bf16 %v6206_v18  ;;  %v6207_v44 = vunpack.i.l.bf16 %v6206_v18  ;;  %6280 = vrot.lane.b32.xlu0 %v7425_v17, %s6891_s29  ;;  %5973 = vmatprep.subr.msk.bf16.mxu1 %vm1577_vm1, %v1773_v40  ;;  %v1793_v17 = vsel %vm1577_vm1, %v1773_v40, 0 }
 0x35c   : > { %v6221_v46 = vpop.permute.xlu1 %6220 }
 0x35d   : > { %v1513_v4 = vpack.c.bf16 %v6208_v53, %v6207_v44  ;;  %6300 = vrot.lane.b32.xlu1 %v7457_v28, %s6891_s29  ;;  %v6192_v28 = vunpack.i.l.bf16 %v7717_v51  ;;  %v6183_v51 = vunpack.i.h.bf16 %v7715_v24  ;;  %v6223_v58 = vunpack.i.h.bf16 %v6221_v46 }
 0x35e   : > { %v7751_v47 = vpop.permute.xlu0 %1976  ;;  %v6222_v33 = vunpack.i.l.bf16 %v6221_v46  ;;  %v2001_v44 = vsel %vm1577_vm1, %v7735_v16, 0  ;;  %v1897_v46 = vsel %vm1577_vm1, %v7728_v8, 0 }
 0x35f   : > { %5690 = vmatprep.mubr.msk.bf16.mxu0 %vm1577_vm1, %v1513_v4  ;;  %6290 = vrot.lane.b32.xlu0 %v7411_v10, %s6891_s29  ;;  %v1510_v40 = vpack.c.bf16 %v6193_v25, %v6192_v28  ;;  %v1998_v4 = vsel %vm1577_vm1, %v7751_v47, 0 }
 0x360   : > { %v7756_v12 = vpop.permute.xlu1 %6230  ;;  %v1512_v20 = vpack.c.bf16 %v6223_v58, %v6222_v33 }
 0x361   : > { %6310 = vrot.lane.b32.xlu1 %v7489_v57, %s6891_s29 }
 0x362   : > { %v6216_v42 = vpop.permute.xlu0 %6215  ;;  %5673 = vmatpush3.bf16.xpose.msra.mxu1 %v1793_v17  ;;  %v6212_v17 = vunpack.i.l.bf16 %v7741_v54 }
 0x363   : > { %6295 = vrot.lane.b32.xlu0 %v7462_v30, %s6891_s29  ;;  %5978 = vmatprep.subr.msk.bf16.mxu1 %vm1577_vm1, %v1981_v15  ;;  %v6218_v5 = vunpack.i.h.bf16 %v6216_v42  ;;  %v6217_v10 = vunpack.i.l.bf16 %v6216_v42  ;;  %v6182_v30 = vunpack.i.l.bf16 %v7715_v24  ;;  %v6232_v42 = vunpack.i.l.bf16 %v7756_v12 }
 0x364   : > { %v7766_v31 = vpop.permute.xlu1 %1873 }
 0x365   : > { %3291 = vrot.lane.b32.xlu1 %v7450_v26, %s6892_s17  ;;  %v1511_v14 = vpack.c.bf16 %v6218_v5, %v6217_v10  ;;  %v7783_v24 = vpack.c.bf16 %v6183_v51, %v6182_v30 }
 0x366   : > { %v7770_v57 = vpop.permute.xlu0 %1974 }
 0x367   : > { %6305 = vrot.lane.b32.xlu0 %v7496_v38, %s6891_s29  ;;  %v2004_v38 = vsel %vm1577_vm1, %v1981_v15, 0  ;;  %s9816_s29 = sld [smem:[#allocation55_spill]] }
 0x368   : > { %v1880_v34 = vpop.permute.xlu1 %1879 }
 0x369   : > { %5675 = vmatmul.mubr.msk.bf16.vlgmr.msra.gmra.mxu1 %vm1577_vm1, %v1510_v40  ;;  %5974 = vmatprep.subr.msk.bf16.mxu0 %vm1577_vm1, %v1880_v34  ;;  %v1903_v50 = vsel %vm1577_vm1, %v1880_v34, 0 }
 0x36a   : > { %3289 = vrot.lane.b32.xlu1 %v7475_v37, %s6892_s17  ;;  %v6226_v26 = vpop.permute.xlu0 %6225  ;;  %5678 = vmatprep.mubr.msk.bf16.mxu1 %vm1577_vm1, %v1511_v14 }
 0x36b   : > { %5683 = vmatpush3.bf16.xpose.msra.mxu0 %v1903_v50  ;;  %5699 = vmatpush3.bf16.xpose.msra.mxu1 %v2004_v38  ;;  %v6228_v59 = vunpack.i.h.bf16 %v6226_v26  ;;  %v6227_v61 = vunpack.i.l.bf16 %v6226_v26 }
 0x36c   : > { %3293 = vrot.lane.b32.xlu0 %v7437_v60, %s6892_s17  ;;  %5979 = vmatprep.subr.msk.bf16.mxu1 %vm1577_vm1, %v7735_v16  ;;  %v7789_v37 = vpop.permute.xlu1 %2081 }
 0x36d   : > { %v1517_v29 = vpack.c.bf16 %v6228_v59, %v6227_v61 }
 0x36e   : > { %2281 = vrot.lane.b32.xlu1 %v7783_v24, %s6890_s22  ;;  %v7793_v15 = vpop.permute.xlu0 %2077  ;;  %s6894_s22 = smov 16  }
 0x370   : > { %3287 = vrot.lane.b32.xlu0 %v7508_v48, %s6892_s17  ;;  %v1878_v18 = vpop.permute.xlu1 %1877 }
 0x371   : > { %5679 = vmatmul.mubr.msk.bf16.gmra.mxu1 %vm1577_vm1, %v1512_v20  ;;  %5975 = vmatprep.subr.msk.bf16.mxu0 %vm1577_vm1, %v1878_v18  ;;  %v1900_v60 = vsel %vm1577_vm1, %v1878_v18, 0 }
 0x372   : > { %3382 = vrot.lane.b32.xlu1 %v7524_v39, %s6892_s17  ;;  %v6236_v53 = vpop.permute.xlu0 %6235  ;;  %5706 = vmatprep.mubr.msk.bf16.mxu1 %vm1577_vm1, %v1517_v29 }
 0x373   : > { %5685 = vmatpush3.bf16.xpose.msra.mxu0 %v1900_v60  ;;  %5701 = vmatpush3.bf16.xpose.msra.mxu1 %v2001_v44  ;;  %v6238_v25 = vunpack.i.h.bf16 %v6236_v53  ;;  %v6237_v28 = vunpack.i.l.bf16 %v6236_v53 }
 0x374   : > { %3380 = vrot.lane.b32.xlu0 %v7536_v63, %s6892_s17  ;;  %5976 = vmatprep.subr.msk.bf16.mxu0 %vm1577_vm1, %v7728_v8  ;;  %v2183_v48 = vpop.permute.xlu1 %2182  ;;  %v1995_v8 = vsel %vm1577_vm1, %v7770_v57, 0 }
 0x375   : > { %5980 = vmatprep.subr.msk.bf16.mxu1 %vm1577_vm1, %v7751_v47  ;;  %v2206_v40 = vsel %vm1577_vm1, %v2183_v48, 0 }
 0x376   : > { %3471 = vrot.lane.b32.xlu1 %v7551_v56, %s6892_s17  ;;  %v7813_v39 = vpop.permute.xlu0 %2075 }
 0x378   : > { %3376 = vrot.lane.b32.xlu0 %v7532_v41, %s6892_s17  ;;  %v6241_v16 = vpop.permute.xlu1 %6240 }
 0x379   : > { %v6243_v51 = vunpack.i.h.bf16 %v6241_v16  ;;  %v6242_v30 = vunpack.i.l.bf16 %v6241_v16  ;;  %v7928_v16 = vld [vmem:[%s9624_s2] sm:$0xff] }
 0x37a   : > { %3469 = vrot.lane.b32.xlu1 %v7576_v2, %s6892_s17  ;;  %v6246_v63 = vpop.permute.xlu0 %6245 }
 0x37b   : > { %5687 = vmatpush3.bf16.xpose.msra.mxu0 %v1897_v46  ;;  %5703 = vmatpush3.bf16.xpose.msra.mxu1 %v1998_v4  ;;  %v6248_v50 = vunpack.i.h.bf16 %v6246_v63  ;;  %v6247_v26 = vunpack.i.l.bf16 %v6246_v63  ;;  %v7935_v4 = vld [vmem:[%s7920_s12] sm:$0xff] }
 0x37c   : > { %3554 = vrot.lane.b32.xlu0 %v7609_v9, %s6892_s17  ;;  %5977 = vmatprep.subr.msk.bf16.mxu0 %vm1577_vm1, %v7766_v31  ;;  %v2181_v41 = vpop.permute.xlu1 %2180  ;;  %v1894_v9 = vsel %vm1577_vm1, %v7766_v31, 0 }
 0x37d   : > { %5981 = vmatprep.subr.msk.bf16.mxu1 %vm1577_vm1, %v7770_v57  ;;  %v1521_v33 = vpack.c.bf16 %v6248_v50, %v6247_v26 }
 0x37e   : > { %3378 = vrot.lane.b32.xlu1 %v7520_v23, %s6892_s17  ;;  %v7831_v56 = vpop.permute.xlu0 %2178  ;;  %v6213_v23 = vunpack.i.h.bf16 %v7741_v54 }
 0x37f   : > { %v2200_v61 = vsel %vm1577_vm1, %v7831_v56, 0 }
 0x380   : > { %3732 = vrot.lane.b32.xlu0 %v7660_v35, %s6892_s17  ;;  %v7835_v2 = vpop.permute.xlu1 %6250  ;;  %v6233_v35 = vunpack.i.h.bf16 %v7756_v12  ;;  %v1514_v54 = vpack.c.bf16 %v6213_v23, %v6212_v17  ;;  %v1515_v12 = vpack.c.bf16 %v6238_v25, %v6237_v28 }
 0x382   : > { %3467 = vrot.lane.b32.xlu1 %v7545_v52, %s6892_s17  ;;  %v6256_v47 = vpop.permute.xlu0 %6255  ;;  %v1518_v31 = vpack.c.bf16 %v6233_v35, %v6232_v42 }
 0x383   : > { %5689 = vmatpush3.bf16.xpose.msra.mxu0 %v1894_v9  ;;  %5705 = vmatpush3.bf16.xpose.msra.mxu1 %v1995_v8  ;;  %v6258_v5 = vunpack.i.h.bf16 %v6256_v47  ;;  %v6257_v10 = vunpack.i.l.bf16 %v6256_v47 }
 0x384   : > { %3558 = vrot.lane.b32.xlu0 %v7649_v7, %s6892_s17  ;;  %5982 = vmatprep.subr.msk.bf16.mxu0 %vm1577_vm1, %v7789_v37  ;;  %v7851_v52 = vpop.permute.xlu1 %2283 }
 0x385   : > { %5986 = vmatprep.subr.msk.bf16.mxu1 %vm1577_vm1, %v2183_v48  ;;  %v1519_v57 = vpack.c.bf16 %v6258_v5, %v6257_v10  ;;  %v2307_v60 = vsel %vm1577_vm1, %v7851_v52, 0  ;;  %v7964_v10 = vld [vmem:[%s9624_s2 + $0x30] sm:$0xff] }
 0x386   : > { %3465 = vrot.lane.b32.xlu1 %v7555_v55, %s6892_s17  ;;  %v2105_v55 = vsel %vm1577_vm1, %v7789_v37, 0 }
 0x388   : > { %3736 = vrot.lane.b32.xlu0 %v7703_v49, %s6892_s17  ;;  %v6261_v7 = vpop.permute.xlu1 %6260 }
 0x389   : > { %v6263_v49 = vunpack.i.h.bf16 %v6261_v7  ;;  %v6262_v14 = vunpack.i.l.bf16 %v6261_v7 }
 0x38a   : > { %5691 = vmatmul.mubr.msk.bf16.vlgmr.msra.gmra.mxu0 %vm1577_vm1, %v1514_v54  ;;  %5707 = vmatmul.mubr.msk.bf16.vlgmr.msra.gmra.mxu1 %vm1577_vm1, %v1518_v31 }
 0x38b   : > { %3560 = vrot.lane.b32.xlu1 %v7627_v45, %s6892_s17  ;;  %5694 = vmatprep.mubr.msk.bf16.mxu0 %vm1577_vm1, %v1515_v12  ;;  %v1516_v45 = vpack.c.bf16 %v6243_v51, %v6242_v30  ;;  %v1520_v38 = vpack.c.bf16 %v6263_v49, %v6262_v14  ;;  %v7980_v51 = vld [vmem:[%s9624_s2 + $0x20] sm:$0xff] }
 0x38c   : > { %5710 = vmatprep.mubr.msk.bf16.mxu1 %vm1577_vm1, %v1519_v57  ;;  %5715 = vmatpush3.bf16.xpose.msra.mxu0 %v2105_v55  ;;  %v7867_v34 = vpop.permute.xlu1 %6270  ;;  %v7975_v55 = vld [vmem:[%s7920_s12 + $0x30] sm:$0xff]  ;;  %v7991_v14 = vld [vmem:[%s7920_s12 + $0x20] sm:$0xff] }
 0x38d   : > { %5731 = vmatpush3.bf16.xpose.msra.mxu1 %v2206_v40  ;;  %v6273_v9 = vunpack.i.h.bf16 %v7867_v34  ;;  %v6272_v47 = vunpack.i.l.bf16 %v7867_v34 }
 0x38e   : > { %5987 = vmatprep.subr.msk.bf16.mxu1 %vm1577_vm1, %v2181_v41 }
 0x38f   : > { %3649 = vrot.lane.b32.xlu1 %v7564_v36, %s6892_s17  ;;  %v2203_v36 = vsel %vm1577_vm1, %v2181_v41, 0  ;;  %v1526_v31 = vpack.c.bf16 %v6273_v9, %v6272_v47 }
 0x390   : > { %v2080_v58 = vpop.permute.xlu1 %2079 }
 0x391   : > { %5983 = vmatprep.subr.msk.bf16.mxu0 %vm1577_vm1, %v2080_v58  ;;  %v2102_v59 = vsel %vm1577_vm1, %v2080_v58, 0 }
 0x392   : > { %5695 = vmatmul.mubr.msk.bf16.gmra.mxu0 %vm1577_vm1, %v1516_v45  ;;  %5711 = vmatmul.mubr.msk.bf16.gmra.mxu1 %vm1577_vm1, %v1520_v38 }
 0x393   : > { %3647 = vrot.lane.b32.xlu1 %v7587_v43, %s6892_s17  ;;  %5722 = vmatprep.mubr.msk.bf16.mxu0 %vm1577_vm1, %v1521_v33  ;;  %v2099_v43 = vsel %vm1577_vm1, %v7793_v15, 0 }
 0x394   : > { %5717 = vmatpush3.bf16.xpose.msra.mxu0 %v2102_v59  ;;  %v6276_v37 = vpop.permute.xlu1 %6275 }
 0x395   : > { %5733 = vmatpush3.bf16.xpose.msra.mxu1 %v2203_v36  ;;  %5984 = vmatprep.subr.msk.bf16.mxu0 %vm1577_vm1, %v7793_v15  ;;  %v6252_v15 = vunpack.i.l.bf16 %v7835_v2  ;;  %v6278_v20 = vunpack.i.h.bf16 %v6276_v37  ;;  %v6277_v29 = vunpack.i.l.bf16 %v6276_v37 }
 0x396   : > { %5988 = vmatprep.subr.msk.bf16.mxu1 %vm1577_vm1, %v7831_v56  ;;  %v7942_v56 = vld [vmem:[%s9624_s2 + $0x18] sm:$0xff] }
 0x397   : > { %3556 = vrot.lane.b32.xlu1 %v7569_v32, %s6892_s17  ;;  %v2096_v32 = vsel %vm1577_vm1, %v7813_v39, 0  ;;  %v1523_v18 = vpack.c.bf16 %v6278_v20, %v6277_v29 }
 0x39b   : > { %3645 = vrot.lane.b32.xlu1 %v7599_v3, %s6892_s17  ;;  %v6253_v3 = vunpack.i.h.bf16 %v7835_v2 }
 0x39c   : > { %5719 = vmatpush3.bf16.xpose.msra.mxu0 %v2099_v43 }
 0x39d   : > { %5735 = vmatpush3.bf16.xpose.msra.mxu1 %v2200_v61  ;;  %5985 = vmatprep.subr.msk.bf16.mxu0 %vm1577_vm1, %v7813_v39 }
 0x39f   : > { %3643 = vrot.lane.b32.xlu1 %v7617_v6, %s6892_s17  ;;  %v1522_v6 = vpack.c.bf16 %v6253_v3, %v6252_v15  ;;  %v2375_v3 = vld [vmem:[%s9624_s2 + $0x8] sm:$0xff] }
 0x3a3   : > { %3738 = vrot.lane.b32.xlu1 %v7633_v21, %s6892_s17  ;;  %v6286_v21 = vpop.permute.xlu1 %6285 }
 0x3a4   : > { %5721 = vmatpush3.bf16.xpose.msra.mxu0 %v2096_v32  ;;  %v6288_v53 = vunpack.i.h.bf16 %v6286_v21  ;;  %v6287_v44 = vunpack.i.l.bf16 %v6286_v21 }
 0x3a5   : > { %5990 = vmatprep.subr.msk.bf16.mxu0 %vm1577_vm1, %v7851_v52  ;;  %v7959_v52 = vld [vmem:[%s7920_s12 + $0x18] sm:$0xff] }
 0x3a6   : > { %v1524_v48 = vpack.c.bf16 %v6288_v53, %v6287_v44 }
 0x3a7   : > { %3827 = vrot.lane.b32.xlu1 %v7656_v0, %s6892_s17  ;;  %v7918_v0 = vld [vmem:[%s9624_s2 + $0x10] sm:$0xff] }
 0x3ab   : > { %5723 = vmatmul.mubr.msk.bf16.vlgmr.msra.gmra.mxu0 %vm1577_vm1, %v1522_v6  ;;  %3825 = vrot.lane.b32.xlu1 %v7672_v22, %s6892_s17  ;;  %v7923_v22 = vld [vmem:[%s7920_s12 + $0x10] sm:$0xff] }
 0x3ac   : > { %5726 = vmatprep.mubr.msk.bf16.mxu0 %vm1577_vm1, %v1523_v18  ;;  %5747 = vmatpush3.bf16.xpose.msra.mxu0 %v2307_v60  ;;  %v8013_v6 = vld [vmem:[%s7920_s12 + $0x50] sm:$0xff] }
 0x3af   : > { %3734 = vrot.lane.b32.xlu1 %v7641_v27, %s6892_s17 }
 0x3b2   : > { %v5644_v39 = vpop.f32.mrf.mxu1 }
 0x3b3   : > { %5727 = vmatmul.mubr.msk.bf16.gmra.mxu0 %vm1577_vm1, %v1524_v48  ;;  %3823 = vrot.lane.b32.xlu1 %v7676_v13, %s6892_s17  ;;  %v2408_v27 = vadd.f32 %v5644_v39, %v7918_v0  ;;  %v2177_v63 = vpop.permute.xlu0 %2176  ;;  %v8017_v39 = vld [vmem:[%s7920_s12 + $0x40] sm:$0xff] }
 0x3b4   : > { %v1636_v46 = vpop.f32.mrf.mxu1  ;;  %5989 = vmatprep.subr.msk.bf16.mxu1 %vm1577_vm1, %v2177_v63  ;;  %v2197_v41 = vsel %vm1577_vm1, %v2177_v63, 0 }
 0x3b5   : > { %v7945_v2 = vadd.f32 %v7923_v22, %v2408_v27  ;;  %v2406_v13 = vadd.f32 %v7928_v16, %v1636_v46  ;;  %5737 = vmatpush3.bf16.xpose.msra.mxu1 %v2197_v41  ;;  %v8021_v27 = vld [vmem:[%s7920_s12 + $0x8] sm:$0xff]  ;;  %v2381_v46 = vld [vmem:[%s9624_s2 + $0x38] sm:$0xff] }
 0x3b6   : > { %v5645_v8 = vpop.f32.mrf.mxu1 }
 0x3b7   : > { %v7951_v23 = vadd.f32 %v7935_v4, %v2406_v13  ;;  %3821 = vrot.lane.b32.xlu1 %v7719_v1, %s6892_s17  ;;  %v2409_v17 = vadd.f32 %v5645_v8, %v7942_v56  ;;  %v6266_v35 = vpop.permute.xlu0 %6265  ;;  %v2557_v42 = vsel %vm2550_vm2, %v7945_v2, -inf }
 0x3b8   : > { %v6268_v25 = vunpack.i.h.bf16 %v6266_v35  ;;  %v6267_v28 = vunpack.i.l.bf16 %v6266_v35  ;;  %v1639_v5 = vpop.f32.mrf.mxu1  ;;  %2558 = vmax.xlane.f32.xlu0 %v2557_v42 }
 0x3b9   : > { %v7967_v7 = vadd.f32 %v7959_v52, %v2409_v17  ;;  %v2551_v57 = vsel %vm2550_vm2, %v7951_v23, -inf  ;;  %v2407_v60 = vadd.f32 %v2375_v3, %v1639_v5  ;;  %v2379_v5 = vld [vmem:[%s9624_s2 + $0x28] sm:$0xff] }
 0x3ba   : > { %v1525_v54 = vpack.c.bf16 %v6268_v25, %v6267_v28  ;;  %v5648_v1 = vpop.f32.mrf.mxu1 }
 0x3bb   : > { %3916 = vrot.lane.b32.xlu1 %v7687_v11, %s6892_s17  ;;  %v2412_v12 = vadd.f32 %v5648_v1, %v7964_v10  ;;  %v2560_v49 = vsel %vm2550_vm2, %v7967_v7, -inf  ;;  %v8038_v35 = vadd.f32 %v8021_v27, %v2407_v60 }
 0x3bc   : > { %v1652_v40 = vpop.f32.mrf.mxu1  ;;  %2552 = vmax.xlane.f32.xlu0 %v2551_v57  ;;  %5738 = vmatprep.mubr.msk.bf16.mxu1 %vm1577_vm1, %v1525_v54 }
 0x3bd   : > { %5739 = vmatmul.mubr.msk.bf16.vlgmr.msra.gmra.mxu1 %vm1577_vm1, %v1526_v31  ;;  %v7985_v11 = vadd.f32 %v7975_v55, %v2412_v12  ;;  %v2410_v30 = vadd.f32 %v7980_v51, %v1652_v40  ;;  %v8050_v31 = vld [vmem:[%s7920_s12 + $0x70] sm:$0xff] }
 0x3be   : > { %v5649_v63 = vpop.f32.mrf.mxu1 }
 0x3bf   : > { %v7994_v34 = vadd.f32 %v7991_v14, %v2410_v30  ;;  %v2569_v50 = vsel %vm2550_vm2, %v7985_v11, -inf  ;;  %v2413_v42 = vadd.f32 %v5649_v63, %v2381_v46 }
 0x3c0   : > { %2561 = vmax.xlane.f32.xlu0 %v2560_v49  ;;  %v1655_v28 = vpop.f32.mrf.mxu1  ;;  %v2554_v49 = vsel %vm2550_vm2, %v8038_v35, -inf }
 0x3c1   : > { %v2563_v26 = vsel %vm2550_vm2, %v7994_v34, -inf  ;;  %v2411_v30 = vadd.f32 %v2379_v5, %v1655_v28 }
 0x3c4   : > { %2570 = vmax.xlane.f32.xlu0 %v2569_v50 }
 0x3c8   : > { %2564 = vmax.xlane.f32.xlu0 %v2563_v26  ;;  %v8061_v26 = vld [vmem:[%s7920_s12 + $0x60] sm:$0xff] }
 0x3c9   : > { %v8000_v45 = vpop.permute.xlu0 %2279 }
 0x3cb   : > { %v8002_v38 = vpop.permute.xlu1 %2277 }
 0x3cd   : > { %v6281_v58 = vpop.permute.xlu0 %6280 }
 0x3ce   : > { %v6283_v33 = vunpack.i.h.bf16 %v6281_v58  ;;  %v6282_v59 = vunpack.i.l.bf16 %v6281_v58  ;;  %v8064_v58 = vld [vmem:[%s7920_s12 + $0x28] sm:$0xff] }
 0x3cf   : > { %v8004_v36 = vpop.permute.xlu1 %6300 }
 0x3d0   : > { %v1527_v43 = vpack.c.bf16 %v6283_v33, %v6282_v59 }
 0x3d1   : > { %v6291_v61 = vpop.permute.xlu0 %6290 }
 0x3d2   : > { %v6293_v37 = vunpack.i.h.bf16 %v6291_v61  ;;  %v6292_v32 = vunpack.i.l.bf16 %v6291_v61  ;;  %5742 = vmatprep.mubr.msk.bf16.mxu1 %vm1577_vm1, %v1527_v43 }
 0x3d3   : > { %v8010_v15 = vpop.permute.xlu1 %6310 }
 0x3d4   : > { %v1528_v20 = vpack.c.bf16 %v6293_v37, %v6292_v32  ;;  %v5660_v29 = vpop.f32.mrf.mxu0  ;;  %v8078_v32 = vadd.f32 %v8064_v58, %v2411_v30  ;;  %v2298_v30 = vsel %vm1577_vm1, %v8002_v38, 0 }
 0x3d5   : > { %v2416_v18 = vadd.f32 %v5660_v29, %v7918_v0  ;;  %v6296_v21 = vpop.permute.xlu0 %6295  ;;  %v8084_v29 = vld [vmem:[%s7920_s12 + $0x58] sm:$0xff] }
 0x3d6   : > { %v6298_v53 = vunpack.i.h.bf16 %v6296_v21  ;;  %v6297_v44 = vunpack.i.l.bf16 %v6296_v21  ;;  %v1737_v48 = vpop.f32.mrf.mxu0  ;;  %5743 = vmatmul.mubr.msk.bf16.gmra.mxu1 %vm1577_vm1, %v1528_v20 }
 0x3d7   : > { %v8027_v41 = vadd.f32 %v8013_v6, %v2416_v18  ;;  %v2414_v0 = vadd.f32 %v7928_v16, %v1737_v48  ;;  %v8030_v13 = vpop.permute.xlu1 %3291  ;;  %v8042_v16 = vld [vmem:[%s7920_s12 + $0x38] sm:$0xff] }
 0x3d8   : > { %v1529_v9 = vpack.c.bf16 %v6298_v53, %v6297_v44  ;;  %v5661_v8 = vpop.f32.mrf.mxu0  ;;  %v8056_v40 = vadd.f32 %v8042_v16, %v2413_v42  ;;  %v2566_v53 = vsel %vm2550_vm2, %v8078_v32, -inf  ;;  %v8098_v44 = vld [vmem:[%s7920_s12 + $0x48] sm:$0xff] }
 0x3d9   : > { %v8033_v47 = vadd.f32 %v8017_v39, %v2414_v0  ;;  %v2581_v17 = vsel %vm2550_vm2, %v8027_v41, -inf  ;;  %v2417_v20 = vadd.f32 %v5661_v8, %v7942_v56  ;;  %v2301_v0 = vsel %vm1577_vm1, %v8000_v45, 0 }
 0x3da   : > { %v1740_v25 = vpop.f32.mrf.mxu0  ;;  %2582 = vmax.xlane.f32.xlu0 %v2581_v17  ;;  %5754 = vmatprep.mubr.msk.bf16.mxu0 %vm1577_vm1, %v1529_v9  ;;  %v8108_v17 = vld [vmem:[%s7920_s12 + $0x78] sm:$0xff] }
 0x3db   : > { %v2575_v57 = vsel %vm2550_vm2, %v8033_v47, -inf  ;;  %v8093_v60 = vadd.f32 %v8084_v29, %v2417_v20  ;;  %v2415_v56 = vadd.f32 %v2375_v3, %v1740_v25  ;;  %v6306_v25 = vpop.permute.xlu0 %6305 }
 0x3dc   : > { %v8047_v54 = vpop.permute.xlu1 %3289  ;;  %v5664_v1 = vpop.f32.mrf.mxu0 }
 0x3dd   : > { %v2420_v12 = vadd.f32 %v5664_v1, %v7964_v10  ;;  %v8103_v9 = vadd.f32 %v8098_v44, %v2415_v56  ;;  %v2584_v3 = vsel %vm2550_vm2, %v8093_v60, -inf }
 0x3de   : > { %v1753_v50 = vpop.f32.mrf.mxu0  ;;  %2576 = vmax.xlane.f32.xlu0 %v2575_v57 }
 0x3df   : > { %v8067_v33 = vadd.f32 %v8050_v31, %v2420_v12  ;;  %2555 = vmax.xlane.f32.xlu1 %v2554_v49  ;;  %v2418_v10 = vadd.f32 %v7980_v51, %v1753_v50  ;;  %v2572_v51 = vsel %vm2550_vm2, %v8056_v40, -inf  ;;  %v8118_v12 = vld [vmem:[%s7920_s12 + $0x68] sm:$0xff]  ;;  %v3294_v49 = vpop.permute.xlu0 %3293  ;;  %s9821_s12 = sld [smem:[#allocation58_spill]] (%p7057_p10) }
 0x3e0   : > { %v2282_v59 = vpop.permute.xlu1 %2281  ;;  %v5665_v48 = vpop.f32.mrf.mxu0 }
 0x3e1   : > { %v8071_v43 = vadd.f32 %v8061_v26, %v2418_v10  ;;  %5991 = vmatprep.subr.msk.bf16.mxu0 %vm1577_vm1, %v2282_v59  ;;  %v2304_v61 = vsel %vm1577_vm1, %v2282_v59, 0  ;;  %v2593_v37 = vsel %vm2550_vm2, %v8067_v33, -inf  ;;  %v2421_v8 = vadd.f32 %v5665_v48, %v2381_v46 }
 0x3e2   : > { %5749 = vmatpush3.bf16.xpose.msra.mxu0 %v2304_v61  ;;  %2594 = vmax.xlane.f32.xlu0 %v2593_v37  ;;  %v1756_v42 = vpop.f32.mrf.mxu0  ;;  %v2578_v46 = vsel %vm2550_vm2, %v8103_v9, -inf  ;;  %v6302_v59 = vunpack.i.l.bf16 %v8004_v36  ;;  %v6308_v61 = vunpack.i.h.bf16 %v6306_v25  ;;  %v6307_v37 = vunpack.i.l.bf16 %v6306_v25 }
 0x3e3   : > { %2573 = vmax.xlane.f32.xlu1 %v2572_v51  ;;  %5992 = vmatprep.subr.msk.bf16.mxu0 %vm1577_vm1, %v8000_v45  ;;  %v2587_v21 = vsel %vm2550_vm2, %v8071_v43, -inf  ;;  %v8113_v45 = vadd.f32 %v8108_v17, %v2421_v8  ;;  %v2419_v1 = vadd.f32 %v2379_v5, %v1756_v42  ;;  %v6303_v5 = vunpack.i.h.bf16 %v8004_v36  ;;  %v3288_v8 = vpop.permute.xlu0 %3287  ;;  %v8156_v42 = vld [vmem:[%s9624_s2 + $0x40] sm:$0xff] }
 0x3e4   : > { %v8088_v18 = vpop.permute.xlu1 %3382  ;;  %v6313_v36 = vunpack.i.h.bf16 %v8010_v15 }
 0x3e5   : > { %9710 = vst [vmem:[#allocation13_spill] sm:$0xff] %v8088_v18  ;;  %v8125_v50 = vadd.f32 %v8118_v12, %v2419_v1  ;;  %v2596_v10 = vsel %vm2550_vm2, %v8113_v45, -inf  ;;  %v1530_v51 = vpack.c.bf16 %v6303_v5, %v6302_v59  ;;  %v8163_v1 = vld [vmem:[%s9624_s2 + $0x58] sm:$0xff]  ;;  %v8174_v5 = vld [vmem:[%s9624_s2 + $0x48] sm:$0xff] }
 0x3e6   : > { %2588 = vmax.xlane.f32.xlu0 %v2587_v21  ;;  %v1531_v21 = vpack.c.bf16 %v6308_v61, %v6307_v37 }
 0x3e7   : > { %2567 = vmax.xlane.f32.xlu1 %v2566_v53  ;;  %v6312_v53 = vunpack.i.l.bf16 %v8010_v15 }
 0x3e8   : > { %v3472_v63 = vpop.permute.xlu1 %3471 }
 0x3e9   : > { %5794 = vmatprep.subr.bf16.mxu1 %v3472_v63 }
 0x3ea   : > { %5751 = vmatpush3.bf16.xpose.msra.mxu0 %v2301_v0  ;;  %5795 = vmatpush3.bf16.msra.mxu1 %v3472_v63  ;;  %v1532_v63 = vpack.c.bf16 %v6313_v36, %v6312_v53  ;;  %v8194_v53 = vld [vmem:[%s9624_s2 + $0x60] sm:$0xff] }
 0x3eb   : > { %2585 = vmax.xlane.f32.xlu1 %v2584_v3  ;;  %5993 = vmatprep.subr.msk.bf16.mxu0 %vm1577_vm1, %v8002_v38  ;;  %v2590_v38 = vsel %vm2550_vm2, %v8125_v50, -inf }
 0x3ec   : > { %v3470_v28 = vpop.permute.xlu1 %3469 }
 0x3ed   : > { %5796 = vmatprep.subr.bf16.mxu1 %v3470_v28 }
 0x3ee   : > { %5797 = vmatpush3.bf16.msra.mxu1 %v3470_v28  ;;  %v8158_v28 = vpop.permute.xlu0 %3380 }
 0x3ef   : > { %2579 = vmax.xlane.f32.xlu1 %v2578_v46  ;;  %9715 = vst [vmem:[#allocation18_spill] sm:$0xff] %v8158_v28 }
 0x3f0   : > { %v8120_v57 = vpop.permute.xlu1 %3378 }
 0x3f1   : > { %9711 = vst [vmem:[#allocation14_spill] sm:$0xff] %v8120_v57 }
 0x3f2   : > { %5753 = vmatpush3.bf16.xpose.msra.mxu0 %v2298_v30 }
 0x3f3   : > { %2597 = vmax.xlane.f32.xlu1 %v2596_v10  ;;  %5762 = vmatprep.subr.bf16.mxu0 %v3294_v49 }
 0x3f4   : > { %v3468_v20 = vpop.permute.xlu1 %3467 }
 0x3f5   : > { %5798 = vmatprep.subr.bf16.mxu1 %v3468_v20 }
 0x3f6   : > { %5799 = vmatpush3.bf16.msra.mxu1 %v3468_v20 }
 0x3f7   : > { %2591 = vmax.xlane.f32.xlu1 %v2590_v38  ;;  %v2388_v38 = vld [vmem:[%s9624_s2 + $0x70] sm:$0xff] }
 0x3f8   : > { %v3466_v56 = vpop.permute.xlu1 %3465 }
 0x3f9   : > { %5755 = vmatmul.mubr.msk.bf16.vlgmr.msra.gmra.mxu0 %vm1577_vm1, %v1530_v51  ;;  %5800 = vmatprep.subr.bf16.mxu1 %v3466_v56 }
 0x3fa   : > { %5758 = vmatprep.mubr.msk.bf16.mxu0 %vm1577_vm1, %v1531_v21  ;;  %5763 = vmatpush3.bf16.msra.mxu0 %v3294_v49 }
 0x3fb   : > { %5801 = vmatpush3.bf16.msra.mxu1 %v3466_v56  ;;  %5764 = vmatprep.subr.bf16.mxu0 %v8030_v13  ;;  %v8189_v56 = vpop.permute.xlu0 %3376 }
 0x3fc   : > { %9719 = vst [vmem:[#allocation22_spill] sm:$0xff] %v8189_v56 }
 0x3fd   : > { %v8138_v48 = vpop.permute.xlu1 %3560 }
 0x3fe   : > { %9712 = vst [vmem:[#allocation15_spill] sm:$0xff] %v8138_v48  ;;  %5765 = vmatpush3.bf16.msra.mxu0 %v8030_v13  ;;  %v2384_v13 = vld [vmem:[%s9624_s2 + $0x50] sm:$0xff] }
 0x3ff   : > { %5766 = vmatprep.subr.bf16.mxu0 %v8047_v54 }
 0x401   : > { %v8142_v0 = vpop.permute.xlu1 %3649  ;;  %5759 = vmatmul.mubr.msk.bf16.gmra.mxu0 %vm1577_vm1, %v1532_v63 }
 0x402   : > { %9713 = vst [vmem:[#allocation16_spill] sm:$0xff] %v8142_v0  ;;  %5826 = vmatprep.subr.bf16.mxu1 %v8142_v0  ;;  %5767 = vmatpush3.bf16.msra.mxu0 %v8047_v54 }
 0x403   : > { %5768 = vmatprep.subr.bf16.mxu0 %v3288_v8 }
 0x405   : > { %v8148_v15 = vpop.permute.xlu1 %3647 }
 0x406   : > { %5769 = vmatpush3.bf16.msra.mxu0 %v3288_v8  ;;  %9714 = vst [vmem:[#allocation17_spill] sm:$0xff] %v8148_v15 }
 0x407   : > { %5778 = vmatprep.subr.bf16.mxu0 %v8088_v18 }
 0x409   : > { %v8169_v49 = vpop.permute.xlu1 %3556 }
 0x40a   : > { %9716 = vst [vmem:[#allocation19_spill] sm:$0xff] %v8169_v49 }
 0x429   : > { %v5676_v3 = vpop.f32.mrf.mxu1 }
 0x42a   : > { %v2424_v25 = vadd.f32 %v5676_v3, %v2384_v13 }
 0x42b   : > { %v1838_v54 = vpop.f32.mrf.mxu1 }
 0x42c   : > { %v8166_v46 = vadd.f32 %v7923_v22, %v2424_v25  ;;  %v2422_v30 = vadd.f32 %v8156_v42, %v1838_v54  ;;  %v8203_v54 = vpop.permute.xlu1 %3645 }
 0x42d   : > { %v5677_v10 = vpop.f32.mrf.mxu1  ;;  %9721 = vst [vmem:[#allocation24_spill] sm:$0xff] %v8203_v54 }
 0x42e   : > { %v8177_v59 = vadd.f32 %v7935_v4, %v2422_v30  ;;  %v2425_v61 = vadd.f32 %v5677_v10, %v8163_v1  ;;  %v2605_v37 = vsel %vm2550_vm2, %v8166_v46, -inf  ;;  %v2389_v10 = vld [vmem:[%s9624_s2 + $0x78] sm:$0xff] }
 0x42f   : > { %2606 = vmax.xlane.f32.xlu0 %v2605_v37  ;;  %v1841_v20 = vpop.f32.mrf.mxu1 }
 0x430   : > { %9717 = vst [vmem:[#allocation20_spill] sm:$0xff] %v8177_v59  ;;  %v8186_v51 = vadd.f32 %v7959_v52, %v2425_v61  ;;  %v2423_v21 = vadd.f32 %v8174_v5, %v1841_v20  ;;  %v2599_v3 = vsel %vm2550_vm2, %v8177_v59, -inf  ;;  %v8230_v19 = vpop.permute.xlu1 %3643 }
 0x431   : > { %v5680_v36 = vpop.f32.mrf.mxu1  ;;  %9723 = vst [vmem:[#allocation26_spill] sm:$0xff] %v8230_v19 }
 0x432   : > { %9718 = vst [vmem:[#allocation21_spill] sm:$0xff] %v8186_v51  ;;  %v8197_v63 = vadd.f32 %v8021_v27, %v2423_v21  ;;  %v2428_v8 = vadd.f32 %v5680_v36, %v2388_v38  ;;  %v2608_v25 = vsel %vm2550_vm2, %v8186_v51, -inf  ;;  %v8215_v21 = vld [vmem:[%s9624_s2 + $0x68] sm:$0xff] }
 0x433   : > { %2600 = vmax.xlane.f32.xlu0 %v2599_v3  ;;  %v1854_v30 = vpop.f32.mrf.mxu1  ;;  %2609 = vmax.xlane.f32.xlu1 %v2608_v25 }
 0x434   : > { %9720 = vst [vmem:[#allocation23_spill] sm:$0xff] %v8197_v63  ;;  %v8209_v61 = vadd.f32 %v7975_v55, %v2428_v8  ;;  %v2426_v37 = vadd.f32 %v8194_v53, %v1854_v30  ;;  %v2602_v54 = vsel %vm2550_vm2, %v8197_v63, -inf  ;;  %v8224_v8 = vpop.permute.xlu0 %3554 }
 0x435   : > { %v5681_v20 = vpop.f32.mrf.mxu1  ;;  %9722 = vst [vmem:[#allocation25_spill] sm:$0xff] %v8224_v8 }
 0x436   : > { %v8218_v36 = vadd.f32 %v7991_v14, %v2426_v37  ;;  %v2429_v3 = vadd.f32 %v5681_v20, %v2389_v10  ;;  %v2617_v25 = vsel %vm2550_vm2, %v8209_v61, -inf }
 0x437   : > { %2618 = vmax.xlane.f32.xlu0 %v2617_v25  ;;  %v1857_v30 = vpop.f32.mrf.mxu1  ;;  %2603 = vmax.xlane.f32.xlu1 %v2602_v54 }
 0x438   : > { %v8227_v15 = vadd.f32 %v8042_v16, %v2429_v3  ;;  %v2427_v0 = vadd.f32 %v8215_v21, %v1857_v30  ;;  %v2611_v20 = vsel %vm2550_vm2, %v8218_v36, -inf  ;;  %v8239_v25 = vpop.permute.xlu0 %3732  ;;  %v8243_v3 = vpop.permute.xlu1 %3738 }
 0x439   : > { %9724 = vst [vmem:[#allocation27_spill] sm:$0xff] %v8239_v25  ;;  %9725 = vst [vmem:[#allocation28_spill] sm:$0xff] %v8243_v3 }
 0x43a   : > { %v8233_v37 = vadd.f32 %v8064_v58, %v2427_v0  ;;  %v2620_v62 = vsel %vm2550_vm2, %v8227_v15, -inf }
 0x43b   : > { %2612 = vmax.xlane.f32.xlu0 %v2611_v20  ;;  %2621 = vmax.xlane.f32.xlu1 %v2620_v62 }
 0x43c   : > { %v2614_v54 = vsel %vm2550_vm2, %v8233_v37, -inf  ;;  %v8245_v30 = vpop.permute.xlu0 %3558  ;;  %v8247_v0 = vpop.permute.xlu1 %3827 }
 0x43d   : > { %9726 = vst [vmem:[#allocation29_spill] sm:$0xff] %v8245_v30  ;;  %9727 = vst [vmem:[#allocation30_spill] sm:$0xff] %v8247_v0 }
 0x43f   : > { %2615 = vmax.xlane.f32.xlu1 %v2614_v54 }
 0x440   : > { %v8249_v19 = vpop.permute.xlu0 %3736  ;;  %v8251_v48 = vpop.permute.xlu1 %3825 }
 0x441   : > { %9728 = vst [vmem:[#allocation31_spill] sm:$0xff] %v8249_v19  ;;  %9729 = vst [vmem:[#allocation32_spill] sm:$0xff] %v8251_v48 }
 0x444   : > { %v2559_v56 = vpop.xlane.xlu0 %2558  ;;  %v8263_v48 = vpop.permute.xlu1 %3734 }
 0x445   : > { %9730 = vst [vmem:[#allocation33_spill] sm:$0xff] %v8263_v48  ;;  %v8276_v48 = vld [vmem:[%s9624_s2 + $0x90] sm:$0xff] }
 0x448   : > { %v2553_v18 = vpop.xlane.xlu0 %2552  ;;  %v8286_v63 = vpop.permute.xlu1 %3823 }
 0x449   : > { %9733 = vst [vmem:[#allocation36_spill] sm:$0xff] %v8286_v63 }
 0x44a   : > { %v5692_v8 = vpop.f32.mrf.mxu0  ;;  %v5708_v49 = vpop.f32.mrf.mxu1 }
 0x44b   : > { %v2432_v20 = vadd.f32 %v5692_v8, %v2384_v13  ;;  %v2440_v51 = vadd.f32 %v5708_v49, %v8276_v48 }
 0x44c   : > { %v1939_v62 = vpop.f32.mrf.mxu0  ;;  %v2040_v3 = vpop.f32.mrf.mxu1 }
 0x44d   : > { %v8254_v25 = vadd.f32 %v8013_v6, %v2432_v20  ;;  %v2430_v57 = vadd.f32 %v8156_v42, %v1939_v62 }
 0x44e   : > { %v5693_v54 = vpop.f32.mrf.mxu0  ;;  %v5709_v42 = vpop.f32.mrf.mxu1 }
 0x44f   : > { %v2433_v30 = vadd.f32 %v5693_v54, %v8163_v1  ;;  %v8259_v0 = vadd.f32 %v8017_v39, %v2430_v57  ;;  %v2629_v19 = vsel %vm2550_vm2, %v8254_v25, -inf }
 0x450   : > { %v1942_v28 = vpop.f32.mrf.mxu0  ;;  %2630 = vmax.xlane.f32.xlu0 %v2629_v19 }
 0x451   : > { %v8266_v13 = vadd.f32 %v8084_v29, %v2433_v30  ;;  %v2431_v8 = vadd.f32 %v8174_v5, %v1942_v28  ;;  %v2623_v57 = vsel %vm2550_vm2, %v8259_v0, -inf }
 0x452   : > { %v5696_v20 = vpop.f32.mrf.mxu0 }
 0x453   : > { %9731 = vst [vmem:[#allocation34_spill] sm:$0xff] %v8266_v13  ;;  %v2436_v62 = vadd.f32 %v5696_v20, %v2388_v38  ;;  %v2632_v54 = vsel %vm2550_vm2, %v8266_v13, -inf  ;;  %v8279_v19 = vadd.f32 %v8098_v44, %v2431_v8  ;;  %v2043_v38 = vpop.f32.mrf.mxu1  ;;  %v2745_v20 = vsub.f32 %v7945_v2, %v2559_v56  ;;  %v2562_v56 = vpop.xlane.xlu0 %2561 }
 0x454   : > { %v1955_v1 = vpop.f32.mrf.mxu0  ;;  %2624 = vmax.xlane.f32.xlu0 %v2623_v57  ;;  %2633 = vmax.xlane.f32.xlu1 %v2632_v54 }
 0x455   : > { %9732 = vst [vmem:[#allocation35_spill] sm:$0xff] %v8279_v19  ;;  %v8282_v28 = vadd.f32 %v8050_v31, %v2436_v62  ;;  %v2434_v5 = vadd.f32 %v8194_v53, %v1955_v1  ;;  %v8297_v53 = vld [vmem:[%s9624_s2 + $0x80] sm:$0xff]  ;;  %v2626_v49 = vsel %vm2550_vm2, %v8279_v19, -inf  ;;  %v5712_v1 = vpop.f32.mrf.mxu1  ;;  %v2811_v54 = vmul.f32 1.442695, %v2745_v20  ;;  %v8324_v20 = vld [vmem:[%s9624_s2 + $0xb0] sm:$0xff] }
 0x456   : > { %v5697_v30 = vpop.f32.mrf.mxu0 }
 0x457   : > { %v2437_v13 = vadd.f32 %v5697_v30, %v2389_v10  ;;  %v8290_v59 = vadd.f32 %v8061_v26, %v2434_v5  ;;  %v2641_v8 = vsel %vm2550_vm2, %v8282_v28, -inf  ;;  %v8308_v10 = vld [vmem:[%s9624_s2 + $0x98] sm:$0xff]  ;;  %v8314_v30 = vadd.f32 %v7923_v22, %v2440_v51  ;;  %v2056_v51 = vpop.f32.mrf.mxu1 }
 0x458   : > { %v1958_v62 = vpop.f32.mrf.mxu0  ;;  %2642 = vmax.xlane.f32.xlu0 %v2641_v8  ;;  %2627 = vmax.xlane.f32.xlu1 %v2626_v49  ;;  %v2441_v63 = vadd.f32 %v5709_v42, %v8308_v10  ;;  %6480 = vpow2.f32 %v2811_v54  ;;  %v2444_v42 = vadd.f32 %v5712_v1, %v8324_v20  ;;  %v8356_v1 = vld [vmem:[%s9624_s2 + $0xb8] sm:$0xff] }
 0x459   : > { %v8300_v57 = vadd.f32 %v8108_v17, %v2437_v13  ;;  %v2435_v2 = vadd.f32 %v8215_v21, %v1958_v62  ;;  %v2743_v13 = vsub.f32 %v7951_v23, %v2553_v18  ;;  %9735 = vst [vmem:[#allocation38_spill] sm:$0xff] %v8314_v30  ;;  %v2438_v21 = vadd.f32 %v8297_v53, %v2040_v3  ;;  %v8329_v23 = vpop.permute.xlu1 %3821  ;;  %v8334_v18 = vld [vmem:[%s9624_s2 + $0x88] sm:$0xff] }
 0x45a   : > { %v2635_v8 = vsel %vm2550_vm2, %v8290_v59, -inf  ;;  %v2746_v62 = vsub.f32 %v7967_v7, %v2562_v56  ;;  %9737 = vst [vmem:[#allocation40_spill] sm:$0xff] %v8329_v23  ;;  %v2439_v23 = vadd.f32 %v8334_v18, %v2043_v38  ;;  %v8361_v38 = vadd.f32 %v7975_v55, %v2444_v42 }
 0x45b   : > { %9734 = vst [vmem:[#allocation37_spill] sm:$0xff] %v8300_v57  ;;  %v2644_v5 = vsel %vm2550_vm2, %v8300_v57, -inf  ;;  %v8327_v49 = vadd.f32 %v8118_v12, %v2435_v2  ;;  %v2807_v7 = vmul.f32 1.442695, %v2743_v13  ;;  %v8337_v3 = vadd.f32 %v7935_v4, %v2438_v21  ;;  %v5713_v13 = vpop.f32.mrf.mxu1 }
 0x45c   : > { %2636 = vmax.xlane.f32.xlu0 %v2635_v8  ;;  %2645 = vmax.xlane.f32.xlu1 %v2644_v5  ;;  %v2653_v2 = vsel %vm2550_vm2, %v8314_v30, -inf  ;;  %v2813_v56 = vmul.f32 1.442695, %v2746_v62  ;;  %v8343_v8 = vadd.f32 %v7959_v52, %v2441_v63  ;;  %v8349_v5 = vld [vmem:[%s9624_s2 + $0xa0] sm:$0xff]  ;;  %v2571_v63 = vpop.xlane.xlu0 %2570  ;;  %9741 = vst [vmem:[#allocation44_spill] sm:$0xff] %v8361_v38  ;;  %v2445_v57 = vadd.f32 %v5713_v13, %v8356_v1 }
 0x45d   : > { %9736 = vst [vmem:[#allocation39_spill] sm:$0xff] %v8327_v49  ;;  %9738 = vst [vmem:[#allocation41_spill] sm:$0xff] %v8337_v3  ;;  %v2638_v54 = vsel %vm2550_vm2, %v8327_v49, -inf  ;;  %v8358_v21 = vpop.permute.xlu1 %3916  ;;  %6482 = vpow2.f32 %v2807_v7  ;;  %v2442_v62 = vadd.f32 %v8349_v5, %v2056_v51  ;;  %v8367_v49 = vadd.f32 %v8021_v27, %v2439_v23  ;;  %v8375_v7 = vld [vmem:[%s9624_s2 + $0xa8] sm:$0xff] }
 0x45e   : > { %9739 = vst [vmem:[#allocation42_spill] sm:$0xff] %v8343_v8  ;;  %9740 = vst [vmem:[#allocation43_spill] sm:$0xff] %v8358_v21  ;;  %6484 = vpow2.f32 %v2813_v56  ;;  %v2059_v21 = vpop.f32.mrf.mxu1  ;;  %v2749_v51 = vsub.f32 %v7985_v11, %v2571_v63  ;;  %v2665_v56 = vsel %vm2550_vm2, %v8361_v38, -inf }
 0x45f   : > { %v8379_v42 = vadd.f32 %v7991_v14, %v2442_v62 }
 0x460   : > { %2654 = vmax.xlane.f32.xlu0 %v2653_v2  ;;  %2639 = vmax.xlane.f32.xlu1 %v2638_v54  ;;  %v2647_v2 = vsel %vm2550_vm2, %v8337_v3, -inf  ;;  %v2656_v54 = vsel %vm2550_vm2, %v8343_v8, -inf  ;;  %v2565_v13 = vpop.xlane.xlu0 %2564  ;;  %v2443_v8 = vadd.f32 %v8375_v7, %v2059_v21  ;;  %v2819_v62 = vmul.f32 1.442695, %v2749_v51 }
 0x461   : > { %v2747_v3 = vsub.f32 %v7994_v34, %v2565_v13 }
 0x462   : > { %v8396_v21 = vadd.f32 %v8064_v58, %v2443_v8 }
 0x463   : > { %v2815_v51 = vmul.f32 1.442695, %v2747_v3 }
 0x464   : > { %2648 = vmax.xlane.f32.xlu0 %v2647_v2  ;;  %2657 = vmax.xlane.f32.xlu1 %v2656_v54  ;;  %v8384_v2 = vadd.f32 %v8042_v16, %v2445_v57  ;;  %v2650_v54 = vsel %vm2550_vm2, %v8367_v49, -inf  ;;  %v2659_v57 = vsel %vm2550_vm2, %v8379_v42, -inf  ;;  %v2583_v8 = vpop.xlane.xlu0 %2582 }
 0x465   : > { %v8390_v63 = vpop.eup %6480 }
 0x466   : > { %9742 = vst [vmem:[#allocation45_spill] sm:$0xff] %v8390_v63  ;;  %v2941_v13 = vsel %vm2550_vm2, %v8390_v63, 0.0 }
 0x468   : > { %v2556_v23 = vpop.xlane.xlu1 %2555  ;;  %2666 = vmax.xlane.f32.xlu0 %v2665_v56  ;;  %2651 = vmax.xlane.f32.xlu1 %v2650_v54 }
 0x469   : > { %v2744_v19 = vsub.f32 %v8038_v35, %v2556_v23  ;;  %v2668_v35 = vsel %vm2550_vm2, %v8384_v2, -inf }
 0x46a   : > { %v8404_v54 = vpop.eup %6482 }
 0x46b   : > { %v2809_v11 = vmul.f32 1.442695, %v2744_v19  ;;  %v5724_v38 = vpop.f32.mrf.mxu0 }
 0x46c   : > { %v2574_v30 = vpop.xlane.xlu1 %2573  ;;  %2660 = vmax.xlane.f32.xlu0 %v2659_v57  ;;  %2669 = vmax.xlane.f32.xlu1 %v2668_v35  ;;  %v2448_v34 = vadd.f32 %v5724_v38, %v8276_v48  ;;  %v8408_v57 = vpop.eup %6484 }
 0x46d   : > { %6486 = vpow2.f32 %v2809_v11  ;;  %v2750_v19 = vsub.f32 %v8056_v40, %v2574_v30  ;;  %v2141_v23 = vpop.f32.mrf.mxu0  ;;  %v2662_v11 = vsel %vm2550_vm2, %v8396_v21, -inf }
 0x46e   : > { %6488 = vpow2.f32 %v2819_v62  ;;  %v8412_v48 = vadd.f32 %v8013_v6, %v2448_v34  ;;  %v2446_v3 = vadd.f32 %v8297_v53, %v2141_v23  ;;  %v2935_v62 = vsel %vm2550_vm2, %v8404_v54, 0.0 }
 0x46f   : > { %v2821_v40 = vmul.f32 1.442695, %v2750_v19  ;;  %6490 = vpow2.f32 %v2815_v51  ;;  %v5725_v38 = vpop.f32.mrf.mxu0  ;;  %v2753_v19 = vsub.f32 %v8027_v41, %v2583_v8 }
 0x470   : > { %v2568_v56 = vpop.xlane.xlu1 %2567  ;;  %2942 = vadd.xlane.f32.xlu0 %v2941_v13  ;;  %2663 = vmax.xlane.f32.xlu1 %v2662_v11  ;;  %v2944_v13 = vsel %vm2550_vm2, %v8408_v57, 0.0  ;;  %v2449_v51 = vadd.f32 %v5725_v38, %v8308_v10  ;;  %v8424_v53 = vadd.f32 %v8017_v39, %v2446_v3 }
 0x471   : > { %v2748_v30 = vsub.f32 %v8078_v32, %v2568_v56  ;;  %v2577_v32 = vpop.xlane.xlu0 %2576  ;;  %6492 = vpow2.f32 %v2821_v40  ;;  %v2144_v23 = vpop.f32.mrf.mxu0  ;;  %v2677_v56 = vsel %vm2550_vm2, %v8412_v48, -inf }
 0x472   : > { %v8431_v63 = vadd.f32 %v8084_v29, %v2449_v51  ;;  %v2447_v41 = vadd.f32 %v8334_v18, %v2144_v23 }
 0x473   : > { %v2817_v34 = vmul.f32 1.442695, %v2748_v30  ;;  %v5728_v40 = vpop.f32.mrf.mxu0  ;;  %v2671_v30 = vsel %vm2550_vm2, %v8424_v53, -inf }
 0x474   : > { %v8417_v35 = vpop.xlane.xlu1 %2585  ;;  %2936 = vadd.xlane.f32.xlu0 %v2935_v62  ;;  %2945 = vadd.xlane.f32.xlu1 %v2944_v13  ;;  %v2827_v62 = vmul.f32 1.442695, %v2753_v19  ;;  %v2751_v13 = vsub.f32 %v8033_v47, %v2577_v32  ;;  %v8442_v19 = vadd.f32 %v8098_v44, %v2447_v41  ;;  %v2680_v18 = vsel %vm2550_vm2, %v8431_v63, -inf }
 0x475   : > { %6494 = vpow2.f32 %v2817_v34  ;;  %v2595_v38 = vpop.xlane.xlu0 %2594  ;;  %v2452_v34 = vadd.f32 %v5728_v40, %v8324_v20  ;;  %v2157_v23 = vpop.f32.mrf.mxu0 }
 0x476   : > { %6496 = vpow2.f32 %v2827_v62  ;;  %v2757_v51 = vsub.f32 %v8067_v33, %v2595_v38  ;;  %v2823_v47 = vmul.f32 1.442695, %v2751_v13  ;;  %v2450_v32 = vadd.f32 %v8349_v5, %v2157_v23  ;;  %v8466_v5 = vld [vmem:[%s9624_s2 + $0xd0] sm:$0xff] }
 0x477   : > { %v2674_v41 = vsel %vm2550_vm2, %v8442_v19, -inf  ;;  %v8458_v20 = vadd.f32 %v8050_v31, %v2452_v34  ;;  %v2754_v13 = vsub.f32 %v8093_v60, %v8417_v35  ;;  %v5729_v23 = vpop.f32.mrf.mxu0  ;;  %v8483_v35 = vld [vmem:[%s9624_s2 + $0xc0] sm:$0xff] }
 0x478   : > { %2678 = vmax.xlane.f32.xlu0 %v2677_v56  ;;  %v2580_v8 = vpop.xlane.xlu1 %2579  ;;  %v2835_v33 = vmul.f32 1.442695, %v2757_v51  ;;  %6498 = vpow2.f32 %v2823_v47  ;;  %v8471_v51 = vadd.f32 %v8061_v26, %v2450_v32  ;;  %v2453_v32 = vadd.f32 %v5729_v23, %v8356_v1 }
 0x479   : > { %v2829_v47 = vmul.f32 1.442695, %v2754_v13  ;;  %v2589_v1 = vpop.xlane.xlu0 %2588 }
 0x47a   : > { %v8428_v11 = vpop.eup %6486  ;;  %6500 = vpow2.f32 %v2835_v33  ;;  %v2752_v33 = vsub.f32 %v8103_v9, %v2580_v8  ;;  %v8499_v9 = vadd.f32 %v8108_v17, %v2453_v32 }
 0x47b   : > { %v2938_v10 = vsel %vm2550_vm2, %v8428_v11, 0.0  ;;  %v8438_v3 = vpop.eup %6488 }
 0x47c   : > { %2939 = vadd.xlane.f32.xlu1 %v2938_v10  ;;  %9743 = vst [vmem:[#allocation46_spill] sm:$0xff] %v8438_v3  ;;  %2672 = vmax.xlane.f32.xlu0 %v2671_v30  ;;  %v2953_v56 = vsel %vm2550_vm2, %v8438_v3, 0.0  ;;  %v8450_v10 = vpop.eup %6490  ;;  %v2598_v62 = vpop.xlane.xlu1 %2597  ;;  %v2825_v8 = vmul.f32 1.442695, %v2752_v33 }
 0x47d   : > { %9744 = vst [vmem:[#allocation47_spill] sm:$0xff] %v8450_v10  ;;  %v2758_v40 = vsub.f32 %v8113_v45, %v2598_v62  ;;  %v2947_v38 = vsel %vm2550_vm2, %v8450_v10, 0.0 }
 0x47e   : > { %v8455_v30 = vpop.eup %6492 }
 0x47f   : > { %v2956_v45 = vsel %vm2550_vm2, %v8455_v30, 0.0 }
 0x480   : > { %2681 = vmax.xlane.f32.xlu1 %v2680_v18  ;;  %2954 = vadd.xlane.f32.xlu0 %v2953_v56  ;;  %v5740_v18 = vpop.f32.mrf.mxu1  ;;  %v2837_v56 = vmul.f32 1.442695, %v2758_v40 }
 0x481   : > { %v2456_v62 = vadd.f32 %v5740_v18, %v8466_v5  ;;  %v2683_v18 = vsel %vm2550_vm2, %v8471_v51, -inf }
 0x482   : > { %v8475_v34 = vpop.eup %6494  ;;  %v2242_v60 = vpop.f32.mrf.mxu1  ;;  %6502 = vpow2.f32 %v2837_v56 }
 0x483   : > { %v2950_v40 = vsel %vm2550_vm2, %v8475_v34, 0.0  ;;  %v8494_v3 = vadd.f32 %v7923_v22, %v2456_v62  ;;  %v2454_v13 = vadd.f32 %v8483_v35, %v2242_v60  ;;  %6504 = vpow2.f32 %v2829_v47 }
 0x484   : > { %2675 = vmax.xlane.f32.xlu1 %v2674_v41  ;;  %2948 = vadd.xlane.f32.xlu0 %v2947_v38  ;;  %v2689_v41 = vsel %vm2550_vm2, %v8458_v20, -inf  ;;  %v2592_v38 = vpop.xlane.xlu1 %2591  ;;  %v5741_v62 = vpop.f32.mrf.mxu1  ;;  %6506 = vpow2.f32 %v2825_v8  ;;  %v2692_v47 = vsel %vm2550_vm2, %v8499_v9, -inf }
 0x485   : > { %v2756_v10 = vsub.f32 %v8125_v50, %v2592_v38  ;;  %v8504_v22 = vadd.f32 %v7935_v4, %v2454_v13  ;;  %v2701_v50 = vsel %vm2550_vm2, %v8494_v3, -inf  ;;  %v2755_v38 = vsub.f32 %v8071_v43, %v2589_v1  ;;  %v8521_v43 = vld [vmem:[%s9624_s2 + $0xf0] sm:$0xff] }
 0x487   : > { %v2833_v56 = vmul.f32 1.442695, %v2756_v10  ;;  %v2245_v10 = vpop.f32.mrf.mxu1  ;;  %v2695_v4 = vsel %vm2550_vm2, %v8504_v22, -inf }
 0x488   : > { %2957 = vadd.xlane.f32.xlu1 %v2956_v45  ;;  %2690 = vmax.xlane.f32.xlu0 %v2689_v41  ;;  %v8491_v45 = vpop.eup %6496  ;;  %v2160_v41 = vpop.f32.mrf.mxu0 }
 0x489   : > { %9745 = vst [vmem:[#allocation48_spill] sm:$0xff] %v8491_v45  ;;  %v2965_v23 = vsel %vm2550_vm2, %v8491_v45, 0.0  ;;  %v2451_v60 = vadd.f32 %v8375_v7, %v2160_v41  ;;  %v8512_v32 = vpop.eup %6498  ;;  %6508 = vpow2.f32 %v2833_v56 }
 0x48a   : > { %v8516_v33 = vpop.eup %6500  ;;  %v2959_v13 = vsel %vm2550_vm2, %v8512_v32, 0.0 }
 0x48b   : > { %9746 = vst [vmem:[#allocation49_spill] sm:$0xff] %v8516_v33  ;;  %v2977_v8 = vsel %vm2550_vm2, %v8516_v33, 0.0 }
 0x48c   : > { %2951 = vadd.xlane.f32.xlu1 %v2950_v40  ;;  %2684 = vmax.xlane.f32.xlu0 %v2683_v18  ;;  %v2831_v40 = vmul.f32 1.442695, %v2755_v38  ;;  %v8524_v18 = vadd.f32 %v8118_v12, %v2451_v60 }
 0x48e   : > { %6510 = vpow2.f32 %v2831_v40  ;;  %v2686_v41 = vsel %vm2550_vm2, %v8524_v18, -inf }
 0x490   : > { %2966 = vadd.xlane.f32.xlu1 %v2965_v23  ;;  %2702 = vmax.xlane.f32.xlu0 %v2701_v50  ;;  %v8531_v23 = vpop.eup %6502  ;;  %v2401_v50 = vld [vmem:[%s9624_s2 + $0xd8] sm:$0xff] }
 0x491   : > { %9747 = vst [vmem:[#allocation50_spill] sm:$0xff] %v8531_v23  ;;  %v8535_v56 = vpop.eup %6504  ;;  %v2980_v60 = vsel %vm2550_vm2, %v8531_v23, 0.0  ;;  %v2405_v23 = vld [vmem:[%s9624_s2 + $0xf8] sm:$0xff] }
 0x492   : > { %v2968_v40 = vsel %vm2550_vm2, %v8535_v56, 0.0 }
 0x494   : > { %2693 = vmax.xlane.f32.xlu1 %v2692_v47  ;;  %2696 = vmax.xlane.f32.xlu0 %v2695_v4  ;;  %v8548_v4 = vld [vmem:[%s9624_s2 + $0xe0] sm:$0xff] }
 0x496   : > { %v5744_v7 = vpop.f32.mrf.mxu1 }
 0x497   : > { %v2460_v1 = vadd.f32 %v5744_v7, %v8521_v43  ;;  %v2457_v7 = vadd.f32 %v5741_v62, %v2401_v50 }
 0x498   : > { %2960 = vadd.xlane.f32.xlu1 %v2959_v13  ;;  %2978 = vadd.xlane.f32.xlu0 %v2977_v8  ;;  %v2258_v47 = vpop.f32.mrf.mxu1  ;;  %v8552_v13 = vpop.eup %6506 }
 0x499   : > { %v8541_v38 = vadd.f32 %v7975_v55, %v2460_v1  ;;  %9748 = vst [vmem:[#allocation51_spill] sm:$0xff] %v8552_v13  ;;  %v2458_v55 = vadd.f32 %v8548_v4, %v2258_v47  ;;  %v8557_v8 = vpop.eup %6508  ;;  %v2962_v62 = vsel %vm2550_vm2, %v8552_v13, 0.0 }
 0x49a   : > { %9749 = vst [vmem:[#allocation52_spill] sm:$0xff] %v8557_v8  ;;  %v2974_v47 = vsel %vm2550_vm2, %v8557_v8, 0.0  ;;  %v2403_v8 = vld [vmem:[%s9624_s2 + $0xe8] sm:$0xff] }
 0x49b   : > { %v2713_v1 = vsel %vm2550_vm2, %v8541_v38, -inf  ;;  %v8568_v33 = vadd.f32 %v7991_v14, %v2458_v55 }
 0x49c   : > { %2687 = vmax.xlane.f32.xlu1 %v2686_v41  ;;  %2981 = vadd.xlane.f32.xlu0 %v2980_v60  ;;  %v8560_v41 = vadd.f32 %v7959_v52, %v2457_v7  ;;  %v2399_v60 = vld [vmem:[%s9624_s2 + $0xc8] sm:$0xff]  ;;  %v8574_v7 = vpop.eup %6510 }
 0x49d   : > { %9750 = vst [vmem:[#allocation53_spill] sm:$0xff] %v8574_v7  ;;  %v2707_v14 = vsel %vm2550_vm2, %v8568_v33, -inf }
 0x49e   : > { %v2704_v52 = vsel %vm2550_vm2, %v8560_v41, -inf }
 0x4a0   : > { %2969 = vadd.xlane.f32.xlu1 %v2968_v40  ;;  %2714 = vmax.xlane.f32.xlu0 %v2713_v1  ;;  %v2455_v40 = vadd.f32 %v2399_v60, %v2245_v10  ;;  %v5745_v1 = vpop.f32.mrf.mxu1  ;;  %v2971_v10 = vsel %vm2550_vm2, %v8574_v7, 0.0 }
 0x4a2   : > { %v8582_v55 = vadd.f32 %v8021_v27, %v2455_v40 }
 0x4a4   : > { %2963 = vadd.xlane.f32.xlu1 %v2962_v62  ;;  %2975 = vadd.xlane.f32.xlu0 %v2974_v47  ;;  %v2461_v62 = vadd.f32 %v5745_v1, %v2405_v23  ;;  %v2261_v47 = vpop.f32.mrf.mxu1 }
 0x4a6   : > { %v8590_v45 = vadd.f32 %v8042_v16, %v2461_v62 }
 0x4a8   : > { %2705 = vmax.xlane.f32.xlu1 %v2704_v52  ;;  %2708 = vmax.xlane.f32.xlu0 %v2707_v14  ;;  %9751 = vst [vmem:[#allocation54_spill] sm:$0xff] %v8590_v45  ;;  %v2459_v52 = vadd.f32 %v2403_v8, %v2261_v47  ;;  %v2698_v14 = vsel %vm2550_vm2, %v8582_v55, -inf  ;;  %v2716_v40 = vsel %vm2550_vm2, %v8590_v45, -inf }
 0x4aa   : > { %v8595_v27 = vadd.f32 %v8064_v58, %v2459_v52 }
 0x4ac   : > { %2972 = vadd.xlane.f32.xlu1 %v2971_v10  ;;  %v2710_v1 = vsel %vm2550_vm2, %v8595_v27, -inf }
 0x4b0   : > { %2699 = vmax.xlane.f32.xlu1 %v2698_v14 }
 0x4b4   : > { %2717 = vmax.xlane.f32.xlu1 %v2716_v40 }
 0x4b8   : > { %2711 = vmax.xlane.f32.xlu1 %v2710_v1  ;;  %v2607_v10 = vpop.xlane.xlu0 %2606 }
 0x4b9   : > { %v2761_v16 = vsub.f32 %v8166_v46, %v2607_v10  ;;  %v5756_v62 = vpop.f32.mrf.mxu0 }
 0x4ba   : > { %v2464_v47 = vadd.f32 %v5756_v62, %v8466_v5 }
 0x4bb   : > { %v2843_v7 = vmul.f32 1.442695, %v2761_v16  ;;  %v2343_v13 = vpop.f32.mrf.mxu0 }
 0x4bc   : > { %v8604_v14 = vadd.f32 %v8013_v6, %v2464_v47  ;;  %v2462_v58 = vadd.f32 %v8483_v35, %v2343_v13  ;;  %v8607_v52 = vpop.xlane.xlu0 %2600  ;;  %v8609_v40 = vpop.xlane.xlu1 %2609 }
 0x4bd   : > { %v5757_v45 = vpop.f32.mrf.mxu0  ;;  %6512 = vpow2.f32 %v2843_v7 }
 0x4be   : > { %v8612_v1 = vadd.f32 %v8017_v39, %v2462_v58  ;;  %v2465_v46 = vadd.f32 %v5757_v45, %v2401_v50  ;;  %v2725_v5 = vsel %vm2550_vm2, %v8604_v14, -inf }
 0x4bf   : > { %2726 = vmax.xlane.f32.xlu0 %v2725_v5  ;;  %v2346_v10 = vpop.f32.mrf.mxu0 }
 0x4c0   : > { %v8617_v6 = vadd.f32 %v8084_v29, %v2465_v46  ;;  %v2463_v16 = vadd.f32 %v2399_v60, %v2346_v10  ;;  %v2619_v35 = vpop.xlane.xlu0 %2618  ;;  %v8619_v13 = vpop.xlane.xlu1 %2603  ;;  %v2719_v45 = vsel %vm2550_vm2, %v8612_v1, -inf }
 0x4c1   : > { %v2765_v62 = vsub.f32 %v8209_v61, %v2619_v35  ;;  %v5760_v47 = vpop.f32.mrf.mxu0 }
 0x4c2   : > { %v8623_v7 = vadd.f32 %v8098_v44, %v2463_v16  ;;  %v2468_v39 = vadd.f32 %v5760_v47, %v8521_v43  ;;  %v2728_v50 = vsel %vm2550_vm2, %v8617_v6, -inf }
 0x4c3   : > { %v2851_v29 = vmul.f32 1.442695, %v2765_v62  ;;  %2720 = vmax.xlane.f32.xlu0 %v2719_v45  ;;  %2729 = vmax.xlane.f32.xlu1 %v2728_v50  ;;  %v2359_v60 = vpop.f32.mrf.mxu0 }
 0x4c4   : > { %v8631_v58 = vadd.f32 %v8050_v31, %v2468_v39  ;;  %v2466_v61 = vadd.f32 %v8548_v4, %v2359_v60  ;;  %v2613_v46 = vpop.xlane.xlu0 %2612  ;;  %v2622_v44 = vpop.xlane.xlu1 %2621  ;;  %v2722_v62 = vsel %vm2550_vm2, %v8623_v7, -inf }
 0x4c5   : > { %6514 = vpow2.f32 %v2851_v29  ;;  %v2763_v43 = vsub.f32 %v8218_v36, %v2613_v46  ;;  %v2766_v5 = vsub.f32 %v8227_v15, %v2622_v44  ;;  %v5761_v10 = vpop.f32.mrf.mxu0 }
 0x4c6   : > { %v8637_v16 = vadd.f32 %v8061_v26, %v2466_v61  ;;  %v2469_v35 = vadd.f32 %v5761_v10, %v2405_v23  ;;  %v2737_v31 = vsel %vm2550_vm2, %v8631_v58, -inf }
 0x4c7   : > { %v2847_v47 = vmul.f32 1.442695, %v2763_v43  ;;  %v2853_v4 = vmul.f32 1.442695, %v2766_v5  ;;  %2723 = vmax.xlane.f32.xlu1 %v2722_v62  ;;  %2738 = vmax.xlane.f32.xlu0 %v2737_v31  ;;  %v2362_v39 = vpop.f32.mrf.mxu0 }
 0x4c8   : > { %v8644_v36 = vadd.f32 %v8108_v17, %v2469_v35  ;;  %v2467_v15 = vadd.f32 %v2403_v8, %v2362_v39  ;;  %v2616_v45 = vpop.xlane.xlu1 %2615  ;;  %v2731_v50 = vsel %vm2550_vm2, %v8637_v16, -inf }
 0x4c9   : > { %6516 = vpow2.f32 %v2847_v47  ;;  %v2764_v26 = vsub.f32 %v8233_v37, %v2616_v45 }
 0x4ca   : > { %v8648_v23 = vadd.f32 %v8118_v12, %v2467_v15  ;;  %v2740_v29 = vsel %vm2550_vm2, %v8644_v36, -inf  ;;  %v8654_v60 = vpop.eup %6512  ;;  %6518 = vpow2.f32 %v2853_v4 }
 0x4cb   : > { %v2849_v61 = vmul.f32 1.442695, %v2764_v26  ;;  %2732 = vmax.xlane.f32.xlu0 %v2731_v50  ;;  %2741 = vmax.xlane.f32.xlu1 %v2740_v29  ;;  %v2989_v17 = vsel %vm2550_vm2, %v8654_v60, 0.0 }
 0x4cc   : > { %v2734_v37 = vsel %vm2550_vm2, %v8648_v23, -inf }
 0x4cd   : > { %6520 = vpow2.f32 %v2849_v61 }
 0x4cf   : > { %2990 = vadd.xlane.f32.xlu0 %v2989_v17  ;;  %2735 = vmax.xlane.f32.xlu1 %v2734_v37 }
 0x4d2   : > { %v8660_v12 = vpop.eup %6514 }
 0x4d3   : > { %v3001_v8 = vsel %vm2550_vm2, %v8660_v12, 0.0 }
 0x4d4   : > { %3002 = vadd.xlane.f32.xlu0 %v3001_v8  ;;  %v9752_v8 = vld [vmem:[#allocation20_spill] sm:$0xff] }
 0x4d6   : > { %v8664_v46 = vpop.eup %6516 }
 0x4d7   : > { %v2995_v44 = vsel %vm2550_vm2, %v8664_v46, 0.0  ;;  %v8668_v43 = vpop.eup %6518 }
 0x4d8   : > { %2996 = vadd.xlane.f32.xlu0 %v2995_v44  ;;  %v3004_v35 = vsel %vm2550_vm2, %v8668_v43, 0.0  ;;  %v2759_v44 = vsub.f32 %v9752_v8, %v8607_v52  ;;  %v9755_v52 = vld [vmem:[#allocation41_spill] sm:$0xff] }
 0x4d9   : > { %v2631_v5 = vpop.xlane.xlu0 %2630 }
 0x4da   : > { %v2769_v10 = vsub.f32 %v8254_v25, %v2631_v5  ;;  %v8673_v62 = vpop.eup %6520 }
 0x4db   : > { %v2998_v15 = vsel %vm2550_vm2, %v8673_v62, 0.0 }
 0x4dc   : > { %3005 = vadd.xlane.f32.xlu0 %v3004_v35  ;;  %v2859_v31 = vmul.f32 1.442695, %v2769_v10 }
 0x4dd   : > { %v2625_v47 = vpop.xlane.xlu0 %2624  ;;  %v8676_v39 = vpop.xlane.xlu1 %2633 }
 0x4de   : > { %6522 = vpow2.f32 %v2859_v31  ;;  %v2767_v4 = vsub.f32 %v8259_v0, %v2625_v47 }
 0x4e0   : > { %3914 = vrot.lane.b32.xlu1 %v7783_v24, %s6892_s17  ;;  %2999 = vadd.xlane.f32.xlu0 %v2998_v15  ;;  %v2855_v25 = vmul.f32 1.442695, %v2767_v4  ;;  %v9753_v24 = vld [vmem:[#allocation38_spill] sm:$0xff]  ;;  %v2839_v4 = vmul.f32 1.442695, %v2759_v44  ;;  %v9756_v44 = vld [vmem:[#allocation23_spill] sm:$0xff] }
 0x4e1   : > { %v2643_v45 = vpop.xlane.xlu0 %2642  ;;  %v2628_v50 = vpop.xlane.xlu1 %2627 }
 0x4e2   : > { %6524 = vpow2.f32 %v2855_v25  ;;  %v2773_v26 = vsub.f32 %v8282_v28, %v2643_v45 }
 0x4e4   : > { %v2867_v29 = vmul.f32 1.442695, %v2773_v26 }
 0x4e5   : > { %v2637_v61 = vpop.xlane.xlu0 %2636  ;;  %v2646_v17 = vpop.xlane.xlu1 %2645 }
 0x4e6   : > { %6526 = vpow2.f32 %v2867_v29  ;;  %v2771_v0 = vsub.f32 %v8290_v59, %v2637_v61  ;;  %v9754_v59 = vld [vmem:[#allocation21_spill] sm:$0xff] }
 0x4e7   : > { %v2762_v25 = vsub.f32 %v9754_v59, %v8609_v40  ;;  %v9757_v40 = vld [vmem:[#allocation44_spill] sm:$0xff] }
 0x4e8   : > { %v2863_v37 = vmul.f32 1.442695, %v2771_v0 }
 0x4e9   : > { %v2655_v5 = vpop.xlane.xlu0 %2654  ;;  %v8687_v35 = vpop.xlane.xlu1 %2639  ;;  %v2845_v8 = vmul.f32 1.442695, %v2762_v25 }
 0x4ea   : > { %6528 = vpow2.f32 %v2863_v37  ;;  %v2777_v10 = vsub.f32 %v9753_v24, %v2655_v5  ;;  %v2760_v5 = vsub.f32 %v9756_v44, %v8619_v13  ;;  %v9759_v44 = vld [vmem:[#allocation35_spill] sm:$0xff] }
 0x4eb   : > { %v8689_v31 = vpop.eup %6522 }
 0x4ec   : > { %v2875_v28 = vmul.f32 1.442695, %v2777_v10  ;;  %v3013_v47 = vsel %vm2550_vm2, %v8689_v31, 0.0  ;;  %v2841_v25 = vmul.f32 1.442695, %v2760_v5 }
 0x4ed   : > { %v2649_v15 = vpop.xlane.xlu0 %2648  ;;  %3014 = vadd.xlane.f32.xlu0 %v3013_v47  ;;  %v8696_v26 = vpop.xlane.xlu1 %2657 }
 0x4ee   : > { %6530 = vpow2.f32 %v2875_v28  ;;  %v2775_v45 = vsub.f32 %v9755_v52, %v2649_v15 }
 0x4ef   : > { %v8698_v29 = vpop.eup %6524  ;;  %6532 = vpow2.f32 %v2839_v4 }
 0x4f0   : > { %v2871_v61 = vmul.f32 1.442695, %v2775_v45  ;;  %v3007_v0 = vsel %vm2550_vm2, %v8698_v29, 0.0  ;;  %v9758_v45 = vld [vmem:[#allocation34_spill] sm:$0xff] }
 0x4f1   : > { %v2667_v37 = vpop.xlane.xlu0 %2666  ;;  %3008 = vadd.xlane.f32.xlu0 %v3007_v0  ;;  %v2652_v10 = vpop.xlane.xlu1 %2651  ;;  %v2770_v13 = vsub.f32 %v9758_v45, %v8676_v39 }
 0x4f2   : > { %6534 = vpow2.f32 %v2871_v61  ;;  %v2781_v24 = vsub.f32 %v9757_v40, %v2667_v37  ;;  %v2776_v47 = vsub.f32 %v8367_v49, %v2652_v10  ;;  %v2768_v49 = vsub.f32 %v9759_v44, %v2628_v50  ;;  %v9760_v40 = vld [vmem:[#allocation37_spill] sm:$0xff] }
 0x4f3   : > { %v8705_v28 = vpop.eup %6526  ;;  %6536 = vpow2.f32 %v2845_v8  ;;  %v2774_v10 = vsub.f32 %v9760_v40, %v2646_v17  ;;  %v2861_v39 = vmul.f32 1.442695, %v2770_v13 }
 0x4f4   : > { %v3025_v15 = vsel %vm2550_vm2, %v8705_v28, 0.0  ;;  %v2883_v59 = vmul.f32 1.442695, %v2781_v24  ;;  %v2873_v52 = vmul.f32 1.442695, %v2776_v47 }
 0x4f5   : > { %v2661_v4 = vpop.xlane.xlu0 %2660  ;;  %3026 = vadd.xlane.f32.xlu0 %v3025_v15  ;;  %v8713_v0 = vpop.xlane.xlu1 %2669  ;;  %v2857_v15 = vmul.f32 1.442695, %v2768_v49  ;;  %v2869_v45 = vmul.f32 1.442695, %v2774_v10 }
 0x4f6   : > { %v2779_v61 = vsub.f32 %v8379_v42, %v2661_v4  ;;  %6538 = vpow2.f32 %v2873_v52 }
 0x4f7   : > { %v8715_v37 = vpop.eup %6528  ;;  %6540 = vpow2.f32 %v2883_v59 }
 0x4f8   : > { %v3019_v24 = vsel %vm2550_vm2, %v8715_v37, 0.0  ;;  %v2879_v8 = vmul.f32 1.442695, %v2779_v61  ;;  %6542 = vpow2.f32 %v2841_v25 }
 0x4f9   : > { %v2943_v5 = vpop.xlane.xlu0 %2942  ;;  %3020 = vadd.xlane.f32.xlu0 %v3019_v24  ;;  %v2664_v47 = vpop.xlane.xlu1 %2663 }
 0x4fa   : > { %v2780_v4 = vsub.f32 %v8396_v21, %v2664_v47  ;;  %6544 = vpow2.f32 %v2879_v8  ;;  %v9761_v21 = vld [vmem:[#allocation39_spill] sm:$0xff] }
 0x4fb   : > { %v8721_v42 = vpop.eup %6530  ;;  %6546 = vpow2.f32 %v2861_v39  ;;  %v2772_v44 = vsub.f32 %v9761_v21, %v8687_v35 }
 0x4fc   : > { %v3037_v50 = vsel %vm2550_vm2, %v8721_v42, 0.0  ;;  %v2881_v17 = vmul.f32 1.442695, %v2780_v4  ;;  %v8726_v59 = vpop.eup %6532  ;;  %6548 = vpow2.f32 %v2857_v15 }
 0x4fd   : > { %v2937_v52 = vpop.xlane.xlu0 %2936  ;;  %3038 = vadd.xlane.f32.xlu0 %v3037_v50  ;;  %v2946_v25 = vpop.xlane.xlu1 %2945  ;;  %6550 = vpow2.f32 %v2869_v45  ;;  %v2983_v10 = vsel %vm2550_vm2, %v8726_v59, 0.0  ;;  %v2865_v15 = vmul.f32 1.442695, %v2772_v44 }
 0x4fe   : > { %6552 = vpow2.f32 %v2881_v17 }
 0x4ff   : > { %v8728_v61 = vpop.eup %6534  ;;  %6554 = vrcp.f32 %v2946_v25  ;;  %v2782_v25 = vsub.f32 %v8384_v2, %v8713_v0 }
 0x500   : > { %v3031_v13 = vsel %vm2550_vm2, %v8728_v61, 0.0  ;;  %v8737_v24 = vpop.eup %6536  ;;  %6556 = vrcp.f32 %v2937_v52 }
 0x501   : > { %v2679_v49 = vpop.xlane.xlu0 %2678  ;;  %3032 = vadd.xlane.f32.xlu0 %v3031_v13  ;;  %6558 = vrcp.f32 %v2943_v5  ;;  %v2992_v5 = vsel %vm2550_vm2, %v8737_v24, 0.0  ;;  %v2885_v2 = vmul.f32 1.442695, %v2782_v25 }
 0x502   : > { %v2785_v40 = vsub.f32 %v8412_v48, %v2679_v49  ;;  %v9763_v48 = vld [vmem:[#allocation42_spill] sm:$0xff] }
 0x503   : > { %v8739_v8 = vpop.eup %6538  ;;  %v2778_v50 = vsub.f32 %v9763_v48, %v8696_v26 }
 0x504   : > { %2984 = vadd.xlane.f32.xlu1 %v2983_v10  ;;  %v2891_v39 = vmul.f32 1.442695, %v2785_v40  ;;  %v3034_v4 = vsel %vm2550_vm2, %v8739_v8, 0.0  ;;  %v8743_v45 = vpop.eup %6540 }
 0x505   : > { %v2940_v47 = vpop.xlane.xlu1 %2939  ;;  %v2673_v35 = vpop.xlane.xlu0 %2672  ;;  %9762 = vst [vmem:[#allocation20_spill] sm:$0xff] %v8743_v45  ;;  %3035 = vadd.xlane.f32.xlu0 %v3034_v4  ;;  %v3049_v26 = vsel %vm2550_vm2, %v8743_v45, 0.0 }
 0x506   : > { %6560 = vrcp.f32 %v2940_v47  ;;  %v2783_v17 = vsub.f32 %v8424_v53, %v2673_v35  ;;  %v8750_v52 = vpop.eup %6542  ;;  %v2877_v53 = vmul.f32 1.442695, %v2778_v50 }
 0x507   : > { %6562 = vpow2.f32 %v2891_v39  ;;  %v8756_v49 = vpop.eup %6544  ;;  %v2986_v40 = vsel %vm2550_vm2, %v8750_v52, 0.0 }
 0x508   : > { %2993 = vadd.xlane.f32.xlu1 %v2992_v5  ;;  %v2887_v13 = vmul.f32 1.442695, %v2783_v17  ;;  %6564 = vpow2.f32 %v2865_v15  ;;  %9764 = vst [vmem:[#allocation38_spill] sm:$0xff] %v8756_v49  ;;  %v8760_v10 = vpop.eup %6546  ;;  %v3043_v4 = vsel %vm2550_vm2, %v8756_v49, 0.0 }
 0x509   : > { %v2682_v21 = vpop.xlane.xlu1 %2681  ;;  %v2955_v44 = vpop.xlane.xlu0 %2954  ;;  %3050 = vadd.xlane.f32.xlu0 %v3049_v26  ;;  %v3016_v50 = vsel %vm2550_vm2, %v8760_v10, 0.0 }
 0x50a   : > { %6566 = vpow2.f32 %v2887_v13  ;;  %v8762_v39 = vpop.eup %6548  ;;  %v2786_v0 = vsub.f32 %v8431_v63, %v2682_v21 }
 0x50b   : > { %v8765_v15 = vpop.eup %6550  ;;  %6568 = vpow2.f32 %v2877_v53 }
 0x50c   : > { %2987 = vadd.xlane.f32.xlu1 %v2986_v40  ;;  %v8769_v48 = vpop.eup %6552  ;;  %6570 = vpow2.f32 %v2885_v2  ;;  %v2893_v25 = vmul.f32 1.442695, %v2786_v0  ;;  %v3010_v2 = vsel %vm2550_vm2, %v8762_v39, 0.0 }
 0x50d   : > { %v2676_v47 = vpop.xlane.xlu1 %2675  ;;  %v2949_v35 = vpop.xlane.xlu0 %2948  ;;  %3044 = vadd.xlane.f32.xlu0 %v3043_v4  ;;  %6572 = vrcp.f32 %v2955_v44  ;;  %v3046_v40 = vsel %vm2550_vm2, %v8769_v48, 0.0 }
 0x50e   : > { %v6555_v17 = vpop.eup %6554  ;;  %v2784_v21 = vsub.f32 %v8442_v19, %v2676_v47  ;;  %v9765_v47 = vld [vmem:[#allocation45_spill] sm:$0xff] }
 0x50f   : > { %v6557_v5 = vpop.eup %6556  ;;  %v3194_v53 = vmul.f32 %v6555_v17, %v8408_v57 }
 0x510   : > { %3017 = vadd.xlane.f32.xlu1 %v3016_v50  ;;  %v6559_v13 = vpop.eup %6558  ;;  %v3191_v19 = vmul.f32 %v6557_v5, %v8404_v54  ;;  %v2889_v17 = vmul.f32 1.442695, %v2784_v21 }
 0x511   : > { %v2958_v63 = vpop.xlane.xlu1 %2957  ;;  %v2691_v26 = vpop.xlane.xlu0 %2690  ;;  %3047 = vadd.xlane.f32.xlu0 %v3046_v40  ;;  %v3193_v50 = vmul.f32 %v6559_v13, %v9765_v47 }
 0x512   : > { %6574 = vrcp.f32 %v2958_v63  ;;  %v2789_v4 = vsub.f32 %v8458_v20, %v2691_v26 }
 0x513   : > { %v6561_v45 = vpop.eup %6560  ;;  %6576 = vrcp.f32 %v2949_v35  ;;  %v3256_v54 = vpack.c.bf16 %v3194_v53, %v3193_v50  ;;  %v9767_v53 = vld [vmem:[#allocation18_spill] sm:$0xff] }
 0x514   : > { %v8780_v0 = vpop.eup %6562  ;;  %3011 = vadd.xlane.f32.xlu1 %v3010_v2  ;;  %v3192_v44 = vmul.f32 %v6561_v45, %v8428_v11  ;;  %6578 = vpow2.f32 %v2893_v25  ;;  %v2899_v49 = vmul.f32 1.442695, %v2789_v4  ;;  %v3028_v11 = vsel %vm2550_vm2, %v8765_v15, 0.0 }
 0x515   : > { %v2952_v57 = vpop.xlane.xlu1 %2951  ;;  %v3061_v20 = vsel %vm2550_vm2, %v8780_v0, 0.0  ;;  %v2685_v63 = vpop.xlane.xlu0 %2684 }
 0x516   : > { %6580 = vrcp.f32 %v2952_v57  ;;  %v3255_v26 = vpack.c.bf16 %v3192_v44, %v3191_v19  ;;  %v8787_v40 = vpop.eup %6564  ;;  %v2787_v35 = vsub.f32 %v8471_v51, %v2685_v63  ;;  %3062 = vadd.xlane.f32.xlu0 %v3061_v20  ;;  %v9766_v51 = vld [vmem:[#allocation13_spill] sm:$0xff] }
 0x517   : > { %6582 = vpow2.f32 %v2899_v49  ;;  %v8792_v45 = vpop.eup %6566  ;;  %v3022_v4 = vsel %vm2550_vm2, %v8787_v40, 0.0 }
 0x518   : > { %5770 = vmatprep.mubr.msk.bf16.mxu0 %vm2550_vm2, %v3255_v26  ;;  %3029 = vadd.xlane.f32.xlu1 %v3028_v11  ;;  %v2895_v5 = vmul.f32 1.442695, %v2787_v35  ;;  %v3055_v49 = vsel %vm2550_vm2, %v8792_v45, 0.0  ;;  %6584 = vpow2.f32 %v2889_v17  ;;  %v8805_v2 = vpop.eup %6568  ;;  %v9768_v17 = vld [vmem:[#allocation14_spill] sm:$0xff] }
 0x519   : > { %v8795_v25 = vpop.xlane.xlu1 %2966  ;;  %5771 = vmatmul.mubr.msk.bf16.vlgmr.msra.gmra.mxu0 %vm2550_vm2, %v3256_v54  ;;  %v2703_v13 = vpop.xlane.xlu0 %2702  ;;  %v3040_v63 = vsel %vm2550_vm2, %v8805_v2, 0.0 }
 0x51a   : > { %5779 = vmatpush3.bf16.msra.mxu0 %v9766_v51  ;;  %6586 = vpow2.f32 %v2895_v5  ;;  %v2793_v21 = vsub.f32 %v8494_v3, %v2703_v13  ;;  %3056 = vadd.xlane.f32.xlu0 %v3055_v49  ;;  %v8807_v47 = vpop.eup %6570 }
 0x51b   : > { %5780 = vmatprep.subr.bf16.mxu0 %v9767_v53  ;;  %v6573_v20 = vpop.eup %6572  ;;  %v3052_v13 = vsel %vm2550_vm2, %v8807_v47, 0.0 }
 0x51c   : > { %3023 = vadd.xlane.f32.xlu1 %v3022_v4  ;;  %v2907_v19 = vmul.f32 1.442695, %v2793_v21  ;;  %v9771_v4 = vld [vmem:[#allocation47_spill] sm:$0xff] }
 0x51d   : > { %v2694_v44 = vpop.xlane.xlu1 %2693  ;;  %v2697_v57 = vpop.xlane.xlu0 %2696 }
 0x51e   : > { %v2790_v50 = vsub.f32 %v8499_v9, %v2694_v44  ;;  %5781 = vmatpush3.bf16.msra.mxu0 %v9767_v53  ;;  %6588 = vpow2.f32 %v2907_v19  ;;  %v2791_v3 = vsub.f32 %v8504_v22, %v2697_v57  ;;  %v9769_v22 = vld [vmem:[#allocation22_spill] sm:$0xff] }
 0x51f   : > { %5782 = vmatprep.subr.bf16.mxu0 %v9768_v17  ;;  %v6575_v26 = vpop.eup %6574 }
 0x520   : > { %v2901_v35 = vmul.f32 1.442695, %v2790_v50  ;;  %3041 = vadd.xlane.f32.xlu1 %v3040_v63  ;;  %v6577_v54 = vpop.eup %6576  ;;  %v2903_v11 = vmul.f32 1.442695, %v2791_v3  ;;  %v3198_v21 = vmul.f32 %v6575_v26, %v8455_v30  ;;  %v9772_v3 = vld [vmem:[#allocation46_spill] sm:$0xff] }
 0x521   : > { %v2961_v5 = vpop.xlane.xlu1 %2960  ;;  %v8815_v49 = vpop.eup %6578  ;;  %v3195_v19 = vmul.f32 %v6577_v54, %v9771_v4 }
 0x522   : > { %6590 = vpow2.f32 %v2901_v35  ;;  %5783 = vmatpush3.bf16.msra.mxu0 %v9768_v17  ;;  %v2979_v9 = vpop.xlane.xlu0 %2978  ;;  %v3197_v17 = vmul.f32 %v6573_v20, %v9772_v3 }
 0x523   : > { %v6581_v51 = vpop.eup %6580  ;;  %6592 = vpow2.f32 %v2903_v11  ;;  %5784 = vmatprep.subr.bf16.mxu0 %v9769_v22  ;;  %v9773_v11 = vld [vmem:[#allocation15_spill] sm:$0xff] }
 0x524   : > { %v8822_v53 = vpop.eup %6582  ;;  %3053 = vadd.xlane.f32.xlu1 %v3052_v13  ;;  %v3196_v44 = vmul.f32 %v6581_v51, %v8475_v34  ;;  %v3258_v54 = vpack.c.bf16 %v3198_v21, %v3197_v17  ;;  %v3064_v34 = vsel %vm2550_vm2, %v8815_v49, 0.0 }
 0x525   : > { %9770 = vst [vmem:[#allocation21_spill] sm:$0xff] %v8822_v53  ;;  %v2688_v50 = vpop.xlane.xlu1 %2687  ;;  %v3073_v57 = vsel %vm2550_vm2, %v8822_v53, 0.0  ;;  %v8831_v26 = vpop.eup %6584 }
 0x526   : > { %v2788_v63 = vsub.f32 %v8524_v18, %v2688_v50  ;;  %5785 = vmatpush3.bf16.msra.mxu0 %v9769_v22  ;;  %v2982_v35 = vpop.xlane.xlu0 %2981  ;;  %3074 = vadd.xlane.f32.xlu0 %v3073_v57  ;;  %v3257_v30 = vpack.c.bf16 %v3196_v44, %v3195_v19  ;;  %v3058_v22 = vsel %vm2550_vm2, %v8831_v26, 0.0 }
 0x527   : > { %5810 = vmatprep.subr.bf16.mxu0 %v9773_v11  ;;  %v8836_v51 = vpop.eup %6586 }
 0x528   : > { %v2897_v13 = vmul.f32 1.442695, %v2788_v63  ;;  %5774 = vmatprep.mubr.msk.bf16.mxu0 %vm2550_vm2, %v3257_v30  ;;  %3065 = vadd.xlane.f32.xlu1 %v3064_v34  ;;  %v3067_v20 = vsel %vm2550_vm2, %v8836_v51, 0.0 }
 0x529   : > { %v2970_v18 = vpop.xlane.xlu1 %2969  ;;  %5775 = vmatmul.mubr.msk.bf16.gmra.mxu0 %vm2550_vm2, %v3258_v54 }
 0x52a   : > { %6594 = vpow2.f32 %v2897_v13  ;;  %3068 = vadd.xlane.f32.xlu0 %v3067_v20  ;;  %v2715_v4 = vpop.xlane.xlu0 %2714 }
 0x52b   : > { %6596 = vrcp.f32 %v2970_v18  ;;  %v8844_v21 = vpop.eup %6588  ;;  %v2797_v13 = vsub.f32 %v8541_v38, %v2715_v4  ;;  %v9777_v4 = vld [vmem:[#allocation51_spill] sm:$0xff] }
 0x52c   : > { %9774 = vst [vmem:[#allocation41_spill] sm:$0xff] %v8844_v21  ;;  %6598 = vrcp.f32 %v2961_v5  ;;  %3059 = vadd.xlane.f32.xlu1 %v3058_v22  ;;  %v3085_v44 = vsel %vm2550_vm2, %v8844_v21, 0.0 }
 0x52d   : > { %6600 = vrcp.f32 %v8795_v25  ;;  %v2964_v19 = vpop.xlane.xlu1 %2963 }
 0x52e   : > { %6602 = vrcp.f32 %v2964_v19  ;;  %3086 = vadd.xlane.f32.xlu0 %v3085_v44  ;;  %v2976_v63 = vpop.xlane.xlu0 %2975 }
 0x52f   : > { %v8849_v50 = vpop.eup %6590  ;;  %6604 = vrcp.f32 %v2982_v35 }
 0x530   : > { %v8851_v57 = vpop.eup %6592  ;;  %v3076_v3 = vsel %vm2550_vm2, %v8849_v50, 0.0  ;;  %6606 = vrcp.f32 %v2976_v63 }
 0x531   : > { %9775 = vst [vmem:[#allocation23_spill] sm:$0xff] %v8851_v57  ;;  %v2706_v17 = vpop.xlane.xlu1 %2705  ;;  %3077 = vadd.xlane.f32.xlu1 %v3076_v3  ;;  %v3079_v5 = vsel %vm2550_vm2, %v8851_v57, 0.0  ;;  %v9779_v57 = vld [vmem:[#allocation54_spill] sm:$0xff] }
 0x532   : > { %v2794_v25 = vsub.f32 %v8560_v41, %v2706_v17  ;;  %3080 = vadd.xlane.f32.xlu0 %v3079_v5  ;;  %v2709_v19 = vpop.xlane.xlu0 %2708  ;;  %v2915_v5 = vmul.f32 1.442695, %v2797_v13 }
 0x534   : > { %v2909_v30 = vmul.f32 1.442695, %v2794_v25 }
 0x535   : > { %v2973_v54 = vpop.xlane.xlu1 %2972 }
 0x536   : > { %6608 = vpow2.f32 %v2909_v30  ;;  %v9778_v30 = vld [vmem:[#allocation48_spill] sm:$0xff] }
 0x537   : > { %v8858_v34 = vpop.eup %6594  ;;  %6610 = vrcp.f32 %v2979_v9  ;;  %v2795_v9 = vsub.f32 %v8568_v33, %v2709_v19 }
 0x538   : > { %9776 = vst [vmem:[#allocation44_spill] sm:$0xff] %v8858_v34  ;;  %v6597_v18 = vpop.eup %6596  ;;  %6612 = vrcp.f32 %v2973_v54  ;;  %v3070_v20 = vsel %vm2550_vm2, %v8858_v34, 0.0 }
 0x539   : > { %v6599_v22 = vpop.eup %6598  ;;  %v2700_v44 = vpop.xlane.xlu1 %2699  ;;  %3071 = vadd.xlane.f32.xlu1 %v3070_v20  ;;  %v3202_v17 = vmul.f32 %v6597_v18, %v8535_v56 }
 0x53a   : > { %v6601_v41 = vpop.eup %6600  ;;  %v2792_v35 = vsub.f32 %v8582_v55, %v2700_v44  ;;  %v3199_v38 = vmul.f32 %v6599_v22, %v8512_v32  ;;  %v2911_v55 = vmul.f32 1.442695, %v2795_v9 }
 0x53b   : > { %v6603_v3 = vpop.eup %6602  ;;  %v3201_v54 = vmul.f32 %v6601_v41, %v9778_v30  ;;  %v9781_v41 = vld [vmem:[#allocation50_spill] sm:$0xff] }
 0x53c   : > { %v2905_v63 = vmul.f32 1.442695, %v2792_v35  ;;  %v3200_v25 = vmul.f32 %v6603_v3, %v9777_v4  ;;  %v6605_v56 = vpop.eup %6604  ;;  %v9782_v35 = vld [vmem:[#allocation53_spill] sm:$0xff]  ;;  %v9783_v3 = vld [vmem:[#allocation52_spill] sm:$0xff] }
 0x53d   : > { %v2718_v21 = vpop.xlane.xlu1 %2717  ;;  %v3260_v34 = vpack.c.bf16 %v3202_v17, %v3201_v54  ;;  %v6607_v32 = vpop.eup %6606  ;;  %v9784_v17 = vld [vmem:[#allocation19_spill] sm:$0xff] }
 0x53e   : > { %6614 = vpow2.f32 %v2905_v63  ;;  %v2798_v20 = vsub.f32 %v9779_v57, %v2718_v21  ;;  %v3259_v53 = vpack.c.bf16 %v3200_v25, %v3199_v38  ;;  %v9780_v21 = vld [vmem:[#allocation29_spill] sm:$0xff] }
 0x53f   : > { %6616 = vpow2.f32 %v2915_v5  ;;  %v9785_v5 = vld [vmem:[#allocation49_spill] sm:$0xff] }
 0x540   : > { %v2917_v44 = vmul.f32 1.442695, %v2798_v20  ;;  %5786 = vmatprep.mubr.msk.bf16.mxu0 %vm2550_vm2, %v3259_v53  ;;  %v9786_v20 = vld [vmem:[#allocation25_spill] sm:$0xff] }
 0x541   : > { %v2712_v33 = vpop.xlane.xlu1 %2711  ;;  %5787 = vmatmul.mubr.msk.bf16.vlgmr.msra.gmra.mxu0 %vm2550_vm2, %v3260_v34  ;;  %v3206_v34 = vmul.f32 %v6605_v56, %v9781_v41 }
 0x542   : > { %6618 = vpow2.f32 %v2917_v44  ;;  %v2796_v13 = vsub.f32 %v8595_v27, %v2712_v33  ;;  %5811 = vmatpush3.bf16.msra.mxu0 %v9773_v11  ;;  %v3204_v11 = vmul.f32 %v6607_v32, %v9783_v3 }
 0x543   : > { %v8874_v18 = vpop.eup %6608  ;;  %5812 = vmatprep.subr.bf16.mxu0 %v9780_v21  ;;  %6620 = vpow2.f32 %v2911_v55 }
 0x544   : > { %v6611_v57 = vpop.eup %6610  ;;  %v2913_v22 = vmul.f32 1.442695, %v2796_v13  ;;  %v3088_v53 = vsel %vm2550_vm2, %v8874_v18, 0.0 }
 0x545   : > { %v6613_v19 = vpop.eup %6612  ;;  %3089 = vadd.xlane.f32.xlu1 %v3088_v53  ;;  %v3205_v9 = vmul.f32 %v6611_v57, %v9785_v5  ;;  %v9787_v57 = vld [vmem:[#allocation28_spill] sm:$0xff] }
 0x546   : > { %5813 = vmatpush3.bf16.msra.mxu0 %v9780_v21  ;;  %v3203_v27 = vmul.f32 %v6613_v19, %v9782_v35  ;;  %6622 = vpow2.f32 %v2913_v22 }
 0x547   : > { %5814 = vmatprep.subr.bf16.mxu0 %v9784_v17  ;;  %v3262_v4 = vpack.c.bf16 %v3206_v34, %v3205_v9 }
 0x548   : > { %v3261_v63 = vpack.c.bf16 %v3204_v11, %v3203_v27  ;;  %v2727_v38 = vpop.xlane.xlu0 %2726 }
 0x549   : > { %v2801_v25 = vsub.f32 %v8604_v14, %v2727_v38 }
 0x54a   : > { %5790 = vmatprep.mubr.msk.bf16.mxu0 %vm2550_vm2, %v3261_v63  ;;  %5815 = vmatpush3.bf16.msra.mxu0 %v9784_v17 }
 0x54b   : > { %v8888_v30 = vpop.eup %6614  ;;  %5791 = vmatmul.mubr.msk.bf16.gmra.mxu0 %vm2550_vm2, %v3262_v4  ;;  %v2923_v54 = vmul.f32 1.442695, %v2801_v25  ;;  %5816 = vmatprep.subr.bf16.mxu0 %v9786_v20 }
 0x54c   : > { %v2721_v55 = vpop.xlane.xlu0 %2720  ;;  %v2730_v44 = vpop.xlane.xlu1 %2729  ;;  %v3082_v56 = vsel %vm2550_vm2, %v8888_v30, 0.0 }
 0x54d   : > { %v8894_v33 = vpop.eup %6616  ;;  %6624 = vpow2.f32 %v2923_v54  ;;  %v2799_v14 = vsub.f32 %v8612_v1, %v2721_v55  ;;  %v2802_v32 = vsub.f32 %v8617_v6, %v2730_v44  ;;  %3083 = vadd.xlane.f32.xlu0 %v3082_v56 }
 0x54e   : > { %5817 = vmatpush3.bf16.msra.mxu0 %v9786_v20  ;;  %v3097_v41 = vsel %vm2550_vm2, %v8894_v33, 0.0 }
 0x54f   : > { %v8899_v13 = vpop.eup %6618  ;;  %v2919_v21 = vmul.f32 1.442695, %v2799_v14  ;;  %5842 = vmatprep.subr.bf16.mxu0 %v9787_v57  ;;  %v2925_v22 = vmul.f32 1.442695, %v2802_v32 }
 0x550   : > { %v2724_v53 = vpop.xlane.xlu1 %2723  ;;  %v2739_v19 = vpop.xlane.xlu0 %2738  ;;  %v3100_v34 = vsel %vm2550_vm2, %v8899_v13, 0.0 }
 0x551   : > { %v8906_v1 = vpop.eup %6620  ;;  %6626 = vpow2.f32 %v2919_v21  ;;  %v2800_v6 = vsub.f32 %v8623_v7, %v2724_v53  ;;  %v2805_v35 = vsub.f32 %v8631_v58, %v2739_v19  ;;  %3098 = vadd.xlane.f32.xlu0 %v3097_v41  ;;  %3101 = vadd.xlane.f32.xlu1 %v3100_v34 }
 0x552   : > { %6628 = vpow2.f32 %v2925_v22  ;;  %v3091_v11 = vsel %vm2550_vm2, %v8906_v1, 0.0 }
 0x553   : > { %v2921_v27 = vmul.f32 1.442695, %v2800_v6  ;;  %v2931_v3 = vmul.f32 1.442695, %v2805_v35  ;;  %v8912_v9 = vpop.eup %6622 }
 0x554   : > { %v2733_v17 = vpop.xlane.xlu0 %2732  ;;  %v2742_v5 = vpop.xlane.xlu1 %2741  ;;  %v3094_v38 = vsel %vm2550_vm2, %v8912_v9, 0.0 }
 0x555   : > { %6630 = vpow2.f32 %v2921_v27  ;;  %3092 = vadd.xlane.f32.xlu0 %v3091_v11  ;;  %v2803_v63 = vsub.f32 %v8637_v16, %v2733_v17  ;;  %v2806_v58 = vsub.f32 %v8644_v36, %v2742_v5 }
 0x556   : > { %6632 = vpow2.f32 %v2931_v3 }
 0x557   : > { %v2927_v7 = vmul.f32 1.442695, %v2803_v63  ;;  %v2933_v44 = vmul.f32 1.442695, %v2806_v58  ;;  %v9791_v58 = vld [vmem:[#allocation12_spill] sm:$0xff] }
 0x558   : > { %v2736_v4 = vpop.xlane.xlu1 %2735  ;;  %v2991_v16 = vpop.xlane.xlu0 %2990 }
 0x559   : > { %3095 = vadd.xlane.f32.xlu0 %v3094_v38  ;;  %v2804_v25 = vsub.f32 %v8648_v23, %v2736_v4  ;;  %6634 = vpow2.f32 %v2927_v7 }
 0x55a   : > { %v8919_v54 = vpop.eup %6624 }
 0x55b   : > { %v2929_v20 = vmul.f32 1.442695, %v2804_v25  ;;  %v3109_v55 = vsel %vm2550_vm2, %v8919_v54, 0.0 }
 0x55d   : > { %6636 = vpow2.f32 %v2929_v20  ;;  %3110 = vadd.xlane.f32.xlu0 %v3109_v55  ;;  %v3003_v23 = vpop.xlane.xlu0 %3002  ;;  %v9792_v20 = vld [vmem:[#allocation11_spill] sm:$0xff]  ;;  %v8955_v55 = vpop.permute.xlu1 %3914 }
 0x55e   : > { %v8923_v56 = vpop.eup %6626  ;;  %6638 = vpow2.f32 %v2933_v44 }
 0x55f   : > { %v3103_v36 = vsel %vm2550_vm2, %v8923_v56, 0.0  ;;  %v8927_v14 = vpop.eup %6628  ;;  %6640 = vrcp.f32 %v2991_v16 }
 0x560   : > { %v3112_v22 = vsel %vm2550_vm2, %v8927_v14, 0.0 }
 0x561   : > { %3104 = vadd.xlane.f32.xlu0 %v3103_v36  ;;  %v2997_v19 = vpop.xlane.xlu0 %2996 }
 0x562   : > { %v8929_v32 = vpop.eup %6630 }
 0x563   : > { %v3106_v21 = vsel %vm2550_vm2, %v8929_v32, 0.0  ;;  %v8935_v53 = vpop.eup %6632 }
 0x564   : > { %3107 = vadd.xlane.f32.xlu1 %v3106_v21  ;;  %9788 = vst [vmem:[#allocation34_spill] sm:$0xff] %v8935_v53  ;;  %v3121_v41 = vsel %vm2550_vm2, %v8935_v53, 0.0 }
 0x565   : > { %3113 = vadd.xlane.f32.xlu0 %v3112_v22  ;;  %v3006_v11 = vpop.xlane.xlu0 %3005 }
 0x566   : > { %v8939_v34 = vpop.eup %6634 }
 0x567   : > { %9789 = vst [vmem:[#allocation35_spill] sm:$0xff] %v8939_v34  ;;  %v3115_v27 = vsel %vm2550_vm2, %v8939_v34, 0.0 }
 0x569   : > { %3122 = vadd.xlane.f32.xlu0 %v3121_v41  ;;  %v3000_v5 = vpop.xlane.xlu0 %2999 }
 0x56a   : > { %v8941_v6 = vpop.eup %6636  ;;  %6642 = vrcp.f32 %v3000_v5 }
 0x56b   : > { %v3118_v35 = vsel %vm2550_vm2, %v8941_v6, 0.0  ;;  %v8947_v3 = vpop.eup %6638 }
 0x56c   : > { %3119 = vadd.xlane.f32.xlu1 %v3118_v35  ;;  %9790 = vst [vmem:[#allocation37_spill] sm:$0xff] %v8947_v3  ;;  %v3124_v17 = vsel %vm2550_vm2, %v8947_v3, 0.0 }
 0x56d   : > { %3116 = vadd.xlane.f32.xlu0 %v3115_v27 }
 0x571   : > { %3125 = vadd.xlane.f32.xlu0 %v3124_v17 }
 0x576   : > { %v3015_v63 = vpop.xlane.xlu0 %3014 }
 0x57a   : > { %v3009_v7 = vpop.xlane.xlu0 %3008 }
 0x57d   : > { %3910 = vrot.lane.b32.xlu1 %v9791_v58, %s6892_s17  ;;  %v6641_v58 = vpop.eup %6640 }
 0x57e   : > { %v3027_v38 = vpop.xlane.xlu0 %3026  ;;  %v6643_v5 = vpop.eup %6642 }
 0x582   : > { %v3021_v4 = vpop.xlane.xlu0 %3020 }
 0x586   : > { %v3039_v25 = vpop.xlane.xlu0 %3038 }
 0x587   : > { %3912 = vrot.lane.b32.xlu0 %v9792_v20, %s6892_s17  ;;  %s6893_s17 = smov 8  }
 0x58a   : > { %v3033_v44 = vpop.xlane.xlu0 %3032 }
 0x58d   : > { %v2985_v36 = vpop.xlane.xlu1 %2984 }
 0x58e   : > { %v3036_v22 = vpop.xlane.xlu0 %3035 }
 0x591   : > { %v2994_v21 = vpop.xlane.xlu1 %2993 }
 0x592   : > { %6644 = vrcp.f32 %v2994_v21  ;;  %v8957_v35 = vpop.xlane.xlu0 %3050 }
 0x593   : > { %6646 = vrcp.f32 %v2985_v36 }
 0x594   : > { %6648 = vrcp.f32 %v2997_v19 }
 0x595   : > { %v2988_v41 = vpop.xlane.xlu1 %2987 }
 0x596   : > { %6650 = vrcp.f32 %v2988_v41  ;;  %v3045_v16 = vpop.xlane.xlu0 %3044 }
 0x597   : > { %6652 = vrcp.f32 %v3003_v23 }
 0x598   : > { %6654 = vrcp.f32 %v3006_v11 }
 0x599   : > { %v3018_v27 = vpop.xlane.xlu1 %3017  ;;  %6656 = vrcp.f32 %v3015_v63 }
 0x59a   : > { %6658 = vrcp.f32 %v3018_v27  ;;  %v3048_v11 = vpop.xlane.xlu0 %3047 }
 0x59b   : > { %6660 = vrcp.f32 %v3009_v7 }
 0x59c   : > { %6662 = vrcp.f32 %v3036_v22  ;;  %v3212_v22 = vmul.f32 %v6643_v5, %v8673_v62 }
 0x59d   : > { %v3012_v17 = vpop.xlane.xlu1 %3011 }
 0x59e   : > { %6664 = vrcp.f32 %v3012_v17  ;;  %v3209_v17 = vmul.f32 %v6641_v58, %v8654_v60 }
 0x59f   : > { %6666 = vrcp.f32 %v3033_v44  ;;  %v6645_v20 = vpop.eup %6644  ;;  %v3063_v5 = vpop.xlane.xlu0 %3062 }
 0x5a0   : > { %v6647_v36 = vpop.eup %6646  ;;  %v3210_v23 = vmul.f32 %v6645_v20, %v8737_v24 }
 0x5a1   : > { %v3030_v19 = vpop.xlane.xlu1 %3029  ;;  %v6649_v21 = vpop.eup %6648  ;;  %v3207_v63 = vmul.f32 %v6647_v36, %v8726_v59  ;;  %v9794_v36 = vld [vmem:[#allocation17_spill] sm:$0xff] }
 0x5a2   : > { %6668 = vrcp.f32 %v3030_v19  ;;  %v3211_v34 = vmul.f32 %v6649_v21, %v8664_v46  ;;  %v3264_v20 = vpack.c.bf16 %v3210_v23, %v3209_v17  ;;  %v9797_v17 = vld [vmem:[#allocation31_spill] sm:$0xff] }
 0x5a3   : > { %v6651_v41 = vpop.eup %6650  ;;  %6670 = vrcp.f32 %v3021_v4 }
 0x5a4   : > { %v3208_v7 = vmul.f32 %v6651_v41, %v8750_v52  ;;  %v6653_v27 = vpop.eup %6652  ;;  %6672 = vrcp.f32 %v3027_v38  ;;  %v3265_v59 = vpack.c.bf16 %v3212_v22, %v3211_v34  ;;  %v9793_v38 = vld [vmem:[#allocation16_spill] sm:$0xff] }
 0x5a5   : > { %v3024_v44 = vpop.xlane.xlu1 %3023  ;;  %v6655_v53 = vpop.eup %6654  ;;  %v3213_v41 = vmul.f32 %v6653_v27, %v8660_v12 }
 0x5a6   : > { %6674 = vrcp.f32 %v3024_v44  ;;  %v3263_v3 = vpack.c.bf16 %v3208_v7, %v3207_v63  ;;  %v6657_v24 = vpop.eup %6656  ;;  %v9795_v63 = vld [vmem:[#allocation24_spill] sm:$0xff] }
 0x5a7   : > { %6676 = vrcp.f32 %v3048_v11  ;;  %v6659_v4 = vpop.eup %6658  ;;  %v3217_v19 = vmul.f32 %v6657_v24, %v8689_v31 }
 0x5a8   : > { %6678 = vrcp.f32 %v3039_v25  ;;  %5802 = vmatprep.mubr.msk.bf16.mxu1 %vm2550_vm2, %v3263_v3  ;;  %v6661_v52 = vpop.eup %6660  ;;  %v3218_v58 = vmul.f32 %v6659_v4, %v8760_v10  ;;  %v3214_v3 = vmul.f32 %v6655_v53, %v8668_v43 }
 0x5a9   : > { %6680 = vrcp.f32 %v3045_v16  ;;  %5803 = vmatmul.mubr.msk.bf16.vlgmr.msra.gmra.mxu1 %vm2550_vm2, %v3264_v20  ;;  %v3042_v60 = vpop.xlane.xlu1 %3041  ;;  %v6663_v62 = vpop.eup %6662  ;;  %v3215_v25 = vmul.f32 %v6661_v52, %v8698_v29 }
 0x5aa   : > { %5827 = vmatpush3.bf16.msra.mxu1 %v9793_v38  ;;  %6682 = vrcp.f32 %v3042_v60  ;;  %5806 = vmatprep.mubr.msk.bf16.mxu1 %vm2550_vm2, %v3265_v59  ;;  %v3224_v23 = vmul.f32 %v6663_v62, %v8739_v8  ;;  %v3268_v11 = vpack.c.bf16 %v3218_v58, %v3217_v19  ;;  %v3266_v43 = vpack.c.bf16 %v3214_v3, %v3213_v41  ;;  %v9798_v60 = vld [vmem:[#allocation33_spill] sm:$0xff]  ;;  %v9799_v62 = vld [vmem:[#allocation30_spill] sm:$0xff] }
 0x5ab   : > { %v6665_v46 = vpop.eup %6664  ;;  %5828 = vmatprep.subr.bf16.mxu1 %v9794_v36  ;;  %v9800_v58 = vld [vmem:[#allocation38_spill] sm:$0xff] }
 0x5ac   : > { %v6667_v34 = vpop.eup %6666  ;;  %v3216_v16 = vmul.f32 %v6665_v46, %v8762_v39  ;;  %v3057_v39 = vpop.xlane.xlu0 %3056 }
 0x5ad   : > { %v3054_v21 = vpop.xlane.xlu1 %3053  ;;  %v3223_v53 = vmul.f32 %v6667_v34, %v8728_v61  ;;  %v9796_v61 = vld [vmem:[#allocation26_spill] sm:$0xff]  ;;  %v9801_v34 = vld [vmem:[#allocation27_spill] sm:$0xff] }
 0x5ae   : > { %5829 = vmatpush3.bf16.msra.mxu1 %v9794_v36  ;;  %6684 = vrcp.f32 %v3054_v21  ;;  %v3267_v10 = vpack.c.bf16 %v3216_v16, %v3215_v25  ;;  %v9802_v16 = vld [vmem:[#allocation32_spill] sm:$0xff]  ;;  %v9803_v21 = vld [vmem:[#allocation43_spill] sm:$0xff] }
 0x5af   : > { %5830 = vmatprep.subr.bf16.mxu1 %v9795_v63  ;;  %v6669_v29 = vpop.eup %6668  ;;  %6686 = vrcp.f32 %v8957_v35  ;;  %v3271_v8 = vpack.c.bf16 %v3224_v23, %v3223_v53  ;;  %v9804_v23 = vld [vmem:[#allocation20_spill] sm:$0xff] }
 0x5b0   : > { %5818 = vmatprep.mubr.msk.bf16.mxu0 %vm2550_vm2, %v3267_v10  ;;  %v6671_v31 = vpop.eup %6670  ;;  %v3222_v35 = vmul.f32 %v6669_v29, %v8765_v15 }
 0x5b1   : > { %5807 = vmatmul.mubr.msk.bf16.gmra.mxu1 %vm2550_vm2, %v3266_v43  ;;  %5819 = vmatmul.mubr.msk.bf16.vlgmr.msra.gmra.mxu0 %vm2550_vm2, %v3268_v11  ;;  %v3066_v12 = vpop.xlane.xlu1 %3065  ;;  %v6673_v7 = vpop.eup %6672  ;;  %v3219_v44 = vmul.f32 %v6671_v31, %v8715_v37  ;;  %v9805_v43 = vld [vmem:[#allocation36_spill] sm:$0xff] }
 0x5b2   : > { %5831 = vmatpush3.bf16.msra.mxu1 %v9795_v63  ;;  %5843 = vmatpush3.bf16.msra.mxu0 %v9787_v57  ;;  %6688 = vrcp.f32 %v3066_v12  ;;  %v3221_v57 = vmul.f32 %v6673_v7, %v8705_v28  ;;  %v3075_v28 = vpop.xlane.xlu0 %3074  ;;  %v9806_v7 = vld [vmem:[#allocation40_spill] sm:$0xff] }
 0x5b3   : > { %v6675_v22 = vpop.eup %6674  ;;  %5832 = vmatprep.subr.bf16.mxu1 %v9796_v61  ;;  %5834 = vmatprep.mubr.msk.bf16.mxu1 %vm2550_vm2, %v3271_v8  ;;  %6690 = vrcp.f32 %v3057_v39 }
 0x5b4   : > { %v6677_v27 = vpop.eup %6676  ;;  %5844 = vmatprep.subr.bf16.mxu0 %v9797_v17  ;;  %v3220_v24 = vmul.f32 %v6675_v22, %v8787_v40  ;;  %6692 = vrcp.f32 %v3063_v5  ;;  %v3270_v37 = vpack.c.bf16 %v3222_v35, %v3221_v57  ;;  %v9808_v57 = vld [vmem:[#allocation21_spill] sm:$0xff] }
 0x5b5   : > { %v6679_v20 = vpop.eup %6678  ;;  %v3060_v4 = vpop.xlane.xlu1 %3059  ;;  %v3228_v40 = vmul.f32 %v6677_v27, %v8769_v48 }
 0x5b6   : > { %v6681_v59 = vpop.eup %6680  ;;  %5833 = vmatpush3.bf16.msra.mxu1 %v9796_v61  ;;  %5845 = vmatpush3.bf16.msra.mxu0 %v9797_v17  ;;  %6694 = vrcp.f32 %v3060_v4  ;;  %v3269_v15 = vpack.c.bf16 %v3220_v24, %v3219_v44  ;;  %v3225_v38 = vmul.f32 %v6679_v20, %v8721_v42  ;;  %v9807_v24 = vld [vmem:[#allocation44_spill] sm:$0xff] }
 0x5b7   : > { %v6683_v52 = vpop.eup %6682  ;;  %5846 = vmatprep.subr.bf16.mxu0 %v9798_v60  ;;  %5858 = vmatprep.subr.bf16.mxu1 %v9799_v62  ;;  %v3227_v5 = vmul.f32 %v6681_v59, %v9800_v58  ;;  %v9809_v58 = vld [vmem:[#allocation23_spill] sm:$0xff] }
 0x5b8   : > { %v3226_v46 = vmul.f32 %v6683_v52, %v8805_v2  ;;  %5822 = vmatprep.mubr.msk.bf16.mxu0 %vm2550_vm2, %v3269_v15  ;;  %v3069_v2 = vpop.xlane.xlu0 %3068 }
 0x5b9   : > { %5823 = vmatmul.mubr.msk.bf16.gmra.mxu0 %vm2550_vm2, %v3270_v37  ;;  %v3273_v25 = vpack.c.bf16 %v3228_v40, %v3227_v5 }
 0x5ba   : > { %v3272_v36 = vpack.c.bf16 %v3226_v46, %v3225_v38  ;;  %5847 = vmatpush3.bf16.msra.mxu0 %v9798_v60  ;;  %v3078_v42 = vpop.xlane.xlu1 %3077 }
 0x5bb   : > { %v6685_v3 = vpop.eup %6684  ;;  %5848 = vmatprep.subr.bf16.mxu0 %v9801_v34  ;;  %6696 = vrcp.f32 %v3078_v42 }
 0x5bc   : > { %5835 = vmatmul.mubr.msk.bf16.vlgmr.msra.gmra.mxu1 %vm2550_vm2, %v3272_v36  ;;  %v6687_v48 = vpop.eup %6686  ;;  %v3230_v19 = vmul.f32 %v6685_v3, %v8807_v47  ;;  %6698 = vrcp.f32 %v3069_v2  ;;  %v9810_v3 = vld [vmem:[#allocation41_spill] sm:$0xff] }
 0x5bd   : > { %5859 = vmatpush3.bf16.msra.mxu1 %v9799_v62  ;;  %5838 = vmatprep.mubr.msk.bf16.mxu1 %vm2550_vm2, %v3273_v25  ;;  %v3229_v10 = vmul.f32 %v6687_v48, %v9804_v23  ;;  %6700 = vrcp.f32 %v3075_v28 }
 0x5be   : > { %5849 = vmatpush3.bf16.msra.mxu0 %v9801_v34  ;;  %5860 = vmatprep.subr.bf16.mxu1 %v9802_v16 }
 0x5bf   : > { %5874 = vmatprep.subr.bf16.mxu0 %v9803_v21  ;;  %v6689_v41 = vpop.eup %6688  ;;  %v3274_v29 = vpack.c.bf16 %v3230_v19, %v3229_v10 }
 0x5c0   : > { %v6691_v11 = vpop.eup %6690  ;;  %v3234_v39 = vmul.f32 %v6689_v41, %v8815_v49 }
 0x5c1   : > { %5861 = vmatpush3.bf16.msra.mxu1 %v9802_v16  ;;  %v6693_v63 = vpop.eup %6692  ;;  %v3231_v47 = vmul.f32 %v6691_v11, %v8792_v45  ;;  %v3087_v45 = vpop.xlane.xlu0 %3086 }
 0x5c2   : > { %5862 = vmatprep.subr.bf16.mxu1 %v9805_v43  ;;  %v3072_v53 = vpop.xlane.xlu1 %3071  ;;  %v3233_v8 = vmul.f32 %v6693_v63, %v8780_v0 }
 0x5c3   : > { %v6695_v31 = vpop.eup %6694  ;;  %6702 = vrcp.f32 %v3072_v53 }
 0x5c4   : > { %5839 = vmatmul.mubr.msk.bf16.gmra.mxu1 %vm2550_vm2, %v3274_v29  ;;  %v3232_v12 = vmul.f32 %v6695_v31, %v8831_v26  ;;  %v3276_v61 = vpack.c.bf16 %v3234_v39, %v3233_v8 }
 0x5c5   : > { %5863 = vmatpush3.bf16.msra.mxu1 %v9805_v43  ;;  %v3081_v4 = vpop.xlane.xlu0 %3080 }
 0x5c6   : > { %5864 = vmatprep.subr.bf16.mxu1 %v9806_v7  ;;  %v3275_v22 = vpack.c.bf16 %v3232_v12, %v3231_v47 }
 0x5c8   : > { %5850 = vmatprep.mubr.msk.bf16.mxu0 %vm2550_vm2, %v3275_v22  ;;  %v6697_v49 = vpop.eup %6696 }
 0x5c9   : > { %5865 = vmatpush3.bf16.msra.mxu1 %v9806_v7  ;;  %5851 = vmatmul.mubr.msk.bf16.vlgmr.msra.gmra.mxu0 %vm2550_vm2, %v3276_v61  ;;  %v6699_v26 = vpop.eup %6698  ;;  %v3238_v27 = vmul.f32 %v6697_v49, %v8849_v50 }
 0x5ca   : > { %5875 = vmatpush3.bf16.msra.mxu0 %v9803_v21  ;;  %v6701_v0 = vpop.eup %6700  ;;  %v3235_v44 = vmul.f32 %v6699_v26, %v8836_v51 }
 0x5cb   : > { %5876 = vmatprep.subr.bf16.mxu0 %v8955_v55  ;;  %v3237_v59 = vmul.f32 %v6701_v0, %v9808_v57 }
 0x5cd   : > { %v3278_v52 = vpack.c.bf16 %v3238_v27, %v3237_v59 }
 0x5ce   : > { %5877 = vmatpush3.bf16.msra.mxu0 %v8955_v55  ;;  %v3090_v17 = vpop.xlane.xlu1 %3089 }
 0x5cf   : > { %6704 = vrcp.f32 %v3090_v17 }
 0x5d0   : > { %v6703_v35 = vpop.eup %6702  ;;  %6706 = vrcp.f32 %v3081_v4  ;;  %v9813_v4 = vld [vmem:[#allocation34_spill] sm:$0xff] }
 0x5d1   : > { %v3236_v20 = vmul.f32 %v6703_v35, %v9807_v24  ;;  %6708 = vrcp.f32 %v3087_v45  ;;  %v9811_v35 = vld [vmem:[#allocation35_spill] sm:$0xff] }
 0x5d3   : > { %v3277_v15 = vpack.c.bf16 %v3236_v20, %v3235_v44  ;;  %v9812_v20 = vld [vmem:[#allocation37_spill] sm:$0xff] }
 0x5d5   : > { %5854 = vmatprep.mubr.msk.bf16.mxu0 %vm2550_vm2, %v3277_v15 }
 0x5d6   : > { %v3084_v55 = vpop.xlane.xlu0 %3083  ;;  %5855 = vmatmul.mubr.msk.bf16.gmra.mxu0 %vm2550_vm2, %v3278_v52 }
 0x5d7   : > { %6710 = vrcp.f32 %v3084_v55 }
 0x5da   : > { %v3099_v50 = vpop.xlane.xlu0 %3098  ;;  %v3102_v60 = vpop.xlane.xlu1 %3101 }
 0x5db   : > { %6712 = vrcp.f32 %v3099_v50 }
 0x5dc   : > { %6714 = vrcp.f32 %v3102_v60  ;;  %v6705_v51 = vpop.eup %6704 }
 0x5dd   : > { %v6707_v37 = vpop.eup %6706  ;;  %v3242_v28 = vmul.f32 %v6705_v51, %v8874_v18 }
 0x5de   : > { %v3093_v62 = vpop.xlane.xlu0 %3092  ;;  %v6709_v38 = vpop.eup %6708  ;;  %v3239_v5 = vmul.f32 %v6707_v37, %v9809_v58 }
 0x5df   : > { %6716 = vrcp.f32 %v3093_v62  ;;  %v3241_v34 = vmul.f32 %v6709_v38, %v9810_v3 }
 0x5e1   : > { %v3280_v42 = vpack.c.bf16 %v3242_v28, %v3241_v34 }
 0x5e2   : > { %v3096_v40 = vpop.xlane.xlu0 %3095 }
 0x5e3   : > { %6718 = vrcp.f32 %v3096_v40 }
 0x5e4   : > { %v6711_v46 = vpop.eup %6710 }
 0x5e5   : > { %v3240_v36 = vmul.f32 %v6711_v46, %v8888_v30 }
 0x5e6   : > { %v3111_v25 = vpop.xlane.xlu0 %3110 }
 0x5e7   : > { %v3279_v48 = vpack.c.bf16 %v3240_v36, %v3239_v5 }
 0x5e8   : > { %v6713_v16 = vpop.eup %6712 }
 0x5e9   : > { %5866 = vmatprep.mubr.msk.bf16.mxu1 %vm2550_vm2, %v3279_v48  ;;  %v6715_v19 = vpop.eup %6714  ;;  %v3245_v30 = vmul.f32 %v6713_v16, %v8894_v33 }
 0x5ea   : > { %v3105_v2 = vpop.xlane.xlu0 %3104  ;;  %5867 = vmatmul.mubr.msk.bf16.vlgmr.msra.gmra.mxu1 %vm2550_vm2, %v3280_v42  ;;  %v3246_v10 = vmul.f32 %v6715_v19, %v8899_v13 }
 0x5eb   : > { %6720 = vrcp.f32 %v3105_v2 }
 0x5ec   : > { %v6717_v41 = vpop.eup %6716  ;;  %v3282_v29 = vpack.c.bf16 %v3246_v10, %v3245_v30 }
 0x5ed   : > { %v3108_v21 = vpop.xlane.xlu1 %3107  ;;  %v3243_v11 = vmul.f32 %v6717_v41, %v8906_v1 }
 0x5ee   : > { %v3114_v18 = vpop.xlane.xlu0 %3113  ;;  %6722 = vrcp.f32 %v3108_v21 }
 0x5ef   : > { %6724 = vrcp.f32 %v3114_v18 }
 0x5f0   : > { %v6719_v23 = vpop.eup %6718  ;;  %6726 = vrcp.f32 %v3111_v25 }
 0x5f1   : > { %v3244_v63 = vmul.f32 %v6719_v23, %v8912_v9 }
 0x5f2   : > { %v3123_v43 = vpop.xlane.xlu0 %3122 }
 0x5f3   : > { %v3281_v53 = vpack.c.bf16 %v3244_v63, %v3243_v11 }
 0x5f5   : > { %5870 = vmatprep.mubr.msk.bf16.mxu1 %vm2550_vm2, %v3281_v53  ;;  %v3120_v31 = vpop.xlane.xlu1 %3119 }
 0x5f6   : > { %v3117_v39 = vpop.xlane.xlu0 %3116  ;;  %5871 = vmatmul.mubr.msk.bf16.gmra.mxu1 %vm2550_vm2, %v3282_v29  ;;  %6728 = vrcp.f32 %v3120_v31 }
 0x5f7   : > { %6730 = vrcp.f32 %v3117_v39 }
 0x5f8   : > { %v6721_v33 = vpop.eup %6720  ;;  %6732 = vrcp.f32 %v3123_v43 }
 0x5f9   : > { %v3247_v1 = vmul.f32 %v6721_v33, %v8923_v56  ;;  %v3911_v61 = vpop.permute.xlu1 %3910 }
 0x5fa   : > { %v3126_v13 = vpop.xlane.xlu0 %3125 }
 0x5fb   : > { %v6723_v47 = vpop.eup %6722  ;;  %6734 = vrcp.f32 %v3126_v13 }
 0x5fc   : > { %v3248_v9 = vmul.f32 %v6723_v47, %v8929_v32  ;;  %v6725_v12 = vpop.eup %6724 }
 0x5fd   : > { %v6727_v22 = vpop.eup %6726  ;;  %v3250_v45 = vmul.f32 %v6725_v12, %v8927_v14 }
 0x5fe   : > { %v3913_v8 = vpop.permute.xlu0 %3912  ;;  %v3283_v7 = vpack.c.bf16 %v3248_v9, %v3247_v1  ;;  %v3249_v26 = vmul.f32 %v6727_v22, %v8919_v54  ;;  %v9058_v54 = vpop.f32.mrf.mxu0 }
 0x5ff   : > { %5878 = vmatprep.subr.bf16.mxu0 %v3913_v8 }
 0x600   : > { %5879 = vmatpush3.bf16.msra.mxu0 %v3913_v8  ;;  %5882 = vmatprep.mubr.msk.bf16.mxu0 %vm2550_vm2, %v3283_v7  ;;  %v3284_v32 = vpack.c.bf16 %v3250_v45, %v3249_v26  ;;  %v6436_v26 = vld [vmem:[%s9629_s7 + $0x8] sm:$0xff]  }
 0x601   : > { %5880 = vmatprep.subr.bf16.mxu0 %v3911_v61  ;;  %5890 = vmatprep.subr.bf16.mxu1 %v6436_v26 }
 0x602   : > { %5891 = vmatpush3.bf16.msra.mxu1 %v6436_v26 }
 0x603   : > { %v6729_v49 = vpop.eup %6728 }
 0x604   : > { %v6731_v0 = vpop.eup %6730  ;;  %5881 = vmatpush3.bf16.msra.mxu0 %v3911_v61  ;;  %v3252_v56 = vmul.f32 %v6729_v49, %v8941_v6  ;;  %v9060_v6 = vpop.f32.mrf.mxu0 }
 0x605   : > { %v3251_v27 = vmul.f32 %v6731_v0, %v9811_v35  ;;  %v6733_v17 = vpop.eup %6732 }
 0x606   : > { %v3253_v57 = vmul.f32 %v6733_v17, %v9813_v4  ;;  %v9062_v15 = vpop.f32.mrf.mxu0 }
 0x607   : > { %5883 = vmatmul.mubr.msk.bf16.vlgmr.msra.gmra.mxu0 %vm2550_vm2, %v3284_v32  ;;  %v3285_v44 = vpack.c.bf16 %v3252_v56, %v3251_v27  ;;  %v6437_v56 = vld [vmem:[%s9629_s7] sm:$0xff]  }
 0x608   : > { %v6735_v24 = vpop.eup %6734  ;;  %v9064_v52 = vpop.f32.mrf.mxu0  ;;  %5892 = vmatprep.subr.bf16.mxu1 %v6437_v56 }
 0x609   : > { %5886 = vmatprep.mubr.msk.bf16.mxu0 %vm2550_vm2, %v3285_v44  ;;  %v3254_v14 = vmul.f32 %v6735_v24, %v9812_v20  ;;  %5893 = vmatpush3.bf16.msra.mxu1 %v6437_v56 }
 0x60a   : > { %v9066_v55 = vpop.f32.mrf.mxu0 }
 0x60b   : > { %v3286_v59 = vpack.c.bf16 %v3254_v14, %v3253_v57 }
 0x60c   : > { %v9068_v50 = vpop.f32.mrf.mxu0 }
 0x60e   : > { %v9070_v60 = vpop.f32.mrf.mxu0 }
 0x60f   : > { %5887 = vmatmul.mubr.msk.bf16.gmra.mxu0 %vm2550_vm2, %v3286_v59 }
 0x610   : > { %v9072_v62 = vpop.f32.mrf.mxu0 }
 0x612   : > { %v9074_v51 = vpop.f32.mrf.mxu0 }
 0x614   : > { %v9076_v37 = vpop.f32.mrf.mxu0 }
 0x616   : > { %v9078_v40 = vpop.f32.mrf.mxu0 }
 0x618   : > { %v9080_v38 = vpop.f32.mrf.mxu0 }
 0x61a   : > { %v9082_v46 = vpop.f32.mrf.mxu0 }
 0x61c   : > { %v9084_v28 = vpop.f32.mrf.mxu0 }
 0x61e   : > { %v9086_v5 = vpop.f32.mrf.mxu0 }
 0x620   : > { %v9088_v25 = vpop.f32.mrf.mxu0 }
 0x669   : > { %v5804_v58 = vpop.f32.mrf.mxu1 }
 0x66b   : > { %v3523_v36 = vpop.f32.mrf.mxu1 }
 0x66d   : > { %v5805_v3 = vpop.f32.mrf.mxu1 }
 0x66e   : > { %v6314_v34 = vpack.i.bf16 %v5805_v3, %v5804_v58 }
 0x66f   : > { %v3526_v48 = vpop.f32.mrf.mxu1 }
 0x670   : > { %v6319_v42 = vpack.i.bf16 %v3526_v48, %v3523_v36  ;;  %6315 = vrot.lane.b32.xlu1 %v6314_v34, %s6893_s17 }
 0x671   : > { %v5808_v2 = vpop.f32.mrf.mxu1  ;;  %v5820_v16 = vpop.f32.mrf.mxu0 }
 0x672   : > { %6320 = vrot.lane.b32.xlu0 %v6319_v42, %s6893_s17 }
 0x673   : > { %v3539_v19 = vpop.f32.mrf.mxu1  ;;  %v3612_v21 = vpop.f32.mrf.mxu0 }
 0x675   : > { %v5809_v41 = vpop.f32.mrf.mxu1  ;;  %v5821_v18 = vpop.f32.mrf.mxu0 }
 0x676   : > { %v6324_v23 = vpack.i.bf16 %v5809_v41, %v5808_v2  ;;  %v6334_v63 = vpack.i.bf16 %v5821_v18, %v5820_v16 }
 0x677   : > { %v3542_v30 = vpop.f32.mrf.mxu1  ;;  %v3615_v11 = vpop.f32.mrf.mxu0 }
 0x678   : > { %v6329_v10 = vpack.i.bf16 %v3542_v30, %v3539_v19  ;;  %6325 = vrot.lane.b32.xlu1 %v6324_v23, %s6893_s17  ;;  %v6339_v43 = vpack.i.bf16 %v3615_v11, %v3612_v21 }
 0x679   : > { %v5824_v22 = vpop.f32.mrf.mxu0 }
 0x67a   : > { %6330 = vrot.lane.b32.xlu0 %v6329_v10, %s6893_s17 }
 0x67b   : > { %v3628_v61 = vpop.f32.mrf.mxu0 }
 0x67c   : > { %6335 = vrot.lane.b32.xlu1 %v6334_v63, %s6893_s17  ;;  %v5836_v53 = vpop.f32.mrf.mxu1 }
 0x67d   : > { %v5825_v45 = vpop.f32.mrf.mxu0 }
 0x67e   : > { %6340 = vrot.lane.b32.xlu0 %v6339_v43, %s6893_s17  ;;  %v3701_v29 = vpop.f32.mrf.mxu1  ;;  %v6399_v19 = vpack.i.bf16 %v5825_v45, %v5824_v22 }
 0x67f   : > { %v3631_v49 = vpop.f32.mrf.mxu0 }
 0x680   : > { %v5837_v31 = vpop.f32.mrf.mxu1  ;;  %v6394_v21 = vpack.i.bf16 %v3631_v49, %v3628_v61 }
 0x681   : > { %v6344_v39 = vpack.i.bf16 %v5837_v31, %v5836_v53 }
 0x682   : > { %v3704_v33 = vpop.f32.mrf.mxu1 }
 0x683   : > { %v6349_v13 = vpack.i.bf16 %v3704_v33, %v3701_v29  ;;  %6345 = vrot.lane.b32.xlu1 %v6344_v39, %s6894_s22 }
 0x684   : > { %v5840_v47 = vpop.f32.mrf.mxu1 }
 0x685   : > { %6350 = vrot.lane.b32.xlu0 %v6349_v13, %s6894_s22 }
 0x686   : > { %v3717_v1 = vpop.f32.mrf.mxu1 }
 0x688   : > { %v5841_v9 = vpop.f32.mrf.mxu1 }
 0x689   : > { %v6354_v12 = vpack.i.bf16 %v5841_v9, %v5840_v47  ;;  %v5852_v0 = vpop.f32.mrf.mxu0 }
 0x68a   : > { %v3720_v8 = vpop.f32.mrf.mxu1 }
 0x68b   : > { %v6359_v7 = vpack.i.bf16 %v3720_v8, %v3717_v1  ;;  %6355 = vrot.lane.b32.xlu1 %v6354_v12, %s6894_s22  ;;  %v3790_v32 = vpop.f32.mrf.mxu0 }
 0x68d   : > { %6360 = vrot.lane.b32.xlu0 %v6359_v7, %s6894_s22  ;;  %v5853_v17 = vpop.f32.mrf.mxu0 }
 0x68e   : > { %v6379_v57 = vpack.i.bf16 %v5853_v17, %v5852_v0 }
 0x68f   : > { %v3793_v4 = vpop.f32.mrf.mxu0 }
 0x690   : > { %v6374_v59 = vpack.i.bf16 %v3793_v4, %v3790_v32 }
 0x696   : > { %v5856_v3 = vpop.f32.mrf.mxu0 }
 0x698   : > { %v3806_v2 = vpop.f32.mrf.mxu0 }
 0x69a   : > { %v5857_v41 = vpop.f32.mrf.mxu0 }
 0x69b   : > { %v6419_v29 = vpack.i.bf16 %v5857_v41, %v5856_v3 }
 0x69c   : > { %v3809_v18 = vpop.f32.mrf.mxu0 }
 0x69d   : > { %v6414_v39 = vpack.i.bf16 %v3809_v18, %v3806_v2 }
 0x6aa   : > { %v5868_v35 = vpop.f32.mrf.mxu1 }
 0x6ac   : > { %v3879_v27 = vpop.f32.mrf.mxu1 }
 0x6ae   : > { %v5869_v44 = vpop.f32.mrf.mxu1 }
 0x6af   : > { %v6364_v24 = vpack.i.bf16 %v5869_v44, %v5868_v35 }
 0x6b0   : > { %v3882_v20 = vpop.f32.mrf.mxu1 }
 0x6b1   : > { %v6369_v14 = vpack.i.bf16 %v3882_v20, %v3879_v27  ;;  %6365 = vrot.lane.b32.xlu1 %v6364_v24, %s6895_s18 }
 0x6b3   : > { %6370 = vrot.lane.b32.xlu0 %v6369_v14, %s6895_s18 }
 0x6b5   : > { %6380 = vrot.lane.b32.xlu1 %v6379_v57, %s6894_s22 }
 0x6b6   : > { %v5872_v58 = vpop.f32.mrf.mxu1 }
 0x6b7   : > { %6375 = vrot.lane.b32.xlu0 %v6374_v59, %s6894_s22 }
 0x6b8   : > { %v3895_v36 = vpop.f32.mrf.mxu1 }
 0x6ba   : > { %v5873_v34 = vpop.f32.mrf.mxu1 }
 0x6bb   : > { %v6384_v48 = vpack.i.bf16 %v5873_v34, %v5872_v58 }
 0x6bc   : > { %v3898_v42 = vpop.f32.mrf.mxu1 }
 0x6bd   : > { %v6389_v16 = vpack.i.bf16 %v3898_v42, %v3895_v36  ;;  %6385 = vrot.lane.b32.xlu1 %v6384_v48, %s6895_s18 }
 0x6bf   : > { %6390 = vrot.lane.b32.xlu0 %v6389_v16, %s6895_s18 }
 0x6c1   : > { %6400 = vrot.lane.b32.xlu1 %v6399_v19, %s6893_s17 }
 0x6c3   : > { %6395 = vrot.lane.b32.xlu0 %v6394_v21, %s6893_s17 }
 0x6c7   : > { %v5884_v23 = vpop.f32.mrf.mxu0 }
 0x6c9   : > { %v3968_v30 = vpop.f32.mrf.mxu0 }
 0x6cb   : > { %v5885_v10 = vpop.f32.mrf.mxu0 }
 0x6cc   : > { %v6404_v11 = vpack.i.bf16 %v5885_v10, %v5884_v23 }
 0x6cd   : > { %v3971_v63 = vpop.f32.mrf.mxu0 }
 0x6ce   : > { %v6409_v43 = vpack.i.bf16 %v3971_v63, %v3968_v30  ;;  %6405 = vrot.lane.b32.xlu1 %v6404_v11, %s6895_s18 }
 0x6cf   : > { %v5888_v53 = vpop.f32.mrf.mxu0 }
 0x6d0   : > { %6410 = vrot.lane.b32.xlu0 %v6409_v43, %s6895_s18 }
 0x6d1   : > { %v3984_v31 = vpop.f32.mrf.mxu0 }
 0x6d2   : > { %6420 = vrot.lane.b32.xlu1 %v6419_v29, %s6894_s22 }
 0x6d3   : > { %v5889_v33 = vpop.f32.mrf.mxu0 }
 0x6d4   : > { %v6429_v13 = vpack.i.bf16 %v5889_v33, %v5888_v53  ;;  %6415 = vrot.lane.b32.xlu0 %v6414_v39, %s6894_s22 }
 0x6d5   : > { %v3987_v47 = vpop.f32.mrf.mxu0 }
 0x6d6   : > { %v6424_v1 = vpack.i.bf16 %v3987_v47, %v3984_v31  ;;  %6430 = vrot.lane.b32.xlu1 %v6429_v13, %s6895_s18 }
 0x6d8   : > { %6425 = vrot.lane.b32.xlu0 %v6424_v1, %s6895_s18  ;;  %s9523_s18 = scalar_lea.vmem [#allocation4], %s7119_s27 }
 0x6e2   : > { %v6316_v9 = vpop.permute.xlu1 %6315 }
 0x6e3   : > { %v6318_v0 = vunpack.i.h.bf16 %v6316_v9  ;;  %v6317_v56 = vunpack.i.l.bf16 %v6316_v9 }
 0x6e4   : > { %v6321_v12 = vpop.permute.xlu0 %6320 }
 0x6e5   : > { %v6323_v32 = vunpack.i.h.bf16 %v6321_v12  ;;  %v6322_v35 = vunpack.i.l.bf16 %v6321_v12  ;;  %v4194_v59 = vsel %vm1577_vm1, %v9062_v15, %v6318_v0  ;;  %v4193_v58 = vsel %vm1577_vm1, %v9058_v54, %v6317_v56 }
 0x6e7   : > { %v4192_v36 = vsel %vm1577_vm1, %v9064_v52, %v6323_v32  ;;  %v4191_v3 = vsel %vm1577_vm1, %v9060_v6, %v6322_v35 }
 0x6ea   : > { %v6326_v8 = vpop.permute.xlu1 %6325 }
 0x6eb   : > { %v6328_v30 = vunpack.i.h.bf16 %v6326_v8  ;;  %v6327_v10 = vunpack.i.l.bf16 %v6326_v8 }
 0x6ec   : > { %v6331_v7 = vpop.permute.xlu0 %6330 }
 0x6ed   : > { %v6333_v11 = vunpack.i.h.bf16 %v6331_v7  ;;  %v6332_v63 = vunpack.i.l.bf16 %v6331_v7  ;;  %v4198_v1 = vsel %vm1577_vm1, %v9070_v60, %v6328_v30  ;;  %v4197_v9 = vsel %vm1577_vm1, %v9066_v55, %v6327_v10 }
 0x6ee   : > { %v9120_v22 = vpop.permute.xlu1 %6335 }
 0x6ef   : > { %v4196_v12 = vsel %vm1577_vm1, %v9072_v62, %v6333_v11  ;;  %v4195_v8 = vsel %vm1577_vm1, %v9068_v50, %v6332_v63 }
 0x6f0   : > { %v9122_v61 = vpop.permute.xlu0 %6340 }
 0x6f5   : > { %v6346_v45 = vpop.permute.xlu1 %6345 }
 0x6f6   : > { %v6348_v17 = vunpack.i.h.bf16 %v6346_v45  ;;  %v6347_v44 = vunpack.i.l.bf16 %v6346_v45 }
 0x6f7   : > { %v6351_v49 = vpop.permute.xlu0 %6350 }
 0x6f8   : > { %v6353_v24 = vunpack.i.h.bf16 %v6351_v49  ;;  %v6352_v20 = vunpack.i.l.bf16 %v6351_v49  ;;  %v4210_v48 = vsel %vm4207_vm3, %v4193_v58, %v6347_v44  ;;  %v4211_v42 = vsel %vm4207_vm3, %v4194_v59, %v6348_v17 }
 0x6f9   : > { %v6338_v44 = vunpack.i.h.bf16 %v9120_v22 }
 0x6fa   : > { %v4209_v19 = vsel %vm4207_vm3, %v4192_v36, %v6353_v24  ;;  %v4208_v15 = vsel %vm4207_vm3, %v4191_v3, %v6352_v20  ;;  %v6337_v24 = vunpack.i.l.bf16 %v9120_v22  ;;  %v6343_v20 = vunpack.i.h.bf16 %v9122_v61 }
 0x6fc   : > { %v4200_v22 = vsel %vm1577_vm1, %v9080_v38, %v6343_v20 }
 0x6fd   : > { %v6356_v26 = vpop.permute.xlu1 %6355 }
 0x6fe   : > { %v6358_v53 = vunpack.i.h.bf16 %v6356_v26  ;;  %v6357_v29 = vunpack.i.l.bf16 %v6356_v26 }
 0x6ff   : > { %v6361_v27 = vpop.permute.xlu0 %6360 }
 0x700   : > { %v6363_v31 = vunpack.i.h.bf16 %v6361_v27  ;;  %v6362_v39 = vunpack.i.l.bf16 %v6361_v27  ;;  %v4214_v45 = vsel %vm4207_vm3, %v4197_v9, %v6357_v29  ;;  %v4215_v49 = vsel %vm4207_vm3, %v4198_v1, %v6358_v53 }
 0x702   : > { %v4213_v56 = vsel %vm4207_vm3, %v4196_v12, %v6363_v31  ;;  %v4212_v60 = vsel %vm4207_vm3, %v4195_v8, %v6362_v39 }
 0x723   : > { %v6366_v14 = vpop.permute.xlu1 %6365 }
 0x724   : > { %v6368_v4 = vunpack.i.h.bf16 %v6366_v14  ;;  %v6367_v57 = vunpack.i.l.bf16 %v6366_v14  ;;  %v6342_v14 = vunpack.i.l.bf16 %v9122_v61 }
 0x725   : > { %v6371_v34 = vpop.permute.xlu0 %6370 }
 0x726   : > { %v6373_v2 = vunpack.i.h.bf16 %v6371_v34  ;;  %v6372_v16 = vunpack.i.l.bf16 %v6371_v34  ;;  %v4227_v21 = vsel %vm4224_vm4, %v4210_v48, %v6367_v57  ;;  %v4228_v54 = vsel %vm4224_vm4, %v4211_v42, %v6368_v4 }
 0x727   : > { %v4242_v18 = vpack.c.bf16 %v4228_v54, %v4227_v21  ;;  %v6381_v23 = vpop.permute.xlu1 %6380  ;;  %v4202_v42 = vsel %vm1577_vm1, %v9078_v40, %v6338_v44  ;;  %v4199_v61 = vsel %vm1577_vm1, %v9076_v37, %v6342_v14 }
 0x728   : > { %v4226_v52 = vsel %vm4224_vm4, %v4209_v19, %v6373_v2  ;;  %v4225_v41 = vsel %vm4224_vm4, %v4208_v15, %v6372_v16  ;;  %v6383_v57 = vunpack.i.h.bf16 %v6381_v23  ;;  %v6382_v59 = vunpack.i.l.bf16 %v6381_v23 }
 0x729   : > { %v4241_v6 = vpack.c.bf16 %v4226_v52, %v4225_v41  ;;  %v6376_v43 = vpop.permute.xlu0 %6375  ;;  %v4201_v2 = vsel %vm1577_vm1, %v9074_v51, %v6337_v24  ;;  %v6800_v24 = vld [vmem:[%s7122_s16] sm:$0xff] }
 0x72a   : > { %v6378_v58 = vunpack.i.h.bf16 %v6376_v43  ;;  %v6377_v36 = vunpack.i.l.bf16 %v6376_v43  ;;  %v4218_v19 = vsel %vm4207_vm3, %v4201_v2, %v6382_v59  ;;  %v4219_v15 = vsel %vm4207_vm3, %v4202_v42, %v6383_v57 }
 0x72b   : > { %5894 = vmatprep.mubr.msk.bf16.mxu1 %vm757_vm0, %v4241_v6 }
 0x72c   : > { %5895 = vmatmul.mubr.msk.bf16.vlgmr.msra.gmra.mxu1 %vm757_vm0, %v4242_v18  ;;  %v4217_v52 = vsel %vm4207_vm3, %v4200_v22, %v6378_v58  ;;  %v4216_v40 = vsel %vm4207_vm3, %v4199_v61, %v6377_v36 }
 0x72f   : > { %v6386_v33 = vpop.permute.xlu1 %6385 }
 0x730   : > { %v6388_v13 = vunpack.i.h.bf16 %v6386_v33  ;;  %v6387_v47 = vunpack.i.l.bf16 %v6386_v33 }
 0x731   : > { %v6391_v7 = vpop.permute.xlu0 %6390 }
 0x732   : > { %v6393_v26 = vunpack.i.h.bf16 %v6391_v7  ;;  %v6392_v0 = vunpack.i.l.bf16 %v6391_v7  ;;  %v4231_v32 = vsel %vm4224_vm4, %v4214_v45, %v6387_v47  ;;  %v4232_v55 = vsel %vm4224_vm4, %v4215_v49, %v6388_v13 }
 0x733   : > { %v4244_v27 = vpack.c.bf16 %v4232_v55, %v4231_v32  ;;  %v6401_v17 = vpop.permute.xlu1 %6400 }
 0x734   : > { %v4230_v62 = vsel %vm4224_vm4, %v4213_v56, %v6393_v26  ;;  %v4229_v35 = vsel %vm4224_vm4, %v4212_v60, %v6392_v0  ;;  %v6403_v38 = vunpack.i.h.bf16 %v6401_v17  ;;  %v6402_v23 = vunpack.i.l.bf16 %v6401_v17 }
 0x735   : > { %v4243_v50 = vpack.c.bf16 %v4230_v62, %v4229_v35  ;;  %v6396_v4 = vpop.permute.xlu0 %6395  ;;  %v9203_v35 = vld [vmem:[%s9630_s8] ss:$0 sm:$0xff] }
 0x736   : > { %v6398_v30 = vunpack.i.h.bf16 %v6396_v4  ;;  %v6397_v10 = vunpack.i.l.bf16 %v6396_v4  ;;  %v4206_v1 = vsel %vm1577_vm1, %v9086_v5, %v6403_v38  ;;  %v4205_v9 = vsel %vm1577_vm1, %v9082_v46, %v6402_v23  ;;  %v6801_v4 = vld [vmem:[%s7122_s16 + $0x10] sm:$0xff]  ;;  %v6806_v23 = vld [vmem:[%s7122_s16 + $0x28] sm:$0xff] }
 0x737   : > { %5898 = vmatprep.mubr.msk.bf16.mxu1 %vm757_vm0, %v4243_v50 }
 0x738   : > { %5899 = vmatmul.mubr.msk.bf16.gmra.mxu1 %vm757_vm0, %v4244_v27  ;;  %v4204_v12 = vsel %vm1577_vm1, %v9088_v25, %v6398_v30  ;;  %v4203_v8 = vsel %vm1577_vm1, %v9084_v28, %v6397_v10  ;;  %v6807_v10 = vld [vmem:[%s7122_s16 + $0x38] sm:$0xff] }
 0x740   : > { %v6406_v3 = vpop.permute.xlu1 %6405 }
 0x741   : > { %v6408_v34 = vunpack.i.h.bf16 %v6406_v3  ;;  %v6407_v48 = vunpack.i.l.bf16 %v6406_v3  ;;  %v6802_v3 = vld [vmem:[%s7122_s16 + $0x8] sm:$0xff] }
 0x742   : > { %v6411_v16 = vpop.permute.xlu0 %6410 }
 0x743   : > { %v6413_v21 = vunpack.i.h.bf16 %v6411_v16  ;;  %v6412_v54 = vunpack.i.l.bf16 %v6411_v16  ;;  %v4235_v41 = vsel %vm4224_vm4, %v4218_v19, %v6407_v48  ;;  %v4236_v51 = vsel %vm4224_vm4, %v4219_v15, %v6408_v34  ;;  %v6803_v48 = vld [vmem:[%s7122_s16 + $0x18] sm:$0xff] }
 0x744   : > { %v6421_v6 = vpop.permute.xlu1 %6420  ;;  %v4246_v43 = vpack.c.bf16 %v4236_v51, %v4235_v41  ;;  %v6805_v51 = vld [vmem:[%s7122_s16 + $0x30] sm:$0xff] }
 0x745   : > { %v4234_v18 = vsel %vm4224_vm4, %v4217_v52, %v6413_v21  ;;  %v4233_v37 = vsel %vm4224_vm4, %v4216_v40, %v6412_v54  ;;  %v6423_v53 = vunpack.i.h.bf16 %v6421_v6  ;;  %v6422_v29 = vunpack.i.l.bf16 %v6421_v6  ;;  %v6804_v52 = vld [vmem:[%s7122_s16 + $0x20] sm:$0xff] }
 0x746   : > { %v4245_v11 = vpack.c.bf16 %v4234_v18, %v4233_v37  ;;  %v6416_v63 = vpop.permute.xlu0 %6415 }
 0x747   : > { %v6418_v31 = vunpack.i.h.bf16 %v6416_v63  ;;  %v6417_v39 = vunpack.i.l.bf16 %v6416_v63  ;;  %v4222_v45 = vsel %vm4207_vm3, %v4205_v9, %v6422_v29  ;;  %v4223_v49 = vsel %vm4207_vm3, %v4206_v1, %v6423_v53 }
 0x748   : > { %v6431_v33 = vpop.permute.xlu1 %6430  ;;  %5902 = vmatprep.mubr.msk.bf16.mxu1 %vm757_vm0, %v4245_v11 }
 0x749   : > { %v6433_v13 = vunpack.i.h.bf16 %v6431_v33  ;;  %v6432_v47 = vunpack.i.l.bf16 %v6431_v33  ;;  %5903 = vmatmul.mubr.msk.bf16.gmra.mxu1 %vm757_vm0, %v4246_v43  ;;  %v4221_v56 = vsel %vm4207_vm3, %v4204_v12, %v6418_v31  ;;  %v4220_v5 = vsel %vm4207_vm3, %v4203_v8, %v6417_v39  ;;  %v6809_v8 = vld [vmem:[%s7122_s16 + $0x50] sm:$0xff] }
 0x74a   : > { %v6426_v7 = vpop.permute.xlu0 %6425 }
 0x74b   : > { %v6428_v26 = vunpack.i.h.bf16 %v6426_v7  ;;  %v6427_v0 = vunpack.i.l.bf16 %v6426_v7  ;;  %v4239_v46 = vsel %vm4224_vm4, %v4222_v45, %v6432_v47  ;;  %v4240_v60 = vsel %vm4224_vm4, %v4223_v49, %v6433_v13  ;;  %v6808_v47 = vld [vmem:[%s7122_s16 + $0x40] sm:$0xff] }
 0x74c   : > { %v4248_v55 = vpack.c.bf16 %v4240_v60, %v4239_v46 }
 0x74d   : > { %v4238_v25 = vsel %vm4224_vm4, %v4221_v56, %v6428_v26  ;;  %v4237_v28 = vsel %vm4224_vm4, %v4220_v5, %v6427_v0  ;;  %v6810_v0 = vld [vmem:[%s7122_s16 + $0x48] sm:$0xff]  ;;  %v6811_v5 = vld [vmem:[%s7122_s16 + $0x58] sm:$0xff] }
 0x74e   : > { %v4247_v32 = vpack.c.bf16 %v4238_v25, %v4237_v28 }
 0x750   : > { %5906 = vmatprep.mubr.msk.bf16.mxu1 %vm757_vm0, %v4247_v32 }
 0x751   : > { %5907 = vmatmul.mubr.msk.bf16.gmra.mxu1 %vm757_vm0, %v4248_v55 }
 0x7ec   : > { %v5896_v62 = vpop.f32.mrf.mxu1 }
 0x7ed   : > { %v4339_v27 = vadd.f32 %v5896_v62, %v9203_v35 }
 0x7ee   : > { %v4330_v50 = vpop.f32.mrf.mxu1 }
 0x7ef   : > { %v4331_v17 = vadd.f32 %v9203_v35, %v4330_v50  ;;  %v9211_v57 = vadd.f32 %v6801_v4, %v4339_v27  ;;  %v6812_v50 = vld [vmem:[%s7122_s16 + $0x60] sm:$0xff] }
 0x7f0   : > { %v5897_v44 = vpop.f32.mrf.mxu1 }
 0x7f1   : > { %v9208_v20 = vadd.f32 %v6800_v24, %v4331_v17  ;;  %v4342_v59 = vadd.f32 %v5897_v44, %v9203_v35  ;;  %v4415_v22 = vsel %vm757_vm0, %v9211_v57, 0.0  ;;  %v6813_v24 = vld [vmem:[%s7122_s16 + $0x70] sm:$0xff] }
 0x7f2   : > { %v4333_v14 = vpop.f32.mrf.mxu1 }
 0x7f3   : > { %v4334_v58 = vadd.f32 %v9203_v35, %v4333_v14  ;;  %v4409_v36 = vsel %vm757_vm0, %v9208_v20, 0.0  ;;  %v9221_v42 = vadd.f32 %v6803_v48, %v4342_v59  ;;  %v6815_v48 = vld [vmem:[%s7122_s16 + $0x78] sm:$0xff] }
 0x7f4   : > { %4410 = vadd.xlane.f32.xlu0 %v4409_v36  ;;  %v6814_v36 = vld [vmem:[%s7122_s16 + $0x68] sm:$0xff]  ;;  %s9820_s16 = sld [smem:[#allocation5_spill]] (%p7057_p10) }
 0x7f5   : > { %v9218_v34 = vadd.f32 %v6802_v3, %v4334_v58  ;;  %v4418_v21 = vsel %vm757_vm0, %v9221_v42, 0.0 }
 0x7f7   : > { %v4412_v2 = vsel %vm757_vm0, %v9218_v34, 0.0 }
 0x7f8   : > { %v5900_v61 = vpop.f32.mrf.mxu1  ;;  %4413 = vadd.xlane.f32.xlu1 %v4412_v2  ;;  %4416 = vadd.xlane.f32.xlu0 %v4415_v22 }
 0x7f9   : > { %v4355_v19 = vadd.f32 %v5900_v61, %v9203_v35 }
 0x7fa   : > { %v4346_v16 = vpop.f32.mrf.mxu1 }
 0x7fb   : > { %v4347_v15 = vadd.f32 %v9203_v35, %v4346_v16  ;;  %v9235_v6 = vadd.f32 %v6805_v51, %v4355_v19 }
 0x7fc   : > { %v5901_v54 = vpop.f32.mrf.mxu1  ;;  %4419 = vadd.xlane.f32.xlu0 %v4418_v21 }
 0x7fd   : > { %v9232_v40 = vadd.f32 %v6804_v52, %v4347_v15  ;;  %v4358_v38 = vadd.f32 %v5901_v54, %v9203_v35  ;;  %v4427_v43 = vsel %vm757_vm0, %v9235_v6, 0.0 }
 0x7fe   : > { %v4349_v41 = vpop.f32.mrf.mxu1 }
 0x7ff   : > { %v4350_v18 = vadd.f32 %v9203_v35, %v4349_v41  ;;  %v4421_v37 = vsel %vm757_vm0, %v9232_v40, 0.0  ;;  %v9245_v11 = vadd.f32 %v6807_v10, %v4358_v38 }
 0x800   : > { %4422 = vadd.xlane.f32.xlu0 %v4421_v37 }
 0x801   : > { %v9242_v30 = vadd.f32 %v6806_v23, %v4350_v18  ;;  %v4430_v53 = vsel %vm757_vm0, %v9245_v11, 0.0 }
 0x803   : > { %v4424_v63 = vsel %vm757_vm0, %v9242_v30, 0.0 }
 0x804   : > { %4425 = vadd.xlane.f32.xlu1 %v4424_v63  ;;  %4428 = vadd.xlane.f32.xlu0 %v4427_v43 }
 0x808   : > { %4431 = vadd.xlane.f32.xlu1 %v4430_v53 }
 0x809   : > { %v5904_v29 = vpop.f32.mrf.mxu1 }
 0x80a   : > { %v4371_v39 = vadd.f32 %v5904_v29, %v9203_v35 }
 0x80b   : > { %v4362_v31 = vpop.f32.mrf.mxu1 }
 0x80c   : > { %v4363_v33 = vadd.f32 %v9203_v35, %v4362_v31  ;;  %v9260_v7 = vadd.f32 %v6809_v8, %v4371_v39 }
 0x80d   : > { %v5905_v13 = vpop.f32.mrf.mxu1 }
 0x80e   : > { %v9256_v1 = vadd.f32 %v6808_v47, %v4363_v33  ;;  %v4374_v9 = vadd.f32 %v5905_v13, %v9203_v35  ;;  %v4439_v55 = vsel %vm757_vm0, %v9260_v7, 0.0 }
 0x80f   : > { %v4365_v12 = vpop.f32.mrf.mxu1 }
 0x810   : > { %v4366_v45 = vadd.f32 %v9203_v35, %v4365_v12  ;;  %v4433_v49 = vsel %vm757_vm0, %v9256_v1, 0.0  ;;  %v9269_v46 = vadd.f32 %v6811_v5, %v4374_v9 }
 0x811   : > { %v5908_v26 = vpop.f32.mrf.mxu1  ;;  %4434 = vadd.xlane.f32.xlu0 %v4433_v49 }
 0x812   : > { %v9266_v56 = vadd.f32 %v6810_v0, %v4366_v45  ;;  %v4387_v25 = vadd.f32 %v5908_v26, %v9203_v35  ;;  %v4442_v44 = vsel %vm757_vm0, %v9269_v46, 0.0 }
 0x813   : > { %v4378_v60 = vpop.f32.mrf.mxu1 }
 0x814   : > { %v4379_v28 = vadd.f32 %v9203_v35, %v4378_v60  ;;  %v4436_v32 = vsel %vm757_vm0, %v9266_v56, 0.0  ;;  %v9283_v14 = vadd.f32 %v6813_v24, %v4387_v25 }
 0x815   : > { %v5909_v62 = vpop.f32.mrf.mxu1  ;;  %4437 = vadd.xlane.f32.xlu1 %v4436_v32  ;;  %4440 = vadd.xlane.f32.xlu0 %v4439_v55 }
 0x816   : > { %v9278_v27 = vadd.f32 %v6812_v50, %v4379_v28  ;;  %v4390_v4 = vadd.f32 %v5909_v62, %v9203_v35  ;;  %v4451_v61 = vsel %vm757_vm0, %v9283_v14, 0.0 }
 0x817   : > { %v4381_v17 = vpop.f32.mrf.mxu1 }
 0x818   : > { %v4382_v59 = vadd.f32 %v9203_v35, %v4381_v17  ;;  %v4445_v58 = vsel %vm757_vm0, %v9278_v27, 0.0  ;;  %v9293_v2 = vadd.f32 %v6815_v48, %v4390_v4 }
 0x819   : > { %4443 = vadd.xlane.f32.xlu1 %v4442_v44  ;;  %4446 = vadd.xlane.f32.xlu0 %v4445_v58 }
 0x81a   : > { %v9290_v3 = vadd.f32 %v6814_v36, %v4382_v59  ;;  %v4454_v35 = vsel %vm757_vm0, %v9293_v2, 0.0 }
 0x81c   : > { %v4448_v22 = vsel %vm757_vm0, %v9290_v3, 0.0 }
 0x81d   : > { %4449 = vadd.xlane.f32.xlu1 %v4448_v22  ;;  %4452 = vadd.xlane.f32.xlu0 %v4451_v61 }
 0x821   : > { %4455 = vadd.xlane.f32.xlu1 %v4454_v35 }
 0x87d   : > { %v4411_v16 = vpop.xlane.xlu0 %4410 }
 0x87e   : > { %v4457_v19 = vmul.f32 0.03125, %v4411_v16 }
 0x880   : > { %v9302_v15 = vsub.f32 %v9208_v20, %v4457_v19 }
 0x881   : > { %v4414_v21 = vpop.xlane.xlu1 %4413  ;;  %v4417_v54 = vpop.xlane.xlu0 %4416 }
 0x882   : > { %v4458_v52 = vmul.f32 0.03125, %v4414_v21  ;;  %v4459_v41 = vmul.f32 0.03125, %v4417_v54  ;;  %v4489_v51 = vmul.f32 %v9302_v15, %v9302_v15 }
 0x884   : > { %v9307_v38 = vsub.f32 %v9218_v34, %v4458_v52  ;;  %v9310_v18 = vsub.f32 %v9211_v57, %v4459_v41  ;;  %v4505_v37 = vsel %vm757_vm0, %v4489_v51, 0.0 }
 0x885   : > { %4506 = vadd.xlane.f32.xlu0 %v4505_v37  ;;  %v4420_v23 = vpop.xlane.xlu0 %4419 }
 0x886   : > { %v4460_v10 = vmul.f32 0.03125, %v4420_v23  ;;  %v4490_v63 = vmul.f32 %v9307_v38, %v9307_v38  ;;  %v4491_v43 = vmul.f32 %v9310_v18, %v9310_v18 }
 0x888   : > { %v9318_v53 = vsub.f32 %v9221_v42, %v4460_v10  ;;  %v4508_v29 = vsel %vm757_vm0, %v4490_v63, 0.0  ;;  %v4511_v31 = vsel %vm757_vm0, %v4491_v43, 0.0 }
 0x889   : > { %4509 = vadd.xlane.f32.xlu1 %v4508_v29  ;;  %4512 = vadd.xlane.f32.xlu0 %v4511_v31  ;;  %v4423_v39 = vpop.xlane.xlu0 %4422 }
 0x88a   : > { %v4461_v33 = vmul.f32 0.03125, %v4423_v39  ;;  %v4492_v13 = vmul.f32 %v9318_v53, %v9318_v53 }
 0x88c   : > { %v9325_v47 = vsub.f32 %v9232_v40, %v4461_v33  ;;  %v4514_v9 = vsel %vm757_vm0, %v4492_v13, 0.0 }
 0x88d   : > { %v4426_v12 = vpop.xlane.xlu1 %4425  ;;  %4515 = vadd.xlane.f32.xlu1 %v4514_v9  ;;  %v4429_v8 = vpop.xlane.xlu0 %4428 }
 0x88e   : > { %v4462_v45 = vmul.f32 0.03125, %v4426_v12  ;;  %v4463_v49 = vmul.f32 0.03125, %v4429_v8  ;;  %v4493_v26 = vmul.f32 %v9325_v47, %v9325_v47 }
 0x890   : > { %v9331_v0 = vsub.f32 %v9242_v30, %v4462_v45  ;;  %v9334_v5 = vsub.f32 %v9235_v6, %v4463_v49  ;;  %v4517_v60 = vsel %vm757_vm0, %v4493_v26, 0.0 }
 0x891   : > { %v4432_v25 = vpop.xlane.xlu1 %4431  ;;  %4518 = vadd.xlane.f32.xlu0 %v4517_v60  ;;  %v6438_v60 = vld [vmem:[%s9633_s11 + $0x8] sm:$0xff]  }
 0x892   : > { %v4464_v28 = vmul.f32 0.03125, %v4432_v25  ;;  %v4494_v32 = vmul.f32 %v9331_v0, %v9331_v0  ;;  %v4495_v55 = vmul.f32 %v9334_v5, %v9334_v5  ;;  %5910 = vmatprep.subr.bf16.mxu0 %v6438_v60 }
 0x893   : > { %5911 = vmatpush3.bf16.msra.mxu0 %v6438_v60 }
 0x894   : > { %v9342_v62 = vsub.f32 %v9245_v11, %v4464_v28  ;;  %v4520_v50 = vsel %vm757_vm0, %v4494_v32, 0.0  ;;  %v4523_v17 = vsel %vm757_vm0, %v4495_v55, 0.0 }
 0x895   : > { %4521 = vadd.xlane.f32.xlu1 %v4520_v50  ;;  %4524 = vadd.xlane.f32.xlu0 %v4523_v17 }
 0x896   : > { %v4496_v44 = vmul.f32 %v9342_v62, %v9342_v62 }
 0x898   : > { %v4526_v24 = vsel %vm757_vm0, %v4496_v44, 0.0 }
 0x899   : > { %4527 = vadd.xlane.f32.xlu1 %v4526_v24  ;;  %v6439_v24 = vld [vmem:[%s9633_s11] sm:$0xff]  }
 0x89a   : > { %v4435_v4 = vpop.xlane.xlu0 %4434  ;;  %5912 = vmatprep.subr.bf16.mxu0 %v6439_v24 }
 0x89b   : > { %v4465_v59 = vmul.f32 0.03125, %v4435_v4  ;;  %5913 = vmatpush3.bf16.msra.mxu0 %v6439_v24 }
 0x89d   : > { %v9350_v58 = vsub.f32 %v9256_v1, %v4465_v59 }
 0x89e   : > { %v4438_v36 = vpop.xlane.xlu1 %4437  ;;  %v4441_v48 = vpop.xlane.xlu0 %4440 }
 0x89f   : > { %v4466_v22 = vmul.f32 0.03125, %v4438_v36  ;;  %v4467_v61 = vmul.f32 0.03125, %v4441_v48  ;;  %v4497_v35 = vmul.f32 %v9350_v58, %v9350_v58 }
 0x8a1   : > { %v9355_v16 = vsub.f32 %v9266_v56, %v4466_v22  ;;  %v9358_v19 = vsub.f32 %v9260_v7, %v4467_v61  ;;  %v4529_v21 = vsel %vm757_vm0, %v4497_v35, 0.0 }
 0x8a2   : > { %v4444_v54 = vpop.xlane.xlu1 %4443  ;;  %4530 = vadd.xlane.f32.xlu0 %v4529_v21  ;;  %v4447_v52 = vpop.xlane.xlu0 %4446 }
 0x8a3   : > { %v4468_v41 = vmul.f32 0.03125, %v4444_v54  ;;  %v4469_v51 = vmul.f32 0.03125, %v4447_v52  ;;  %v4498_v37 = vmul.f32 %v9355_v16, %v9355_v16  ;;  %v4499_v23 = vmul.f32 %v9358_v19, %v9358_v19 }
 0x8a5   : > { %v9366_v10 = vsub.f32 %v9269_v46, %v4468_v41  ;;  %v9369_v63 = vsub.f32 %v9278_v27, %v4469_v51  ;;  %v4532_v43 = vsel %vm757_vm0, %v4498_v37, 0.0  ;;  %v4535_v29 = vsel %vm757_vm0, %v4499_v23, 0.0 }
 0x8a6   : > { %v4450_v31 = vpop.xlane.xlu1 %4449  ;;  %4533 = vadd.xlane.f32.xlu1 %v4532_v43  ;;  %4536 = vadd.xlane.f32.xlu0 %v4535_v29  ;;  %v4453_v39 = vpop.xlane.xlu0 %4452 }
 0x8a7   : > { %v4470_v33 = vmul.f32 0.03125, %v4450_v31  ;;  %v4471_v13 = vmul.f32 0.03125, %v4453_v39  ;;  %v4500_v9 = vmul.f32 %v9366_v10, %v9366_v10  ;;  %v4501_v12 = vmul.f32 %v9369_v63, %v9369_v63 }
 0x8a9   : > { %v9378_v8 = vsub.f32 %v9290_v3, %v4470_v33  ;;  %v9381_v45 = vsub.f32 %v9283_v14, %v4471_v13  ;;  %v4538_v49 = vsel %vm757_vm0, %v4500_v9, 0.0  ;;  %v4541_v26 = vsel %vm757_vm0, %v4501_v12, 0.0 }
 0x8aa   : > { %v4456_v25 = vpop.xlane.xlu1 %4455  ;;  %4539 = vadd.xlane.f32.xlu1 %v4538_v49  ;;  %4542 = vadd.xlane.f32.xlu0 %v4541_v26 }
 0x8ab   : > { %v4472_v28 = vmul.f32 0.03125, %v4456_v25  ;;  %v4502_v32 = vmul.f32 %v9378_v8, %v9378_v8  ;;  %v4503_v55 = vmul.f32 %v9381_v45, %v9381_v45  ;;  %v9407_v25 = vld [vmem:[%s9631_s9] ss:$0 sm:$0xff] }
 0x8ad   : > { %v9393_v50 = vsub.f32 %v9293_v2, %v4472_v28  ;;  %v4544_v17 = vsel %vm757_vm0, %v4502_v32, 0.0  ;;  %v4547_v44 = vsel %vm757_vm0, %v4503_v55, 0.0 }
 0x8ae   : > { %4545 = vadd.xlane.f32.xlu1 %v4544_v17  ;;  %4548 = vadd.xlane.f32.xlu0 %v4547_v44 }
 0x8af   : > { %v4504_v4 = vmul.f32 %v9393_v50, %v9393_v50 }
 0x8b1   : > { %v4550_v59 = vsel %vm757_vm0, %v4504_v4, 0.0 }
 0x8b2   : > { %4551 = vadd.xlane.f32.xlu1 %v4550_v59 }
 0x90e   : > { %v4507_v36 = vpop.xlane.xlu0 %4506 }
 0x90f   : > { %v4553_v48 = vmul.f32 0.03125, %v4507_v36 }
 0x911   : > { %v4569_v22 = vadd.f32 1e-05, %v4553_v48 }
 0x912   : > { %v4510_v61 = vpop.xlane.xlu1 %4509  ;;  %v4513_v35 = vpop.xlane.xlu0 %4512 }
 0x913   : > { %6736 = vrsqrt.f32 %v4569_v22  ;;  %v4554_v21 = vmul.f32 0.03125, %v4510_v61  ;;  %v4555_v54 = vmul.f32 0.03125, %v4513_v35 }
 0x915   : > { %v4570_v52 = vadd.f32 1e-05, %v4554_v21  ;;  %v4571_v41 = vadd.f32 1e-05, %v4555_v54 }
 0x916   : > { %v4516_v51 = vpop.xlane.xlu1 %4515 }
 0x917   : > { %6738 = vrsqrt.f32 %v4570_v52  ;;  %v4556_v37 = vmul.f32 0.03125, %v4516_v51 }
 0x918   : > { %6740 = vrsqrt.f32 %v4571_v41 }
 0x919   : > { %v4572_v23 = vadd.f32 1e-05, %v4556_v37 }
 0x91a   : > { %v4519_v43 = vpop.xlane.xlu0 %4518 }
 0x91b   : > { %6742 = vrsqrt.f32 %v4572_v23  ;;  %v4557_v29 = vmul.f32 0.03125, %v4519_v43 }
 0x91d   : > { %v4573_v31 = vadd.f32 1e-05, %v4557_v29 }
 0x91e   : > { %v4522_v39 = vpop.xlane.xlu1 %4521  ;;  %v4525_v33 = vpop.xlane.xlu0 %4524 }
 0x91f   : > { %6744 = vrsqrt.f32 %v4573_v31  ;;  %v4558_v13 = vmul.f32 0.03125, %v4522_v39  ;;  %v4559_v9 = vmul.f32 0.03125, %v4525_v33 }
 0x920   : > { %v6737_v12 = vpop.eup %6736 }
 0x921   : > { %v4574_v49 = vadd.f32 1e-05, %v4558_v13  ;;  %v4575_v26 = vadd.f32 1e-05, %v4559_v9  ;;  %v4601_v60 = vmul.f32 %v6737_v12, %v9302_v15  ;;  %v9415_v15 = vld [vmem:[%s9632_s10] ss:$0 sm:$0xff] }
 0x922   : > { %v4528_v28 = vpop.xlane.xlu1 %4527 }
 0x923   : > { %6746 = vrsqrt.f32 %v4574_v49  ;;  %v4560_v32 = vmul.f32 0.03125, %v4528_v28  ;;  %v4624_v4 = vmul.f32 %v9407_v25, %v4601_v60 }
 0x924   : > { %v6739_v55 = vpop.eup %6738  ;;  %6748 = vrsqrt.f32 %v4575_v26 }
 0x925   : > { %v6741_v17 = vpop.eup %6740  ;;  %v4576_v44 = vadd.f32 1e-05, %v4560_v32  ;;  %v4602_v24 = vmul.f32 %v6739_v55, %v9307_v38  ;;  %v4647_v35 = vadd.f32 %v9415_v15, %v4624_v4 }
 0x926   : > { %v4603_v59 = vmul.f32 %v6741_v17, %v9310_v18 }
 0x927   : > { %6750 = vrsqrt.f32 %v4576_v44  ;;  %v4625_v36 = vmul.f32 %v9407_v25, %v4602_v24 }
 0x928   : > { %v6743_v48 = vpop.eup %6742  ;;  %v4626_v22 = vmul.f32 %v9407_v25, %v4603_v59 }
 0x929   : > { %v4604_v61 = vmul.f32 %v6743_v48, %v9318_v53  ;;  %v4648_v38 = vadd.f32 %v9415_v15, %v4625_v36 }
 0x92a   : > { %v4649_v51 = vadd.f32 %v9415_v15, %v4626_v22 }
 0x92b   : > { %v4627_v21 = vmul.f32 %v9407_v25, %v4604_v61  ;;  %v4531_v18 = vpop.xlane.xlu0 %4530  ;;  %v4663_v54 = vpack.c.bf16 %v4648_v38, %v4647_v35 }
 0x92c   : > { %v6745_v52 = vpop.eup %6744  ;;  %v4561_v41 = vmul.f32 0.03125, %v4531_v18 }
 0x92d   : > { %5914 = vmatprep.mubr.msk.bf16.mxu0 %vm757_vm0, %v4663_v54  ;;  %v4650_v37 = vadd.f32 %v9415_v15, %v4627_v21  ;;  %v4605_v23 = vmul.f32 %v6745_v52, %v9325_v47 }
 0x92e   : > { %v4577_v43 = vadd.f32 1e-05, %v4561_v41 }
 0x92f   : > { %v4534_v53 = vpop.xlane.xlu1 %4533  ;;  %v4537_v29 = vpop.xlane.xlu0 %4536  ;;  %v4664_v31 = vpack.c.bf16 %v4650_v37, %v4649_v51  ;;  %v4628_v9 = vmul.f32 %v9407_v25, %v4605_v23 }
 0x930   : > { %v6747_v39 = vpop.eup %6746  ;;  %6752 = vrsqrt.f32 %v4577_v43  ;;  %v4562_v33 = vmul.f32 0.03125, %v4534_v53  ;;  %v4563_v13 = vmul.f32 0.03125, %v4537_v29 }
 0x931   : > { %v6749_v12 = vpop.eup %6748  ;;  %5915 = vmatmul.mubr.msk.bf16.vlgmr.msra.gmra.mxu0 %vm757_vm0, %v4664_v31  ;;  %v4606_v49 = vmul.f32 %v6747_v39, %v9331_v0  ;;  %v4651_v4 = vadd.f32 %v9415_v15, %v4628_v9 }
 0x932   : > { %v4578_v26 = vadd.f32 1e-05, %v4562_v33  ;;  %v4579_v60 = vadd.f32 1e-05, %v4563_v13  ;;  %v4607_v28 = vmul.f32 %v6749_v12, %v9334_v5 }
 0x933   : > { %v4540_v47 = vpop.xlane.xlu1 %4539  ;;  %v4543_v32 = vpop.xlane.xlu0 %4542  ;;  %v4629_v55 = vmul.f32 %v9407_v25, %v4606_v49 }
 0x934   : > { %v6751_v17 = vpop.eup %6750  ;;  %6754 = vrsqrt.f32 %v4578_v26  ;;  %v4564_v44 = vmul.f32 0.03125, %v4540_v47  ;;  %v4565_v24 = vmul.f32 0.03125, %v4543_v32  ;;  %v4630_v0 = vmul.f32 %v9407_v25, %v4607_v28 }
 0x935   : > { %6756 = vrsqrt.f32 %v4579_v60  ;;  %v4652_v59 = vadd.f32 %v9415_v15, %v4629_v55  ;;  %v4608_v36 = vmul.f32 %v6751_v17, %v9342_v62 }
 0x936   : > { %v4580_v48 = vadd.f32 1e-05, %v4564_v44  ;;  %v4581_v22 = vadd.f32 1e-05, %v4565_v24  ;;  %v4653_v54 = vadd.f32 %v9415_v15, %v4630_v0 }
 0x937   : > { %v4546_v5 = vpop.xlane.xlu1 %4545  ;;  %v4549_v61 = vpop.xlane.xlu0 %4548  ;;  %v4665_v35 = vpack.c.bf16 %v4652_v59, %v4651_v4  ;;  %v4631_v38 = vmul.f32 %v9407_v25, %v4608_v36 }
 0x938   : > { %6758 = vrsqrt.f32 %v4580_v48  ;;  %v4566_v21 = vmul.f32 0.03125, %v4546_v5  ;;  %v4567_v18 = vmul.f32 0.03125, %v4549_v61 }
 0x939   : > { %6760 = vrsqrt.f32 %v4581_v22  ;;  %5918 = vmatprep.mubr.msk.bf16.mxu0 %vm757_vm0, %v4665_v35  ;;  %v4654_v52 = vadd.f32 %v9415_v15, %v4631_v38 }
 0x93a   : > { %v4582_v62 = vadd.f32 1e-05, %v4566_v21  ;;  %v4583_v41 = vadd.f32 1e-05, %v4567_v18  ;;  %v6440_v18 = vld [vmem:[%s9814_s23 + $0x38] sm:$0xff]   ;;  %s9819_s23 = sld [smem:[#allocation6_spill]] (%p7057_p10) }
 0x93b   : > { %v4552_v51 = vpop.xlane.xlu1 %4551  ;;  %v4666_v37 = vpack.c.bf16 %v4654_v52, %v4653_v54  ;;  %5930 = vmatprep.subr.bf16.mxu1 %v6440_v18  ;;  %v6444_v54 = vld [vmem:[%s9815_s28 + $0x18] sm:$0xff]   ;;  %v6445_v52 = vld [vmem:[%s9815_s28 + $0x10] sm:$0xff]  }
 0x93c   : > { %6762 = vrsqrt.f32 %v4582_v62  ;;  %v4568_v23 = vmul.f32 0.03125, %v4552_v51  ;;  %5931 = vmatpush3.bf16.msra.mxu1 %v6440_v18  ;;  %v6446_v62 = vld [vmem:[%s9815_s28 + $0x8] sm:$0xff]   ;;  %v9496_v51 = vld [vmem:[%s9816_s29] ss:$0 sm:$0xff] }
 0x93d   : > { %v6753_v43 = vpop.eup %6752  ;;  %6764 = vrsqrt.f32 %v4583_v41  ;;  %5919 = vmatmul.mubr.msk.bf16.gmra.mxu0 %vm757_vm0, %v4666_v37  ;;  %v6447_v41 = vld [vmem:[%s9815_s28] sm:$0xff]  }
 0x93e   : > { %v4584_v53 = vadd.f32 1e-05, %v4568_v23  ;;  %v4609_v29 = vmul.f32 %v6753_v43, %v9350_v58 }
 0x940   : > { %6766 = vrsqrt.f32 %v4584_v53  ;;  %v4632_v13 = vmul.f32 %v9407_v25, %v4609_v29  ;;  %s5435_s20 = sshll.u32 (%p7057_p10), %s9819_s23, 5 }
 0x941   : > { %v6755_v31 = vpop.eup %6754  ;;  %s5114_s30 = sadd.s32 (%p7057_p10), %s9820_s16, %s5435_s20 }
 0x942   : > { %v6757_v39 = vpop.eup %6756  ;;  %v4610_v33 = vmul.f32 %v6755_v31, %v9355_v16  ;;  %v4655_v60 = vadd.f32 %v9415_v15, %v4632_v13  ;;  %s5436_s17 = sshll.u32 (%p7057_p10), %s5114_s30, 3 }
 0x943   : > { %v4611_v9 = vmul.f32 %v6757_v39, %v9358_v19  ;;  %s5116_s14 = scalar_lea.vmem (%p7057_p10), %s9821_s12, %s5436_s17 }
 0x944   : > { %v4633_v12 = vmul.f32 %v9407_v25, %v4610_v33 }
 0x945   : > { %v6759_v49 = vpop.eup %6758  ;;  %v4634_v58 = vmul.f32 %v9407_v25, %v4611_v9 }
 0x946   : > { %v6761_v26 = vpop.eup %6760  ;;  %v4656_v28 = vadd.f32 %v9415_v15, %v4633_v12  ;;  %v4612_v47 = vmul.f32 %v6759_v49, %v9366_v10 }
 0x947   : > { %v4613_v32 = vmul.f32 %v6761_v26, %v9369_v63  ;;  %v4657_v19 = vadd.f32 %v9415_v15, %v4634_v58 }
 0x948   : > { %v4667_v55 = vpack.c.bf16 %v4656_v28, %v4655_v60  ;;  %v4635_v16 = vmul.f32 %v9407_v25, %v4612_v47 }
 0x949   : > { %v6763_v17 = vpop.eup %6762  ;;  %v4636_v59 = vmul.f32 %v9407_v25, %v4613_v32 }
 0x94a   : > { %v6765_v44 = vpop.eup %6764  ;;  %5922 = vmatprep.mubr.msk.bf16.mxu0 %vm757_vm0, %v4667_v55  ;;  %v4658_v24 = vadd.f32 %v9415_v15, %v4635_v16  ;;  %v4614_v4 = vmul.f32 %v6763_v17, %v9378_v8 }
 0x94b   : > { %v4615_v10 = vmul.f32 %v6765_v44, %v9381_v45  ;;  %v4659_v48 = vadd.f32 %v9415_v15, %v4636_v59 }
 0x94c   : > { %v4668_v36 = vpack.c.bf16 %v4658_v24, %v4657_v19  ;;  %v4637_v63 = vmul.f32 %v9407_v25, %v4614_v4 }
 0x94d   : > { %v6767_v0 = vpop.eup %6766  ;;  %v4638_v61 = vmul.f32 %v9407_v25, %v4615_v10 }
 0x94e   : > { %5923 = vmatmul.mubr.msk.bf16.gmra.mxu0 %vm757_vm0, %v4668_v36  ;;  %v4660_v22 = vadd.f32 %v9415_v15, %v4637_v63  ;;  %v4616_v5 = vmul.f32 %v6767_v0, %v9393_v50  ;;  %v6441_v50 = vld [vmem:[%s9815_s28 + $0x30] sm:$0xff]  }
 0x94f   : > { %v4661_v45 = vadd.f32 %v9415_v15, %v4638_v61  ;;  %5932 = vmatprep.subr.bf16.mxu1 %v6441_v50 }
 0x950   : > { %v4669_v35 = vpack.c.bf16 %v4660_v22, %v4659_v48  ;;  %v4639_v8 = vmul.f32 %v9407_v25, %v4616_v5  ;;  %5933 = vmatpush3.bf16.msra.mxu1 %v6441_v50  ;;  %v6442_v25 = vld [vmem:[%s9815_s28 + $0x28] sm:$0xff]  }
 0x951   : > { %5934 = vmatprep.subr.bf16.mxu1 %v6442_v25 }
 0x952   : > { %5926 = vmatprep.mubr.msk.bf16.mxu0 %vm757_vm0, %v4669_v35  ;;  %v4662_v38 = vadd.f32 %v9415_v15, %v4639_v8  ;;  %v6443_v15 = vld [vmem:[%s9815_s28 + $0x20] sm:$0xff]  }
 0x954   : > { %v4670_v21 = vpack.c.bf16 %v4662_v38, %v4661_v45  ;;  %5935 = vmatpush3.bf16.msra.mxu1 %v6442_v25 }
 0x955   : > { %5936 = vmatprep.subr.bf16.mxu1 %v6443_v15 }
 0x956   : > { %5927 = vmatmul.mubr.msk.bf16.gmra.mxu0 %vm757_vm0, %v4670_v21 }
 0x958   : > { %5937 = vmatpush3.bf16.msra.mxu1 %v6443_v15 }
 0x959   : > { %5938 = vmatprep.subr.bf16.mxu1 %v6444_v54 }
 0x95c   : > { %5939 = vmatpush3.bf16.msra.mxu1 %v6444_v54 }
 0x95d   : > { %5940 = vmatprep.subr.bf16.mxu1 %v6445_v52 }
 0x960   : > { %5941 = vmatpush3.bf16.msra.mxu1 %v6445_v52 }
 0x961   : > { %5942 = vmatprep.subr.bf16.mxu1 %v6446_v62 }
 0x964   : > { %5943 = vmatpush3.bf16.msra.mxu1 %v6446_v62 }
 0x965   : > { %5944 = vmatprep.subr.bf16.mxu1 %v6447_v41 }
 0x968   : > { %5945 = vmatpush3.bf16.msra.mxu1 %v6447_v41 }
 0x9f1   : > { %v5916_v37 = vpop.f32.mrf.mxu0 }
 0x9f2   : > { %v4761_v23 = vadd.f32 %v5916_v37, %v9496_v51 }
 0x9f3   : > { %v4752_v43 = vpop.f32.mrf.mxu0 }
 0x9f4   : > { %v4753_v53 = vadd.f32 %v9496_v51, %v4752_v43  ;;  %v4833_v29 = vmul.f32 0.70710677, %v4761_v23  ;;  %v4817_v8 = vmul.f32 0.5, %v4761_v23 }
 0x9f5   : > { %v5917_v31 = vpop.f32.mrf.mxu0 }
 0x9f6   : > { %v4831_v39 = vmul.f32 0.70710677, %v4753_v53  ;;  %v4764_v33 = vadd.f32 %v5917_v31, %v9496_v51  ;;  %v4815_v5 = vmul.f32 0.5, %v4753_v53 }
 0x9f7   : > { %v4755_v13 = vpop.f32.mrf.mxu0 }
 0x9f8   : > { %6768 = verf.f32 %v4831_v39  ;;  %v4834_v9 = vmul.f32 0.70710677, %v4764_v33  ;;  %v4756_v12 = vadd.f32 %v9496_v51, %v4755_v13  ;;  %v4818_v22 = vmul.f32 0.5, %v4764_v33 }
 0x9f9   : > { %6770 = verf.f32 %v4833_v29 }
 0x9fa   : > { %6772 = verf.f32 %v4834_v9  ;;  %v4832_v49 = vmul.f32 0.70710677, %v4756_v12  ;;  %v4816_v61 = vmul.f32 0.5, %v4756_v12 }
 0x9fc   : > { %6774 = verf.f32 %v4832_v49 }
 0x9fd   : > { %v5920_v26 = vpop.f32.mrf.mxu0 }
 0x9fe   : > { %v4777_v60 = vadd.f32 %v5920_v26, %v9496_v51 }
 0x9ff   : > { %v4768_v28 = vpop.f32.mrf.mxu0 }
 0xa00   : > { %v4837_v47 = vmul.f32 0.70710677, %v4777_v60  ;;  %v4769_v58 = vadd.f32 %v9496_v51, %v4768_v28 }
 0xa01   : > { %v5921_v32 = vpop.f32.mrf.mxu0 }
 0xa02   : > { %v4835_v55 = vmul.f32 0.70710677, %v4769_v58  ;;  %v4780_v16 = vadd.f32 %v5921_v32, %v9496_v51  ;;  %6776 = verf.f32 %v4837_v47  ;;  %v4819_v28 = vmul.f32 0.5, %v4769_v58 }
 0xa03   : > { %v4771_v17 = vpop.f32.mrf.mxu0 }
 0xa04   : > { %v4838_v44 = vmul.f32 0.70710677, %v4780_v16  ;;  %6778 = verf.f32 %v4835_v55  ;;  %v4772_v24 = vadd.f32 %v9496_v51, %v4771_v17  ;;  %v4822_v47 = vmul.f32 0.5, %v4780_v16 }
 0xa05   : > { %v6769_v19 = vpop.eup %6768 }
 0xa06   : > { %v6771_v4 = vpop.eup %6770  ;;  %6780 = verf.f32 %v4838_v44  ;;  %v4836_v10 = vmul.f32 0.70710677, %v4772_v24  ;;  %v4863_v36 = vadd.f32 1.0, %v6769_v19  ;;  %v4820_v55 = vmul.f32 0.5, %v4772_v24 }
 0xa07   : > { %v6773_v59 = vpop.eup %6772  ;;  %v4865_v48 = vadd.f32 1.0, %v6771_v4  ;;  %v4821_v19 = vmul.f32 0.5, %v4777_v60 }
 0xa08   : > { %v4866_v63 = vadd.f32 1.0, %v6773_v59  ;;  %6782 = verf.f32 %v4836_v10  ;;  %v4879_v38 = vmul.f32 %v4863_v36, %v4815_v5 }
 0xa09   : > { %v6775_v0 = vpop.eup %6774  ;;  %v4881_v18 = vmul.f32 %v4865_v48, %v4817_v8 }
 0xa0a   : > { %v4864_v35 = vadd.f32 1.0, %v6775_v0  ;;  %v4882_v45 = vmul.f32 %v4866_v63, %v4818_v22 }
 0xa0c   : > { %v4880_v21 = vmul.f32 %v4864_v35, %v4816_v61  ;;  %v4896_v15 = vpack.c.bf16 %v4882_v45, %v4881_v18 }
 0xa0e   : > { %v5924_v50 = vpop.f32.mrf.mxu0  ;;  %v4895_v25 = vpack.c.bf16 %v4880_v21, %v4879_v38 }
 0xa0f   : > { %v9507_v54 = vadd.f32 %v5924_v50, %v9496_v51  ;;  %v6777_v62 = vpop.eup %6776 }
 0xa10   : > { %v4784_v52 = vpop.f32.mrf.mxu0  ;;  %5946 = vmatprep.mubr.bf16.mxu1 %v4895_v25  ;;  %v4869_v26 = vadd.f32 1.0, %v6777_v62 }
 0xa11   : > { %v4785_v41 = vadd.f32 %v9496_v51, %v4784_v52  ;;  %5947 = vmatmul.mubr.bf16.vlgmr.msra.gmra.mxu1 %v4896_v15  ;;  %v6779_v37 = vpop.eup %6778  ;;  %v4841_v43 = vmul.f32 0.70710677, %v9507_v54 }
 0xa12   : > { %v5925_v23 = vpop.f32.mrf.mxu0  ;;  %v4867_v13 = vadd.f32 1.0, %v6779_v37  ;;  %v4885_v48 = vmul.f32 %v4869_v26, %v4821_v19 }
 0xa13   : > { %v6781_v53 = vpop.eup %6780  ;;  %v4839_v29 = vmul.f32 0.70710677, %v4785_v41  ;;  %v4796_v31 = vadd.f32 %v5925_v23, %v9496_v51  ;;  %v4823_v37 = vmul.f32 0.5, %v4785_v41 }
 0xa14   : > { %v4870_v39 = vadd.f32 1.0, %v6781_v53  ;;  %v4787_v33 = vpop.f32.mrf.mxu0  ;;  %v4883_v36 = vmul.f32 %v4867_v13, %v4819_v28  ;;  %v4825_v53 = vmul.f32 0.5, %v9507_v54 }
 0xa15   : > { %6784 = verf.f32 %v4839_v29  ;;  %v4842_v9 = vmul.f32 0.70710677, %v4796_v31  ;;  %v4788_v12 = vadd.f32 %v9496_v51, %v4787_v33  ;;  %v6783_v49 = vpop.eup %6782  ;;  %v4826_v62 = vmul.f32 0.5, %v4796_v31 }
 0xa16   : > { %6786 = verf.f32 %v4841_v43  ;;  %v5928_v32 = vpop.f32.mrf.mxu0  ;;  %v4868_v17 = vadd.f32 1.0, %v6783_v49  ;;  %v4886_v4 = vmul.f32 %v4870_v39, %v4822_v47 }
 0xa17   : > { %6788 = verf.f32 %v4842_v9  ;;  %v4840_v44 = vmul.f32 0.70710677, %v4788_v12  ;;  %v4809_v59 = vadd.f32 %v5928_v32, %v9496_v51  ;;  %v4824_v43 = vmul.f32 0.5, %v4788_v12 }
 0xa18   : > { %v4800_v10 = vpop.f32.mrf.mxu0  ;;  %v4884_v63 = vmul.f32 %v4868_v17, %v4820_v55  ;;  %v4898_v35 = vpack.c.bf16 %v4886_v4, %v4885_v48 }
 0xa19   : > { %6790 = verf.f32 %v4840_v44  ;;  %v4801_v0 = vadd.f32 %v9496_v51, %v4800_v10  ;;  %v4845_v22 = vmul.f32 0.70710677, %v4809_v59  ;;  %v4829_v54 = vmul.f32 0.5, %v4809_v59 }
 0xa1a   : > { %v5929_v58 = vpop.f32.mrf.mxu0  ;;  %v4897_v24 = vpack.c.bf16 %v4884_v63, %v4883_v36 }
 0xa1b   : > { %v4843_v16 = vmul.f32 0.70710677, %v4801_v0  ;;  %v4812_v5 = vadd.f32 %v5929_v58, %v9496_v51  ;;  %v4827_v41 = vmul.f32 0.5, %v4801_v0 }
 0xa1c   : > { %v4803_v61 = vpop.f32.mrf.mxu0  ;;  %5950 = vmatprep.mubr.bf16.mxu1 %v4897_v24 }
 0xa1d   : > { %6792 = verf.f32 %v4843_v16  ;;  %v4846_v60 = vmul.f32 0.70710677, %v4812_v5  ;;  %v4804_v8 = vadd.f32 %v9496_v51, %v4803_v61  ;;  %5951 = vmatmul.mubr.bf16.gmra.mxu1 %v4898_v35  ;;  %v4830_v31 = vmul.f32 0.5, %v4812_v5 }
 0xa1e   : > { %6794 = verf.f32 %v4845_v22  ;;  %v5425_v22 = vld [vmem:[%s9817_s15] ss:$0 sm:$0xff] }
 0xa1f   : > { %6796 = verf.f32 %v4846_v60  ;;  %v4844_v45 = vmul.f32 0.70710677, %v4804_v8  ;;  %v4828_v12 = vmul.f32 0.5, %v4804_v8 }
 0xa21   : > { %6798 = verf.f32 %v4844_v45 }
 0xa22   : > { %v6785_v38 = vpop.eup %6784 }
 0xa23   : > { %v6787_v21 = vpop.eup %6786  ;;  %v4871_v50 = vadd.f32 1.0, %v6785_v38 }
 0xa24   : > { %v6789_v18 = vpop.eup %6788  ;;  %v4873_v52 = vadd.f32 1.0, %v6787_v21 }
 0xa25   : > { %v4874_v25 = vadd.f32 1.0, %v6789_v18  ;;  %v4887_v29 = vmul.f32 %v4871_v50, %v4823_v37 }
 0xa26   : > { %v6791_v15 = vpop.eup %6790  ;;  %v4889_v13 = vmul.f32 %v4873_v52, %v4825_v53 }
 0xa27   : > { %v4872_v23 = vadd.f32 1.0, %v6791_v15  ;;  %v4890_v51 = vmul.f32 %v4874_v25, %v4826_v62 }
 0xa29   : > { %v4888_v39 = vmul.f32 %v4872_v23, %v4824_v43  ;;  %v4900_v28 = vpack.c.bf16 %v4890_v51, %v4889_v13 }
 0xa2a   : > { %v6793_v33 = vpop.eup %6792 }
 0xa2b   : > { %v6795_v9 = vpop.eup %6794  ;;  %v4899_v49 = vpack.c.bf16 %v4888_v39, %v4887_v29  ;;  %v4875_v47 = vadd.f32 1.0, %v6793_v33 }
 0xa2c   : > { %v6797_v26 = vpop.eup %6796  ;;  %v4877_v17 = vadd.f32 1.0, %v6795_v9 }
 0xa2d   : > { %v4878_v32 = vadd.f32 1.0, %v6797_v26  ;;  %5954 = vmatprep.mubr.bf16.mxu1 %v4899_v49  ;;  %v4891_v4 = vmul.f32 %v4875_v47, %v4827_v41 }
 0xa2e   : > { %v6799_v55 = vpop.eup %6798  ;;  %5955 = vmatmul.mubr.bf16.gmra.mxu1 %v4900_v28  ;;  %v4893_v36 = vmul.f32 %v4877_v17, %v4829_v54 }
 0xa2f   : > { %v4876_v44 = vadd.f32 1.0, %v6799_v55  ;;  %v4894_v19 = vmul.f32 %v4878_v32, %v4830_v31 }
 0xa31   : > { %v4892_v10 = vmul.f32 %v4876_v44, %v4828_v12  ;;  %v4902_v48 = vpack.c.bf16 %v4894_v19, %v4893_v36 }
 0xa33   : > { %v4901_v63 = vpack.c.bf16 %v4892_v10, %v4891_v4 }
 0xa35   : > { %5958 = vmatprep.mubr.bf16.mxu1 %v4901_v63 }
 0xa36   : > { %5959 = vmatmul.mubr.bf16.gmra.mxu1 %v4902_v48 }
 0xad1   : > { %v5948_v58 = vpop.f32.mrf.mxu1 }
 0xad2   : > { %v5017_v16 = vadd.f32 %v5948_v58, %v5425_v22 }
 0xad3   : > { %v5008_v5 = vpop.f32.mrf.mxu1 }
 0xad4   : > { %v5073_v0 = vadd.f32 %v5017_v16, %v9211_v57  ;;  %v5009_v24 = vadd.f32 %v5425_v22, %v5008_v5 }
 0xad5   : > { %v5949_v59 = vpop.f32.mrf.mxu1 }
 0xad6   : > { %5089 = vst.msk [vmem:[%s9523_s18 + $0x10] sm:$0xff] %vm757_vm0, %v5073_v0  ;;  %v5071_v61 = vadd.f32 %v5009_v24, %v9208_v20  ;;  %v5020_v35 = vadd.f32 %v5949_v59, %v5425_v22 }
 0xad7   : > { %v5011_v60 = vpop.f32.mrf.mxu1 }
 0xad8   : > { %5087 = vst.msk [vmem:[%s9523_s18] sm:$0xff] %vm757_vm0, %v5071_v61  ;;  %v5074_v57 = vadd.f32 %v5020_v35, %v9221_v42  ;;  %v5012_v8 = vadd.f32 %v5425_v22, %v5011_v60 }
 0xada   : > { %5090 = vst.msk [vmem:[%s9523_s18 + $0x18] sm:$0xff] %vm757_vm0, %v5074_v57  ;;  %v5072_v45 = vadd.f32 %v5012_v8, %v9218_v34 }
 0xadc   : > { %5088 = vst.msk [vmem:[%s9523_s18 + $0x8] sm:$0xff] %vm757_vm0, %v5072_v45 }
 0xadd   : > { %v5952_v38 = vpop.f32.mrf.mxu1 }
 0xade   : > { %v5033_v21 = vadd.f32 %v5952_v38, %v5425_v22 }
 0xadf   : > { %v5024_v18 = vpop.f32.mrf.mxu1 }
 0xae0   : > { %v5077_v20 = vadd.f32 %v5033_v21, %v9235_v6  ;;  %v5025_v50 = vadd.f32 %v5425_v22, %v5024_v18 }
 0xae1   : > { %v5953_v25 = vpop.f32.mrf.mxu1 }
 0xae2   : > { %5093 = vst.msk [vmem:[%s9523_s18 + $0x30] sm:$0xff] %vm757_vm0, %v5077_v20  ;;  %v5075_v42 = vadd.f32 %v5025_v50, %v9232_v40  ;;  %v5036_v15 = vadd.f32 %v5953_v25, %v5425_v22 }
 0xae3   : > { %v5027_v52 = vpop.f32.mrf.mxu1 }
 0xae4   : > { %5091 = vst.msk [vmem:[%s9523_s18 + $0x20] sm:$0xff] %vm757_vm0, %v5075_v42  ;;  %v5078_v34 = vadd.f32 %v5036_v15, %v9245_v11  ;;  %v5028_v62 = vadd.f32 %v5425_v22, %v5027_v52 }
 0xae6   : > { %5094 = vst.msk [vmem:[%s9523_s18 + $0x38] sm:$0xff] %vm757_vm0, %v5078_v34  ;;  %v5076_v37 = vadd.f32 %v5028_v62, %v9242_v30 }
 0xae8   : > { %5092 = vst.msk [vmem:[%s9523_s18 + $0x28] sm:$0xff] %vm757_vm0, %v5076_v37 }
 0xae9   : > { %v5187_v12 = vld [vmem:[%s9523_s18 + $0x30] sm:$0xff] (%p7057_p10) }
 0xaea   : > { %5188 = vst [vmem:[%s5116_s14 + $0x60] sm:$0xff] (%p7057_p10), %v5187_v12 }
 0xaeb   : > { %v5183_v31 = vld [vmem:[%s9523_s18 + $0x20] sm:$0xff] (%p7057_p10) }
 0xaec   : > { %5184 = vst [vmem:[%s5116_s14 + $0x40] sm:$0xff] (%p7057_p10), %v5183_v31 }
 0xaed   : > { %v5189_v44 = vld [vmem:[%s9523_s18 + $0x38] sm:$0xff] (%p7057_p10) }
 0xaee   : > { %v5956_v6 = vpop.f32.mrf.mxu1  ;;  %5190 = vst [vmem:[%s5116_s14 + $0x70] sm:$0xff] (%p7057_p10), %v5189_v44 }
 0xaef   : > { %v5049_v43 = vadd.f32 %v5956_v6, %v5425_v22  ;;  %v5185_v41 = vld [vmem:[%s9523_s18 + $0x28] sm:$0xff] (%p7057_p10) }
 0xaf0   : > { %v5040_v23 = vpop.f32.mrf.mxu1  ;;  %5186 = vst [vmem:[%s5116_s14 + $0x50] sm:$0xff] (%p7057_p10), %v5185_v41 }
 0xaf1   : > { %v5081_v40 = vadd.f32 %v5049_v43, %v9260_v7  ;;  %v5041_v53 = vadd.f32 %v5425_v22, %v5040_v23 }
 0xaf2   : > { %v5957_v51 = vpop.f32.mrf.mxu1 }
 0xaf3   : > { %5097 = vst.msk [vmem:[%s9523_s18 + $0x50] sm:$0xff] %vm757_vm0, %v5081_v40  ;;  %v5079_v11 = vadd.f32 %v5041_v53, %v9256_v1  ;;  %v5052_v29 = vadd.f32 %v5957_v51, %v5425_v22 }
 0xaf4   : > { %v5043_v39 = vpop.f32.mrf.mxu1 }
 0xaf5   : > { %5095 = vst.msk [vmem:[%s9523_s18 + $0x40] sm:$0xff] %vm757_vm0, %v5079_v11  ;;  %v5082_v30 = vadd.f32 %v5052_v29, %v9269_v46  ;;  %v5044_v33 = vadd.f32 %v5425_v22, %v5043_v39 }
 0xaf6   : > { %v5960_v13 = vpop.f32.mrf.mxu1 }
 0xaf7   : > { %5098 = vst.msk [vmem:[%s9523_s18 + $0x58] sm:$0xff] %vm757_vm0, %v5082_v30  ;;  %v5080_v7 = vadd.f32 %v5044_v33, %v9266_v56  ;;  %v5065_v9 = vadd.f32 %v5960_v13, %v5425_v22 }
 0xaf8   : > { %v5056_v49 = vpop.f32.mrf.mxu1 }
 0xaf9   : > { %5096 = vst.msk [vmem:[%s9523_s18 + $0x48] sm:$0xff] %vm757_vm0, %v5080_v7  ;;  %v5085_v1 = vadd.f32 %v5065_v9, %v9283_v14  ;;  %v5057_v26 = vadd.f32 %v5425_v22, %v5056_v49  ;;  %v5177_v14 = vld [vmem:[%s9523_s18 + $0x8] sm:$0xff] (%p7057_p10) }
 0xafa   : > { %v5961_v28 = vpop.f32.mrf.mxu1  ;;  %v5195_v4 = vld [vmem:[%s9523_s18 + $0x50] sm:$0xff] (%p7057_p10)  ;;  %5178 = vst [vmem:[%s5116_s14 + $0x10] sm:$0xff] (%p7057_p10), %v5177_v14 }
 0xafb   : > { %5101 = vst.msk [vmem:[%s9523_s18 + $0x70] sm:$0xff] %vm757_vm0, %v5085_v1  ;;  %v5083_v46 = vadd.f32 %v5057_v26, %v9278_v27  ;;  %v5068_v47 = vadd.f32 %v5961_v28, %v5425_v22  ;;  %v5175_v27 = vld [vmem:[%s9523_s18] sm:$0xff] (%p7057_p10)  ;;  %5196 = vst [vmem:[%s5116_s14 + $0xa0] sm:$0xff] (%p7057_p10), %v5195_v4 }
 0xafc   : > { %v5059_v32 = vpop.f32.mrf.mxu1  ;;  %v5191_v54 = vld [vmem:[%s9523_s18 + $0x40] sm:$0xff] (%p7057_p10)  ;;  %5176 = vst [vmem:[%s5116_s14] sm:$0xff] (%p7057_p10), %v5175_v27 }
 0xafd   : > { %5099 = vst.msk [vmem:[%s9523_s18 + $0x60] sm:$0xff] %vm757_vm0, %v5083_v46  ;;  %v5086_v55 = vadd.f32 %v5068_v47, %v9293_v2  ;;  %v5060_v56 = vadd.f32 %v5425_v22, %v5059_v32  ;;  %5109 = sbr.rel (!%p7057_p10) target bundleno = 2826 (0xb0a), region = 160  ;;  %v5181_v2 = vld [vmem:[%s9523_s18 + $0x18] sm:$0xff] (%p7057_p10)  ;;  %5192 = vst [vmem:[%s5116_s14 + $0x80] sm:$0xff] (%p7057_p10), %v5191_v54 }
 0xafe   : > { %v5197_v10 = vld [vmem:[%s9523_s18 + $0x58] sm:$0xff] (%p7057_p10)  ;;  %5182 = vst [vmem:[%s5116_s14 + $0x30] sm:$0xff] (%p7057_p10), %v5181_v2 }
 0xaff   : > { %5102 = vst.msk [vmem:[%s9523_s18 + $0x78] sm:$0xff] %vm757_vm0, %v5086_v55  ;;  %v5084_v17 = vadd.f32 %v5060_v56, %v9290_v3  ;;  %v5179_v3 = vld [vmem:[%s9523_s18 + $0x10] sm:$0xff] (%p7057_p10)  ;;  %5198 = vst [vmem:[%s5116_s14 + $0xb0] sm:$0xff] (%p7057_p10), %v5197_v10 }
 0xb00   : > { %v5193_v19 = vld [vmem:[%s9523_s18 + $0x48] sm:$0xff] (%p7057_p10)  ;;  %5180 = vst [vmem:[%s5116_s14 + $0x20] sm:$0xff] (%p7057_p10), %v5179_v3 }
 0xb01   : > { %5100 = vst.msk [vmem:[%s9523_s18 + $0x68] sm:$0xff] %vm757_vm0, %v5084_v17  ;;  %5194 = vst [vmem:[%s5116_s14 + $0x90] sm:$0xff] (%p7057_p10), %v5193_v19 }
 0xb02   : > { %v5203_v48 = vld [vmem:[%s9523_s18 + $0x70] sm:$0xff] }
 0xb03   : > { %5204 = vst [vmem:[%s5116_s14 + $0xe0] sm:$0xff] %v5203_v48 }
 0xb04   : > { %v5199_v36 = vld [vmem:[%s9523_s18 + $0x60] sm:$0xff] }
 0xb05   : > { %5200 = vst [vmem:[%s5116_s14 + $0xc0] sm:$0xff] %v5199_v36 }
 0xb06   : > { %v5205_v22 = vld [vmem:[%s9523_s18 + $0x78] sm:$0xff] }
 0xb07   : > { %5206 = vst [vmem:[%s5116_s14 + $0xf0] sm:$0xff] %v5205_v22 }
 0xb08   : > { %v5201_v63 = vld [vmem:[%s9523_s18 + $0x68] sm:$0xff] }
 0xb09   : > { %5202 = vst [vmem:[%s5116_s14 + $0xd0] sm:$0xff] %v5201_v63 }
 0xb0a PF: > { %s25_s26 = sadd.s32 1, %s6886_s26   ;;  %s9822_s15 = sld [smem:[#allocation9_spill]] }
 0xb0b   : > { %p22_p1 = scmp.ge.s32.totalorder %s25_s26, 6   ;;  %s9823_s27 = sld [smem:[#allocation7_spill]] }
 0xb0c   : > { %s9824_s16 = sld [smem:[#allocation8_spill]]  ;;  %s9825_s18 = smov %s6858_s19 }
 0xb0d   : > { %s9827_s20 = smov %s6866_s21  ;;  %s9828_s21 = smov %s7062_s13 }
 0xb0e   : > { %s9829_s22 = smov %s6878_s24  ;;  %s9830_s23 = smov %s6882_s25 }
 0xb0f   :  { %24 = sbr.rel (!%p22_p1) target bundleno = 10 (0xa), region = 237 }
 0xb10   : > { %s9826_s19 = smov %s9822_s15 }
 0xb11   : > { %s9831_s24 = smov %s9823_s27 }
 0xb12   : > { %s9832_s25 = smov %s9824_s16 }

</bundles_post_ra>
